<compile_context>
chip_gen: v7x
topology: tpu7x:2x2x1
jax: 0.10.0
libtpu: 0.0.40
codegen_flags: <defaults>
</compile_context>

<pallas_src>
import jax
import jax.numpy as jnp
import numpy as np
from jax import lax
from jax.experimental import pallas as pl
from jax.experimental.pallas import tpu as pltpu

BN_EPS = 1e-5

# Images stacked per grid step.  8 fills the 256-row MXU on v6e/v7x; on v5e
# (128-row MXU) 8 is simply two full-height passes (4 also works).
TB = 8


# ----------------------------------------------------------------------------
# Fused kernel: the whole Net3 forward for TB images per grid step.
# Activation layout: rows = stacked image heights (sublanes), cols = W*C
# interleaved (lanes).
# ----------------------------------------------------------------------------
def _net3_kernel(
    x_ref,                                   # (TB*30, 28) pre-padded images
    w1_ref, b1_ref,                          # conv1 (banded, BN folded)
    w2_ref, b2_ref, m1_ref,                  # conv2 (banded, BN folded) + mask
    w3_ref, sc3_ref, b3_ref,                 # conv3 1x1 (ReLU then BN)
    p1h_ref, sw1_ref,                        # pool1 row/col selection mats
    w4_ref, b4_ref,                          # conv4 (banded, BN folded)
    w5_ref, b5_ref,                          # conv5 (banded, BN folded)
    w6_ref, sc6_ref, b6_ref,                 # conv6 1x1 (ReLU then BN)
    p2h_ref, sw2_ref,                        # pool2 row/col selection mats
    w7_ref, sc7_ref, b7_ref,                 # conv7 (ReLU then BN)
    gsel_ref, wfc_ref, bfc_ref,              # GAP row-sum sel + fused FC
    o_ref,                                   # (TB, 10) log-probs
    x1p, x4p, x5b, x7b,                      # VMEM scratch
):
    f32 = jnp.float32
    bf16 = jnp.bfloat16
    N0 = x1p.shape[0]          # TB*30
    N4 = x4p.shape[0]          # TB*16
    N7 = x7b.shape[0]          # TB*8
    R1, R4, R5, R7 = N0 - 2, N4 - 2, N4 - 4, N7 - 2

    def mm(a, b):
        # bf16 x bf16 MXU matmul with f32 accumulation.
        return jnp.dot(a.astype(bf16), b, preferred_element_type=f32)

    def conv3x3(buf_ref, w_ref, out_rows):
        # Sum over the 3 row (kh) taps; kw taps + W padding are inside the
        # banded weight, H padding lives in the row-padded buffer layout.
        acc = mm(buf_ref[pl.ds(0, out_rows), :], w_ref[0])
        acc = acc + mm(buf_ref[pl.ds(1, out_rows), :], w_ref[1])
        acc = acc + mm(buf_ref[pl.ds(2, out_rows), :], w_ref[2])
        return acc

    def pool(x, ph_ref, pw_ref):
        # 2x2/2 max-pool via 0/1 selection matmuls.  The row selection also
        # drops the inter-image garbage rows and re-packs the output into the
        # zero-padded stride the next conv expects.
        xb = x.astype(bf16)
        hm = jnp.maximum(jnp.dot(ph_ref[0], xb, preferred_element_type=f32),
                         jnp.dot(ph_ref[1], xb, preferred_element_type=f32))
        hb = hm.astype(bf16)
        return jnp.maximum(jnp.dot(hb, pw_ref[0], preferred_element_type=f32),
                           jnp.dot(hb, pw_ref[1], preferred_element_type=f32))

    # conv1: 1 -> 10, 3x3, pad 1 (BN folded).  Input rows are pre-padded.
    a1 = conv3x3(x_ref, w1_ref, R1) + b1_ref[...]                 # (R1, 280)
    # Store into the row-padded conv2 input at offset 1; m1 zeroes the two
    # inter-image boundary (garbage) rows so they act as conv padding.
    x1p[pl.ds(1, R1), :] = a1 * m1_ref[...]
    zrow = jnp.zeros((1, x1p.shape[1]), f32)
    x1p[pl.ds(0, 1), :] = zrow                # top pad of first image
    x1p[pl.ds(N0 - 1, 1), :] = zrow           # bottom pad of last image

    # conv2: 10 -> 16, 3x3, pad 1 (BN folded).
    a2 = conv3x3(x1p, w2_ref, R1) + b2_ref[...]                   # (R1, 448)

    # conv3: 16 -> 10, 1x1, ReLU then BN.
    a3 = jnp.maximum(mm(a2, w3_ref[...]), 0.0) * sc3_ref[...] + b3_ref[...]

    # pool1: 28x28x10 -> 14x14x10, packed to stride-16 zero-padded rows.
    x4p[...] = pool(a3, p1h_ref, sw1_ref)                         # (TB*16, 140)

    # conv4: 10 -> 14, 3x3, pad 1 (BN folded).
    a4 = conv3x3(x4p, w4_ref, R4) + b4_ref[...]                   # (R4, 196)
    x5b[pl.ds(0, R4), :] = a4

    # conv5: 14 -> 24, 3x3, pad 0 (14 -> 12, BN folded).
    a5 = conv3x3(x5b, w5_ref, R5) + b5_ref[...]                   # (R5, 288)

    # conv6: 24 -> 10, 1x1, ReLU then BN.
    a6 = jnp.maximum(mm(a5, w6_ref[...]), 0.0) * sc6_ref[...] + b6_ref[...]

    # pool2: 12x12x10 -> 6x6x10, packed to stride-8 zero-padded rows.
    x7b[...] = pool(a6, p2h_ref, sw2_ref)                         # (TB*8, 60)

    # conv7: 10 -> 15, 3x3, pad 0 (6 -> 4), ReLU then BN.
    a7 = jnp.maximum(conv3x3(x7b, w7_ref, R7), 0.0) * sc7_ref[...] + b7_ref[...]

    # GAP (AvgPool2d(3) = top-left 3x3 window) + Linear(15 -> 10): gsel sums
    # the 3 window rows per image; the /9 and the 3 window columns are folded
    # into the (60, 10) wfc matrix.
    pooled = jnp.dot(gsel_ref[...], a7, preferred_element_type=f32)   # (TB, 60)
    logits = jnp.dot(pooled, wfc_ref[...],
                     preferred_element_type=f32) + bfc_ref[...]       # (TB, 10)

    # log_softmax.
    m = jnp.max(logits, axis=-1, keepdims=True)
    s = logits - m
    o_ref[...] = s - jnp.log(jnp.sum(jnp.exp(s), axis=-1, keepdims=True))


# ----------------------------------------------------------------------------
# One-time parameter preparation (numpy, outside jit).
# ----------------------------------------------------------------------------
def _bn_scale_shift(blk):
    scale = np.asarray(blk['gamma'], np.float32) / np.sqrt(
        np.asarray(blk['var'], np.float32) + BN_EPS)
    shift = (np.asarray(blk['beta'], np.float32)
             - np.asarray(blk['mean'], np.float32) * scale)
    return scale, shift


def _banded_weight(w_oihw, k, pad, w_in, w_out, chan_scale=None):
    """OIHW conv weight -> (k, w_in*Cin, w_out*Cout) banded matrices."""
    w = np.asarray(w_oihw, np.float32)                    # (Cout, Cin, k, k)
    cout, cin = w.shape[0], w.shape[1]
    if chan_scale is not None:
        w = w * np.asarray(chan_scale, np.float32).reshape(cout, 1, 1, 1)
    out = np.zeros((k, w_in * cin, w_out * cout), np.float32)
    for kh in range(k):
        for kw in range(k):
            tap = w[:, :, kh, kw].T                       # (Cin, Cout)
            for wo in range(w_out):
                wi = wo + kw - pad
                if 0 <= wi < w_in:
                    out[kh, wi * cin:(wi + 1) * cin,
                        wo * cout:(wo + 1) * cout] = tap
    return out


def _rowpool_sel(tb, in_stride, in_len, out_stride, out_off, n_out):
    """0/1 row-selection matrices: 2x max-pool over image-local rows, drop the
    inter-image garbage rows and re-pack to a (possibly zero-padded) stride."""
    sel = np.zeros((2, tb * out_stride, in_len), np.float32)
    for s in range(2):
        for i in range(tb):
            for j in range(n_out):
                sel[s, out_stride * i + out_off + j, in_stride * i + 2 * j + s] = 1.0
    return sel


def _colpool_sel(w_in, c):
    """0/1 column-selection matrices implementing the W-axis 2x max-pool."""
    w_out = w_in // 2
    sw = np.zeros((2, w_in * c, w_out * c), np.float32)
    for j in range(w_out):
        for ch in range(c):
            sw[0, (2 * j) * c + ch, j * c + ch] = 1.0
            sw[1, (2 * j + 1) * c + ch, j * c + ch] = 1.0
    return sw


def _tile_row(v, w_out):
    return np.tile(np.asarray(v, np.float32), w_out).reshape(1, -1)


def prepare_fused_params(p, tb=TB):
    """Expand/fold the torch-layout parameters into the fused-kernel operands.

    Matmul operands (banded weights, selection matrices) -> bf16;
    elementwise operands (BN shifts/scales, masks, FC) -> f32.
    """
    W, E = jnp.bfloat16, jnp.float32
    ops = []

    def add(a, dt):
        ops.append(jnp.asarray(np.asarray(a, np.float32), dt))

    # conv1, conv2: conv -> BN (scale folded into weights).
    s1, h1 = _bn_scale_shift(p['c1'])
    add(_banded_weight(p['c1']['w'], 3, 1, 28, 28, chan_scale=s1), W)
    add(_tile_row(h1, 28), E)
    s2, h2 = _bn_scale_shift(p['c2'])
    add(_banded_weight(p['c2']['w'], 3, 1, 28, 28, chan_scale=s2), W)
    add(_tile_row(h2, 28), E)
    # Row-validity mask for the stacked conv1 output (local row < 28 is valid).
    r = np.arange(tb * 30 - 2)
    add(((r % 30) < 28).astype(np.float32).reshape(-1, 1), E)
    # conv3: 1x1 conv -> ReLU -> BN.
    s3, h3 = _bn_scale_shift(p['c3'])
    add(_banded_weight(p['c3']['w'], 1, 0, 28, 28)[0], W)
    add(_tile_row(s3, 28), E)
    add(_tile_row(h3, 28), E)
    # pool1: rows (stride 30 -> stride 16, offset 1, 14 rows) + columns.
    add(_rowpool_sel(tb, 30, tb * 30 - 2, 16, 1, 14), W)
    add(_colpool_sel(28, 10), W)
    # conv4, conv5: conv -> BN.
    s4, h4 = _bn_scale_shift(p['c4'])
    add(_banded_weight(p['c4']['w'], 3, 1, 14, 14, chan_scale=s4), W)
    add(_tile_row(h4, 14), E)
    s5, h5 = _bn_scale_shift(p['c5'])
    add(_banded_weight(p['c5']['w'], 3, 0, 14, 12, chan_scale=s5), W)
    add(_tile_row(h5, 12), E)
    # conv6: 1x1 conv -> ReLU -> BN.
    s6, h6 = _bn_scale_shift(p['c6'])
    add(_banded_weight(p['c6']['w'], 1, 0, 12, 12)[0], W)
    add(_tile_row(s6, 12), E)
    add(_tile_row(h6, 12), E)
    # pool2: rows (stride 16 -> stride 8, offset 0, 6 rows) + columns.
    add(_rowpool_sel(tb, 16, tb * 16 - 4, 8, 0, 6), W)
    add(_colpool_sel(12, 10), W)
    # conv7: conv -> ReLU -> BN.
    s7, h7 = _bn_scale_shift(p['c7'])
    add(_banded_weight(p['c7']['w'], 3, 0, 6, 4), W)
    add(_tile_row(s7, 4), E)
    add(_tile_row(h7, 4), E)
    # GAP row-sum selection (3 window rows per image).
    gsel = np.zeros((tb, tb * 8 - 2), np.float32)
    for i in range(tb):
        gsel[i, 8 * i:8 * i + 3] = 1.0
    add(gsel, E)
    # Fused GAP(3x3)/9 + Linear(15 -> 10) matrix over the 60 conv7 columns.
    fc_w = np.asarray(p['fc_w'], np.float32)          # (10, 15)
    wfc = np.zeros((60, 10), np.float32)
    for wcol in range(3):
        wfc[wcol * 15:(wcol + 1) * 15, :] = fc_w.T / 9.0
    add(wfc, E)
    add(np.asarray(p['fc_b'], np.float32).reshape(1, 10), E)

    return tuple(ops)


# ----------------------------------------------------------------------------
# Forward pass.
# ----------------------------------------------------------------------------
def _const_spec(arr):
    nd = arr.ndim
    return pl.BlockSpec(arr.shape, lambda g, _n=nd: (0,) * _n)


@jax.jit
def net3_forward(x_nchw, fused):
    """x_nchw: (B, 1, 28, 28) float.  Returns (B, 10) log-probabilities."""
    B = x_nchw.shape[0]
    assert x_nchw.shape[1:] == (1, 28, 28)
    Bp = ((B + TB - 1) // TB) * TB
    x = x_nchw.reshape(B, 28, 28).astype(jnp.float32)
    if Bp != B:
        x = jnp.concatenate(
            [x, jnp.zeros((Bp - B, 28, 28), jnp.float32)], axis=0)
    # Pre-insert the conv1 H-padding rows host-side: (Bp, 30, 28) -> (Bp*30, 28).
    xp = jnp.pad(x, ((0, 0), (1, 1), (0, 0))).reshape(Bp * 30, 28)

    in_specs = [pl.BlockSpec((TB * 30, 28), lambda g: (g, 0))]
    in_specs += [_const_spec(a) for a in fused]

    cost = pl.CostEstimate(flops=50_000_000 * Bp,
                           transcendentals=11 * Bp,
                           bytes_accessed=int(2.2e6) + 3500 * Bp)

    out = pl.pallas_call(
        _net3_kernel,
        grid=(Bp // TB,),
        in_specs=in_specs,
        out_specs=pl.BlockSpec((TB, 10), lambda g: (g, 0)),
        out_shape=jax.ShapeDtypeStruct((Bp, 10), jnp.float32),
        scratch_shapes=[
            pltpu.VMEM((TB * 30, 280), jnp.float32),   # x1p: padded conv1 out
            pltpu.VMEM((TB * 16, 140), jnp.float32),   # x4p: padded pool1 out
            pltpu.VMEM((TB * 16, 196), jnp.float32),   # x5b: conv4 out
            pltpu.VMEM((TB * 8, 60), jnp.float32),     # x7b: pool2 out
        ],
        compiler_params=pltpu.CompilerParams(
            dimension_semantics=("parallel",),
            vmem_limit_bytes=32 * 1024 * 1024,
        ),
        cost_estimate=cost,
    )(xp, *fused)
    return out[:B]


# ----------------------------------------------------------------------------
# Parameters & pure-JAX reference (for validation).
# ----------------------------------------------------------------------------
def init_params(key):
    def conv_block(k_, cin, cout, ks):
        k1, k2, k3 = jax.random.split(k_, 3)
        return dict(
            w=0.1 * jax.random.normal(k1, (cout, cin, ks, ks), jnp.float32),
            gamma=1.0 + 0.1 * jax.random.normal(k2, (cout,), jnp.float32),
            beta=0.1 * jax.random.normal(k3, (cout,), jnp.float32),
            mean=jnp.zeros((cout,), jnp.float32),     # BN running stats
            var=jnp.ones((cout,), jnp.float32),
        )

    keys = jax.random.split(key, 9)
    return dict(
        c1=conv_block(keys[0], 1, 10, 3),
        c2=conv_block(keys[1], 10, 16, 3),
        c3=conv_block(keys[2], 16, 10, 1),
        c4=conv_block(keys[3], 10, 14, 3),
        c5=conv_block(keys[4], 14, 24, 3),
        c6=conv_block(keys[5], 24, 10, 1),
        c7=conv_block(keys[6], 10, 15, 3),
        fc_w=0.1 * jax.random.normal(keys[7], (10, 15), jnp.float32),
        fc_b=0.1 * jax.random.normal(keys[8], (10,), jnp.float32),
    )


def reference_forward(x_nchw, p):
    """Pure-XLA reference of Net3 (inference semantics, HIGHEST precision)."""
    prec = lax.Precision.HIGHEST

    def bn(x, blk):
        scale = blk['gamma'] / jnp.sqrt(blk['var'] + BN_EPS)
        shift = blk['beta'] - blk['mean'] * scale
        return x * scale.reshape(1, -1, 1, 1) + shift.reshape(1, -1, 1, 1)

    def block(x, blk, pad, relu):
        y = lax.conv_general_dilated(
            x, blk['w'], (1, 1), [(pad, pad), (pad, pad)],
            dimension_numbers=('NCHW', 'OIHW', 'NCHW'), precision=prec)
        if relu:
            y = jnp.maximum(y, 0.0)
        return bn(y, blk)

    def maxpool(x):
        return lax.reduce_window(x, -jnp.inf, lax.max,
                                 (1, 1, 2, 2), (1, 1, 2, 2), 'VALID')

    x = x_nchw.astype(jnp.float32)
    x = block(x, p['c1'], 1, False)
    x = block(x, p['c2'], 1, False)
    x = block(x, p['c3'], 0, True)
    x = maxpool(x)
    x = block(x, p['c4'], 1, False)
    x = block(x, p['c5'], 0, False)
    x = block(x, p['c6'], 0, True)
    x = maxpool(x)
    x = block(x, p['c7'], 0, True)
    g = jnp.mean(x[:, :, :3, :3], axis=(2, 3))            # AvgPool2d(3) -> (B, 15)
    logits = jnp.dot(g, p['fc_w'].T, precision=prec) + p['fc_b']
    return jax.nn.log_softmax(logits, axis=-1)


if __name__ == "__main__":
    key = jax.random.PRNGKey(0)
    kx, kp = jax.random.split(key)
    # MNIST-style 1x28x28 input; B=13 exercises batch padding + a 2-step grid.
    x = jax.random.normal(kx, (13, 1, 28, 28), jnp.float32)
    params = init_params(kp)

    fused = prepare_fused_params(params)          # one-time weight preparation
    out = jax.block_until_ready(net3_forward(x, fused))

    assert out.shape == (13, 10)
    # log_softmax rows must sum to 1 in probability space.
    assert bool(jnp.all(jnp.abs(jnp.sum(jnp.exp(out), axis=-1) - 1.0) < 1e-3))
    # Validate the bf16-MXU fused kernel against the HIGHEST-precision reference.
    ref = reference_forward(x, params)
    err = float(jnp.max(jnp.abs(out - ref)))
    assert err < 5e-2, f"max abs err {err}"
    print("KERNEL_OK")
</pallas_src>

<mosaic_0001>
module attributes {stable_mosaic.version = 11 : i64} {
  func.func @_net3_kernel(%arg0: i32, %arg1: memref<240x28xf32, #tpu.memory_space<vmem>>, %arg2: memref<3x28x280xbf16, #tpu.memory_space<vmem>>, %arg3: memref<1x280xf32, #tpu.memory_space<vmem>>, %arg4: memref<3x280x448xbf16, #tpu.memory_space<vmem>>, %arg5: memref<1x448xf32, #tpu.memory_space<vmem>>, %arg6: memref<238x1xf32, #tpu.memory_space<vmem>>, %arg7: memref<448x280xbf16, #tpu.memory_space<vmem>>, %arg8: memref<1x280xf32, #tpu.memory_space<vmem>>, %arg9: memref<1x280xf32, #tpu.memory_space<vmem>>, %arg10: memref<2x128x238xbf16, #tpu.memory_space<vmem>>, %arg11: memref<2x280x140xbf16, #tpu.memory_space<vmem>>, %arg12: memref<3x140x196xbf16, #tpu.memory_space<vmem>>, %arg13: memref<1x196xf32, #tpu.memory_space<vmem>>, %arg14: memref<3x196x288xbf16, #tpu.memory_space<vmem>>, %arg15: memref<1x288xf32, #tpu.memory_space<vmem>>, %arg16: memref<288x120xbf16, #tpu.memory_space<vmem>>, %arg17: memref<1x120xf32, #tpu.memory_space<vmem>>, %arg18: memref<1x120xf32, #tpu.memory_space<vmem>>, %arg19: memref<2x64x124xbf16, #tpu.memory_space<vmem>>, %arg20: memref<2x120x60xbf16, #tpu.memory_space<vmem>>, %arg21: memref<3x60x60xbf16, #tpu.memory_space<vmem>>, %arg22: memref<1x60xf32, #tpu.memory_space<vmem>>, %arg23: memref<1x60xf32, #tpu.memory_space<vmem>>, %arg24: memref<8x62xf32, #tpu.memory_space<vmem>>, %arg25: memref<60x10xf32, #tpu.memory_space<vmem>>, %arg26: memref<1x10xf32, #tpu.memory_space<vmem>>, %arg27: memref<8x10xf32, #tpu.memory_space<vmem>>, %arg28: memref<240x280xf32, #tpu.memory_space<vmem>>, %arg29: memref<128x140xf32, #tpu.memory_space<vmem>>, %arg30: memref<128x196xf32, #tpu.memory_space<vmem>>, %arg31: memref<64x60xf32, #tpu.memory_space<vmem>>) attributes {dimension_semantics = [#tpu.dimension_semantics<parallel>], iteration_bounds = array<i64: 2>, scalar_prefetch = 0 : i64, scratch_operands = 4 : i64, tpu.core_type = #tpu.core_type<tc>, window_params = [{transform_indices = @transform_0, window_bounds = array<i64: 240, 28>}, {pipeline_mode = #tpu.pipeline_mode<synchronous>, transform_indices = @transform_1, window_bounds = array<i64: 3, 28, 280>}, {pipeline_mode = #tpu.pipeline_mode<synchronous>, transform_indices = @transform_2, window_bounds = array<i64: 1, 280>}, {pipeline_mode = #tpu.pipeline_mode<synchronous>, transform_indices = @transform_3, window_bounds = array<i64: 3, 280, 448>}, {pipeline_mode = #tpu.pipeline_mode<synchronous>, transform_indices = @transform_4, window_bounds = array<i64: 1, 448>}, {pipeline_mode = #tpu.pipeline_mode<synchronous>, transform_indices = @transform_5, window_bounds = array<i64: 238, 1>}, {pipeline_mode = #tpu.pipeline_mode<synchronous>, transform_indices = @transform_6, window_bounds = array<i64: 448, 280>}, {pipeline_mode = #tpu.pipeline_mode<synchronous>, transform_indices = @transform_7, window_bounds = array<i64: 1, 280>}, {pipeline_mode = #tpu.pipeline_mode<synchronous>, transform_indices = @transform_8, window_bounds = array<i64: 1, 280>}, {pipeline_mode = #tpu.pipeline_mode<synchronous>, transform_indices = @transform_9, window_bounds = array<i64: 2, 128, 238>}, {pipeline_mode = #tpu.pipeline_mode<synchronous>, transform_indices = @transform_10, window_bounds = array<i64: 2, 280, 140>}, {pipeline_mode = #tpu.pipeline_mode<synchronous>, transform_indices = @transform_11, window_bounds = array<i64: 3, 140, 196>}, {pipeline_mode = #tpu.pipeline_mode<synchronous>, transform_indices = @transform_12, window_bounds = array<i64: 1, 196>}, {pipeline_mode = #tpu.pipeline_mode<synchronous>, transform_indices = @transform_13, window_bounds = array<i64: 3, 196, 288>}, {pipeline_mode = #tpu.pipeline_mode<synchronous>, transform_indices = @transform_14, window_bounds = array<i64: 1, 288>}, {pipeline_mode = #tpu.pipeline_mode<synchronous>, transform_indices = @transform_15, window_bounds = array<i64: 288, 120>}, {pipeline_mode = #tpu.pipeline_mode<synchronous>, transform_indices = @transform_16, window_bounds = array<i64: 1, 120>}, {pipeline_mode = #tpu.pipeline_mode<synchronous>, transform_indices = @transform_17, window_bounds = array<i64: 1, 120>}, {pipeline_mode = #tpu.pipeline_mode<synchronous>, transform_indices = @transform_18, window_bounds = array<i64: 2, 64, 124>}, {pipeline_mode = #tpu.pipeline_mode<synchronous>, transform_indices = @transform_19, window_bounds = array<i64: 2, 120, 60>}, {pipeline_mode = #tpu.pipeline_mode<synchronous>, transform_indices = @transform_20, window_bounds = array<i64: 3, 60, 60>}, {pipeline_mode = #tpu.pipeline_mode<synchronous>, transform_indices = @transform_21, window_bounds = array<i64: 1, 60>}, {pipeline_mode = #tpu.pipeline_mode<synchronous>, transform_indices = @transform_22, window_bounds = array<i64: 1, 60>}, {pipeline_mode = #tpu.pipeline_mode<synchronous>, transform_indices = @transform_23, window_bounds = array<i64: 8, 62>}, {pipeline_mode = #tpu.pipeline_mode<synchronous>, transform_indices = @transform_24, window_bounds = array<i64: 60, 10>}, {pipeline_mode = #tpu.pipeline_mode<synchronous>, transform_indices = @transform_25, window_bounds = array<i64: 1, 10>}, {transform_indices = @transform_26, window_bounds = array<i64: 8, 10>}]} {
    %c0 = arith.constant 0 : index
    %c0_0 = arith.constant 0 : index
    %0 = vector.load %arg1[%c0, %c0_0] : memref<240x28xf32, #tpu.memory_space<vmem>>, vector<238x28xf32>
    %c0_1 = arith.constant 0 : index
    %c0_2 = arith.constant 0 : index
    %c0_3 = arith.constant 0 : index
    %1 = vector.load %arg2[%c0_1, %c0_2, %c0_3] : memref<3x28x280xbf16, #tpu.memory_space<vmem>>, vector<1x28x280xbf16>
    %2 = vector.shape_cast %1 : vector<1x28x280xbf16> to vector<28x280xbf16>
    %3 = arith.truncf %0 : vector<238x28xf32> to vector<238x28xbf16>
    %cst = arith.constant dense<0.000000e+00> : vector<238x280xf32>
    %4 = tpu.matmul %3, %2, %cst {dimension_numbers = #tpu.dot_dimension_numbers<[1], [0], [0], [1], [0, 0, 1, 1], [], []>} : vector<238x28xbf16>, vector<28x280xbf16>, vector<238x280xf32> -> vector<238x280xf32>
    %c1 = arith.constant 1 : index
    %c0_4 = arith.constant 0 : index
    %5 = vector.load %arg1[%c1, %c0_4] : memref<240x28xf32, #tpu.memory_space<vmem>>, vector<238x28xf32>
    %c1_5 = arith.constant 1 : index
    %c0_6 = arith.constant 0 : index
    %c0_7 = arith.constant 0 : index
    %6 = vector.load %arg2[%c1_5, %c0_6, %c0_7] : memref<3x28x280xbf16, #tpu.memory_space<vmem>>, vector<1x28x280xbf16>
    %7 = vector.shape_cast %6 : vector<1x28x280xbf16> to vector<28x280xbf16>
    %8 = arith.truncf %5 : vector<238x28xf32> to vector<238x28xbf16>
    %cst_8 = arith.constant dense<0.000000e+00> : vector<238x280xf32>
    %9 = tpu.matmul %8, %7, %cst_8 {dimension_numbers = #tpu.dot_dimension_numbers<[1], [0], [0], [1], [0, 0, 1, 1], [], []>} : vector<238x28xbf16>, vector<28x280xbf16>, vector<238x280xf32> -> vector<238x280xf32>
    %10 = arith.addf %4, %9 : vector<238x280xf32>
    %c2 = arith.constant 2 : index
    %c0_9 = arith.constant 0 : index
    %11 = vector.load %arg1[%c2, %c0_9] : memref<240x28xf32, #tpu.memory_space<vmem>>, vector<238x28xf32>
    %c2_10 = arith.constant 2 : index
    %c0_11 = arith.constant 0 : index
    %c0_12 = arith.constant 0 : index
    %12 = vector.load %arg2[%c2_10, %c0_11, %c0_12] : memref<3x28x280xbf16, #tpu.memory_space<vmem>>, vector<1x28x280xbf16>
    %13 = vector.shape_cast %12 : vector<1x28x280xbf16> to vector<28x280xbf16>
    %14 = arith.truncf %11 : vector<238x28xf32> to vector<238x28xbf16>
    %cst_13 = arith.constant dense<0.000000e+00> : vector<238x280xf32>
    %15 = tpu.matmul %14, %13, %cst_13 {dimension_numbers = #tpu.dot_dimension_numbers<[1], [0], [0], [1], [0, 0, 1, 1], [], []>} : vector<238x28xbf16>, vector<28x280xbf16>, vector<238x280xf32> -> vector<238x280xf32>
    %16 = arith.addf %10, %15 : vector<238x280xf32>
    %c0_14 = arith.constant 0 : index
    %c0_15 = arith.constant 0 : index
    %17 = vector.load %arg3[%c0_14, %c0_15] : memref<1x280xf32, #tpu.memory_space<vmem>>, vector<1x280xf32>
    %18 = vector.broadcast %17 : vector<1x280xf32> to vector<238x280xf32>
    %19 = arith.addf %16, %18 : vector<238x280xf32>
    %c0_16 = arith.constant 0 : index
    %c0_17 = arith.constant 0 : index
    %20 = vector.load %arg6[%c0_16, %c0_17] : memref<238x1xf32, #tpu.memory_space<vmem>>, vector<238x1xf32>
    %21 = vector.broadcast %20 : vector<238x1xf32> to vector<238x280xf32>
    %22 = arith.mulf %19, %21 : vector<238x280xf32>
    %c1_18 = arith.constant 1 : index
    %c0_19 = arith.constant 0 : index
    %23 = vector.load %arg28[%c1_18, %c0_19] : memref<240x280xf32, #tpu.memory_space<vmem>>, vector<238x280xf32>
    tpu.vector_store %arg28[%c1_18, %c0_19], %22 {strides = array<i32>} : memref<240x280xf32, #tpu.memory_space<vmem>>, vector<238x280xf32>,
    %cst_20 = arith.constant 0.000000e+00 : f32
    %24 = vector.broadcast %cst_20 : f32 to vector<1x280xf32>
    %c0_21 = arith.constant 0 : index
    %c0_22 = arith.constant 0 : index
    %25 = vector.load %arg28[%c0_21, %c0_22] : memref<240x280xf32, #tpu.memory_space<vmem>>, vector<1x280xf32>
    tpu.vector_store %arg28[%c0_21, %c0_22], %24 {strides = array<i32>} : memref<240x280xf32, #tpu.memory_space<vmem>>, vector<1x280xf32>,
    %c239 = arith.constant 239 : index
    %c0_23 = arith.constant 0 : index
    %26 = vector.load %arg28[%c239, %c0_23] : memref<240x280xf32, #tpu.memory_space<vmem>>, vector<1x280xf32>
    tpu.vector_store %arg28[%c239, %c0_23], %24 {strides = array<i32>} : memref<240x280xf32, #tpu.memory_space<vmem>>, vector<1x280xf32>,
    %c0_24 = arith.constant 0 : index
    %c0_25 = arith.constant 0 : index
    %27 = vector.load %arg28[%c0_24, %c0_25] : memref<240x280xf32, #tpu.memory_space<vmem>>, vector<238x280xf32>
    %c0_26 = arith.constant 0 : index
    %c0_27 = arith.constant 0 : index
    %c0_28 = arith.constant 0 : index
    %28 = vector.load %arg4[%c0_26, %c0_27, %c0_28] : memref<3x280x448xbf16, #tpu.memory_space<vmem>>, vector<1x280x448xbf16>
    %29 = vector.shape_cast %28 : vector<1x280x448xbf16> to vector<280x448xbf16>
    %30 = arith.truncf %27 : vector<238x280xf32> to vector<238x280xbf16>
    %cst_29 = arith.constant dense<0.000000e+00> : vector<238x448xf32>
    %31 = tpu.matmul %30, %29, %cst_29 {dimension_numbers = #tpu.dot_dimension_numbers<[1], [0], [0], [1], [0, 0, 1, 1], [], []>} : vector<238x280xbf16>, vector<280x448xbf16>, vector<238x448xf32> -> vector<238x448xf32>
    %c1_30 = arith.constant 1 : index
    %c0_31 = arith.constant 0 : index
    %32 = vector.load %arg28[%c1_30, %c0_31] : memref<240x280xf32, #tpu.memory_space<vmem>>, vector<238x280xf32>
    %c1_32 = arith.constant 1 : index
    %c0_33 = arith.constant 0 : index
    %c0_34 = arith.constant 0 : index
    %33 = vector.load %arg4[%c1_32, %c0_33, %c0_34] : memref<3x280x448xbf16, #tpu.memory_space<vmem>>, vector<1x280x448xbf16>
    %34 = vector.shape_cast %33 : vector<1x280x448xbf16> to vector<280x448xbf16>
    %35 = arith.truncf %32 : vector<238x280xf32> to vector<238x280xbf16>
    %cst_35 = arith.constant dense<0.000000e+00> : vector<238x448xf32>
    %36 = tpu.matmul %35, %34, %cst_35 {dimension_numbers = #tpu.dot_dimension_numbers<[1], [0], [0], [1], [0, 0, 1, 1], [], []>} : vector<238x280xbf16>, vector<280x448xbf16>, vector<238x448xf32> -> vector<238x448xf32>
    %37 = arith.addf %31, %36 : vector<238x448xf32>
    %c2_36 = arith.constant 2 : index
    %c0_37 = arith.constant 0 : index
    %38 = vector.load %arg28[%c2_36, %c0_37] : memref<240x280xf32, #tpu.memory_space<vmem>>, vector<238x280xf32>
    %c2_38 = arith.constant 2 : index
    %c0_39 = arith.constant 0 : index
    %c0_40 = arith.constant 0 : index
    %39 = vector.load %arg4[%c2_38, %c0_39, %c0_40] : memref<3x280x448xbf16, #tpu.memory_space<vmem>>, vector<1x280x448xbf16>
    %40 = vector.shape_cast %39 : vector<1x280x448xbf16> to vector<280x448xbf16>
    %41 = arith.truncf %38 : vector<238x280xf32> to vector<238x280xbf16>
    %cst_41 = arith.constant dense<0.000000e+00> : vector<238x448xf32>
    %42 = tpu.matmul %41, %40, %cst_41 {dimension_numbers = #tpu.dot_dimension_numbers<[1], [0], [0], [1], [0, 0, 1, 1], [], []>} : vector<238x280xbf16>, vector<280x448xbf16>, vector<238x448xf32> -> vector<238x448xf32>
    %43 = arith.addf %37, %42 : vector<238x448xf32>
    %c0_42 = arith.constant 0 : index
    %c0_43 = arith.constant 0 : index
    %44 = vector.load %arg5[%c0_42, %c0_43] : memref<1x448xf32, #tpu.memory_space<vmem>>, vector<1x448xf32>
    %45 = vector.broadcast %44 : vector<1x448xf32> to vector<238x448xf32>
    %46 = arith.addf %43, %45 : vector<238x448xf32>
    %c0_44 = arith.constant 0 : index
    %c0_45 = arith.constant 0 : index
    %47 = vector.load %arg7[%c0_44, %c0_45] : memref<448x280xbf16, #tpu.memory_space<vmem>>, vector<448x280xbf16>
    %48 = arith.truncf %46 : vector<238x448xf32> to vector<238x448xbf16>
    %cst_46 = arith.constant dense<0.000000e+00> : vector<238x280xf32>
    %49 = tpu.matmul %48, %47, %cst_46 {dimension_numbers = #tpu.dot_dimension_numbers<[1], [0], [0], [1], [0, 0, 1, 1], [], []>} : vector<238x448xbf16>, vector<448x280xbf16>, vector<238x280xf32> -> vector<238x280xf32>
    %cst_47 = arith.constant 0.000000e+00 : f32
    %50 = vector.broadcast %cst_47 : f32 to vector<238x280xf32>
    %51 = arith.maximumf %49, %50 : vector<238x280xf32>
    %c0_48 = arith.constant 0 : index
    %c0_49 = arith.constant 0 : index
    %52 = vector.load %arg8[%c0_48, %c0_49] : memref<1x280xf32, #tpu.memory_space<vmem>>, vector<1x280xf32>
    %53 = vector.broadcast %52 : vector<1x280xf32> to vector<238x280xf32>
    %54 = arith.mulf %51, %53 : vector<238x280xf32>
    %c0_50 = arith.constant 0 : index
    %c0_51 = arith.constant 0 : index
    %55 = vector.load %arg9[%c0_50, %c0_51] : memref<1x280xf32, #tpu.memory_space<vmem>>, vector<1x280xf32>
    %56 = vector.broadcast %55 : vector<1x280xf32> to vector<238x280xf32>
    %57 = arith.addf %54, %56 : vector<238x280xf32>
    %58 = arith.truncf %57 : vector<238x280xf32> to vector<238x280xbf16>
    %c0_52 = arith.constant 0 : index
    %c0_53 = arith.constant 0 : index
    %c0_54 = arith.constant 0 : index
    %59 = vector.load %arg10[%c0_52, %c0_53, %c0_54] : memref<2x128x238xbf16, #tpu.memory_space<vmem>>, vector<1x128x238xbf16>
    %60 = vector.shape_cast %59 : vector<1x128x238xbf16> to vector<128x238xbf16>
    %cst_55 = arith.constant dense<0.000000e+00> : vector<128x280xf32>
    %61 = tpu.matmul %60, %58, %cst_55 {dimension_numbers = #tpu.dot_dimension_numbers<[1], [0], [0], [1], [0, 0, 1, 1], [], []>} : vector<128x238xbf16>, vector<238x280xbf16>, vector<128x280xf32> -> vector<128x280xf32>
    %c1_56 = arith.constant 1 : index
    %c0_57 = arith.constant 0 : index
    %c0_58 = arith.constant 0 : index
    %62 = vector.load %arg10[%c1_56, %c0_57, %c0_58] : memref<2x128x238xbf16, #tpu.memory_space<vmem>>, vector<1x128x238xbf16>
    %63 = vector.shape_cast %62 : vector<1x128x238xbf16> to vector<128x238xbf16>
    %cst_59 = arith.constant dense<0.000000e+00> : vector<128x280xf32>
    %64 = tpu.matmul %63, %58, %cst_59 {dimension_numbers = #tpu.dot_dimension_numbers<[1], [0], [0], [1], [0, 0, 1, 1], [], []>} : vector<128x238xbf16>, vector<238x280xbf16>, vector<128x280xf32> -> vector<128x280xf32>
    %65 = arith.maximumf %61, %64 : vector<128x280xf32>
    %66 = arith.truncf %65 : vector<128x280xf32> to vector<128x280xbf16>
    %c0_60 = arith.constant 0 : index
    %c0_61 = arith.constant 0 : index
    %c0_62 = arith.constant 0 : index
    %67 = vector.load %arg11[%c0_60, %c0_61, %c0_62] : memref<2x280x140xbf16, #tpu.memory_space<vmem>>, vector<1x280x140xbf16>
    %68 = vector.shape_cast %67 : vector<1x280x140xbf16> to vector<280x140xbf16>
    %cst_63 = arith.constant dense<0.000000e+00> : vector<128x140xf32>
    %69 = tpu.matmul %66, %68, %cst_63 {dimension_numbers = #tpu.dot_dimension_numbers<[1], [0], [0], [1], [0, 0, 1, 1], [], []>} : vector<128x280xbf16>, vector<280x140xbf16>, vector<128x140xf32> -> vector<128x140xf32>
    %c1_64 = arith.constant 1 : index
    %c0_65 = arith.constant 0 : index
    %c0_66 = arith.constant 0 : index
    %70 = vector.load %arg11[%c1_64, %c0_65, %c0_66] : memref<2x280x140xbf16, #tpu.memory_space<vmem>>, vector<1x280x140xbf16>
    %71 = vector.shape_cast %70 : vector<1x280x140xbf16> to vector<280x140xbf16>
    %cst_67 = arith.constant dense<0.000000e+00> : vector<128x140xf32>
    %72 = tpu.matmul %66, %71, %cst_67 {dimension_numbers = #tpu.dot_dimension_numbers<[1], [0], [0], [1], [0, 0, 1, 1], [], []>} : vector<128x280xbf16>, vector<280x140xbf16>, vector<128x140xf32> -> vector<128x140xf32>
    %73 = arith.maximumf %69, %72 : vector<128x140xf32>
    %c0_68 = arith.constant 0 : index
    %c0_69 = arith.constant 0 : index
    %74 = vector.load %arg29[%c0_68, %c0_69] : memref<128x140xf32, #tpu.memory_space<vmem>>, vector<128x140xf32>
    tpu.vector_store %arg29[%c0_68, %c0_69], %73 {strides = array<i32>} : memref<128x140xf32, #tpu.memory_space<vmem>>, vector<128x140xf32>,
    %c0_70 = arith.constant 0 : index
    %c0_71 = arith.constant 0 : index
    %75 = vector.load %arg29[%c0_70, %c0_71] : memref<128x140xf32, #tpu.memory_space<vmem>>, vector<126x140xf32>
    %c0_72 = arith.constant 0 : index
    %c0_73 = arith.constant 0 : index
    %c0_74 = arith.constant 0 : index
    %76 = vector.load %arg12[%c0_72, %c0_73, %c0_74] : memref<3x140x196xbf16, #tpu.memory_space<vmem>>, vector<1x140x196xbf16>
    %77 = vector.shape_cast %76 : vector<1x140x196xbf16> to vector<140x196xbf16>
    %78 = arith.truncf %75 : vector<126x140xf32> to vector<126x140xbf16>
    %cst_75 = arith.constant dense<0.000000e+00> : vector<126x196xf32>
    %79 = tpu.matmul %78, %77, %cst_75 {dimension_numbers = #tpu.dot_dimension_numbers<[1], [0], [0], [1], [0, 0, 1, 1], [], []>} : vector<126x140xbf16>, vector<140x196xbf16>, vector<126x196xf32> -> vector<126x196xf32>
    %c1_76 = arith.constant 1 : index
    %c0_77 = arith.constant 0 : index
    %80 = vector.load %arg29[%c1_76, %c0_77] : memref<128x140xf32, #tpu.memory_space<vmem>>, vector<126x140xf32>
    %c1_78 = arith.constant 1 : index
    %c0_79 = arith.constant 0 : index
    %c0_80 = arith.constant 0 : index
    %81 = vector.load %arg12[%c1_78, %c0_79, %c0_80] : memref<3x140x196xbf16, #tpu.memory_space<vmem>>, vector<1x140x196xbf16>
    %82 = vector.shape_cast %81 : vector<1x140x196xbf16> to vector<140x196xbf16>
    %83 = arith.truncf %80 : vector<126x140xf32> to vector<126x140xbf16>
    %cst_81 = arith.constant dense<0.000000e+00> : vector<126x196xf32>
    %84 = tpu.matmul %83, %82, %cst_81 {dimension_numbers = #tpu.dot_dimension_numbers<[1], [0], [0], [1], [0, 0, 1, 1], [], []>} : vector<126x140xbf16>, vector<140x196xbf16>, vector<126x196xf32> -> vector<126x196xf32>
    %85 = arith.addf %79, %84 : vector<126x196xf32>
    %c2_82 = arith.constant 2 : index
    %c0_83 = arith.constant 0 : index
    %86 = vector.load %arg29[%c2_82, %c0_83] : memref<128x140xf32, #tpu.memory_space<vmem>>, vector<126x140xf32>
    %c2_84 = arith.constant 2 : index
    %c0_85 = arith.constant 0 : index
    %c0_86 = arith.constant 0 : index
    %87 = vector.load %arg12[%c2_84, %c0_85, %c0_86] : memref<3x140x196xbf16, #tpu.memory_space<vmem>>, vector<1x140x196xbf16>
    %88 = vector.shape_cast %87 : vector<1x140x196xbf16> to vector<140x196xbf16>
    %89 = arith.truncf %86 : vector<126x140xf32> to vector<126x140xbf16>
    %cst_87 = arith.constant dense<0.000000e+00> : vector<126x196xf32>
    %90 = tpu.matmul %89, %88, %cst_87 {dimension_numbers = #tpu.dot_dimension_numbers<[1], [0], [0], [1], [0, 0, 1, 1], [], []>} : vector<126x140xbf16>, vector<140x196xbf16>, vector<126x196xf32> -> vector<126x196xf32>
    %91 = arith.addf %85, %90 : vector<126x196xf32>
    %c0_88 = arith.constant 0 : index
    %c0_89 = arith.constant 0 : index
    %92 = vector.load %arg13[%c0_88, %c0_89] : memref<1x196xf32, #tpu.memory_space<vmem>>, vector<1x196xf32>
    %93 = vector.broadcast %92 : vector<1x196xf32> to vector<126x196xf32>
    %94 = arith.addf %91, %93 : vector<126x196xf32>
    %c0_90 = arith.constant 0 : index
    %c0_91 = arith.constant 0 : index
    %95 = vector.load %arg30[%c0_90, %c0_91] : memref<128x196xf32, #tpu.memory_space<vmem>>, vector<126x196xf32>
    tpu.vector_store %arg30[%c0_90, %c0_91], %94 {strides = array<i32>} : memref<128x196xf32, #tpu.memory_space<vmem>>, vector<126x196xf32>,
    %c0_92 = arith.constant 0 : index
    %c0_93 = arith.constant 0 : index
    %96 = vector.load %arg30[%c0_92, %c0_93] : memref<128x196xf32, #tpu.memory_space<vmem>>, vector<124x196xf32>
    %c0_94 = arith.constant 0 : index
    %c0_95 = arith.constant 0 : index
    %c0_96 = arith.constant 0 : index
    %97 = vector.load %arg14[%c0_94, %c0_95, %c0_96] : memref<3x196x288xbf16, #tpu.memory_space<vmem>>, vector<1x196x288xbf16>
    %98 = vector.shape_cast %97 : vector<1x196x288xbf16> to vector<196x288xbf16>
    %99 = arith.truncf %96 : vector<124x196xf32> to vector<124x196xbf16>
    %cst_97 = arith.constant dense<0.000000e+00> : vector<124x288xf32>
    %100 = tpu.matmul %99, %98, %cst_97 {dimension_numbers = #tpu.dot_dimension_numbers<[1], [0], [0], [1], [0, 0, 1, 1], [], []>} : vector<124x196xbf16>, vector<196x288xbf16>, vector<124x288xf32> -> vector<124x288xf32>
    %c1_98 = arith.constant 1 : index
    %c0_99 = arith.constant 0 : index
    %101 = vector.load %arg30[%c1_98, %c0_99] : memref<128x196xf32, #tpu.memory_space<vmem>>, vector<124x196xf32>
    %c1_100 = arith.constant 1 : index
    %c0_101 = arith.constant 0 : index
    %c0_102 = arith.constant 0 : index
    %102 = vector.load %arg14[%c1_100, %c0_101, %c0_102] : memref<3x196x288xbf16, #tpu.memory_space<vmem>>, vector<1x196x288xbf16>
    %103 = vector.shape_cast %102 : vector<1x196x288xbf16> to vector<196x288xbf16>
    %104 = arith.truncf %101 : vector<124x196xf32> to vector<124x196xbf16>
    %cst_103 = arith.constant dense<0.000000e+00> : vector<124x288xf32>
    %105 = tpu.matmul %104, %103, %cst_103 {dimension_numbers = #tpu.dot_dimension_numbers<[1], [0], [0], [1], [0, 0, 1, 1], [], []>} : vector<124x196xbf16>, vector<196x288xbf16>, vector<124x288xf32> -> vector<124x288xf32>
    %106 = arith.addf %100, %105 : vector<124x288xf32>
    %c2_104 = arith.constant 2 : index
    %c0_105 = arith.constant 0 : index
    %107 = vector.load %arg30[%c2_104, %c0_105] : memref<128x196xf32, #tpu.memory_space<vmem>>, vector<124x196xf32>
    %c2_106 = arith.constant 2 : index
    %c0_107 = arith.constant 0 : index
    %c0_108 = arith.constant 0 : index
    %108 = vector.load %arg14[%c2_106, %c0_107, %c0_108] : memref<3x196x288xbf16, #tpu.memory_space<vmem>>, vector<1x196x288xbf16>
    %109 = vector.shape_cast %108 : vector<1x196x288xbf16> to vector<196x288xbf16>
    %110 = arith.truncf %107 : vector<124x196xf32> to vector<124x196xbf16>
    %cst_109 = arith.constant dense<0.000000e+00> : vector<124x288xf32>
    %111 = tpu.matmul %110, %109, %cst_109 {dimension_numbers = #tpu.dot_dimension_numbers<[1], [0], [0], [1], [0, 0, 1, 1], [], []>} : vector<124x196xbf16>, vector<196x288xbf16>, vector<124x288xf32> -> vector<124x288xf32>
    %112 = arith.addf %106, %111 : vector<124x288xf32>
    %c0_110 = arith.constant 0 : index
    %c0_111 = arith.constant 0 : index
    %113 = vector.load %arg15[%c0_110, %c0_111] : memref<1x288xf32, #tpu.memory_space<vmem>>, vector<1x288xf32>
    %114 = vector.broadcast %113 : vector<1x288xf32> to vector<124x288xf32>
    %115 = arith.addf %112, %114 : vector<124x288xf32>
    %c0_112 = arith.constant 0 : index
    %c0_113 = arith.constant 0 : index
    %116 = vector.load %arg16[%c0_112, %c0_113] : memref<288x120xbf16, #tpu.memory_space<vmem>>, vector<288x120xbf16>
    %117 = arith.truncf %115 : vector<124x288xf32> to vector<124x288xbf16>
    %cst_114 = arith.constant dense<0.000000e+00> : vector<124x120xf32>
    %118 = tpu.matmul %117, %116, %cst_114 {dimension_numbers = #tpu.dot_dimension_numbers<[1], [0], [0], [1], [0, 0, 1, 1], [], []>} : vector<124x288xbf16>, vector<288x120xbf16>, vector<124x120xf32> -> vector<124x120xf32>
    %cst_115 = arith.constant 0.000000e+00 : f32
    %119 = vector.broadcast %cst_115 : f32 to vector<124x120xf32>
    %120 = arith.maximumf %118, %119 : vector<124x120xf32>
    %c0_116 = arith.constant 0 : index
    %c0_117 = arith.constant 0 : index
    %121 = vector.load %arg17[%c0_116, %c0_117] : memref<1x120xf32, #tpu.memory_space<vmem>>, vector<1x120xf32>
    %122 = vector.broadcast %121 : vector<1x120xf32> to vector<124x120xf32>
    %123 = arith.mulf %120, %122 : vector<124x120xf32>
    %c0_118 = arith.constant 0 : index
    %c0_119 = arith.constant 0 : index
    %124 = vector.load %arg18[%c0_118, %c0_119] : memref<1x120xf32, #tpu.memory_space<vmem>>, vector<1x120xf32>
    %125 = vector.broadcast %124 : vector<1x120xf32> to vector<124x120xf32>
    %126 = arith.addf %123, %125 : vector<124x120xf32>
    %127 = arith.truncf %126 : vector<124x120xf32> to vector<124x120xbf16>
    %c0_120 = arith.constant 0 : index
    %c0_121 = arith.constant 0 : index
    %c0_122 = arith.constant 0 : index
    %128 = vector.load %arg19[%c0_120, %c0_121, %c0_122] : memref<2x64x124xbf16, #tpu.memory_space<vmem>>, vector<1x64x124xbf16>
    %129 = vector.shape_cast %128 : vector<1x64x124xbf16> to vector<64x124xbf16>
    %cst_123 = arith.constant dense<0.000000e+00> : vector<64x120xf32>
    %130 = tpu.matmul %129, %127, %cst_123 {dimension_numbers = #tpu.dot_dimension_numbers<[1], [0], [0], [1], [0, 0, 1, 1], [], []>} : vector<64x124xbf16>, vector<124x120xbf16>, vector<64x120xf32> -> vector<64x120xf32>
    %c1_124 = arith.constant 1 : index
    %c0_125 = arith.constant 0 : index
    %c0_126 = arith.constant 0 : index
    %131 = vector.load %arg19[%c1_124, %c0_125, %c0_126] : memref<2x64x124xbf16, #tpu.memory_space<vmem>>, vector<1x64x124xbf16>
    %132 = vector.shape_cast %131 : vector<1x64x124xbf16> to vector<64x124xbf16>
    %cst_127 = arith.constant dense<0.000000e+00> : vector<64x120xf32>
    %133 = tpu.matmul %132, %127, %cst_127 {dimension_numbers = #tpu.dot_dimension_numbers<[1], [0], [0], [1], [0, 0, 1, 1], [], []>} : vector<64x124xbf16>, vector<124x120xbf16>, vector<64x120xf32> -> vector<64x120xf32>
    %134 = arith.maximumf %130, %133 : vector<64x120xf32>
    %135 = arith.truncf %134 : vector<64x120xf32> to vector<64x120xbf16>
    %c0_128 = arith.constant 0 : index
    %c0_129 = arith.constant 0 : index
    %c0_130 = arith.constant 0 : index
    %136 = vector.load %arg20[%c0_128, %c0_129, %c0_130] : memref<2x120x60xbf16, #tpu.memory_space<vmem>>, vector<1x120x60xbf16>
    %137 = vector.shape_cast %136 : vector<1x120x60xbf16> to vector<120x60xbf16>
    %cst_131 = arith.constant dense<0.000000e+00> : vector<64x60xf32>
    %138 = tpu.matmul %135, %137, %cst_131 {dimension_numbers = #tpu.dot_dimension_numbers<[1], [0], [0], [1], [0, 0, 1, 1], [], []>} : vector<64x120xbf16>, vector<120x60xbf16>, vector<64x60xf32> -> vector<64x60xf32>
    %c1_132 = arith.constant 1 : index
    %c0_133 = arith.constant 0 : index
    %c0_134 = arith.constant 0 : index
    %139 = vector.load %arg20[%c1_132, %c0_133, %c0_134] : memref<2x120x60xbf16, #tpu.memory_space<vmem>>, vector<1x120x60xbf16>
    %140 = vector.shape_cast %139 : vector<1x120x60xbf16> to vector<120x60xbf16>
    %cst_135 = arith.constant dense<0.000000e+00> : vector<64x60xf32>
    %141 = tpu.matmul %135, %140, %cst_135 {dimension_numbers = #tpu.dot_dimension_numbers<[1], [0], [0], [1], [0, 0, 1, 1], [], []>} : vector<64x120xbf16>, vector<120x60xbf16>, vector<64x60xf32> -> vector<64x60xf32>
    %142 = arith.maximumf %138, %141 : vector<64x60xf32>
    %c0_136 = arith.constant 0 : index
    %c0_137 = arith.constant 0 : index
    %143 = vector.load %arg31[%c0_136, %c0_137] : memref<64x60xf32, #tpu.memory_space<vmem>>, vector<64x60xf32>
    tpu.vector_store %arg31[%c0_136, %c0_137], %142 {strides = array<i32>} : memref<64x60xf32, #tpu.memory_space<vmem>>, vector<64x60xf32>,
    %c0_138 = arith.constant 0 : index
    %c0_139 = arith.constant 0 : index
    %144 = vector.load %arg31[%c0_138, %c0_139] : memref<64x60xf32, #tpu.memory_space<vmem>>, vector<62x60xf32>
    %c0_140 = arith.constant 0 : index
    %c0_141 = arith.constant 0 : index
    %c0_142 = arith.constant 0 : index
    %145 = vector.load %arg21[%c0_140, %c0_141, %c0_142] : memref<3x60x60xbf16, #tpu.memory_space<vmem>>, vector<1x60x60xbf16>
    %146 = vector.shape_cast %145 : vector<1x60x60xbf16> to vector<60x60xbf16>
    %147 = arith.truncf %144 : vector<62x60xf32> to vector<62x60xbf16>
    %cst_143 = arith.constant dense<0.000000e+00> : vector<62x60xf32>
    %148 = tpu.matmul %147, %146, %cst_143 {dimension_numbers = #tpu.dot_dimension_numbers<[1], [0], [0], [1], [0, 0, 1, 1], [], []>} : vector<62x60xbf16>, vector<60x60xbf16>, vector<62x60xf32> -> vector<62x60xf32>
    %c1_144 = arith.constant 1 : index
    %c0_145 = arith.constant 0 : index
    %149 = vector.load %arg31[%c1_144, %c0_145] : memref<64x60xf32, #tpu.memory_space<vmem>>, vector<62x60xf32>
    %c1_146 = arith.constant 1 : index
    %c0_147 = arith.constant 0 : index
    %c0_148 = arith.constant 0 : index
    %150 = vector.load %arg21[%c1_146, %c0_147, %c0_148] : memref<3x60x60xbf16, #tpu.memory_space<vmem>>, vector<1x60x60xbf16>
    %151 = vector.shape_cast %150 : vector<1x60x60xbf16> to vector<60x60xbf16>
    %152 = arith.truncf %149 : vector<62x60xf32> to vector<62x60xbf16>
    %cst_149 = arith.constant dense<0.000000e+00> : vector<62x60xf32>
    %153 = tpu.matmul %152, %151, %cst_149 {dimension_numbers = #tpu.dot_dimension_numbers<[1], [0], [0], [1], [0, 0, 1, 1], [], []>} : vector<62x60xbf16>, vector<60x60xbf16>, vector<62x60xf32> -> vector<62x60xf32>
    %154 = arith.addf %148, %153 : vector<62x60xf32>
    %c2_150 = arith.constant 2 : index
    %c0_151 = arith.constant 0 : index
    %155 = vector.load %arg31[%c2_150, %c0_151] : memref<64x60xf32, #tpu.memory_space<vmem>>, vector<62x60xf32>
    %c2_152 = arith.constant 2 : index
    %c0_153 = arith.constant 0 : index
    %c0_154 = arith.constant 0 : index
    %156 = vector.load %arg21[%c2_152, %c0_153, %c0_154] : memref<3x60x60xbf16, #tpu.memory_space<vmem>>, vector<1x60x60xbf16>
    %157 = vector.shape_cast %156 : vector<1x60x60xbf16> to vector<60x60xbf16>
    %158 = arith.truncf %155 : vector<62x60xf32> to vector<62x60xbf16>
    %cst_155 = arith.constant dense<0.000000e+00> : vector<62x60xf32>
    %159 = tpu.matmul %158, %157, %cst_155 {dimension_numbers = #tpu.dot_dimension_numbers<[1], [0], [0], [1], [0, 0, 1, 1], [], []>} : vector<62x60xbf16>, vector<60x60xbf16>, vector<62x60xf32> -> vector<62x60xf32>
    %160 = arith.addf %154, %159 : vector<62x60xf32>
    %cst_156 = arith.constant 0.000000e+00 : f32
    %161 = vector.broadcast %cst_156 : f32 to vector<62x60xf32>
    %162 = arith.maximumf %160, %161 : vector<62x60xf32>
    %c0_157 = arith.constant 0 : index
    %c0_158 = arith.constant 0 : index
    %163 = vector.load %arg22[%c0_157, %c0_158] : memref<1x60xf32, #tpu.memory_space<vmem>>, vector<1x60xf32>
    %164 = vector.broadcast %163 : vector<1x60xf32> to vector<62x60xf32>
    %165 = arith.mulf %162, %164 : vector<62x60xf32>
    %c0_159 = arith.constant 0 : index
    %c0_160 = arith.constant 0 : index
    %166 = vector.load %arg23[%c0_159, %c0_160] : memref<1x60xf32, #tpu.memory_space<vmem>>, vector<1x60xf32>
    %167 = vector.broadcast %166 : vector<1x60xf32> to vector<62x60xf32>
    %168 = arith.addf %165, %167 : vector<62x60xf32>
    %c0_161 = arith.constant 0 : index
    %c0_162 = arith.constant 0 : index
    %169 = vector.load %arg24[%c0_161, %c0_162] : memref<8x62xf32, #tpu.memory_space<vmem>>, vector<8x62xf32>
    %cst_163 = arith.constant dense<0.000000e+00> : vector<8x60xf32>
    %170 = tpu.matmul %169, %168, %cst_163 {dimension_numbers = #tpu.dot_dimension_numbers<[1], [0], [0], [1], [0, 0, 1, 1], [], []>} : vector<8x62xf32>, vector<62x60xf32>, vector<8x60xf32> -> vector<8x60xf32>
    %c0_164 = arith.constant 0 : index
    %c0_165 = arith.constant 0 : index
    %171 = vector.load %arg25[%c0_164, %c0_165] : memref<60x10xf32, #tpu.memory_space<vmem>>, vector<60x10xf32>
    %cst_166 = arith.constant dense<0.000000e+00> : vector<8x10xf32>
    %172 = tpu.matmul %170, %171, %cst_166 {dimension_numbers = #tpu.dot_dimension_numbers<[1], [0], [0], [1], [0, 0, 1, 1], [], []>} : vector<8x60xf32>, vector<60x10xf32>, vector<8x10xf32> -> vector<8x10xf32>
    %c0_167 = arith.constant 0 : index
    %c0_168 = arith.constant 0 : index
    %173 = vector.load %arg26[%c0_167, %c0_168] : memref<1x10xf32, #tpu.memory_space<vmem>>, vector<1x10xf32>
    %174 = vector.broadcast %173 : vector<1x10xf32> to vector<8x10xf32>
    %175 = arith.addf %172, %174 : vector<8x10xf32>
    %cst_169 = arith.constant dense<0xFF800000> : vector<8xf32>
    %176 = vector.multi_reduction <maximumf>, %175, %cst_169 [1] : vector<8x10xf32> to vector<8xf32>
    %177 = vector.shape_cast %176 : vector<8xf32> to vector<8x1xf32>
    %178 = vector.broadcast %177 : vector<8x1xf32> to vector<8x10xf32>
    %179 = arith.subf %175, %178 : vector<8x10xf32>
    %180 = math.exp %179 : vector<8x10xf32>
    %cst_170 = arith.constant dense<0.000000e+00> : vector<8xf32>
    %181 = vector.multi_reduction <add>, %180, %cst_170 [1] : vector<8x10xf32> to vector<8xf32>
    %182 = vector.shape_cast %181 : vector<8xf32> to vector<8x1xf32>
    %183 = math.log %182 : vector<8x1xf32>
    %184 = vector.broadcast %183 : vector<8x1xf32> to vector<8x10xf32>
    %185 = arith.subf %179, %184 : vector<8x10xf32>
    %c0_171 = arith.constant 0 : index
    %c0_172 = arith.constant 0 : index
    %186 = vector.load %arg27[%c0_171, %c0_172] : memref<8x10xf32, #tpu.memory_space<vmem>>, vector<8x10xf32>
    tpu.vector_store %arg27[%c0_171, %c0_172], %185 {strides = array<i32>} : memref<8x10xf32, #tpu.memory_space<vmem>>, vector<8x10xf32>,
    return
  }
  func.func @transform_0(%arg0: i32) -> (i32, i32) {
    %c0_i32 = arith.constant 0 : i32
    %c0_i32_0 = arith.constant 0 : i32
    return %arg0, %c0_i32 : i32, i32
  }
  func.func @transform_1(%arg0: i32) -> (i32, i32, i32) {
    %c0_i32 = arith.constant 0 : i32
    %c0_i32_0 = arith.constant 0 : i32
    %c0_i32_1 = arith.constant 0 : i32
    %c0_i32_2 = arith.constant 0 : i32
    return %c0_i32, %c0_i32_0, %c0_i32_1 : i32, i32, i32
  }
  func.func @transform_2(%arg0: i32) -> (i32, i32) {
    %c0_i32 = arith.constant 0 : i32
    %c0_i32_0 = arith.constant 0 : i32
    %c0_i32_1 = arith.constant 0 : i32
    return %c0_i32, %c0_i32_0 : i32, i32
  }
  func.func @transform_3(%arg0: i32) -> (i32, i32, i32) {
    %c0_i32 = arith.constant 0 : i32
    %c0_i32_0 = arith.constant 0 : i32
    %c0_i32_1 = arith.constant 0 : i32
    %c0_i32_2 = arith.constant 0 : i32
    return %c0_i32, %c0_i32_0, %c0_i32_1 : i32, i32, i32
  }
  func.func @transform_4(%arg0: i32) -> (i32, i32) {
    %c0_i32 = arith.constant 0 : i32
    %c0_i32_0 = arith.constant 0 : i32
    %c0_i32_1 = arith.constant 0 : i32
    return %c0_i32, %c0_i32_0 : i32, i32
  }
  func.func @transform_5(%arg0: i32) -> (i32, i32) {
    %c0_i32 = arith.constant 0 : i32
    %c0_i32_0 = arith.constant 0 : i32
    %c0_i32_1 = arith.constant 0 : i32
    return %c0_i32, %c0_i32_0 : i32, i32
  }
  func.func @transform_6(%arg0: i32) -> (i32, i32) {
    %c0_i32 = arith.constant 0 : i32
    %c0_i32_0 = arith.constant 0 : i32
    %c0_i32_1 = arith.constant 0 : i32
    return %c0_i32, %c0_i32_0 : i32, i32
  }
  func.func @transform_7(%arg0: i32) -> (i32, i32) {
    %c0_i32 = arith.constant 0 : i32
    %c0_i32_0 = arith.constant 0 : i32
    %c0_i32_1 = arith.constant 0 : i32
    return %c0_i32, %c0_i32_0 : i32, i32
  }
  func.func @transform_8(%arg0: i32) -> (i32, i32) {
    %c0_i32 = arith.constant 0 : i32
    %c0_i32_0 = arith.constant 0 : i32
    %c0_i32_1 = arith.constant 0 : i32
    return %c0_i32, %c0_i32_0 : i32, i32
  }
  func.func @transform_9(%arg0: i32) -> (i32, i32, i32) {
    %c0_i32 = arith.constant 0 : i32
    %c0_i32_0 = arith.constant 0 : i32
    %c0_i32_1 = arith.constant 0 : i32
    %c0_i32_2 = arith.constant 0 : i32
    return %c0_i32, %c0_i32_0, %c0_i32_1 : i32, i32, i32
  }
  func.func @transform_10(%arg0: i32) -> (i32, i32, i32) {
    %c0_i32 = arith.constant 0 : i32
    %c0_i32_0 = arith.constant 0 : i32
    %c0_i32_1 = arith.constant 0 : i32
    %c0_i32_2 = arith.constant 0 : i32
    return %c0_i32, %c0_i32_0, %c0_i32_1 : i32, i32, i32
  }
  func.func @transform_11(%arg0: i32) -> (i32, i32, i32) {
    %c0_i32 = arith.constant 0 : i32
    %c0_i32_0 = arith.constant 0 : i32
    %c0_i32_1 = arith.constant 0 : i32
    %c0_i32_2 = arith.constant 0 : i32
    return %c0_i32, %c0_i32_0, %c0_i32_1 : i32, i32, i32
  }
  func.func @transform_12(%arg0: i32) -> (i32, i32) {
    %c0_i32 = arith.constant 0 : i32
    %c0_i32_0 = arith.constant 0 : i32
    %c0_i32_1 = arith.constant 0 : i32
    return %c0_i32, %c0_i32_0 : i32, i32
  }
  func.func @transform_13(%arg0: i32) -> (i32, i32, i32) {
    %c0_i32 = arith.constant 0 : i32
    %c0_i32_0 = arith.constant 0 : i32
    %c0_i32_1 = arith.constant 0 : i32
    %c0_i32_2 = arith.constant 0 : i32
    return %c0_i32, %c0_i32_0, %c0_i32_1 : i32, i32, i32
  }
  func.func @transform_14(%arg0: i32) -> (i32, i32) {
    %c0_i32 = arith.constant 0 : i32
    %c0_i32_0 = arith.constant 0 : i32
    %c0_i32_1 = arith.constant 0 : i32
    return %c0_i32, %c0_i32_0 : i32, i32
  }
  func.func @transform_15(%arg0: i32) -> (i32, i32) {
    %c0_i32 = arith.constant 0 : i32
    %c0_i32_0 = arith.constant 0 : i32
    %c0_i32_1 = arith.constant 0 : i32
    return %c0_i32, %c0_i32_0 : i32, i32
  }
  func.func @transform_16(%arg0: i32) -> (i32, i32) {
    %c0_i32 = arith.constant 0 : i32
    %c0_i32_0 = arith.constant 0 : i32
    %c0_i32_1 = arith.constant 0 : i32
    return %c0_i32, %c0_i32_0 : i32, i32
  }
  func.func @transform_17(%arg0: i32) -> (i32, i32) {
    %c0_i32 = arith.constant 0 : i32
    %c0_i32_0 = arith.constant 0 : i32
    %c0_i32_1 = arith.constant 0 : i32
    return %c0_i32, %c0_i32_0 : i32, i32
  }
  func.func @transform_18(%arg0: i32) -> (i32, i32, i32) {
    %c0_i32 = arith.constant 0 : i32
    %c0_i32_0 = arith.constant 0 : i32
    %c0_i32_1 = arith.constant 0 : i32
    %c0_i32_2 = arith.constant 0 : i32
    return %c0_i32, %c0_i32_0, %c0_i32_1 : i32, i32, i32
  }
  func.func @transform_19(%arg0: i32) -> (i32, i32, i32) {
    %c0_i32 = arith.constant 0 : i32
    %c0_i32_0 = arith.constant 0 : i32
    %c0_i32_1 = arith.constant 0 : i32
    %c0_i32_2 = arith.constant 0 : i32
    return %c0_i32, %c0_i32_0, %c0_i32_1 : i32, i32, i32
  }
  func.func @transform_20(%arg0: i32) -> (i32, i32, i32) {
    %c0_i32 = arith.constant 0 : i32
    %c0_i32_0 = arith.constant 0 : i32
    %c0_i32_1 = arith.constant 0 : i32
    %c0_i32_2 = arith.constant 0 : i32
    return %c0_i32, %c0_i32_0, %c0_i32_1 : i32, i32, i32
  }
  func.func @transform_21(%arg0: i32) -> (i32, i32) {
    %c0_i32 = arith.constant 0 : i32
    %c0_i32_0 = arith.constant 0 : i32
    %c0_i32_1 = arith.constant 0 : i32
    return %c0_i32, %c0_i32_0 : i32, i32
  }
  func.func @transform_22(%arg0: i32) -> (i32, i32) {
    %c0_i32 = arith.constant 0 : i32
    %c0_i32_0 = arith.constant 0 : i32
    %c0_i32_1 = arith.constant 0 : i32
    return %c0_i32, %c0_i32_0 : i32, i32
  }
  func.func @transform_23(%arg0: i32) -> (i32, i32) {
    %c0_i32 = arith.constant 0 : i32
    %c0_i32_0 = arith.constant 0 : i32
    %c0_i32_1 = arith.constant 0 : i32
    return %c0_i32, %c0_i32_0 : i32, i32
  }
  func.func @transform_24(%arg0: i32) -> (i32, i32) {
    %c0_i32 = arith.constant 0 : i32
    %c0_i32_0 = arith.constant 0 : i32
    %c0_i32_1 = arith.constant 0 : i32
    return %c0_i32, %c0_i32_0 : i32, i32
  }
  func.func @transform_25(%arg0: i32) -> (i32, i32) {
    %c0_i32 = arith.constant 0 : i32
    %c0_i32_0 = arith.constant 0 : i32
    %c0_i32_1 = arith.constant 0 : i32
    return %c0_i32, %c0_i32_0 : i32, i32
  }
  func.func @transform_26(%arg0: i32) -> (i32, i32) {
    %c0_i32 = arith.constant 0 : i32
    %c0_i32_0 = arith.constant 0 : i32
    return %arg0, %c0_i32 : i32, i32
  }
}

</mosaic_0001>

<bundles_post_ra>
// kernel: net3_forward.1
= control target key start
LH: loop header
LB: loop body
LE: loop exit
PB: predicated region body
PF: predicated region fallthrough
CT: control target
= control target key end

     0   :  { %s25672_s0 = inlined_call_operand.vmem [shape: f32[480,28], index: 0, kind: input, shape index: {}]   ;;  %s25673_s1 = inlined_call_operand.vmem [shape: bf16[3,28,280], index: 1, kind: input, shape index: {}]   ;;  %s25674_s2 = inlined_call_operand.vmem [shape: f32[1,280], index: 2, kind: input, shape index: {}]   ;;  %s25675_s3 = inlined_call_operand.vmem [shape: bf16[3,280,448], index: 3, kind: input, shape index: {}]   ;;  %s25676_s4 = inlined_call_operand.vmem [shape: f32[1,448], index: 4, kind: input, shape index: {}]   ;;  %s25677_s5 = inlined_call_operand.vmem [shape: f32[238,1], index: 5, kind: input, shape index: {}]   ;;  %s25678_s6 = inlined_call_operand.vmem [shape: bf16[448,280], index: 6, kind: input, shape index: {}]   ;;  %s25679_s7 = inlined_call_operand.vmem [shape: f32[1,280], index: 7, kind: input, shape index: {}]   ;;  %s25680_s8 = inlined_call_operand.vmem [shape: f32[1,280], index: 8, kind: input, shape index: {}]   ;;  %s25681_s9 = inlined_call_operand.vmem [shape: bf16[2,128,238], index: 9, kind: input, shape index: {}]   ;;  %s25682_s10 = inlined_call_operand.vmem [shape: bf16[2,280,140], index: 10, kind: input, shape index: {}]   ;;  %s25683_s11 = inlined_call_operand.vmem [shape: bf16[3,140,196], index: 11, kind: input, shape index: {}]   ;;  %s25684_s12 = inlined_call_operand.vmem [shape: f32[1,196], index: 12, kind: input, shape index: {}]   ;;  %s25685_s13 = inlined_call_operand.vmem [shape: bf16[3,196,288], index: 13, kind: input, shape index: {}]   ;;  %s25686_s14 = inlined_call_operand.vmem [shape: f32[1,288], index: 14, kind: input, shape index: {}]   ;;  %s25687_s15 = inlined_call_operand.vmem [shape: bf16[288,120], index: 15, kind: input, shape index: {}]   ;;  %s25688_s16 = inlined_call_operand.vmem [shape: f32[1,120], index: 16, kind: input, shape index: {}]   ;;  %s25689_s17 = inlined_call_operand.vmem [shape: f32[1,120], index: 17, kind: input, shape index: {}]   ;;  %s25690_s18 = inlined_call_operand.vmem [shape: bf16[2,64,124], index: 18, kind: input, shape index: {}]   ;;  %s25691_s19 = inlined_call_operand.vmem [shape: bf16[2,120,60], index: 19, kind: input, shape index: {}]   ;;  %s25692_s20 = inlined_call_operand.vmem [shape: bf16[3,60,60], index: 20, kind: input, shape index: {}]   ;;  %s25693_s21 = inlined_call_operand.vmem [shape: f32[1,60], index: 21, kind: input, shape index: {}]   ;;  %s25694_s22 = inlined_call_operand.vmem [shape: f32[1,60], index: 22, kind: input, shape index: {}]   ;;  %s25695_s23 = inlined_call_operand.vmem [shape: f32[8,62], index: 23, kind: input, shape index: {}]   ;;  %s25696_s24 = inlined_call_operand.vmem [shape: f32[60,10], index: 24, kind: input, shape index: {}]   ;;  %s25697_s25 = inlined_call_operand.vmem [shape: f32[1,10], index: 25, kind: input, shape index: {}]   ;;  %s25698_s26 = inlined_call_operand.hbm [shape: f32[16,10], index: 26, kind: output, shape index: {}]  }
   0x1   :  { %25743 = sst [smem:[#allocation24_spill]] %s25672_s0 }
   0x2   :  { %25744 = sst [smem:[#allocation25_spill]] %s25673_s1 }
   0x3   :  { %25745 = sst [smem:[#allocation26_spill]] %s25674_s2 }
   0x4   :  { %25746 = sst [smem:[#allocation27_spill]] %s25675_s3 }
   0x5   :  { %25747 = sst [smem:[#allocation28_spill]] %s25676_s4 }
   0x6   :  { %25748 = sst [smem:[#allocation29_spill]] %s25677_s5 }
   0x7   :  { %25749 = sst [smem:[#allocation30_spill]] %s25678_s6 }
   0x8   :  { %25750 = sst [smem:[#allocation31_spill]] %s25679_s7 }
   0x9   :  { %25751 = sst [smem:[#allocation32_spill]] %s25680_s8 }
   0xa   :  { %25752 = sst [smem:[#allocation33_spill]] %s25681_s9 }
   0xb   :  { %25753 = sst [smem:[#allocation34_spill]] %s25682_s10 }
   0xc   :  { %25754 = sst [smem:[#allocation35_spill]] %s25698_s26 }
   0xd   :  { %31 = vsyncpa [#allocation7], 0 }
   0xe   :  { %33 = vsyncpa [#allocation7 + $0x1], 0  ;;  %s20032_s27 = smov 0   ;;  %s20034_s3 = smov 0  }
   0xf   :  { %s20036_s7 = smov 0   ;;  %s20038_s28 = smov 0  }
  0x10 LB: > { %25755 = sst [smem:[#allocation9_spill]] %s19877_s27  ;;  %s20053_s8 = sadd.s32 4294967295, %s19889_s28   ;;  %s19889_s28 = sphi %s20038_s28, %s25811_s28   ;;  %s19885_s7 = sphi %s20036_s7, %s25813_s7   ;;  %s19881_s3 = sphi %s20034_s3, %s25815_s3   ;;  %s19877_s27 = sphi %s20032_s27, %s25814_s27  }
  0x11   : > { %25756 = sst [smem:[#allocation10_spill]] %s19885_s7  ;;  %s15708_s4 = sadd.s32 4294967294, %s19889_s28  }
  0x12   : > { %25757 = sst [smem:[#allocation11_spill]] %s19889_s28  ;;  %s20057_s29 = sadd.s32 1, %s19889_s28  }
  0x13   : > { %25758 = sst [smem:[#allocation12_spill]] %s20057_s29  ;;  %s597_s0 = sadd.s32 1, %s19885_s7 }
  0x14   : > { %s594_s9 = ssub.s32 %s19889_s28, %s20057_s29  ;;  %p607_p0 = scmp.ne.s32.totalorder %s19885_s7, %s19881_s3 }
  0x15   : > { %p595_p1 = scmp.eq.s32.totalorder %s594_s9, 0  ;;  %p608_p2 = scmp.eq.s32.totalorder %s20053_s8, 1 }
  0x16   : > { %p613_p3 = scmp.ne.s32.totalorder %s19881_s3, %s19877_s27  ;;  %p614_p4 = scmp.eq.s32.totalorder %s15708_s4, 1 }
  0x17   : > { %s20068_s30 = scalar_select %p595_p1, %s19885_s7, %s597_s0  }
  0x18   : > { %p20070_p5 = por %p608_p2, %p607_p0  ;;  %p20074_p6 = por %p614_p4, %p613_p3 }
  0x19   : > { %25759 = sst [smem:[#allocation13_spill]] %s20068_s30  ;;  %p15711_p7 = scmp.ge.s32.totalorder %s19889_s28, 1 }
  0x1a   : > { %s25761_s5 = scalar_select %p20074_p6, 1, 0 }
  0x1b   : > { %p716_p8 = scmp.lt.s32.totalorder %s19889_s28, 3 }
  0x1c   : > { %25762 = sst [smem:[#allocation14_spill]] %s25761_s5 }
  0x1d   : > { %p717_p9 = pnand %p15711_p7, %p716_p8 }
  0x1f   : > { %720 = sbr.rel (%p717_p9) target bundleno = 4980 (0x1374), region = 124 }
  0x26   : > { %s25763_s1 = sld [smem:[#allocation25_spill]]  ;;  %vm975_vm0 = vcmask 1045504   ;;  %v25711_v1 = vmov 0.0   ;;  %v25713_v6 = vmov 0   ;;  %s786_s4 = smul.u32 30, %s20053_s8  ;;  %vm19893_vm1 = vmmov 0  }
  0x27   : > { %17462 = vmatprep.subr.bf16.mxu1 %v25711_v1  ;;  %1017 = vmatprep.mubr.bf16.mxu0 %v25713_v6  ;;  %s25764_s30 = sld [smem:[#allocation24_spill]]  ;;  %vm929_vm2 = vcmask 228352   ;;  %s25766_s5 = sld [smem:[#allocation27_spill]]  ;;  %vm3040_vm4 = vcmask 195585   ;;  %vm2770_vm5 = vcmask 1040384   ;;  %vm3044_vm6 = vcmask 195584  }
  0x28   : > { %18921 = vset.pattern.permute.xlu0 %v25713_v6  ;;  %17466 = vmatprep.mubr.msk.bf16.mxu1 %vm19893_vm1, %v25711_v1  ;;  %p787_p10 = scmp.lt.s32.totalorder %s786_s4, 59  ;;  %s25769_s0 = sld [smem:[#allocation26_spill]]  ;;  %vm4211_vm7 = vcmask 1043456   ;;  %vm3428_vm8 = vsmask.f32 7424  ;;  %vm3129_vm9 = vcmask 194560  }
  0x29   : > { %18922 = vset.pattern.permute.xlu1 %v25713_v6  ;;  %vm6210_vm10 = vcmask 1046528   ;;  %s25780_s10 = sld [smem:[#allocation30_spill]]  ;;  %vm8349_vm11 = vcmask 523264   ;;  %s25788_s27 = sld [smem:[#allocation33_spill]]  ;;  %vm9504_vm12 = vcmask 900096   ;;  %vm11086_vm13 = vcmask 97280  }
  0x2a   : > { %s25817_s4 = smov (!%p787_p10, %s786_s4), 59  ;;  %vm12738_vm14 = vcmask 1041408   ;;  %vm12190_vm15 = vcmask 556032   ;;  %s783_s28 = sand.u32 1, %s19881_s3  }
  0x2b   : > { %s15713_s9 = sshll.u32 %s25817_s4, 3  ;;  %s25765_s4 = sld [smem:[#allocation29_spill]] }
  0x2c   : > { %v18923_v0 = vld [vmem:[%s25763_s1 + $0x34] ss:$12 sps:$4 sm:$0xff]   ;;  %v18925_v2 = vld [vmem:[%s25763_s1 + $0x30] ss:$12 sps:$4 sm:$0xff]   ;;  %v18926_v3 = vld [vmem:[%s25763_s1 + $0x38] ss:$12 sps:$4 sm:$0xff]  }
  0x2d   : > { %985 = vmatprep.subr.bf16.mxu0 %v18923_v0  ;;  %v18927_v4 = vld [vmem:[%s25763_s1 + $0x4c] ss:$12 sps:$4 sm:$0x3f]   ;;  %v18929_v5 = vld [vmem:[%s25763_s1 + $0x48] ss:$12 sps:$4 sm:$0x3f]   ;;  %17463 = vmatpush3.bf16.msra.mxu1 %v18926_v3  ;;  %s20116_s7 = scalar_lea.vmem %s25764_s30, %s15713_s9 }
  0x2e   : > { %986 = vmatpush1.bf16.msra.mxu0 %v18925_v2  ;;  %17464 = vmatprep.subr.bf16.mxu1 %v25711_v1  ;;  %v977_v7 = vsel %vm975_vm0, %v18929_v5, 0  ;;  %v18930_v8 = vld [vmem:[%s25763_s1 + $0x50] ss:$12 sps:$4 sm:$0x3f]   ;;  %v846_v11 = vld [vmem:[%s20116_s7 + $0x1] sm:$0xff]  ;;  %s25786_s9 = sld [smem:[#allocation31_spill]] }
  0x2f   : > { %15728 = vmatprep.subr.msk.bf16.mxu0 %vm975_vm0, %v18927_v4  ;;  %v18933_v9 = vld [vmem:[%s25763_s1 + $0x4] ss:$12 sps:$4 sm:$0xff]   ;;  %v983_v10 = vsel %vm975_vm0, %v18930_v8, 0  ;;  %v18931_v13 = vld [vmem:[%s25763_s1] ss:$12 sps:$4 sm:$0xff]   ;;  %s25807_s30 = sld [smem:[#allocation35_spill]] }
  0x30   : > { %v847_v12 = vld [vmem:[%s20116_s7 + $0x9] sm:$0xff]  ;;  %v18936_v16 = vld [vmem:[%s25763_s1 + $0x18] ss:$12 sps:$4 sm:$0x3f]   ;;  %s15636_s29 = scalar_lea.sflag [#allocation7], %s783_s28 }
  0x31   : > { %17465 = vmatpush3.bf16.msra.mxu1 %v983_v10  ;;  %v885_v14 = vpack.c.bf16 %v847_v12, %v846_v11  ;;  %v18934_v15 = vld [vmem:[%s25763_s1 + $0x1c] ss:$12 sps:$4 sm:$0x3f]   ;;  %v18938_v18 = vld [vmem:[%s25763_s1 + $0x20] ss:$12 sps:$4 sm:$0x3f]  }
  0x32   : > { %988 = vmatpush1.bf16.msra.mxu0 %v977_v7  ;;  %17526 = vmatprep.subr.bf16.mxu1 %v25711_v1  ;;  %v18937_v17 = vld [vmem:[%s25763_s1 + $0x8] ss:$12 sps:$4 sm:$0xff]   ;;  %v849_v20 = vld [vmem:[%s20116_s7 + $0x19] sm:$0xff]  ;;  %v1396_v21 = vsel %vm975_vm0, %v18936_v16, 0  ;;  %v1402_v23 = vsel %vm975_vm0, %v18938_v18, 0 }
  0x33   : > { %1404 = vmatprep.subr.bf16.mxu0 %v18933_v9  ;;  %v848_v19 = vld [vmem:[%s20116_s7 + $0x11] sm:$0xff]  ;;  %v850_v25 = vld [vmem:[%s20116_s7 + $0x21] sm:$0xff]  ;;  %v851_v26 = vld [vmem:[%s20116_s7 + $0x29] sm:$0xff] }
  0x34   : > { %17467 = vmatmul.mubr.msk.bf16.vlgmr.msra.gmra.mrb[0].mxu1 %vm929_vm2, %v885_v14  ;;  %v886_v22 = vpack.c.bf16 %v849_v20, %v848_v19  ;;  %v18941_v24 = vld [vmem:[%s25763_s1 + $0x64] ss:$12 sps:$4 sm:$0xff]   ;;  %v887_v27 = vpack.c.bf16 %v851_v26, %v850_v25  ;;  %v853_v29 = vld [vmem:[%s20116_s7 + $0x39] sm:$0xff]  ;;  %v875_v62 = vld [vmem:[%s20116_s7 + $0xe9] sm:$0x3f] }
  0x35   : > { %15729 = vmatmul.mubr.msk.bf16.vlgmr.msra.gmra.mrb[0].mxu0 %vm929_vm2, %v885_v14  ;;  %17470 = vmatprep.mubr.msk.bf16.mxu1 %vm19893_vm1, %v25711_v1  ;;  %v852_v28 = vld [vmem:[%s20116_s7 + $0x31] sm:$0xff]  ;;  %v854_v31 = vld [vmem:[%s20116_s7 + $0x41] sm:$0xff]  ;;  %v855_v32 = vld [vmem:[%s20116_s7 + $0x49] sm:$0xff] }
  0x36   : > { %1405 = vmatpush1.bf16.msra.mxu0 %v18931_v13  ;;  %1027 = vmatprep.mubr.bf16.mxu0 %v25713_v6  ;;  %v888_v30 = vpack.c.bf16 %v853_v29, %v852_v28  ;;  %v889_v33 = vpack.c.bf16 %v855_v32, %v854_v31  ;;  %v856_v34 = vld [vmem:[%s20116_s7 + $0x51] sm:$0xff]  ;;  %v857_v35 = vld [vmem:[%s20116_s7 + $0x59] sm:$0xff]  ;;  %v858_v37 = vld [vmem:[%s20116_s7 + $0x61] sm:$0xff] }
  0x37   : > { %15765 = vmatprep.subr.msk.bf16.mxu0 %vm975_vm0, %v18934_v15  ;;  %17527 = vmatpush3.bf16.msra.mxu1 %v18937_v17  ;;  %v890_v36 = vpack.c.bf16 %v857_v35, %v856_v34  ;;  %v859_v38 = vld [vmem:[%s20116_s7 + $0x69] sm:$0xff]  ;;  %v860_v40 = vld [vmem:[%s20116_s7 + $0x71] sm:$0xff]  ;;  %v861_v41 = vld [vmem:[%s20116_s7 + $0x79] sm:$0xff] }
  0x38   : > { %17528 = vmatprep.subr.bf16.mxu1 %v25711_v1  ;;  %v891_v39 = vpack.c.bf16 %v859_v38, %v858_v37  ;;  %v892_v42 = vpack.c.bf16 %v861_v41, %v860_v40  ;;  %v862_v43 = vld [vmem:[%s20116_s7 + $0x81] sm:$0xff]  ;;  %v863_v44 = vld [vmem:[%s20116_s7 + $0x89] sm:$0xff]  ;;  %v864_v46 = vld [vmem:[%s20116_s7 + $0x91] sm:$0xff] }
  0x39   : > { %v893_v45 = vpack.c.bf16 %v863_v44, %v862_v43  ;;  %v865_v47 = vld [vmem:[%s20116_s7 + $0x99] sm:$0xff]  ;;  %v866_v49 = vld [vmem:[%s20116_s7 + $0xa1] sm:$0xff]  ;;  %v867_v50 = vld [vmem:[%s20116_s7 + $0xa9] sm:$0xff] }
  0x3a   : > { %1407 = vmatpush1.bf16.msra.mxu0 %v1396_v21  ;;  %v894_v48 = vpack.c.bf16 %v865_v47, %v864_v46  ;;  %v895_v51 = vpack.c.bf16 %v867_v50, %v866_v49  ;;  %v868_v52 = vld [vmem:[%s20116_s7 + $0xb1] sm:$0xff]  ;;  %v869_v53 = vld [vmem:[%s20116_s7 + $0xb9] sm:$0xff]  ;;  %v870_v55 = vld [vmem:[%s20116_s7 + $0xc1] sm:$0xff] }
  0x3b   : > { %17529 = vmatpush3.bf16.msra.mxu1 %v1402_v23  ;;  %1877 = vmatprep.subr.bf16.mxu0 %v18941_v24  ;;  %v896_v54 = vpack.c.bf16 %v869_v53, %v868_v52  ;;  %v871_v56 = vld [vmem:[%s20116_s7 + $0xc9] sm:$0xff]  ;;  %v872_v58 = vld [vmem:[%s20116_s7 + $0xd1] sm:$0xff]  ;;  %v873_v59 = vld [vmem:[%s20116_s7 + $0xd9] sm:$0xff] }
  0x3c   : > { %17471 = vmatmul.mubr.msk.bf16.gmra.mrb[4].mxu1 %vm929_vm2, %v886_v22  ;;  %17590 = vmatprep.subr.bf16.mxu1 %v25711_v1  ;;  %v897_v57 = vpack.c.bf16 %v871_v56, %v870_v55  ;;  %v898_v60 = vpack.c.bf16 %v873_v59, %v872_v58  ;;  %v874_v61 = vld [vmem:[%s20116_s7 + $0xe1] sm:$0xff]  ;;  %v795_v10 = vld [vmem:[%s20116_s7 + $0x10] sm:$0xff]  ;;  %v796_v11 = vld [vmem:[%s20116_s7 + $0x18] sm:$0xff] }
  0x3d   : > { %15730 = vmatmul.mubr.msk.bf16.gmra.mrb[4].mxu0 %vm929_vm2, %v886_v22  ;;  %17474 = vmatprep.mubr.msk.bf16.mxu1 %vm19893_vm1, %v25711_v1  ;;  %v899_v63 = vpack.c.bf16 %v875_v62, %v874_v61  ;;  %v793_v0 = vld [vmem:[%s20116_s7] sm:$0xff]  ;;  %v794_v2 = vld [vmem:[%s20116_s7 + $0x8] sm:$0xff]  ;;  %v832_v13 = vpack.c.bf16 %v796_v11, %v795_v10  ;;  %v799_v18 = vld [vmem:[%s20116_s7 + $0x30] sm:$0xff] }
  0x3e   : > { %1037 = vmatprep.mubr.bf16.mxu0 %v25713_v6  ;;  %v18939_v3 = vld [vmem:[%s25763_s1 + $0x60] ss:$12 sps:$4 sm:$0xff]   ;;  %v831_v4 = vpack.c.bf16 %v794_v2, %v793_v0  ;;  %v18942_v5 = vld [vmem:[%s25763_s1 + $0x7c] ss:$12 sps:$4 sm:$0x3f]   ;;  %v2412_v23 = vld [vmem:[%s25765_s4 + $0x10] sm:$0xff] }
  0x3f   : > { %v18944_v7 = vld [vmem:[%s25763_s1 + $0x78] ss:$12 sps:$4 sm:$0x3f]   ;;  %v18945_v8 = vld [vmem:[%s25763_s1 + $0x68] ss:$12 sps:$4 sm:$0xff]   ;;  %2452 = vperm.xlu1 %18922, %v2412_v23  }
  0x40   : > { %v18946_v9 = vld [vmem:[%s25763_s1 + $0x80] ss:$12 sps:$4 sm:$0x3f]   ;;  %v1869_v12 = vsel %vm975_vm0, %v18944_v7, 0  ;;  %v800_v19 = vld [vmem:[%s20116_s7 + $0x38] sm:$0xff]  ;;  %v2416_v32 = vld [vmem:[%s25765_s4 + $0x30] sm:$0xff] }
  0x41   : > { %v1875_v14 = vsel %vm975_vm0, %v18946_v9, 0  ;;  %v797_v15 = vld [vmem:[%s20116_s7 + $0x20] sm:$0xff]  ;;  %v798_v16 = vld [vmem:[%s20116_s7 + $0x28] sm:$0xff]  ;;  %v834_v20 = vpack.c.bf16 %v800_v19, %v799_v18  ;;  %v2413_v28 = vld [vmem:[%s25765_s4 + $0x18] sm:$0xff]  ;;  %s25802_s1 = sld [smem:[#allocation34_spill]] }
  0x42   : > { %v833_v17 = vpack.c.bf16 %v798_v16, %v797_v15  ;;  %v801_v21 = vld [vmem:[%s20116_s7 + $0x40] sm:$0xff]  ;;  %v802_v24 = vld [vmem:[%s20116_s7 + $0x48] sm:$0xff]  ;;  %v2417_v35 = vld [vmem:[%s25765_s4 + $0x38] sm:$0xff] }
  0x43   : > { %v2410_v22 = vld [vmem:[%s25765_s4] sm:$0xff]  ;;  %v2411_v25 = vld [vmem:[%s25765_s4 + $0x8] sm:$0xff]  ;;  %v835_v26 = vpack.c.bf16 %v802_v24, %v801_v21  ;;  %2457 = vperm.xlu1 %18922, %v2413_v28   ;;  %v807_v41 = vld [vmem:[%s20116_s7 + $0x70] sm:$0xff] }
  0x44   : > { %17475 = vmatmul.mubr.msk.bf16.gmra.mrb[8].mxu1 %vm929_vm2, %v887_v27  ;;  %2442 = vperm.xlu0 %18921, %v2410_v22   ;;  %v2414_v29 = vld [vmem:[%s25765_s4 + $0x20] sm:$0xff]  ;;  %v2415_v31 = vld [vmem:[%s25765_s4 + $0x28] sm:$0xff]  ;;  %v808_v44 = vld [vmem:[%s20116_s7 + $0x78] sm:$0xff] }
  0x45   : > { %15731 = vmatmul.mubr.msk.bf16.gmra.mrb[8].mxu0 %vm929_vm2, %v887_v27  ;;  %17478 = vmatprep.mubr.msk.bf16.mxu1 %vm19893_vm1, %v25711_v1  ;;  %v803_v27 = vld [vmem:[%s20116_s7 + $0x50] sm:$0xff]  ;;  %v805_v34 = vld [vmem:[%s20116_s7 + $0x60] sm:$0xff]  ;;  %v806_v37 = vld [vmem:[%s20116_s7 + $0x68] sm:$0xff]  ;;  %v838_v47 = vpack.c.bf16 %v808_v44, %v807_v41 }
  0x46   : > { %1047 = vmatprep.mubr.bf16.mxu0 %v25713_v6  ;;  %v2419_v38 = vld [vmem:[%s25765_s4 + $0x48] sm:$0xff]  ;;  %v837_v40 = vpack.c.bf16 %v806_v37, %v805_v34  ;;  %v2422_v43 = vld [vmem:[%s25765_s4 + $0x60] sm:$0xff]  ;;  %v2424_v46 = vld [vmem:[%s25765_s4 + $0x70] sm:$0xff] }
  0x47   : > { %2467 = vperm.xlu1 %18922, %v2415_v31   ;;  %v2425_v49 = vld [vmem:[%s25765_s4 + $0x78] sm:$0xff]  ;;  %v2426_v50 = vld [vmem:[%s25765_s4 + $0x80] sm:$0xff]  ;;  %v2427_v52 = vld [vmem:[%s25765_s4 + $0x88] sm:$0xff] }
  0x48   : > { %2447 = vperm.xlu0 %18921, %v2411_v25   ;;  %v2428_v53 = vld [vmem:[%s25765_s4 + $0x90] sm:$0xff]  ;;  %v2429_v56 = vld [vmem:[%s25765_s4 + $0x98] sm:$0xff]  ;;  %v2431_v59 = vld [vmem:[%s25765_s4 + $0xa8] sm:$0xff] }
  0x49   : > { %v811_v55 = vld [vmem:[%s20116_s7 + $0x90] sm:$0xff]  ;;  %v812_v58 = vld [vmem:[%s20116_s7 + $0x98] sm:$0xff]  ;;  %v813_v62 = vld [vmem:[%s20116_s7 + $0xa0] sm:$0xff] }
  0x4a   : > { %v840_v61 = vpack.c.bf16 %v812_v58, %v811_v55  ;;  %v2433_v0 = vld [vmem:[%s25765_s4 + $0xb8] sm:$0xff]  ;;  %v2434_v2 = vld [vmem:[%s25765_s4 + $0xc0] sm:$0xff]  ;;  %v815_v7 = vld [vmem:[%s20116_s7 + $0xb0] sm:$0xff] }
  0x4b   : > { %2477 = vperm.xlu1 %18922, %v2417_v35   ;;  %v2437_v9 = vld [vmem:[%s25765_s4 + $0xd8] sm:$0xff]  ;;  %v2438_v10 = vld [vmem:[%s25765_s4 + $0xe0] sm:$0xff]  ;;  %v822_v28 = vld [vmem:[%s20116_s7 + $0xe8] sm:$0x3f] }
  0x4c   : > { %17479 = vmatmul.mubr.msk.bf16.gmra.mrb[12].mxu1 %vm929_vm2, %v888_v30  ;;  %2462 = vperm.xlu0 %18921, %v2414_v29   ;;  %v820_v21 = vld [vmem:[%s20116_s7 + $0xd8] sm:$0xff]  ;;  %v1740_v34 = vld [vmem:[%s20116_s7 + $0x2] sm:$0xff]  ;;  %v1741_v35 = vld [vmem:[%s20116_s7 + $0xa] sm:$0xff] }
  0x4d   : > { %15732 = vmatmul.mubr.msk.bf16.gmra.mrb[12].mxu0 %vm929_vm2, %v888_v30  ;;  %17482 = vmatprep.mubr.msk.bf16.mxu1 %vm19893_vm1, %v25711_v1  ;;  %v804_v30 = vld [vmem:[%s20116_s7 + $0x58] sm:$0xff]  ;;  %v1779_v37 = vpack.c.bf16 %v1741_v35, %v1740_v34  ;;  %v18947_v41 = vld [vmem:[%s25766_s5 + $0x230] ss:$16 sps:$4 sm:$0xff]  }
  0x4e   : > { %1057 = vmatprep.mubr.bf16.mxu0 %v25713_v6  ;;  %v1743_v44 = vld [vmem:[%s20116_s7 + $0x1a] sm:$0xff] }
  0x4f   : > { %2487 = vperm.xlu1 %18922, %v2419_v38  }
  0x50   : > { %2472 = vperm.xlu0 %18921, %v2416_v32  }
  0x54   : > { %17483 = vmatmul.mubr.msk.bf16.gmra.mrb[16].mxu1 %vm929_vm2, %v889_v33 }
  0x55   : > { %15733 = vmatmul.mubr.msk.bf16.gmra.mrb[16].mxu0 %vm929_vm2, %v889_v33  ;;  %17486 = vmatprep.mubr.msk.bf16.mxu1 %vm19893_vm1, %v25711_v1  ;;  %v836_v33 = vpack.c.bf16 %v804_v30, %v803_v27  ;;  %v821_v27 = vld [vmem:[%s20116_s7 + $0xe0] sm:$0xff] }
  0x56   : > { %1067 = vmatprep.mubr.bf16.mxu0 %v25713_v6  ;;  %v845_v30 = vpack.c.bf16 %v822_v28, %v821_v27  ;;  %v18962_v28 = vld [vmem:[%s25766_s5 + $0x2d0] ss:$16 sps:$4 sm:$0xff]  }
  0x5c   : > { %17487 = vmatmul.mubr.msk.bf16.gmra.mrb[20].mxu1 %vm929_vm2, %v890_v36 }
  0x5d   : > { %15734 = vmatmul.mubr.msk.bf16.gmra.mrb[20].mxu0 %vm929_vm2, %v890_v36  ;;  %17490 = vmatprep.mubr.msk.bf16.mxu1 %vm19893_vm1, %v25711_v1  ;;  %v2418_v36 = vld [vmem:[%s25765_s4 + $0x40] sm:$0xff] }
  0x5e   : > { %1077 = vmatprep.mubr.bf16.mxu0 %v25713_v6  ;;  %2482 = vperm.xlu0 %18921, %v2418_v36  }
  0x64   : > { %17491 = vmatmul.mubr.msk.bf16.gmra.mrb[24].mxu1 %vm929_vm2, %v891_v39 }
  0x65   : > { %15735 = vmatmul.mubr.msk.bf16.gmra.mrb[24].mxu0 %vm929_vm2, %v891_v39  ;;  %17494 = vmatprep.mubr.msk.bf16.mxu1 %vm19893_vm1, %v25711_v1  ;;  %v2420_v39 = vld [vmem:[%s25765_s4 + $0x50] sm:$0xff] }
  0x66   : > { %1087 = vmatprep.mubr.bf16.mxu0 %v25713_v6  ;;  %2492 = vperm.xlu0 %18921, %v2420_v39  }
  0x6a   : > { %2502 = vperm.xlu0 %18921, %v2422_v43   ;;  %v1742_v43 = vld [vmem:[%s20116_s7 + $0x12] sm:$0xff] }
  0x6c   : > { %17495 = vmatmul.mubr.msk.bf16.gmra.mrb[28].mxu1 %vm929_vm2, %v892_v42 }
  0x6d   : > { %15736 = vmatmul.mubr.msk.bf16.gmra.mrb[28].mxu0 %vm929_vm2, %v892_v42  ;;  %17498 = vmatprep.mubr.msk.bf16.mxu1 %vm19893_vm1, %v25711_v1  ;;  %v2421_v42 = vld [vmem:[%s25765_s4 + $0x58] sm:$0xff] }
  0x6e   : > { %1097 = vmatprep.mubr.bf16.mxu0 %v25713_v6  ;;  %2497 = vperm.xlu1 %18922, %v2421_v42   ;;  %v18949_v42 = vld [vmem:[%s25766_s5 + $0x234] ss:$16 sps:$4 sm:$0xff]  }
  0x6f   : > { %2512 = vperm.xlu0 %18921, %v2424_v46   ;;  %v1780_v46 = vpack.c.bf16 %v1743_v44, %v1742_v43  ;;  %v18965_v43 = vld [vmem:[%s25766_s5 + $0x2f0] ss:$16 sps:$4 sm:$0xff]   ;;  %v18967_v44 = vld [vmem:[%s25766_s5 + $0x2f4] ss:$16 sps:$4 sm:$0xff]  }
  0x73   : > { %2522 = vperm.xlu0 %18921, %v2426_v50   ;;  %v18950_v50 = vld [vmem:[%s25766_s5 + $0x250] ss:$16 sps:$4 sm:$0xff]  }
  0x74   : > { %17499 = vmatmul.mubr.msk.bf16.gmra.mrb[32].mxu1 %vm929_vm2, %v893_v45 }
  0x75   : > { %15737 = vmatmul.mubr.msk.bf16.gmra.mrb[32].mxu0 %vm929_vm2, %v893_v45  ;;  %17502 = vmatprep.mubr.msk.bf16.mxu1 %vm19893_vm1, %v25711_v1  ;;  %v2423_v45 = vld [vmem:[%s25765_s4 + $0x68] sm:$0xff] }
  0x76   : > { %1107 = vmatprep.mubr.bf16.mxu0 %v25713_v6  ;;  %2507 = vperm.xlu1 %18922, %v2423_v45  }
  0x77   : > { %2532 = vperm.xlu0 %18921, %v2428_v53   ;;  %v1745_v53 = vld [vmem:[%s20116_s7 + $0x2a] sm:$0xff] }
  0x7a   : > { %2517 = vperm.xlu1 %18922, %v2425_v49  }
  0x7c   : > { %17503 = vmatmul.mubr.msk.bf16.gmra.mrb[36].mxu1 %vm929_vm2, %v894_v48 }
  0x7d   : > { %15738 = vmatmul.mubr.msk.bf16.gmra.mrb[36].mxu0 %vm929_vm2, %v894_v48  ;;  %17506 = vmatprep.mubr.msk.bf16.mxu1 %vm19893_vm1, %v25711_v1  ;;  %v809_v48 = vld [vmem:[%s20116_s7 + $0x80] sm:$0xff] }
  0x7e   : > { %1117 = vmatprep.mubr.bf16.mxu0 %v25713_v6  ;;  %2527 = vperm.xlu1 %18922, %v2427_v52   ;;  %v1744_v52 = vld [vmem:[%s20116_s7 + $0x22] sm:$0xff] }
  0x7f   : > { %v1781_v55 = vpack.c.bf16 %v1745_v53, %v1744_v52 }
  0x82   : > { %2537 = vperm.xlu1 %18922, %v2429_v56  }
  0x84   : > { %17507 = vmatmul.mubr.msk.bf16.gmra.mrb[40].mxu1 %vm929_vm2, %v895_v51 }
  0x85   : > { %15739 = vmatmul.mubr.msk.bf16.gmra.mrb[40].mxu0 %vm929_vm2, %v895_v51  ;;  %17510 = vmatprep.mubr.msk.bf16.mxu1 %vm19893_vm1, %v25711_v1  ;;  %v810_v51 = vld [vmem:[%s20116_s7 + $0x88] sm:$0xff] }
  0x86   : > { %1127 = vmatprep.mubr.bf16.mxu0 %v25713_v6  ;;  %2547 = vperm.xlu1 %18922, %v2431_v59   ;;  %v18953_v59 = vld [vmem:[%s25766_s5 + $0x270] ss:$16 sps:$4 sm:$0xff]  }
  0x8a   : > { %2557 = vperm.xlu1 %18922, %v2433_v0  }
  0x8c   : > { %17511 = vmatmul.mubr.msk.bf16.gmra.mrb[44].mxu1 %vm929_vm2, %v896_v54 }
  0x8d   : > { %15740 = vmatmul.mubr.msk.bf16.gmra.mrb[44].mxu0 %vm929_vm2, %v896_v54  ;;  %17514 = vmatprep.mubr.msk.bf16.mxu1 %vm19893_vm1, %v25711_v1  ;;  %v839_v54 = vpack.c.bf16 %v810_v51, %v809_v48  ;;  %v18952_v51 = vld [vmem:[%s25766_s5 + $0x254] ss:$16 sps:$4 sm:$0xff]  }
  0x8e   : > { %1137 = vmatprep.mubr.bf16.mxu0 %v25713_v6 }
  0x94   : > { %17515 = vmatmul.mubr.msk.bf16.gmra.mrb[48].mxu1 %vm929_vm2, %v897_v57 }
  0x95   : > { %15741 = vmatmul.mubr.msk.bf16.gmra.mrb[48].mxu0 %vm929_vm2, %v897_v57  ;;  %17518 = vmatprep.mubr.msk.bf16.mxu1 %vm19893_vm1, %v25711_v1  ;;  %v2430_v57 = vld [vmem:[%s25765_s4 + $0xa0] sm:$0xff] }
  0x96   : > { %1147 = vmatprep.mubr.bf16.mxu0 %v25713_v6  ;;  %2542 = vperm.xlu0 %18921, %v2430_v57  }
  0x9c   : > { %17519 = vmatmul.mubr.msk.bf16.gmra.mrb[52].mxu1 %vm929_vm2, %v898_v60 }
  0x9d   : > { %15742 = vmatmul.mubr.msk.bf16.gmra.mrb[52].mxu0 %vm929_vm2, %v898_v60  ;;  %17522 = vmatprep.mubr.msk.bf16.mxu1 %vm19893_vm1, %v25711_v1  ;;  %v2432_v60 = vld [vmem:[%s25765_s4 + $0xb0] sm:$0xff] }
  0x9e   : > { %1157 = vmatprep.mubr.bf16.mxu0 %v25713_v6  ;;  %2552 = vperm.xlu0 %18921, %v2432_v60   ;;  %v18955_v60 = vld [vmem:[%s25766_s5 + $0x274] ss:$16 sps:$4 sm:$0xff]  }
  0xa2   : > { %2562 = vperm.xlu0 %18921, %v2434_v2  }
  0xa4   : > { %17523 = vmatmul.mubr.msk.bf16.gmra.mrb[56].mxu1 %vm929_vm2, %v899_v63 }
  0xa5   : > { %15743 = vmatmul.mubr.msk.bf16.gmra.mrb[56].mxu0 %vm929_vm2, %v899_v63  ;;  %17530 = vmatprep.mubr.msk.bf16.mxu1 %vm19893_vm1, %v25711_v1  ;;  %v814_v63 = vld [vmem:[%s20116_s7 + $0xa8] sm:$0xff] }
  0xa6   : > { %1436 = vmatprep.mubr.bf16.mxu0 %v25713_v6 }
  0xac   : > { %17531 = vmatmul.mubr.msk.bf16.vlgmr.msra.gmra.mrb[60].mxu1 %vm929_vm2, %v831_v4 }
  0xad   : > { %15766 = vmatmul.mubr.msk.bf16.vlgmr.msra.gmra.mrb[0].mxu0 %vm929_vm2, %v831_v4  ;;  %17534 = vmatprep.mubr.msk.bf16.mxu1 %vm19893_vm1, %v25711_v1  ;;  %v2436_v4 = vld [vmem:[%s25765_s4 + $0xd0] sm:$0xff] }
  0xae   : > { %1878 = vmatpush1.bf16.msra.mxu0 %v18939_v3  ;;  %1446 = vmatprep.mubr.bf16.mxu0 %v25713_v6  ;;  %v2435_v3 = vld [vmem:[%s25765_s4 + $0xc8] sm:$0xff] }
  0xaf   : > { %15810 = vmatprep.subr.msk.bf16.mxu0 %vm975_vm0, %v18942_v5  ;;  %17591 = vmatpush3.bf16.msra.mxu1 %v18945_v8  ;;  %v841_v5 = vpack.c.bf16 %v814_v63, %v813_v62  ;;  %v816_v8 = vld [vmem:[%s20116_s7 + $0xb8] sm:$0xff] }
  0xb0   : > { %17592 = vmatprep.subr.bf16.mxu1 %v25711_v1  ;;  %2567 = vperm.xlu1 %18922, %v2435_v3   ;;  %v842_v11 = vpack.c.bf16 %v816_v8, %v815_v7  ;;  %v1747_v62 = vld [vmem:[%s20116_s7 + $0x3a] sm:$0xff]  ;;  %v18958_v7 = vld [vmem:[%s25766_s5 + $0x294] ss:$16 sps:$4 sm:$0xff]  }
  0xb1   : > { %2572 = vperm.xlu0 %18921, %v2436_v4   ;;  %v1748_v8 = vld [vmem:[%s20116_s7 + $0x42] sm:$0xff] }
  0xb2   : > { %1880 = vmatpush1.bf16.msra.mxu0 %v1869_v12  ;;  %v2439_v12 = vld [vmem:[%s25765_s4 + $0xe8] sm:$0x3f]  ;;  %s25789_s4 = smov %s25788_s27 }
  0xb3   : > { %17593 = vmatpush3.bf16.msra.mxu1 %v1875_v14  ;;  %v818_v14 = vld [vmem:[%s20116_s7 + $0xc8] sm:$0xff]  ;;  %4224 = vmatprep.subr.bf16.mxu0 %v18949_v42 }
  0xb4   : > { %17535 = vmatmul.mubr.msk.bf16.gmra.mrb[64].mxu1 %vm929_vm2, %v832_v13  ;;  %2577 = vperm.xlu1 %18922, %v2437_v9   ;;  %v1749_v9 = vld [vmem:[%s20116_s7 + $0x4a] sm:$0xff] }
  0xb5   : > { %15767 = vmatmul.mubr.msk.bf16.gmra.mrb[4].mxu0 %vm929_vm2, %v832_v13  ;;  %17538 = vmatprep.mubr.msk.bf16.mxu1 %vm19893_vm1, %v25711_v1  ;;  %v817_v13 = vld [vmem:[%s20116_s7 + $0xc0] sm:$0xff] }
  0xb6   : > { %1456 = vmatprep.mubr.bf16.mxu0 %v25713_v6  ;;  %2582 = vperm.xlu0 %18921, %v2438_v10   ;;  %v843_v16 = vpack.c.bf16 %v818_v14, %v817_v13 }
  0xb8   : > { %2587 = vperm.xlu1 %18922, %v2439_v12  }
  0xbc   : > { %17539 = vmatmul.mubr.msk.bf16.gmra.mrb[68].mxu1 %vm929_vm2, %v833_v17 }
  0xbd   : > { %15768 = vmatmul.mubr.msk.bf16.gmra.mrb[8].mxu0 %vm929_vm2, %v833_v17  ;;  %17542 = vmatprep.mubr.msk.bf16.mxu1 %vm19893_vm1, %v25711_v1 }
  0xbe   : > { %1466 = vmatprep.mubr.bf16.mxu0 %v25713_v6 }
  0xc4   : > { %17543 = vmatmul.mubr.msk.bf16.gmra.mrb[72].mxu1 %vm929_vm2, %v834_v20 }
  0xc5   : > { %15769 = vmatmul.mubr.msk.bf16.gmra.mrb[12].mxu0 %vm929_vm2, %v834_v20  ;;  %17546 = vmatprep.mubr.msk.bf16.mxu1 %vm19893_vm1, %v25711_v1  ;;  %v819_v20 = vld [vmem:[%s20116_s7 + $0xd0] sm:$0xff] }
  0xc6   : > { %1476 = vmatprep.mubr.bf16.mxu0 %v25713_v6  ;;  %v844_v23 = vpack.c.bf16 %v820_v21, %v819_v20  ;;  %v1751_v20 = vld [vmem:[%s20116_s7 + $0x5a] sm:$0xff] }
  0xcc   : > { %17547 = vmatmul.mubr.msk.bf16.gmra.mrb[76].mxu1 %vm929_vm2, %v835_v26 }
  0xcd   : > { %15770 = vmatmul.mubr.msk.bf16.gmra.mrb[16].mxu0 %vm929_vm2, %v835_v26  ;;  %17550 = vmatprep.mubr.msk.bf16.mxu1 %vm19893_vm1, %v25711_v1 }
  0xce   : > { %1486 = vmatprep.mubr.bf16.mxu0 %v25713_v6 }
  0xd4   : > { %17551 = vmatmul.mubr.msk.bf16.gmra.mrb[80].mxu1 %vm929_vm2, %v836_v33 }
  0xd5   : > { %15771 = vmatmul.mubr.msk.bf16.gmra.mrb[20].mxu0 %vm929_vm2, %v836_v33  ;;  %17554 = vmatprep.mubr.msk.bf16.mxu1 %vm19893_vm1, %v25711_v1 }
  0xd6   : > { %1496 = vmatprep.mubr.bf16.mxu0 %v25713_v6 }
  0xdc   : > { %17555 = vmatmul.mubr.msk.bf16.gmra.mrb[84].mxu1 %vm929_vm2, %v837_v40 }
  0xdd   : > { %15772 = vmatmul.mubr.msk.bf16.gmra.mrb[24].mxu0 %vm929_vm2, %v837_v40  ;;  %17558 = vmatprep.mubr.msk.bf16.mxu1 %vm19893_vm1, %v25711_v1 }
  0xde   : > { %1506 = vmatprep.mubr.bf16.mxu0 %v25713_v6 }
  0xe4   : > { %17559 = vmatmul.mubr.msk.bf16.gmra.mrb[88].mxu1 %vm929_vm2, %v838_v47 }
  0xe5   : > { %15773 = vmatmul.mubr.msk.bf16.gmra.mrb[28].mxu0 %vm929_vm2, %v838_v47  ;;  %17562 = vmatprep.mubr.msk.bf16.mxu1 %vm19893_vm1, %v25711_v1 }
  0xe6   : > { %1516 = vmatprep.mubr.bf16.mxu0 %v25713_v6 }
  0xec   : > { %17563 = vmatmul.mubr.msk.bf16.gmra.mrb[92].mxu1 %vm929_vm2, %v839_v54 }
  0xed   : > { %15774 = vmatmul.mubr.msk.bf16.gmra.mrb[32].mxu0 %vm929_vm2, %v839_v54  ;;  %17566 = vmatprep.mubr.msk.bf16.mxu1 %vm19893_vm1, %v25711_v1 }
  0xee   : > { %1526 = vmatprep.mubr.bf16.mxu0 %v25713_v6 }
  0xf4   : > { %17567 = vmatmul.mubr.msk.bf16.gmra.mrb[96].mxu1 %vm929_vm2, %v840_v61 }
  0xf5   : > { %15775 = vmatmul.mubr.msk.bf16.gmra.mrb[36].mxu0 %vm929_vm2, %v840_v61  ;;  %17570 = vmatprep.mubr.msk.bf16.mxu1 %vm19893_vm1, %v25711_v1  ;;  %v1746_v61 = vld [vmem:[%s20116_s7 + $0x32] sm:$0xff] }
  0xf6   : > { %1536 = vmatprep.mubr.bf16.mxu0 %v25713_v6  ;;  %v1782_v0 = vpack.c.bf16 %v1747_v62, %v1746_v61  ;;  %v18973_v61 = vld [vmem:[%s25766_s5 + $0x314] ss:$16 sps:$4 sm:$0xff]   ;;  %v18985_v62 = vld [vmem:[%s25766_s5 + $0x29c] ss:$16 sps:$4 sm:$0xff]  }
  0xfc   : > { %17571 = vmatmul.mubr.msk.bf16.gmra.mrb[100].mxu1 %vm929_vm2, %v841_v5 }
  0xfd   : > { %15776 = vmatmul.mubr.msk.bf16.gmra.mrb[40].mxu0 %vm929_vm2, %v841_v5  ;;  %17574 = vmatprep.mubr.msk.bf16.mxu1 %vm19893_vm1, %v25711_v1  ;;  %v18956_v5 = vld [vmem:[%s25766_s5 + $0x290] ss:$16 sps:$4 sm:$0xff]  }
  0xfe   : > { %1546 = vmatprep.mubr.bf16.mxu0 %v25713_v6 }
 0x104   : > { %17575 = vmatmul.mubr.msk.bf16.gmra.mrb[104].mxu1 %vm929_vm2, %v842_v11 }
 0x105   : > { %15777 = vmatmul.mubr.msk.bf16.gmra.mrb[44].mxu0 %vm929_vm2, %v842_v11  ;;  %17578 = vmatprep.mubr.msk.bf16.mxu1 %vm19893_vm1, %v25711_v1  ;;  %v1783_v11 = vpack.c.bf16 %v1749_v9, %v1748_v8  ;;  %v18991_v9 = vld [vmem:[%s25766_s5 + $0x2bc] ss:$16 sps:$4 sm:$0xff]  }
 0x106   : > { %1556 = vmatprep.mubr.bf16.mxu0 %v25713_v6 }
 0x107   : > { %v20441_v15 = vpop.f32.mrb[0].mxu1 }
 0x108   : > { %v17468_v17 = vpop.f32.mrb[1].mxu1 }
 0x109   : > { %v20443_v18 = vpop.f32.mrb[2].mxu1  ;;  %v18961_v17 = vld [vmem:[%s25766_s5 + $0x2b4] ss:$16 sps:$4 sm:$0xff]  }
 0x10a   : > { %v17469_v19 = vpop.f32.mrb[3].mxu1 }
 0x10b   : > { %v1750_v19 = vld [vmem:[%s20116_s7 + $0x52] sm:$0xff] }
 0x10c   : > { %17579 = vmatmul.mubr.msk.bf16.gmra.mrb[108].mxu1 %vm929_vm2, %v843_v16 }
 0x10d   : > { %15778 = vmatmul.mubr.msk.bf16.gmra.mrb[48].mxu0 %vm929_vm2, %v843_v16  ;;  %17582 = vmatprep.mubr.msk.bf16.mxu1 %vm19893_vm1, %v25711_v1  ;;  %v18959_v16 = vld [vmem:[%s25766_s5 + $0x2b0] ss:$16 sps:$4 sm:$0xff]  }
 0x10e   : > { %1566 = vmatprep.mubr.bf16.mxu0 %v25713_v6 }
 0x10f   : > { %v20452_v22 = vpop.f32.mrb[4].mxu1 }
 0x110   : > { %v17472_v24 = vpop.f32.mrb[5].mxu1 }
 0x111   : > { %v20454_v25 = vpop.f32.mrb[6].mxu1 }
 0x112   : > { %v17473_v26 = vpop.f32.mrb[7].mxu1 }
 0x114   : > { %17583 = vmatmul.mubr.msk.bf16.gmra.mrb[112].mxu1 %vm929_vm2, %v844_v23 }
 0x115   : > { %15779 = vmatmul.mubr.msk.bf16.gmra.mrb[52].mxu0 %vm929_vm2, %v844_v23  ;;  %17586 = vmatprep.mubr.msk.bf16.mxu1 %vm19893_vm1, %v25711_v1  ;;  %v1784_v23 = vpack.c.bf16 %v1751_v20, %v1750_v19  ;;  %v18994_v19 = vld [vmem:[%s25766_s5 + $0x2dc] ss:$16 sps:$4 sm:$0xff]   ;;  %v1758_v20 = vld [vmem:[%s20116_s7 + $0x92] sm:$0xff] }
 0x116   : > { %1576 = vmatprep.mubr.bf16.mxu0 %v25713_v6 }
 0x117   : > { %v20463_v29 = vpop.f32.mrb[8].mxu1 }
 0x118   : > { %v17476_v31 = vpop.f32.mrb[9].mxu1 }
 0x119   : > { %v20465_v32 = vpop.f32.mrb[10].mxu1  ;;  %v1752_v31 = vld [vmem:[%s20116_s7 + $0x62] sm:$0xff] }
 0x11a   : > { %v17477_v33 = vpop.f32.mrb[11].mxu1 }
 0x11b   : > { %v1753_v33 = vld [vmem:[%s20116_s7 + $0x6a] sm:$0xff] }
 0x11c   : > { %17587 = vmatmul.mubr.msk.bf16.gmra.mrb[116].mxu1 %vm929_vm2, %v845_v30  ;;  %v1785_v35 = vpack.c.bf16 %v1753_v33, %v1752_v31  ;;  %v19000_v31 = vld [vmem:[%s25766_s5 + $0x2fc] ss:$16 sps:$4 sm:$0xff]  }
 0x11d   : > { %15780 = vmatmul.mubr.msk.bf16.gmra.mrb[56].mxu0 %vm929_vm2, %v845_v30  ;;  %17594 = vmatprep.mubr.msk.bf16.mxu1 %vm19893_vm1, %v25711_v1  ;;  %v18964_v30 = vld [vmem:[%s25766_s5 + $0x2d4] ss:$16 sps:$4 sm:$0xff]  }
 0x11e   : > { %1909 = vmatprep.mubr.bf16.mxu0 %v25713_v6 }
 0x11f   : > { %v20474_v36 = vpop.f32.mrb[12].mxu1 }
 0x120   : > { %v17480_v38 = vpop.f32.mrb[13].mxu1 }
 0x121   : > { %v20476_v39 = vpop.f32.mrb[14].mxu1  ;;  %v18970_v38 = vld [vmem:[%s25766_s5 + $0x23c] ss:$16 sps:$4 sm:$0xff]  }
 0x122   : > { %v17481_v40 = vpop.f32.mrb[15].mxu1  ;;  %4590 = vmatprep.subr.bf16.mxu1 %v18970_v38  ;;  %v18988_v38 = vld [vmem:[%s25766_s5 + $0x354] ss:$16 sps:$4 sm:$0xff]  }
 0x124   : > { %17595 = vmatmul.mubr.msk.bf16.vlgmr.msra.gmra.mrb[120].mxu1 %vm929_vm2, %v1779_v37 }
 0x125   : > { %15811 = vmatmul.mubr.msk.bf16.vlgmr.msra.gmra.mrb[0].mxu0 %vm929_vm2, %v1779_v37  ;;  %17598 = vmatprep.mubr.msk.bf16.mxu1 %vm19893_vm1, %v25711_v1 }
 0x126   : > { %1919 = vmatprep.mubr.bf16.mxu0 %v25713_v6  ;;  %4225 = vmatpush1.bf16.msra.mxu0 %v18947_v41  ;;  %v18968_v41 = vld [vmem:[%s25766_s5 + $0x238] ss:$16 sps:$4 sm:$0xff]  }
 0x127   : > { %v20491_v45 = vpop.f32.mrb[16].mxu1  ;;  %4226 = vmatprep.subr.bf16.mxu0 %v18952_v51  ;;  %4591 = vmatpush1.bf16.msra.mxu1 %v18968_v41  ;;  %v18986_v41 = vld [vmem:[%s25766_s5 + $0x350] ss:$16 sps:$4 sm:$0xff]  }
 0x128   : > { %v17484_v47 = vpop.f32.mrb[17].mxu1 }
 0x129   : > { %v20493_v48 = vpop.f32.mrb[18].mxu1  ;;  %v1755_v47 = vld [vmem:[%s20116_s7 + $0x7a] sm:$0xff] }
 0x12a   : > { %v17485_v49 = vpop.f32.mrb[19].mxu1  ;;  %4227 = vmatpush1.bf16.msra.mxu0 %v18950_v50  ;;  %v18974_v50 = vld [vmem:[%s25766_s5 + $0x258] ss:$16 sps:$4 sm:$0xff]  }
 0x12b   : > { %4228 = vmatprep.subr.bf16.mxu0 %v18955_v60  ;;  %v18976_v49 = vld [vmem:[%s25766_s5 + $0x25c] ss:$16 sps:$4 sm:$0xff]   ;;  %v18971_v60 = vld [vmem:[%s25766_s5 + $0x310] ss:$16 sps:$4 sm:$0xff]  }
 0x12c   : > { %17599 = vmatmul.mubr.msk.bf16.gmra.mrb[124].mxu1 %vm929_vm2, %v1780_v46  ;;  %4592 = vmatprep.subr.bf16.mxu1 %v18976_v49 }
 0x12d   : > { %15812 = vmatmul.mubr.msk.bf16.gmra.mrb[4].mxu0 %vm929_vm2, %v1780_v46  ;;  %17602 = vmatprep.mubr.msk.bf16.mxu1 %vm19893_vm1, %v25711_v1  ;;  %v1754_v46 = vld [vmem:[%s20116_s7 + $0x72] sm:$0xff] }
 0x12e   : > { %1929 = vmatprep.mubr.bf16.mxu0 %v25713_v6  ;;  %4229 = vmatpush1.bf16.msra.mxu0 %v18953_v59  ;;  %v1786_v52 = vpack.c.bf16 %v1755_v47, %v1754_v46  ;;  %v19001_v46 = vld [vmem:[%s25766_s5 + $0x318] ss:$16 sps:$4 sm:$0xff]  }
 0x12f   : > { %v20508_v54 = vpop.f32.mrb[20].mxu1  ;;  %4230 = vmatprep.subr.bf16.mxu0 %v18958_v7  ;;  %4593 = vmatpush1.bf16.msra.mxu1 %v18974_v50 }
 0x130   : > { %v17488_v56 = vpop.f32.mrb[21].mxu1 }
 0x131   : > { %v20510_v57 = vpop.f32.mrb[22].mxu1 }
 0x132   : > { %v17489_v58 = vpop.f32.mrb[23].mxu1  ;;  %4231 = vmatpush1.bf16.msra.mxu0 %v18956_v5 }
 0x133   : > { %4232 = vmatprep.subr.bf16.mxu0 %v18961_v17  ;;  %v18980_v58 = vld [vmem:[%s25766_s5 + $0x278] ss:$16 sps:$4 sm:$0xff]   ;;  %v18977_v17 = vld [vmem:[%s25766_s5 + $0x330] ss:$16 sps:$4 sm:$0xff]  }
 0x134   : > { %17603 = vmatmul.mubr.msk.bf16.gmra.mrb[128].mxu1 %vm929_vm2, %v1781_v55 }
 0x135   : > { %15813 = vmatmul.mubr.msk.bf16.gmra.mrb[8].mxu0 %vm929_vm2, %v1781_v55  ;;  %17606 = vmatprep.mubr.msk.bf16.mxu1 %vm19893_vm1, %v25711_v1  ;;  %v18982_v55 = vld [vmem:[%s25766_s5 + $0x27c] ss:$16 sps:$4 sm:$0xff]  }
 0x136   : > { %1939 = vmatprep.mubr.bf16.mxu0 %v25713_v6  ;;  %4233 = vmatpush1.bf16.msra.mxu0 %v18959_v16  ;;  %v18979_v16 = vld [vmem:[%s25766_s5 + $0x334] ss:$16 sps:$4 sm:$0xff]  }
 0x137   : > { %v20525_v63 = vpop.f32.mrb[24].mxu1  ;;  %4234 = vmatprep.subr.bf16.mxu0 %v18964_v30  ;;  %4594 = vmatprep.subr.bf16.mxu1 %v18982_v55  ;;  %v19007_v55 = vld [vmem:[%s25766_s5 + $0x338] ss:$16 sps:$4 sm:$0xff]  }
 0x138   : > { %v17492_v2 = vpop.f32.mrb[25].mxu1  ;;  %4595 = vmatpush1.bf16.msra.mxu1 %v18980_v58 }
 0x139   : > { %v20527_v3 = vpop.f32.mrb[26].mxu1  ;;  %v1757_v2 = vld [vmem:[%s20116_s7 + $0x8a] sm:$0xff]  ;;  %4596 = vmatprep.subr.bf16.mxu1 %v18985_v62  ;;  %v1762_v62 = vld [vmem:[%s20116_s7 + $0xb2] sm:$0xff] }
 0x13a   : > { %v17493_v4 = vpop.f32.mrb[27].mxu1  ;;  %4235 = vmatpush1.bf16.msra.mxu0 %v18962_v28 }
 0x13b   : > { %4236 = vmatprep.subr.bf16.mxu0 %v18967_v44  ;;  %v18983_v4 = vld [vmem:[%s25766_s5 + $0x298] ss:$16 sps:$4 sm:$0xff]  }
 0x13c   : > { %17607 = vmatmul.mubr.msk.bf16.gmra.mrb[132].mxu1 %vm929_vm2, %v1782_v0  ;;  %v1761_v44 = vld [vmem:[%s20116_s7 + $0xaa] sm:$0xff] }
 0x13d   : > { %15814 = vmatmul.mubr.msk.bf16.gmra.mrb[12].mxu0 %vm929_vm2, %v1782_v0  ;;  %17610 = vmatprep.mubr.msk.bf16.mxu1 %vm19893_vm1, %v25711_v1  ;;  %v1756_v0 = vld [vmem:[%s20116_s7 + $0x82] sm:$0xff] }
 0x13e   : > { %1949 = vmatprep.mubr.bf16.mxu0 %v25713_v6  ;;  %4237 = vmatpush1.bf16.msra.mxu0 %v18965_v43  ;;  %v1787_v7 = vpack.c.bf16 %v1757_v2, %v1756_v0  ;;  %v1760_v43 = vld [vmem:[%s20116_s7 + $0xa2] sm:$0xff]  ;;  %v1763_v0 = vld [vmem:[%s20116_s7 + $0xba] sm:$0xff] }
 0x13f   : > { %v20542_v10 = vpop.f32.mrb[28].mxu1  ;;  %4238 = vmatprep.subr.bf16.mxu0 %v18973_v61  ;;  %4597 = vmatpush1.bf16.msra.mxu1 %v18983_v4  ;;  %v1789_v49 = vpack.c.bf16 %v1761_v44, %v1760_v43  ;;  %v19012_v61 = vld [vmem:[%s25766_s5 + $0x35c] ss:$16 sps:$4 sm:$0xff]   ;;  %v19010_v2 = vld [vmem:[%s25766_s5 + $0x358] ss:$16 sps:$4 sm:$0xff]  }
 0x140   : > { %v17496_v12 = vpop.f32.mrb[29].mxu1  ;;  %4598 = vmatprep.subr.bf16.mxu1 %v18991_v9  ;;  %v19027_v43 = vld [vmem:[%s25766_s5 + $0x3bc] ss:$16 sps:$4 sm:$0xff]  }
 0x141   : > { %v20544_v13 = vpop.f32.mrb[30].mxu1  ;;  %v18989_v12 = vld [vmem:[%s25766_s5 + $0x2b8] ss:$16 sps:$4 sm:$0xff]  }
 0x142   : > { %v17497_v14 = vpop.f32.mrb[31].mxu1  ;;  %4239 = vmatpush1.bf16.msra.mxu0 %v18971_v60  ;;  %v18995_v60 = vld [vmem:[%s25766_s5 + $0x370] ss:$16 sps:$4 sm:$0xff]  }
 0x143   : > { %4599 = vmatpush1.bf16.msra.mxu1 %v18989_v12  ;;  %4240 = vmatprep.subr.bf16.mxu0 %v18979_v16  ;;  %v19018_v12 = vld [vmem:[%s25766_s5 + $0x37c] ss:$16 sps:$4 sm:$0xff]   ;;  %v19016_v16 = vld [vmem:[%s25766_s5 + $0x378] ss:$16 sps:$4 sm:$0xff]  }
 0x144   : > { %17611 = vmatmul.mubr.msk.bf16.gmra.mrb[136].mxu1 %vm929_vm2, %v1783_v11  ;;  %4600 = vmatprep.subr.bf16.mxu1 %v18994_v19  ;;  %v19006_v19 = vld [vmem:[%s25766_s5 + $0x394] ss:$16 sps:$4 sm:$0xff]  }
 0x145   : > { %15815 = vmatmul.mubr.msk.bf16.gmra.mrb[16].mxu0 %vm929_vm2, %v1783_v11  ;;  %17614 = vmatprep.mubr.msk.bf16.mxu1 %vm19893_vm1, %v25711_v1 }
 0x146   : > { %1959 = vmatprep.mubr.bf16.mxu0 %v25713_v6  ;;  %4241 = vmatpush1.bf16.msra.mxu0 %v18977_v17  ;;  %v1764_v17 = vld [vmem:[%s20116_s7 + $0xc2] sm:$0xff] }
 0x147   : > { %v20559_v21 = vpop.f32.mrb[32].mxu1  ;;  %4242 = vmatprep.subr.bf16.mxu0 %v18988_v38  ;;  %v19015_v38 = vld [vmem:[%s25766_s5 + $0x3b4] ss:$16 sps:$4 sm:$0xff]  }
 0x148   : > { %v17500_v24 = vpop.f32.mrb[33].mxu1 }
 0x149   : > { %v20561_v26 = vpop.f32.mrb[34].mxu1  ;;  %v18992_v24 = vld [vmem:[%s25766_s5 + $0x2d8] ss:$16 sps:$4 sm:$0xff]  }
 0x14a   : > { %v17501_v27 = vpop.f32.mrb[35].mxu1  ;;  %4601 = vmatpush1.bf16.msra.mxu1 %v18992_v24  ;;  %4243 = vmatpush1.bf16.msra.mxu0 %v18986_v41  ;;  %v19021_v24 = vld [vmem:[%s25766_s5 + $0x39c] ss:$16 sps:$4 sm:$0xff]  }
 0x14b   : > { %4602 = vmatprep.subr.bf16.mxu1 %v19000_v31 }
 0x14c   : > { %17615 = vmatmul.mubr.msk.bf16.gmra.mrb[140].mxu1 %vm929_vm2, %v1784_v23 }
 0x14d   : > { %15816 = vmatmul.mubr.msk.bf16.gmra.mrb[20].mxu0 %vm929_vm2, %v1784_v23  ;;  %17618 = vmatprep.mubr.msk.bf16.mxu1 %vm19893_vm1, %v25711_v1  ;;  %v1759_v23 = vld [vmem:[%s20116_s7 + $0x9a] sm:$0xff] }
 0x14e   : > { %1969 = vmatprep.mubr.bf16.mxu0 %v25713_v6  ;;  %v1788_v28 = vpack.c.bf16 %v1759_v23, %v1758_v20  ;;  %v1765_v20 = vld [vmem:[%s20116_s7 + $0xca] sm:$0xff] }
 0x14f   : > { %v20576_v34 = vpop.f32.mrb[36].mxu1  ;;  %v19004_v23 = vld [vmem:[%s25766_s5 + $0x390] ss:$16 sps:$4 sm:$0xff]  }
 0x150   : > { %v17504_v37 = vpop.f32.mrb[37].mxu1 }
 0x151   : > { %v20581_v40 = vpop.f32.mrb[38].mxu1 }
 0x152   : > { %v17505_v42 = vpop.f32.mrb[39].mxu1 }
 0x153   : > { %v19003_v42 = vld [vmem:[%s25766_s5 + $0x31c] ss:$16 sps:$4 sm:$0xff]  }
 0x154   : > { %17619 = vmatmul.mubr.msk.bf16.gmra.mrb[144].mxu1 %vm929_vm2, %v1785_v35 }
 0x155   : > { %15817 = vmatmul.mubr.msk.bf16.gmra.mrb[24].mxu0 %vm929_vm2, %v1785_v35  ;;  %17622 = vmatprep.mubr.msk.bf16.mxu1 %vm19893_vm1, %v25711_v1  ;;  %v18998_v35 = vld [vmem:[%s25766_s5 + $0x2f8] ss:$16 sps:$4 sm:$0xff]  }
 0x156   : > { %1979 = vmatprep.mubr.bf16.mxu0 %v25713_v6  ;;  %4603 = vmatpush1.bf16.msra.mxu1 %v18998_v35 }
 0x157   : > { %v20605_v51 = vpop.f32.mrb[40].mxu1  ;;  %4604 = vmatprep.subr.bf16.mxu1 %v19003_v42  ;;  %v19013_v42 = vld [vmem:[%s25766_s5 + $0x3b0] ss:$16 sps:$4 sm:$0xff]  }
 0x158   : > { %v17508_v53 = vpop.f32.mrb[41].mxu1 }
 0x159   : > { %v20610_v56 = vpop.f32.mrb[42].mxu1 }
 0x15a   : > { %v17509_v59 = vpop.f32.mrb[43].mxu1  ;;  %4605 = vmatpush1.bf16.msra.mxu1 %v19001_v46  ;;  %v19025_v46 = vld [vmem:[%s25766_s5 + $0x3b8] ss:$16 sps:$4 sm:$0xff]  }
 0x15b   : > { %v18997_v59 = vld [vmem:[%s25766_s5 + $0x374] ss:$16 sps:$4 sm:$0xff]  }
 0x15c   : > { %17623 = vmatmul.mubr.msk.bf16.gmra.mrb[148].mxu1 %vm929_vm2, %v1786_v52  ;;  %4244 = vmatprep.subr.bf16.mxu0 %v18997_v59 }
 0x15d   : > { %15818 = vmatmul.mubr.msk.bf16.gmra.mrb[28].mxu0 %vm929_vm2, %v1786_v52  ;;  %17626 = vmatprep.mubr.msk.bf16.mxu1 %vm19893_vm1, %v25711_v1  ;;  %v19009_v52 = vld [vmem:[%s25766_s5 + $0x33c] ss:$16 sps:$4 sm:$0xff]  }
 0x15e   : > { %1989 = vmatprep.mubr.bf16.mxu0 %v25713_v6  ;;  %4606 = vmatprep.subr.bf16.mxu1 %v19009_v52  ;;  %v19030_v52 = vld [vmem:[%s25766_s5 + $0x3dc] ss:$16 sps:$4 sm:$0xff]  }
 0x15f   : > { %v20634_v5 = vpop.f32.mrb[44].mxu1  ;;  %4607 = vmatpush1.bf16.msra.mxu1 %v19007_v55  ;;  %4245 = vmatpush1.bf16.msra.mxu0 %v18995_v60  ;;  %v19022_v55 = vld [vmem:[%s25766_s5 + $0x3d0] ss:$16 sps:$4 sm:$0xff]  }
 0x160   : > { %v17512_v8 = vpop.f32.mrb[45].mxu1  ;;  %4608 = vmatprep.subr.bf16.mxu1 %v19012_v61  ;;  %4246 = vmatprep.subr.bf16.mxu0 %v19006_v19  ;;  %v19042_v19 = vld [vmem:[%s25766_s5 + $0x41c] ss:$16 sps:$4 sm:$0xff]  }
 0x161   : > { %v20639_v11 = vpop.f32.mrb[46].mxu1  ;;  %v1790_v8 = vpack.c.bf16 %v1763_v0, %v1762_v62 }
 0x162   : > { %v17513_v14 = vpop.f32.mrb[47].mxu1 }
 0x163   : > { %4609 = vmatpush1.bf16.msra.mxu1 %v19010_v2  ;;  %4247 = vmatpush1.bf16.msra.mxu0 %v19004_v23  ;;  %v19033_v2 = vld [vmem:[%s25766_s5 + $0x3f4] ss:$16 sps:$4 sm:$0xff]   ;;  %v19040_v23 = vld [vmem:[%s25766_s5 + $0x418] ss:$16 sps:$4 sm:$0xff]  }
 0x164   : > { %17627 = vmatmul.mubr.msk.bf16.gmra.mrb[152].mxu1 %vm929_vm2, %v1787_v7  ;;  %4610 = vmatprep.subr.bf16.mxu1 %v19018_v12 }
 0x165   : > { %15819 = vmatmul.mubr.msk.bf16.gmra.mrb[32].mxu0 %vm929_vm2, %v1787_v7  ;;  %17630 = vmatprep.mubr.msk.bf16.mxu1 %vm19893_vm1, %v25711_v1 }
 0x166   : > { %1999 = vmatprep.mubr.bf16.mxu0 %v25713_v6  ;;  %4248 = vmatprep.subr.bf16.mxu0 %v19015_v38 }
 0x167   : > { %v20663_v27 = vpop.f32.mrb[48].mxu1  ;;  %4611 = vmatpush1.bf16.msra.mxu1 %v19016_v16  ;;  %4249 = vmatpush1.bf16.msra.mxu0 %v19013_v42  ;;  %v1768_v16 = vld [vmem:[%s20116_s7 + $0xe2] sm:$0xff] }
 0x168   : > { %v17516_v30 = vpop.f32.mrb[49].mxu1  ;;  %4612 = vmatprep.subr.bf16.mxu1 %v19021_v24 }
 0x169   : > { %v20668_v33 = vpop.f32.mrb[50].mxu1 }
 0x16a   : > { %v17517_v37 = vpop.f32.mrb[51].mxu1 }
 0x16b   : > { %v1791_v37 = vpack.c.bf16 %v1765_v20, %v1764_v17  ;;  %v19039_v17 = vld [vmem:[%s25766_s5 + $0x414] ss:$16 sps:$4 sm:$0xff]   ;;  %v19037_v20 = vld [vmem:[%s25766_s5 + $0x410] ss:$16 sps:$4 sm:$0xff]  }
 0x16c   : > { %17631 = vmatmul.mubr.msk.bf16.gmra.mrb[156].mxu1 %vm929_vm2, %v1788_v28 }
 0x16d   : > { %15820 = vmatmul.mubr.msk.bf16.gmra.mrb[36].mxu0 %vm929_vm2, %v1788_v28  ;;  %17634 = vmatprep.mubr.msk.bf16.mxu1 %vm19893_vm1, %v25711_v1  ;;  %v19019_v28 = vld [vmem:[%s25766_s5 + $0x398] ss:$16 sps:$4 sm:$0xff]  }
 0x16e   : > { %2009 = vmatprep.mubr.bf16.mxu0 %v25713_v6  ;;  %4613 = vmatpush1.bf16.msra.mxu1 %v19019_v28 }
 0x16f   : > { %v20692_v47 = vpop.f32.mrb[52].mxu1  ;;  %4614 = vmatprep.subr.bf16.mxu1 %v19027_v43 }
 0x170   : > { %v17520_v50 = vpop.f32.mrb[53].mxu1 }
 0x171   : > { %v20697_v53 = vpop.f32.mrb[54].mxu1  ;;  %v19024_v50 = vld [vmem:[%s25766_s5 + $0x3d4] ss:$16 sps:$4 sm:$0xff]  }
 0x172   : > { %v17521_v58 = vpop.f32.mrb[55].mxu1  ;;  %4615 = vmatpush1.bf16.msra.mxu1 %v19025_v46  ;;  %4250 = vmatprep.subr.bf16.mxu0 %v19024_v50 }
 0x173   : > { %v19028_v58 = vld [vmem:[%s25766_s5 + $0x3d8] ss:$16 sps:$4 sm:$0xff]   ;;  %4616 = vmatprep.subr.bf16.mxu1 %v19030_v52  ;;  %4251 = vmatpush1.bf16.msra.mxu0 %v19022_v55 }
 0x174   : > { %17635 = vmatmul.mubr.msk.bf16.gmra.mrb[160].mxu1 %vm929_vm2, %v1789_v49  ;;  %4252 = vmatprep.subr.bf16.mxu0 %v19033_v2 }
 0x175   : > { %15821 = vmatmul.mubr.msk.bf16.gmra.mrb[40].mxu0 %vm929_vm2, %v1789_v49  ;;  %17638 = vmatprep.mubr.msk.bf16.mxu1 %vm19893_vm1, %v25711_v1  ;;  %v1766_v49 = vld [vmem:[%s20116_s7 + $0xd2] sm:$0xff] }
 0x176   : > { %2019 = vmatprep.mubr.bf16.mxu0 %v25713_v6  ;;  %4617 = vmatpush1.bf16.msra.mxu1 %v19028_v58 }
 0x177   : > { %v20721_v4 = vpop.f32.mrb[56].mxu1 }
 0x178   : > { %v17524_v7 = vpop.f32.mrb[57].mxu1 }
 0x179   : > { %v20723_v9 = vpop.f32.mrb[58].mxu1  ;;  %v19036_v7 = vld [vmem:[%s25766_s5 + $0x3fc] ss:$16 sps:$4 sm:$0xff]  }
 0x17a   : > { %v17525_v14 = vpop.f32.mrb[59].mxu1  ;;  %4618 = vmatprep.subr.bf16.mxu1 %v19036_v7 }
 0x17b   : > { %v19034_v14 = vld [vmem:[%s25766_s5 + $0x3f8] ss:$16 sps:$4 sm:$0xff]  }
 0x17c   : > { %17639 = vmatmul.mubr.msk.bf16.gmra.mrb[164].mxu1 %vm929_vm2, %v1790_v8 }
 0x17d   : > { %15822 = vmatmul.mubr.msk.bf16.gmra.mrb[44].mxu0 %vm929_vm2, %v1790_v8  ;;  %17642 = vmatprep.mubr.msk.bf16.mxu1 %vm19893_vm1, %v25711_v1 }
 0x17e   : > { %2029 = vmatprep.mubr.bf16.mxu0 %v25713_v6  ;;  %4619 = vmatpush1.bf16.msra.mxu1 %v19034_v14 }
 0x17f   : > { %v1621_v30 = vpop.f32.mrb[60].mxu1  ;;  %4620 = vmatprep.subr.bf16.mxu1 %v19042_v19 }
 0x180   : > { %v20751_v31 = vadd.f32 %v1621_v30, %v20441_v15  ;;  %v17532_v35 = vpop.f32.mrb[61].mxu1 }
 0x181   : > { %v1624_v41 = vpop.f32.mrb[62].mxu1 }
 0x182   : > { %v20763_v15 = vadd.f32 %v1624_v41, %v20443_v18  ;;  %v17533_v44 = vpop.f32.mrb[63].mxu1  ;;  %v1767_v18 = vld [vmem:[%s20116_s7 + $0xda] sm:$0xff]  ;;  %4621 = vmatpush1.bf16.msra.mxu1 %v19040_v23 }
 0x183   : > { %v1792_v62 = vpack.c.bf16 %v1767_v18, %v1766_v49 }
 0x184   : > { %17643 = vmatmul.mubr.msk.bf16.gmra.mrb[168].mxu1 %vm929_vm2, %v1791_v37 }
 0x185   : > { %15823 = vmatmul.mubr.msk.bf16.gmra.mrb[48].mxu0 %vm929_vm2, %v1791_v37  ;;  %17646 = vmatprep.mubr.msk.bf16.mxu1 %vm19893_vm1, %v25711_v1 }
 0x186   : > { %2039 = vmatprep.mubr.bf16.mxu0 %v25713_v6 }
 0x187   : > { %v1629_v59 = vpop.f32.mrb[64].mxu1 }
 0x188   : > { %v20788_v60 = vadd.f32 %v1629_v59, %v20452_v22  ;;  %v17536_v61 = vpop.f32.mrb[65].mxu1  ;;  %v19031_v22 = vld [vmem:[%s25766_s5 + $0x3f0] ss:$16 sps:$4 sm:$0xff]  }
 0x189   : > { %v1632_v0 = vpop.f32.mrb[66].mxu1  ;;  %4253 = vmatpush1.bf16.msra.mxu0 %v19031_v22 }
 0x18a   : > { %v20797_v8 = vadd.f32 %v1632_v0, %v20454_v25  ;;  %v17537_v12 = vpop.f32.mrb[67].mxu1  ;;  %v1769_v25 = vld [vmem:[%s20116_s7 + $0xea] sm:$0x3f]  ;;  %4254 = vmatprep.subr.bf16.mxu0 %v19039_v17  ;;  %s25787_s7 = sld [smem:[#allocation32_spill]] }
 0x18b   : > { %v1793_v35 = vpack.c.bf16 %v1769_v25, %v1768_v16 }
 0x18c   : > { %17647 = vmatmul.mubr.msk.bf16.gmra.mrb[172].mxu1 %vm929_vm2, %v1792_v62 }
 0x18d   : > { %15824 = vmatmul.mubr.msk.bf16.gmra.mrb[52].mxu0 %vm929_vm2, %v1792_v62  ;;  %17650 = vmatprep.mubr.msk.bf16.mxu1 %vm19893_vm1, %v25711_v1 }
 0x18e   : > { %2049 = vmatprep.mubr.bf16.mxu0 %v25713_v6  ;;  %4255 = vmatpush1.bf16.msra.mxu0 %v19037_v20 }
 0x18f   : > { %v1637_v24 = vpop.f32.mrb[68].mxu1 }
 0x190   : > { %v20825_v28 = vadd.f32 %v1637_v24, %v20463_v29  ;;  %v17540_v30 = vpop.f32.mrb[69].mxu1 }
 0x191   : > { %v1640_v37 = vpop.f32.mrb[70].mxu1 }
 0x192   : > { %v20828_v38 = vadd.f32 %v1640_v37, %v20465_v32  ;;  %v17541_v41 = vpop.f32.mrb[71].mxu1 }
 0x194   : > { %17651 = vmatmul.mubr.msk.bf16.gmra.mrb[176].mxu1 %vm929_vm2, %v1793_v35 }
 0x195   : > { %15825 = vmatmul.mubr.msk.bf16.gmra.mrb[56].mxu0 %vm929_vm2, %v1793_v35  ;;  %vm12221_vm2 = vcmask 553984  }
 0x197   : > { %v1645_v42 = vpop.f32.mrb[72].mxu1 }
 0x198   : > { %v20833_v43 = vadd.f32 %v1645_v42, %v20474_v36  ;;  %v17544_v44 = vpop.f32.mrb[73].mxu1  ;;  %v19045_v36 = vld [vmem:[%s25766_s5 + $0x434] ss:$16 sps:$4 sm:$0xff]  }
 0x199   : > { %v1648_v29 = vpop.f32.mrb[74].mxu1  ;;  %4407 = vmatprep.subr.bf16.mxu0 %v19045_v36 }
 0x19a   : > { %v20836_v46 = vadd.f32 %v1648_v29, %v20476_v39  ;;  %v17545_v49 = vpop.f32.mrb[75].mxu1 }
 0x19f   : > { %v1653_v18 = vpop.f32.mrb[76].mxu1 }
 0x1a0   : > { %v20839_v32 = vadd.f32 %v1653_v18, %v20491_v45  ;;  %v17548_v50 = vpop.f32.mrb[77].mxu1 }
 0x1a1   : > { %v1656_v52 = vpop.f32.mrb[78].mxu1 }
 0x1a2   : > { %v20842_v55 = vadd.f32 %v1656_v52, %v20493_v48  ;;  %v17549_v58 = vpop.f32.mrb[79].mxu1 }
 0x1a7   : > { %v1661_v59 = vpop.f32.mrb[80].mxu1 }
 0x1a8   : > { %v20848_v39 = vadd.f32 %v1661_v59, %v20508_v54  ;;  %v17552_v61 = vpop.f32.mrb[81].mxu1 }
 0x1a9   : > { %v1664_v62 = vpop.f32.mrb[82].mxu1 }
 0x1aa   : > { %v20851_v45 = vadd.f32 %v1664_v62, %v20510_v57  ;;  %v17553_v0 = vpop.f32.mrb[83].mxu1 }
 0x1af   : > { %v1669_v2 = vpop.f32.mrb[84].mxu1 }
 0x1b0   : > { %v20854_v48 = vadd.f32 %v1669_v2, %v20525_v63  ;;  %v17556_v7 = vpop.f32.mrb[85].mxu1 }
 0x1b1   : > { %v1672_v12 = vpop.f32.mrb[86].mxu1 }
 0x1b2   : > { %v20857_v22 = vadd.f32 %v1672_v12, %v20527_v3  ;;  %v17557_v14 = vpop.f32.mrb[87].mxu1  ;;  %v2305_v12 = vlaneseq }
 0x1b4   : > { %vm3133_vm3 = vcmp.lt.s32.totalorder %v2305_v12, 280 }
 0x1b5   : > { %3135 = vst.msk [vmem:[#allocation2] ss:$8 sm:$0x7] %vm3133_vm3, %v25711_v1  ;;  %3138 = vst.msk [vmem:[#allocation2 + $0x2bf] ss:$8 sm:$0x7] %vm3133_vm3, %v25711_v1 }
 0x1b6   : > { %vm14232_vm3 = vcmask 261120  }
 0x1b7   : > { %v1677_v16 = vpop.f32.mrb[88].mxu1 }
 0x1b8   : > { %v20860_v54 = vadd.f32 %v1677_v16, %v20542_v10  ;;  %v17560_v25 = vpop.f32.mrb[89].mxu1 }
 0x1b9   : > { %v1680_v17 = vpop.f32.mrb[90].mxu1  ;;  %v20901_v25 = vshrl.u32 %v2305_v12, 7  ;;  %v20943_v12 = vld [vmem:[%s25766_s5 + $0x450] sm:$0xff] }
 0x1ba   : > { %v20863_v57 = vadd.f32 %v1680_v17, %v20544_v13  ;;  %v17561_v19 = vpop.f32.mrb[91].mxu1 }
 0x1bb   : > { %25767 = vst [vmem:[#allocation15_spill] sm:$0xff] %v20901_v25  ;;  %v20907_v19 = vsub.s32 0, %v20901_v25 }
 0x1bd   : > { %25768 = vst [vmem:[#allocation16_spill] sm:$0xff] %v20907_v19 }
 0x1bf   : > { %v1685_v20 = vpop.f32.mrb[92].mxu1 }
 0x1c0   : > { %v20866_v63 = vadd.f32 %v1685_v20, %v20559_v21  ;;  %v17564_v23 = vpop.f32.mrb[93].mxu1 }
 0x1c1   : > { %v1688_v24 = vpop.f32.mrb[94].mxu1  ;;  %v20913_v23 = vsub.s32 1, %v20901_v25 }
 0x1c2   : > { %v20869_v3 = vadd.f32 %v1688_v24, %v20561_v26  ;;  %v17565_v30 = vpop.f32.mrb[95].mxu1 }
 0x1c3   : > { %25770 = vst [vmem:[#allocation17_spill] sm:$0xff] %v20913_v23  ;;  %v20919_v30 = vsub.s32 2, %v20901_v25 }
 0x1c5   : > { %25771 = vst [vmem:[#allocation18_spill] sm:$0xff] %v20919_v30 }
 0x1c7   : > { %v1693_v35 = vpop.f32.mrb[96].mxu1 }
 0x1c8   : > { %v20872_v10 = vadd.f32 %v1693_v35, %v20576_v34  ;;  %v17568_v37 = vpop.f32.mrb[97].mxu1  ;;  %v2443_v35 = vpop.permute.xlu0 %2442 }
 0x1c9   : > { %v1696_v41 = vpop.f32.mrb[98].mxu1 }
 0x1ca   : > { %v20875_v13 = vadd.f32 %v1696_v41, %v20581_v40  ;;  %v17569_v42 = vpop.f32.mrb[99].mxu1 }
 0x1cf   : > { %v1701_v44 = vpop.f32.mrb[100].mxu1 }
 0x1d0   : > { %v20878_v21 = vadd.f32 %v1701_v44, %v20605_v51  ;;  %v17572_v29 = vpop.f32.mrb[101].mxu1 }
 0x1d1   : > { %v1704_v49 = vpop.f32.mrb[102].mxu1 }
 0x1d2   : > { %v20881_v26 = vadd.f32 %v1704_v49, %v20610_v56  ;;  %v17573_v18 = vpop.f32.mrb[103].mxu1 }
 0x1d7   : > { %v1709_v50 = vpop.f32.mrb[104].mxu1 }
 0x1d8   : > { %v20884_v34 = vadd.f32 %v1709_v50, %v20634_v5  ;;  %v17576_v52 = vpop.f32.mrb[105].mxu1 }
 0x1d9   : > { %v1712_v58 = vpop.f32.mrb[106].mxu1 }
 0x1da   : > { %v20887_v40 = vadd.f32 %v1712_v58, %v20639_v11  ;;  %v17577_v36 = vpop.f32.mrb[107].mxu1 }
 0x1df   : > { %v1717_v59 = vpop.f32.mrb[108].mxu1 }
 0x1e0   : > { %v20890_v51 = vadd.f32 %v1717_v59, %v20663_v27  ;;  %v17580_v61 = vpop.f32.mrb[109].mxu1 }
 0x1e1   : > { %v1720_v62 = vpop.f32.mrb[110].mxu1 }
 0x1e2   : > { %v20893_v56 = vadd.f32 %v1720_v62, %v20668_v33  ;;  %v17581_v0 = vpop.f32.mrb[111].mxu1 }
 0x1e7   : > { %v1725_v2 = vpop.f32.mrb[112].mxu1 }
 0x1e8   : > { %v20896_v5 = vadd.f32 %v1725_v2, %v20692_v47  ;;  %v17584_v7 = vpop.f32.mrb[113].mxu1  ;;  %v2303_v47 = vld [vmem:[%s25769_s0] sm:$0x7]  ;;  %s25781_s0 = sld [smem:[#allocation28_spill]] }
 0x1e9   : > { %v1728_v14 = vpop.f32.mrb[114].mxu1  ;;  %v20925_v37 = vrot.slane %v2303_v47, %v20913_v23  ;;  %v20928_v41 = vrot.slane %v2303_v47, %v20919_v30  ;;  %v2448_v7 = vpop.permute.xlu0 %2447 }
 0x1ea   : > { %v20899_v11 = vadd.f32 %v1728_v14, %v20697_v53  ;;  %v17585_v16 = vpop.f32.mrb[115].mxu1 }
 0x1ef   : > { %v1733_v27 = vpop.f32.mrb[116].mxu1 }
 0x1f0   : > { %v20904_v17 = vadd.f32 %v1733_v27, %v20721_v4  ;;  %v17588_v33 = vpop.f32.mrb[117].mxu1  ;;  %v20922_v4 = vrot.slane %v2303_v47, %v20907_v19  ;;  %v2453_v47 = vpop.permute.xlu1 %2452 }
 0x1f1   : > { %v1736_v20 = vpop.f32.mrb[118].mxu1 }
 0x1f2   : > { %v20916_v53 = vadd.f32 %v1736_v20, %v20723_v9  ;;  %v17589_v24 = vpop.f32.mrb[119].mxu1 }
 0x1f7   : > { %v2094_v44 = vpop.f32.mrb[120].mxu1 }
 0x1f8   : > { %v1911_v42 = vpop.f32.mrb[0].mxu0  ;;  %v2215_v9 = vadd.f32 %v2094_v44, %v20751_v31  ;;  %v17596_v18 = vpop.f32.mrb[121].mxu1 }
 0x1f9   : > { %v2320_v29 = vadd.f32 %v20922_v4, %v1911_v42  ;;  %v1913_v49 = vpop.f32.mrb[1].mxu0  ;;  %v2097_v58 = vpop.f32.mrb[122].mxu1 }
 0x1fa   : > { %v2321_v50 = vadd.f32 %v20925_v37, %v1913_v49  ;;  %v1915_v52 = vpop.f32.mrb[2].mxu0  ;;  %v2322_v59 = vadd.f32 %v20928_v41, %v2215_v9  ;;  %v2218_v62 = vadd.f32 %v2097_v58, %v20763_v15  ;;  %v17597_v2 = vpop.f32.mrb[123].mxu1 }
 0x1fb   : > { %v2590_v36 = vmul.f32 %v2443_v35, %v2320_v29  ;;  %v2323_v61 = vadd.f32 %v20922_v4, %v1915_v52  ;;  %v1917_v0 = vpop.f32.mrb[3].mxu0 }
 0x1fc   : > { %v2591_v14 = vmul.f32 %v2443_v35, %v2321_v50  ;;  %v2324_v16 = vadd.f32 %v20925_v37, %v1917_v0  ;;  %v2592_v27 = vmul.f32 %v2443_v35, %v2322_v59  ;;  %v2325_v20 = vadd.f32 %v20928_v41, %v2218_v62 }
 0x1fd   : > { %v2771_v31 = vrot.slane %v2590_v36, 7  ;;  %v2593_v33 = vmul.f32 %v2448_v7, %v2323_v61 }
 0x1fe   : > { %v2772_v24 = vrot.slane %v2591_v14, 7  ;;  %v2594_v15 = vmul.f32 %v2448_v7, %v2324_v16  ;;  %v2773_v42 = vrot.slane %v2592_v27, 7  ;;  %v2595_v29 = vmul.f32 %v2448_v7, %v2325_v20  ;;  %v2458_v20 = vpop.permute.xlu1 %2457 }
 0x1ff   : > { %3038 = vst [vmem:[#allocation2] sm:$0xfe] %v2771_v31  ;;  %v2774_v44 = vrot.slane %v2593_v33, 7  ;;  %v2102_v49 = vpop.f32.mrb[124].mxu1  ;;  %v15979_v7 = vcombine.low %v20943_v12, %v20943_v12 }
 0x200   : > { %3039 = vst [vmem:[#allocation2 + $0x8] sm:$0xfe] %v2772_v24  ;;  %v2776_v35 = vrot.slane %v2594_v15, 7  ;;  %v1921_v9 = vpop.f32.mrb[4].mxu0  ;;  %3041 = vst.msk [vmem:[#allocation2 + $0x10] sm:$0xfe] %vm3040_vm4, %v2773_v42  ;;  %v2221_v58 = vadd.f32 %v2102_v49, %v20788_v60 }
 0x201   : > { %v2775_v18 = vsel %vm2770_vm5, %v2771_v31, %v2774_v44  ;;  %v2778_v50 = vrot.slane %v2595_v29, 7  ;;  %v2326_v52 = vadd.f32 %v20922_v4, %v1921_v9  ;;  %v1923_v36 = vpop.f32.mrb[5].mxu0  ;;  %v17600_v59 = vpop.f32.mrb[125].mxu1  ;;  %vm14549_vm4 = vcmask 1014784  }
 0x202   : > { %3042 = vst [vmem:[#allocation2 + $0x18] sm:$0xff] %v2775_v18  ;;  %v2777_v61 = vsel %vm2770_vm5, %v2772_v24, %v2776_v35  ;;  %v2327_v62 = vadd.f32 %v20925_v37, %v1923_v36  ;;  %v1925_v0 = vpop.f32.mrb[6].mxu0  ;;  %v2105_v2 = vpop.f32.mrb[126].mxu1  ;;  %v2328_v31 = vadd.f32 %v20928_v41, %v2221_v58 }
 0x203   : > { %v2779_v14 = vsel %vm2770_vm5, %v2773_v42, %v2778_v50  ;;  %3043 = vst [vmem:[#allocation2 + $0x20] sm:$0xff] %v2777_v61  ;;  %v2596_v16 = vmul.f32 %v2453_v47, %v2326_v52  ;;  %v2329_v60 = vadd.f32 %v20922_v4, %v1925_v0  ;;  %v1927_v27 = vpop.f32.mrb[7].mxu0  ;;  %v17601_v33 = vpop.f32.mrb[127].mxu1  ;;  %v2224_v15 = vadd.f32 %v2105_v2, %v20797_v8 }
 0x204   : > { %3045 = vst.msk [vmem:[#allocation2 + $0x28] sm:$0xff] %vm3044_vm6, %v2779_v14  ;;  %v2597_v24 = vmul.f32 %v2453_v47, %v2327_v62  ;;  %v2330_v29 = vadd.f32 %v20925_v37, %v1927_v27  ;;  %v2598_v49 = vmul.f32 %v2453_v47, %v2328_v31  ;;  %v20962_v33 = vsel %vm4211_vm7, %v15979_v7, 0  ;;  %v2463_v14 = vpop.permute.xlu0 %2462 }
 0x205   : > { %v2780_v9 = vrot.slane %v2596_v16, 7  ;;  %v2599_v36 = vmul.f32 %v2458_v20, %v2329_v60  ;;  %v2331_v58 = vadd.f32 %v20928_v41, %v2224_v15 }
 0x206   : > { %v2782_v52 = vrot.slane %v2597_v24, 7  ;;  %v2600_v59 = vmul.f32 %v2458_v20, %v2330_v29  ;;  %v3345_v0 = vld [vmem:[#allocation2] sm:$0xfe]  ;;  %v2784_v8 = vrot.slane %v2598_v49, 7 }
 0x207   : > { %v20965_v62 = vsel %vm2770_vm5, %v2774_v44, %v2780_v9  ;;  %v2786_v2 = vrot.slane %v2599_v36, 7  ;;  %v3346_v16 = vld [vmem:[#allocation2 + $0x8] sm:$0xfe]  ;;  %v20967_v47 = vpack.c.bf16 %v2775_v18, %v3345_v0  ;;  %v2601_v60 = vmul.f32 %v2458_v20, %v2331_v58  ;;  %v2110_v15 = vpop.f32.mrb[128].mxu1 }
 0x208   : > { %v2783_v31 = vsel %vm2770_vm5, %v2776_v35, %v2782_v52  ;;  %v2788_v27 = vrot.slane %v2600_v59, 7  ;;  %v1931_v24 = vpop.f32.mrb[8].mxu0  ;;  %v3423_v29 = vpack.c.bf16 %v2777_v61, %v3346_v16  ;;  %v2785_v1 = vsel %vm2770_vm5, %v2778_v50, %v2784_v8  ;;  %v17604_v6 = vpop.f32.mrb[129].mxu1 }
 0x209   : > { %v20972_v7 = vsel %vm2770_vm5, %v2780_v9, %v2786_v2  ;;  %v2332_v44 = vadd.f32 %v20922_v4, %v1931_v24  ;;  %v2227_v49 = vadd.f32 %v2110_v15, %v20825_v28  ;;  %v1933_v36 = vpop.f32.mrb[9].mxu0  ;;  %3048 = vst.msk [vmem:[#allocation2 + $0x40] sm:$0xff] %vm3044_vm6, %v2785_v1  ;;  %v2790_v35 = vrot.slane %v2601_v60, 7  ;;  %v2113_v58 = vpop.f32.mrb[130].mxu1 }
 0x20a   : > { %v2789_v18 = vsel %vm2770_vm5, %v2782_v52, %v2788_v27  ;;  %v2333_v20 = vadd.f32 %v20925_v37, %v1933_v36  ;;  %v1935_v61 = vpop.f32.mrb[10].mxu0  ;;  %v3442_v50 = vshrl.u32 %v3423_v29, 16  ;;  %v2230_v28 = vadd.f32 %v2113_v58, %v20828_v38  ;;  %v17605_v6 = vpop.f32.mrb[131].mxu1 }
 0x20b   : > { %v2602_v59 = vmul.f32 %v2463_v14, %v2332_v44  ;;  %v2334_v9 = vadd.f32 %v20928_v41, %v2227_v49  ;;  %v2335_v0 = vadd.f32 %v20922_v4, %v1935_v61  ;;  %v1937_v16 = vpop.f32.mrb[11].mxu0  ;;  %v2468_v24 = vpop.permute.xlu1 %2467  ;;  %v2791_v1 = vsel %vm2770_vm5, %v2784_v8, %v2790_v35 }
 0x20c   : > { %v2603_v60 = vmul.f32 %v2463_v14, %v2333_v20  ;;  %v2336_v52 = vadd.f32 %v20925_v37, %v1937_v16  ;;  %v20984_v15 = vpack.c.bf16 %v2789_v18, %v2783_v31  ;;  %3051 = vst.msk [vmem:[#allocation2 + $0x58] sm:$0xff] %vm3044_vm6, %v2791_v1  ;;  %v2337_v49 = vadd.f32 %v20928_v41, %v2230_v28  ;;  %v2473_v6 = vpop.permute.xlu0 %2472 }
 0x20d   : > { %v2792_v36 = vrot.slane %v2602_v59, 7  ;;  %v2604_v44 = vmul.f32 %v2463_v14, %v2334_v9  ;;  %v2605_v42 = vmul.f32 %v2468_v24, %v2335_v0  ;;  %v3444_v38 = vshll.u32 %v3423_v29, 16 }
 0x20e   : > { %v2794_v61 = vrot.slane %v2603_v60, 7  ;;  %v2606_v23 = vmul.f32 %v2468_v24, %v2336_v52  ;;  %v3449_v58 = vshll.u32 %v20984_v15, 16  ;;  %v2607_v31 = vmul.f32 %v2468_v24, %v2337_v49 }
 0x20f   : > { %v20990_v8 = vsel %vm2770_vm5, %v2786_v2, %v2792_v36  ;;  %v2796_v20 = vrot.slane %v2604_v44, 7  ;;  %v2798_v16 = vrot.slane %v2605_v42, 7  ;;  %v2118_v9 = vpop.f32.mrb[132].mxu1  ;;  %v3446_v0 = vrot.slane %v3444_v38, 1 }
 0x210   : > { %v20993_v18 = vsel %vm2770_vm5, %v2788_v27, %v2794_v61  ;;  %v2800_v59 = vrot.slane %v2606_v23, 7  ;;  %v1941_v14 = vpop.f32.mrb[12].mxu0  ;;  %v20995_v28 = vrot.slane %v3449_v58, 1  ;;  %v2802_v60 = vrot.slane %v2607_v31, 7  ;;  %v17608_v42 = vpop.f32.mrb[133].mxu1 }
 0x211   : > { %v2797_v29 = vsel %vm2770_vm5, %v2790_v35, %v2796_v20  ;;  %v20999_v1 = vsel %vm2770_vm5, %v2792_v36, %v2798_v16  ;;  %v2338_v2 = vadd.f32 %v20922_v4, %v1941_v14  ;;  %v1943_v52 = vpop.f32.mrb[13].mxu0  ;;  %v2233_v23 = vadd.f32 %v2118_v9, %v20833_v43  ;;  %v2121_v49 = vpop.f32.mrb[134].mxu1 }
 0x212   : > { %3054 = vst.msk [vmem:[#allocation2 + $0x70] sm:$0xff] %vm3044_vm6, %v2797_v29  ;;  %v21004_v27 = vsel %vm2770_vm5, %v2794_v61, %v2800_v59  ;;  %v2339_v24 = vadd.f32 %v20925_v37, %v1943_v52  ;;  %v1945_v44 = vpop.f32.mrb[14].mxu0  ;;  %v3447_v35 = vor.u32 %v3446_v0, %v3442_v50  ;;  %v2803_v36 = vsel %vm2770_vm5, %v2796_v20, %v2802_v60  ;;  %v17609_v42 = vpop.f32.mrb[135].mxu1 }
 0x213   : > { %v2608_v38 = vmul.f32 %v2473_v6, %v2338_v2  ;;  %v2341_v58 = vadd.f32 %v20922_v4, %v1945_v44  ;;  %v2236_v31 = vadd.f32 %v2121_v49, %v20836_v46  ;;  %v1947_v14 = vpop.f32.mrb[15].mxu0  ;;  %v2478_v29 = vpop.permute.xlu1 %2477  ;;  %3057 = vst.msk [vmem:[#allocation2 + $0x88] sm:$0xff] %vm3044_vm6, %v2803_v36  ;;  %v2340_v61 = vadd.f32 %v20928_v41, %v2233_v23 }
 0x214   : > { %v2609_v43 = vmul.f32 %v2473_v6, %v2339_v24  ;;  %v2342_v9 = vadd.f32 %v20925_v37, %v1947_v14  ;;  %v3452_v50 = vsel %vm3428_vm8, %v3447_v35, %v20995_v28  ;;  %v21019_v46 = vpack.c.bf16 %v20972_v7, %v20965_v62  ;;  %v2483_v24 = vpop.permute.xlu0 %2482 }
 0x215   : > { %v2804_v0 = vrot.slane %v2608_v38, 7  ;;  %v2611_v20 = vmul.f32 %v2478_v29, %v2341_v58  ;;  %v2343_v2 = vadd.f32 %v20928_v41, %v2236_v31  ;;  %4256 = vmatprep.mubr.bf16.mxu0 %v3452_v50  ;;  %4622 = vmatprep.mubr.bf16.mxu1 %v3452_v50  ;;  %v2610_v52 = vmul.f32 %v2473_v6, %v2340_v61 }
 0x216   : > { %v2806_v44 = vrot.slane %v2609_v43, 7  ;;  %v2612_v49 = vmul.f32 %v2478_v29, %v2342_v9  ;;  %v3430_v23 = vshrl.u32 %v20967_v47, 16  ;;  %v3432_v58 = vshll.u32 %v20967_v47, 16 }
 0x217   : > { %v21023_v36 = vsel %vm2770_vm5, %v2798_v16, %v2804_v0  ;;  %v2810_v35 = vrot.slane %v2611_v20, 7  ;;  %v2613_v38 = vmul.f32 %v2478_v29, %v2343_v2  ;;  %v2808_v31 = vrot.slane %v2610_v52, 7  ;;  %v2126_v7 = vpop.f32.mrb[136].mxu1 }
 0x218   : > { %v21027_v14 = vsel %vm2770_vm5, %v2800_v59, %v2806_v44  ;;  %v2812_v42 = vrot.slane %v2612_v49, 7  ;;  %v1951_v62 = vpop.f32.mrb[16].mxu0  ;;  %v3437_v6 = vshll.u32 %v21019_v46, 16  ;;  %v2239_v9 = vadd.f32 %v2126_v7, %v20839_v32  ;;  %v17612_v50 = vpop.f32.mrb[137].mxu1 }
 0x219   : > { %v21031_v61 = vsel %vm2770_vm5, %v2804_v0, %v2810_v35  ;;  %v2814_v43 = vrot.slane %v2613_v38, 7  ;;  %v2344_v16 = vadd.f32 %v20922_v4, %v1951_v62  ;;  %v1953_v29 = vpop.f32.mrb[17].mxu0  ;;  %v2809_v47 = vsel %vm2770_vm5, %v2802_v60, %v2808_v31  ;;  %v2129_v52 = vpop.f32.mrb[138].mxu1 }
 0x21a   : > { %v21037_v59 = vsel %vm2770_vm5, %v2806_v44, %v2812_v42  ;;  %v2345_v20 = vadd.f32 %v20925_v37, %v1953_v29  ;;  %v1955_v2 = vpop.f32.mrb[18].mxu0  ;;  %v3434_v49 = vrot.slane %v3432_v58, 1  ;;  %3060 = vst.msk [vmem:[#allocation2 + $0xa0] sm:$0xff] %vm3044_vm6, %v2809_v47  ;;  %v2346_v62 = vadd.f32 %v20928_v41, %v2239_v9  ;;  %v17613_v50 = vpop.f32.mrb[139].mxu1 }
 0x21b   : > { %v2815_v0 = vsel %vm2770_vm5, %v2808_v31, %v2814_v43  ;;  %v2614_v38 = vmul.f32 %v2483_v24, %v2344_v16  ;;  %v2347_v32 = vadd.f32 %v20922_v4, %v1955_v2  ;;  %v1957_v7 = vpop.f32.mrb[19].mxu0  ;;  %v2488_v60 = vpop.permute.xlu1 %2487  ;;  %v2242_v29 = vadd.f32 %v2129_v52, %v20842_v55  ;;  %v19043_v16 = vld [vmem:[%s25766_s5 + $0x430] ss:$16 sps:$4 sm:$0xff]  }
 0x21c   : > { %3063 = vst.msk [vmem:[#allocation2 + $0xb8] sm:$0xff] %vm3044_vm6, %v2815_v0  ;;  %v2615_v44 = vmul.f32 %v2483_v24, %v2345_v20  ;;  %v2348_v30 = vadd.f32 %v20925_v37, %v1957_v7  ;;  %v3435_v58 = vor.u32 %v3434_v49, %v3430_v23  ;;  %v2616_v47 = vmul.f32 %v2483_v24, %v2346_v62  ;;  %v2493_v55 = vpop.permute.xlu0 %2492 }
 0x21d   : > { %v2816_v19 = vrot.slane %v2614_v38, 7  ;;  %v2617_v25 = vmul.f32 %v2488_v60, %v2347_v32  ;;  %v21047_v31 = vrot.slane %v3437_v6, 1  ;;  %v2349_v2 = vadd.f32 %v20928_v41, %v2242_v29 }
 0x21e   : > { %v2818_v9 = vrot.slane %v2615_v44, 7  ;;  %v2618_v50 = vmul.f32 %v2488_v60, %v2348_v30  ;;  %v21055_v20 = vpack.c.bf16 %v21004_v27, %v20993_v18  ;;  %v2820_v24 = vrot.slane %v2616_v47, 7 }
 0x21f   : > { %v21058_v23 = vsel %vm2770_vm5, %v2810_v35, %v2816_v19  ;;  %v2822_v52 = vrot.slane %v2617_v25, 7  ;;  %v3440_v6 = vsel %vm3428_vm8, %v3435_v58, %v21047_v31  ;;  %v2619_v0 = vmul.f32 %v2488_v60, %v2349_v2  ;;  %v2134_v62 = vpop.f32.mrb[140].mxu1 }
 0x220   : > { %v21063_v49 = vsel %vm2770_vm5, %v2812_v42, %v2818_v9  ;;  %v2824_v38 = vrot.slane %v2618_v50, 7  ;;  %4257 = vmatmul.mubr.bf16.vlgmr.msra.gmra.mrb[60].mxu0 %v3440_v6  ;;  %4623 = vmatmul.mubr.bf16.vlgmr.msra.gmra.mrb[180].mxu1 %v3440_v6  ;;  %v1961_v30 = vpop.f32.mrb[20].mxu0  ;;  %v3473_v18 = vshrl.u32 %v20984_v15, 16  ;;  %v2821_v27 = vsel %vm2770_vm5, %v2814_v43, %v2820_v24  ;;  %v17616_v7 = vpop.f32.mrb[141].mxu1 }
 0x221   : > { %v21068_v35 = vsel %vm2770_vm5, %v2816_v19, %v2822_v52  ;;  %v2350_v25 = vadd.f32 %v20922_v4, %v1961_v30  ;;  %v2245_v32 = vadd.f32 %v2134_v62, %v20848_v39  ;;  %4408 = vmatpush1.bf16.msra.mxu0 %v19043_v16  ;;  %v1963_v42 = vpop.f32.mrb[21].mxu0  ;;  %3066 = vst.msk [vmem:[#allocation2 + $0xd0] sm:$0xff] %vm3044_vm6, %v2821_v27  ;;  %v2826_v60 = vrot.slane %v2619_v0, 7  ;;  %v2137_v43 = vpop.f32.mrb[142].mxu1  ;;  %v19050_v27 = vld [vmem:[%s25766_s5 + $0x43c] ss:$16 sps:$4 sm:$0xff]  }
 0x222   : > { %v21074_v44 = vsel %vm2770_vm5, %v2818_v9, %v2824_v38  ;;  %v2351_v29 = vadd.f32 %v20925_v37, %v1963_v42  ;;  %v1965_v58 = vpop.f32.mrb[22].mxu0  ;;  %v3475_v19 = vor.u32 %v3473_v18, %v20995_v28  ;;  %v25772_v47 = vcombine.high %v20943_v12, %v20943_v12  ;;  %v17617_v6 = vpop.f32.mrb[143].mxu1  ;;  %v19048_v12 = vld [vmem:[%s25766_s5 + $0x438] ss:$16 sps:$4 sm:$0xff]   ;;  %4773 = vmatprep.subr.bf16.mxu1 %v19050_v27 }
 0x223   : > { %v2620_v39 = vmul.f32 %v2493_v55, %v2350_v25  ;;  %v2352_v16 = vadd.f32 %v20928_v41, %v2245_v32  ;;  %v2353_v2 = vadd.f32 %v20922_v4, %v1965_v58  ;;  %v2248_v50 = vadd.f32 %v2137_v43, %v20851_v45  ;;  %v1967_v9 = vpop.f32.mrb[23].mxu0  ;;  %v2498_v0 = vpop.permute.xlu1 %2497  ;;  %4774 = vmatpush1.bf16.msra.mxu1 %v19048_v12 }
 0x224   : > { %15983 = vmatprep.subr.msk.bf16.mxu0 %vm4211_vm7, %v25772_v47  ;;  %v2827_v30 = vsel %vm2770_vm5, %v2820_v24, %v2826_v60  ;;  %v2621_v62 = vmul.f32 %v2493_v55, %v2351_v29  ;;  %v3477_v28 = vshll.u32 %v21055_v20, 16  ;;  %v2354_v18 = vadd.f32 %v20925_v37, %v1967_v9  ;;  %v2503_v43 = vpop.permute.xlu0 %2502 }
 0x225   : > { %3069 = vst.msk [vmem:[#allocation2 + $0xe8] sm:$0xff] %vm3044_vm6, %v2827_v30  ;;  %v2828_v45 = vrot.slane %v2620_v39, 7  ;;  %v2622_v25 = vmul.f32 %v2493_v55, %v2352_v16  ;;  %v21095_v32 = vmul.f32 %v2498_v0, %v2353_v2  ;;  %v2355_v24 = vadd.f32 %v20928_v41, %v2248_v50  ;;  %4410 = vmatpush1.bf16.msra.mxu0 %v20962_v33 }
 0x226   : > { %v2830_v42 = vrot.slane %v2621_v62, 7  ;;  %v3479_v7 = vrot.slane %v3477_v28, 1  ;;  %v21099_v29 = vmul.f32 %v2498_v0, %v2354_v18  ;;  %v21103_v58 = vpack.c.bf16 %v20999_v1, %v20990_v8 }
 0x227   : > { %v21106_v47 = vsel %vm2770_vm5, %v2822_v52, %v2828_v45  ;;  %v2832_v55 = vrot.slane %v2622_v25, 7  ;;  %v2834_v39 = vrot.slane %v21095_v32, 7  ;;  %v21109_v16 = vmul.f32 %v2498_v0, %v2355_v24  ;;  %v2142_v9 = vpop.f32.mrb[144].mxu1 }
 0x228   : > { %v21112_v33 = vsel %vm2770_vm5, %v2824_v38, %v2830_v42  ;;  %v3480_v2 = vsel %vm3428_vm8, %v3475_v19, %v3479_v7  ;;  %v2836_v50 = vrot.slane %v21099_v29, 7  ;;  %v3465_v8 = vshrl.u32 %v21019_v46, 16  ;;  %v1971_v1 = vpop.f32.mrb[24].mxu0  ;;  %v17620_v62 = vpop.f32.mrb[145].mxu1 }
 0x229   : > { %v2833_v52 = vsel %vm2770_vm5, %v2826_v60, %v2832_v55  ;;  %v21119_v6 = vsel %vm2770_vm5, %v2828_v45, %v2834_v39  ;;  %v2838_v0 = vrot.slane %v21109_v16, 7  ;;  %4266 = vmatprep.mubr.bf16.mxu0 %v3480_v2  ;;  %4632 = vmatprep.mubr.bf16.mxu1 %v3480_v2  ;;  %v3469_v38 = vshll.u32 %v21103_v58, 16  ;;  %v1973_v30 = vpop.f32.mrb[25].mxu0  ;;  %v2145_v27 = vpop.f32.mrb[146].mxu1 }
 0x22a   : > { %3072 = vst.msk [vmem:[#allocation2 + $0x100] sm:$0xff] %vm3044_vm6, %v2833_v52  ;;  %v21125_v19 = vsel %vm2770_vm5, %v2830_v42, %v2836_v50  ;;  %v3467_v28 = vor.u32 %v3465_v8, %v21047_v31  ;;  %v2356_v60 = vadd.f32 %v20922_v4, %v1971_v1  ;;  %v2251_v18 = vadd.f32 %v2142_v9, %v20854_v48  ;;  %v1975_v12 = vpop.f32.mrb[26].mxu0  ;;  %v17621_v16 = vpop.f32.mrb[147].mxu1 }
 0x22b   : > { %v2839_v45 = vsel %vm2770_vm5, %v2832_v55, %v2838_v0  ;;  %v3471_v25 = vrot.slane %v3469_v38, 1  ;;  %v2357_v32 = vadd.f32 %v20925_v37, %v1973_v30  ;;  %v2359_v24 = vadd.f32 %v20922_v4, %v1975_v12  ;;  %v1977_v29 = vpop.f32.mrb[27].mxu0  ;;  %v2508_v2 = vpop.permute.xlu1 %2507  ;;  %v19055_v55 = vld [vmem:[%s25766_s5 + $0x4] ss:$16 sps:$4 sm:$0xff]  }
 0x22c   : > { %3075 = vst.msk [vmem:[#allocation2 + $0x118] sm:$0xff] %vm3044_vm6, %v2839_v45  ;;  %v2626_v42 = vmul.f32 %v2503_v43, %v2356_v60  ;;  %v2358_v31 = vadd.f32 %v20928_v41, %v2251_v18  ;;  %v2254_v8 = vadd.f32 %v2145_v27, %v20857_v22  ;;  %v21138_v48 = vpack.c.bf16 %v21037_v59, %v21027_v14 }
 0x22d   : > { %v3472_v1 = vsel %vm3428_vm8, %v3467_v28, %v3471_v25  ;;  %v2627_v9 = vmul.f32 %v2503_v43, %v2357_v32  ;;  %v21144_v52 = vmul.f32 %v2508_v2, %v2359_v24  ;;  %v3497_v38 = vshrl.u32 %v21055_v20, 16  ;;  %5350 = vmatprep.subr.bf16.mxu0 %v19055_v55 }
 0x22e   : > { %4267 = vmatmul.mubr.bf16.gmra.mrb[64].mxu0 %v3472_v1  ;;  %4633 = vmatmul.mubr.bf16.gmra.mrb[184].mxu1 %v3472_v1  ;;  %v2840_v30 = vrot.slane %v2626_v42, 7  ;;  %v2628_v62 = vmul.f32 %v2503_v43, %v2358_v31  ;;  %v2361_v22 = vadd.f32 %v20928_v41, %v2254_v8  ;;  %v3501_v14 = vshll.u32 %v21138_v48, 16 }
 0x22f   : > { %v2842_v59 = vrot.slane %v2627_v9, 7  ;;  %v2846_v60 = vrot.slane %v21144_v52, 7  ;;  %v3499_v18 = vor.u32 %v3497_v38, %v3479_v7  ;;  %v2360_v12 = vadd.f32 %v20925_v37, %v1977_v29  ;;  %v2150_v43 = vpop.f32.mrb[148].mxu1 }
 0x230   : > { %v21152_v28 = vsel %vm2770_vm5, %v2834_v39, %v2840_v30  ;;  %v2844_v27 = vrot.slane %v2628_v62, 7  ;;  %v21154_v45 = vmul.f32 %v2508_v2, %v2361_v22  ;;  %v3503_v32 = vrot.slane %v3501_v14, 1  ;;  %v1981_v24 = vpop.f32.mrb[28].mxu0  ;;  %v17624_v39 = vpop.f32.mrb[149].mxu1 }
 0x231   : > { %v21157_v16 = vsel %vm2770_vm5, %v2836_v50, %v2842_v59  ;;  %v21160_v42 = vsel %vm2770_vm5, %v2840_v30, %v2846_v60  ;;  %v2630_v31 = vmul.f32 %v2508_v2, %v2360_v12  ;;  %v21164_v7 = vpack.c.bf16 %v21031_v61, %v21023_v36  ;;  %v1983_v29 = vpop.f32.mrb[29].mxu0  ;;  %v2153_v52 = vpop.f32.mrb[150].mxu1 }
 0x232   : > { %v2845_v8 = vsel %vm2770_vm5, %v2838_v0, %v2844_v27  ;;  %v2850_v55 = vrot.slane %v21154_v45, 7  ;;  %v3504_v1 = vsel %vm3428_vm8, %v3499_v18, %v3503_v32  ;;  %v3489_v9 = vshrl.u32 %v21103_v58, 16  ;;  %v1985_v50 = vpop.f32.mrb[30].mxu0  ;;  %v17625_v30 = vpop.f32.mrb[151].mxu1 }
 0x233   : > { %3078 = vst.msk [vmem:[#allocation2 + $0x130] sm:$0xff] %vm3044_vm6, %v2845_v8  ;;  %4276 = vmatprep.mubr.bf16.mxu0 %v3504_v1  ;;  %4642 = vmatprep.mubr.bf16.mxu1 %v3504_v1  ;;  %v2848_v2 = vrot.slane %v2630_v31, 7  ;;  %v3493_v36 = vshll.u32 %v21164_v7, 16  ;;  %v2362_v61 = vadd.f32 %v20922_v4, %v1981_v24  ;;  %v2257_v38 = vadd.f32 %v2150_v43, %v20860_v54  ;;  %v1987_v0 = vpop.f32.mrb[31].mxu0  ;;  %v2513_v62 = vpop.permute.xlu0 %2512 }
 0x234   : > { %v2851_v22 = vsel %vm2770_vm5, %v2844_v27, %v2850_v55  ;;  %v3491_v14 = vor.u32 %v3489_v9, %v3471_v25  ;;  %v2363_v18 = vadd.f32 %v20925_v37, %v1983_v29  ;;  %v2365_v12 = vadd.f32 %v20922_v4, %v1985_v50  ;;  %v2518_v45 = vpop.permute.xlu1 %2517 }
 0x235   : > { %3081 = vst.msk [vmem:[#allocation2 + $0x148] sm:$0xff] %vm3044_vm6, %v2851_v22  ;;  %v21179_v31 = vsel %vm2770_vm5, %v2842_v59, %v2848_v2  ;;  %v3495_v39 = vrot.slane %v3493_v36, 1  ;;  %v2632_v24 = vmul.f32 %v2513_v62, %v2362_v61  ;;  %v2364_v54 = vadd.f32 %v20928_v41, %v2257_v38 }
 0x236   : > { %v2633_v43 = vmul.f32 %v2513_v62, %v2363_v18  ;;  %v21182_v8 = vmul.f32 %v2518_v45, %v2365_v12  ;;  %v2260_v27 = vadd.f32 %v2153_v52, %v20863_v57  ;;  %v21187_v25 = vpack.c.bf16 %v21074_v44, %v21063_v49 }
 0x237   : > { %v3496_v29 = vsel %vm3428_vm8, %v3491_v14, %v3495_v39  ;;  %v2852_v1 = vrot.slane %v2632_v24, 7  ;;  %v2634_v9 = vmul.f32 %v2513_v62, %v2364_v54  ;;  %v3521_v59 = vshrl.u32 %v21138_v48, 16  ;;  %v2158_v52 = vpop.f32.mrb[152].mxu1 }
 0x238   : > { %4277 = vmatmul.mubr.bf16.gmra.mrb[68].mxu0 %v3496_v29  ;;  %4643 = vmatmul.mubr.bf16.gmra.mrb[188].mxu1 %v3496_v29  ;;  %v2854_v50 = vrot.slane %v2633_v43, 7  ;;  %v2858_v36 = vrot.slane %v21182_v8, 7  ;;  %v2367_v61 = vadd.f32 %v20928_v41, %v2260_v27  ;;  %v3525_v38 = vshll.u32 %v21187_v25, 16  ;;  %v1991_v57 = vpop.f32.mrb[32].mxu0  ;;  %v17628_v14 = vpop.f32.mrb[153].mxu1 }
 0x239   : > { %v21195_v49 = vsel %vm2770_vm5, %v2846_v60, %v2852_v1  ;;  %v2856_v44 = vrot.slane %v2634_v9, 7  ;;  %v3523_v30 = vor.u32 %v3521_v59, %v3503_v32  ;;  %v2366_v62 = vadd.f32 %v20925_v37, %v1987_v0  ;;  %v1993_v22 = vpop.f32.mrb[33].mxu0  ;;  %v2161_v8 = vpop.f32.mrb[154].mxu1 }
 0x23a   : > { %v21199_v18 = vsel %vm2770_vm5, %v2848_v2, %v2854_v50  ;;  %v21202_v12 = vsel %vm2770_vm5, %v2852_v1, %v2858_v36  ;;  %v2637_v24 = vmul.f32 %v2518_v45, %v2367_v61  ;;  %v3527_v54 = vrot.slane %v3525_v38, 1  ;;  %v1995_v43 = vpop.f32.mrb[34].mxu0  ;;  %v17629_v9 = vpop.f32.mrb[155].mxu1 }
 0x23b   : > { %v2857_v27 = vsel %vm2770_vm5, %v2850_v55, %v2856_v44  ;;  %v2636_v60 = vmul.f32 %v2518_v45, %v2366_v62  ;;  %v21207_v32 = vpack.c.bf16 %v21068_v35, %v21058_v23  ;;  %v3513_v0 = vshrl.u32 %v21164_v7, 16  ;;  %v1997_v29 = vpop.f32.mrb[35].mxu0  ;;  %v2523_v38 = vpop.permute.xlu0 %2522 }
 0x23c   : > { %3084 = vst.msk [vmem:[#allocation2 + $0x160] sm:$0xff] %vm3044_vm6, %v2857_v27  ;;  %v2862_v2 = vrot.slane %v2637_v24, 7  ;;  %v3528_v1 = vsel %vm3428_vm8, %v3523_v30, %v3527_v54  ;;  %v2368_v59 = vadd.f32 %v20922_v4, %v1991_v57  ;;  %v2263_v61 = vadd.f32 %v2158_v52, %v20866_v63  ;;  %v2528_v27 = vpop.permute.xlu1 %2527 }
 0x23d   : > { %25773 = vst [vmem:[#allocation19_spill] sm:$0xff] %v21207_v32  ;;  %4286 = vmatprep.mubr.bf16.mxu0 %v3528_v1  ;;  %4652 = vmatprep.mubr.bf16.mxu1 %v3528_v1  ;;  %v2860_v55 = vrot.slane %v2636_v60, 7  ;;  %v3515_v45 = vor.u32 %v3513_v0, %v3495_v39  ;;  %v3517_v23 = vshll.u32 %v21207_v32, 16  ;;  %v2369_v35 = vadd.f32 %v20925_v37, %v1993_v22 }
 0x23e   : > { %v2863_v62 = vsel %vm2770_vm5, %v2856_v44, %v2862_v2  ;;  %v2638_v14 = vmul.f32 %v2523_v38, %v2368_v59  ;;  %v2370_v24 = vadd.f32 %v20928_v41, %v2263_v61  ;;  %v2371_v30 = vadd.f32 %v20922_v4, %v1995_v43 }
 0x23f   : > { %3087 = vst.msk [vmem:[#allocation2 + $0x178] sm:$0xff] %vm3044_vm6, %v2863_v62  ;;  %v21221_v63 = vsel %vm2770_vm5, %v2854_v50, %v2860_v55  ;;  %v3519_v57 = vrot.slane %v3517_v23, 1  ;;  %v2639_v52 = vmul.f32 %v2523_v38, %v2369_v35  ;;  %v2266_v39 = vadd.f32 %v2161_v8, %v20869_v3  ;;  %v2166_v43 = vpop.f32.mrb[156].mxu1 }
 0x240   : > { %v2864_v60 = vrot.slane %v2638_v14, 7  ;;  %v2640_v0 = vmul.f32 %v2523_v38, %v2370_v24  ;;  %v21224_v22 = vmul.f32 %v2528_v27, %v2371_v30  ;;  %v21228_v44 = vpack.c.bf16 %v21125_v19, %v21112_v33  ;;  %v2001_v9 = vpop.f32.mrb[36].mxu0  ;;  %v17632_v35 = vpop.f32.mrb[157].mxu1 }
 0x241   : > { %v3520_v1 = vsel %vm3428_vm8, %v3515_v45, %v3519_v57  ;;  %v2866_v59 = vrot.slane %v2639_v52, 7  ;;  %v2373_v50 = vadd.f32 %v20928_v41, %v2266_v39  ;;  %v3545_v61 = vshrl.u32 %v21187_v25, 16  ;;  %v2003_v23 = vpop.f32.mrb[37].mxu0  ;;  %v2169_v62 = vpop.f32.mrb[158].mxu1 }
 0x242   : > { %25774 = vst [vmem:[#allocation20_spill] sm:$0xff] %v21228_v44  ;;  %4287 = vmatmul.mubr.bf16.gmra.mrb[72].mxu0 %v3520_v1  ;;  %4653 = vmatmul.mubr.bf16.gmra.mrb[192].mxu1 %v3520_v1  ;;  %v21234_v3 = vsel %vm2770_vm5, %v2858_v36, %v2864_v60  ;;  %v2868_v8 = vrot.slane %v2640_v0, 7  ;;  %v2870_v33 = vrot.slane %v21224_v22, 7  ;;  %v3549_v19 = vshll.u32 %v21228_v44, 16  ;;  %v2005_v38 = vpop.f32.mrb[38].mxu0  ;;  %v17633_v39 = vpop.f32.mrb[159].mxu1 }
 0x243   : > { %v21239_v45 = vsel %vm2770_vm5, %v2860_v55, %v2866_v59  ;;  %v21241_v14 = vmul.f32 %v2528_v27, %v2373_v50  ;;  %v3547_v24 = vor.u32 %v3545_v61, %v3527_v54  ;;  %v2372_v30 = vadd.f32 %v20925_v37, %v1997_v29  ;;  %v2007_v52 = vpop.f32.mrb[39].mxu0  ;;  %v2533_v61 = vpop.permute.xlu0 %2532 }
 0x244   : > { %v2869_v36 = vsel %vm2770_vm5, %v2862_v2, %v2868_v8  ;;  %v21246_v0 = vsel %vm2770_vm5, %v2864_v60, %v2870_v33  ;;  %v3551_v22 = vrot.slane %v3549_v19, 1  ;;  %v21250_v1 = vpack.c.bf16 %v21119_v6, %v21106_v47  ;;  %v2538_v47 = vpop.permute.xlu1 %2537 }
 0x245   : > { %3090 = vst.msk [vmem:[#allocation2 + $0x190] sm:$0xff] %vm3044_vm6, %v2869_v36  ;;  %v2874_v55 = vrot.slane %v21241_v14, 7  ;;  %v2642_v50 = vmul.f32 %v2528_v27, %v2372_v30  ;;  %v3537_v54 = vshrl.u32 %v21207_v32, 16  ;;  %v2374_v29 = vadd.f32 %v20922_v4, %v2001_v9 }
 0x246   : > { %25775 = vst [vmem:[#allocation21_spill] sm:$0xff] %v21250_v1  ;;  %v3552_v2 = vsel %vm3428_vm8, %v3547_v24, %v3551_v22  ;;  %v3541_v60 = vshll.u32 %v21250_v1, 16  ;;  %v2269_v35 = vadd.f32 %v2166_v43, %v20872_v10  ;;  %v2375_v19 = vadd.f32 %v20925_v37, %v2003_v23 }
 0x247   : > { %v2875_v6 = vsel %vm2770_vm5, %v2868_v8, %v2874_v55  ;;  %4296 = vmatprep.mubr.bf16.mxu0 %v3552_v2  ;;  %4662 = vmatprep.mubr.bf16.mxu1 %v3552_v2  ;;  %v2872_v14 = vrot.slane %v2642_v50, 7  ;;  %v3539_v27 = vor.u32 %v3537_v54, %v3519_v57  ;;  %v2644_v30 = vmul.f32 %v2533_v61, %v2374_v29  ;;  %v2174_v10 = vpop.f32.mrb[160].mxu1 }
 0x248   : > { %3093 = vst.msk [vmem:[#allocation2 + $0x1a8] sm:$0xff] %vm3044_vm6, %v2875_v6  ;;  %v3543_v9 = vrot.slane %v3541_v60, 1  ;;  %v2376_v39 = vadd.f32 %v20928_v41, %v2269_v35  ;;  %v2645_v24 = vmul.f32 %v2533_v61, %v2375_v19  ;;  %v2377_v36 = vadd.f32 %v20922_v4, %v2005_v38  ;;  %v2011_v32 = vpop.f32.mrb[40].mxu0  ;;  %v17636_v54 = vpop.f32.mrb[161].mxu1 }
 0x249   : > { %v21265_v43 = vsel %vm2770_vm5, %v2866_v59, %v2872_v14  ;;  %v2876_v23 = vrot.slane %v2644_v30, 7  ;;  %v2272_v8 = vadd.f32 %v2169_v62, %v20875_v13  ;;  %v21270_v57 = vpack.c.bf16 %v21179_v31, %v21157_v16  ;;  %v2013_v50 = vpop.f32.mrb[41].mxu0  ;;  %v2177_v19 = vpop.f32.mrb[162].mxu1 }
 0x24a   : > { %v3544_v29 = vsel %vm3428_vm8, %v3539_v27, %v3543_v9  ;;  %v2646_v2 = vmul.f32 %v2533_v61, %v2376_v39  ;;  %v2878_v60 = vrot.slane %v2645_v24, 7  ;;  %v21273_v35 = vmul.f32 %v2538_v47, %v2377_v36  ;;  %v2015_v38 = vpop.f32.mrb[42].mxu0  ;;  %v17637_v6 = vpop.f32.mrb[163].mxu1 }
 0x24b   : > { %4297 = vmatmul.mubr.bf16.gmra.mrb[76].mxu0 %v3544_v29  ;;  %4663 = vmatmul.mubr.bf16.gmra.mrb[196].mxu1 %v3544_v29  ;;  %v21276_v59 = vsel %vm2770_vm5, %v2870_v33, %v2876_v23  ;;  %v2379_v13 = vadd.f32 %v20928_v41, %v2272_v8  ;;  %v3569_v16 = vshrl.u32 %v21228_v44, 16  ;;  %v3573_v31 = vshll.u32 %v21270_v57, 16  ;;  %v2017_v62 = vpop.f32.mrb[43].mxu0  ;;  %v2543_v6 = vpop.permute.xlu0 %2542 }
 0x24c   : > { %v2880_v27 = vrot.slane %v2646_v2, 7  ;;  %v21282_v61 = vsel %vm2770_vm5, %v2872_v14, %v2878_v60  ;;  %v2882_v30 = vrot.slane %v21273_v35, 7  ;;  %v2378_v39 = vadd.f32 %v20925_v37, %v2007_v52  ;;  %v2548_v35 = vpop.permute.xlu1 %2547 }
 0x24d   : > { %v21286_v24 = vmul.f32 %v2538_v47, %v2379_v13  ;;  %v3571_v33 = vor.u32 %v3569_v16, %v3551_v22  ;;  %v3575_v36 = vrot.slane %v3573_v31, 1  ;;  %v21290_v8 = vpack.c.bf16 %v21160_v42, %v21152_v28 }
 0x24e   : > { %v2881_v54 = vsel %vm2770_vm5, %v2874_v55, %v2880_v27  ;;  %v21294_v29 = vsel %vm2770_vm5, %v2876_v23, %v2882_v30  ;;  %v2648_v2 = vmul.f32 %v2538_v47, %v2378_v39  ;;  %v3561_v14 = vshrl.u32 %v21250_v1, 16 }
 0x24f   : > { %3096 = vst.msk [vmem:[#allocation2 + $0x1c0] sm:$0xff] %vm3044_vm6, %v2881_v54  ;;  %v2886_v52 = vrot.slane %v21286_v24, 7  ;;  %v3576_v22 = vsel %vm3428_vm8, %v3571_v33, %v3575_v36  ;;  %v3565_v13 = vshll.u32 %v21290_v8, 16  ;;  %v2380_v28 = vadd.f32 %v20922_v4, %v2011_v32  ;;  %v2182_v31 = vpop.f32.mrb[164].mxu1 }
 0x250   : > { %4306 = vmatprep.mubr.bf16.mxu0 %v3576_v22  ;;  %4672 = vmatprep.mubr.bf16.mxu1 %v3576_v22  ;;  %v2884_v42 = vrot.slane %v2648_v2, 7  ;;  %v3563_v55 = vor.u32 %v3561_v14, %v3543_v9  ;;  %v2275_v47 = vadd.f32 %v2174_v10, %v20878_v21  ;;  %v2381_v23 = vadd.f32 %v20925_v37, %v2013_v50  ;;  %v2021_v16 = vpop.f32.mrb[44].mxu0  ;;  %v17640_v44 = vpop.f32.mrb[165].mxu1 }
 0x251   : > { %v2887_v39 = vsel %vm2770_vm5, %v2880_v27, %v2886_v52  ;;  %v3567_v54 = vrot.slane %v3565_v13, 1  ;;  %v2650_v24 = vmul.f32 %v2543_v6, %v2380_v28  ;;  %v2383_v33 = vadd.f32 %v20922_v4, %v2015_v38  ;;  %v2023_v1 = vpop.f32.mrb[45].mxu0  ;;  %v2185_v2 = vpop.f32.mrb[166].mxu1 }
 0x252   : > { %3099 = vst.msk [vmem:[#allocation2 + $0x1d8] sm:$0xff] %vm3044_vm6, %v2887_v39  ;;  %v21308_v32 = vsel %vm2770_vm5, %v2878_v60, %v2884_v42  ;;  %v2382_v9 = vadd.f32 %v20928_v41, %v2275_v47  ;;  %v2651_v21 = vmul.f32 %v2543_v6, %v2381_v23  ;;  %v2278_v10 = vadd.f32 %v2177_v19, %v20881_v26  ;;  %v2025_v50 = vpop.f32.mrb[46].mxu0  ;;  %v17641_v60 = vpop.f32.mrb[167].mxu1 }
 0x253   : > { %v3568_v27 = vsel %vm3428_vm8, %v3563_v55, %v3567_v54  ;;  %v2888_v14 = vrot.slane %v2650_v24, 7  ;;  %v21313_v22 = vmul.f32 %v2548_v35, %v2383_v33  ;;  %v21317_v44 = vpack.c.bf16 %v21221_v63, %v21199_v18  ;;  %v21319_v38 = vpop.f32.mrb[47].mxu0  ;;  %v2553_v33 = vpop.permute.xlu0 %2552 }
 0x254   : > { %4307 = vmatmul.mubr.bf16.gmra.mrb[80].mxu0 %v3568_v27  ;;  %4673 = vmatmul.mubr.bf16.gmra.mrb[200].mxu1 %v3568_v27  ;;  %v2652_v13 = vmul.f32 %v2543_v6, %v2382_v9  ;;  %v2890_v28 = vrot.slane %v2651_v21, 7  ;;  %v2385_v26 = vadd.f32 %v20928_v41, %v2278_v10  ;;  %v3593_v19 = vshrl.u32 %v21270_v57, 16 }
 0x255   : > { %v21324_v55 = vsel %vm2770_vm5, %v2882_v30, %v2888_v14  ;;  %v2894_v47 = vrot.slane %v21313_v22, 7  ;;  %v3597_v23 = vshll.u32 %v21317_v44, 16  ;;  %v2384_v18 = vadd.f32 %v20925_v37, %v2017_v62 }
 0x256   : > { %v2892_v63 = vrot.slane %v2652_v13, 7  ;;  %v21330_v39 = vsel %vm2770_vm5, %v2884_v42, %v2890_v28  ;;  %v2655_v24 = vmul.f32 %v2548_v35, %v2385_v26  ;;  %v3595_v6 = vor.u32 %v3593_v19, %v3575_v36 }
 0x257   : > { %v21333_v9 = vsel %vm2770_vm5, %v2888_v14, %v2894_v47  ;;  %v3599_v21 = vrot.slane %v3597_v23, 1  ;;  %v2654_v10 = vmul.f32 %v2548_v35, %v2384_v18  ;;  %v21337_v30 = vpack.c.bf16 %v21202_v12, %v21195_v49  ;;  %v21344_v36 = vpop.f32.mrb[168].mxu1 }
 0x258   : > { %v2893_v27 = vsel %vm2770_vm5, %v2886_v52, %v2892_v63  ;;  %v2898_v22 = vrot.slane %v2655_v24, 7  ;;  %v3585_v62 = vshrl.u32 %v21290_v8, 16  ;;  %v2386_v42 = vadd.f32 %v20922_v4, %v2021_v16  ;;  %v21342_v60 = vpop.f32.mrb[48].mxu0  ;;  %v17644_v52 = vpop.f32.mrb[169].mxu1 }
 0x259   : > { %3102 = vst.msk [vmem:[#allocation2 + $0x1f0] sm:$0xff] %vm3044_vm6, %v2893_v27  ;;  %v3600_v14 = vsel %vm3428_vm8, %v3595_v6, %v3599_v21  ;;  %v2896_v35 = vrot.slane %v2654_v10, 7  ;;  %v3589_v13 = vshll.u32 %v21337_v30, 16  ;;  %v2281_v49 = vadd.f32 %v2182_v31, %v20884_v34  ;;  %v21350_v12 = vpop.f32.mrb[49].mxu0  ;;  %v2193_v24 = vpop.f32.mrb[170].mxu1 }
 0x25a   : > { %v2899_v26 = vsel %vm2770_vm5, %v2892_v63, %v2898_v22  ;;  %4316 = vmatprep.mubr.bf16.mxu0 %v3600_v14  ;;  %4682 = vmatprep.mubr.bf16.mxu1 %v3600_v14  ;;  %v3587_v16 = vor.u32 %v3585_v62, %v3567_v54  ;;  %v2656_v19 = vmul.f32 %v2553_v33, %v2386_v42  ;;  %v3617_v23 = vshrl.u32 %v21317_v44, 16  ;;  %v2035_v18 = vpop.f32.mrb[50].mxu0  ;;  %v17645_v63 = vpop.f32.mrb[171].mxu1 }
 0x25b   : > { %3105 = vst.msk [vmem:[#allocation2 + $0x208] sm:$0xff] %vm3044_vm6, %v2899_v26  ;;  %v21356_v6 = vsel %vm2770_vm5, %v2890_v28, %v2896_v35  ;;  %v3591_v10 = vrot.slane %v3589_v13, 1  ;;  %v2388_v34 = vadd.f32 %v20928_v41, %v2281_v49  ;;  %v2387_v31 = vadd.f32 %v20925_v37, %v2023_v1  ;;  %v21360_v27 = vpop.f32.mrb[51].mxu0  ;;  %v2558_v52 = vpop.permute.xlu1 %2557 }
 0x25c   : > { %v2900_v14 = vrot.slane %v2656_v19, 7  ;;  %v2389_v54 = vadd.f32 %v20922_v4, %v2025_v50  ;;  %v2284_v62 = vadd.f32 %v2185_v2, %v20887_v40  ;;  %v21366_v42 = vpack.c.bf16 %v21265_v43, %v21239_v45 }
 0x25d   : > { %v3592_v28 = vsel %vm3428_vm8, %v3587_v16, %v3591_v10  ;;  %v2658_v13 = vmul.f32 %v2553_v33, %v2388_v34  ;;  %v2657_v26 = vmul.f32 %v2553_v33, %v2387_v31  ;;  %v3619_v49 = vor.u32 %v3617_v23, %v3599_v21 }
 0x25e   : > { %4317 = vmatmul.mubr.bf16.gmra.mrb[84].mxu0 %v3592_v28  ;;  %4683 = vmatmul.mubr.bf16.gmra.mrb[204].mxu1 %v3592_v28  ;;  %v21370_v1 = vsel %vm2770_vm5, %v2894_v47, %v2900_v14  ;;  %v21372_v19 = vmul.f32 %v2558_v52, %v2389_v54  ;;  %v2391_v50 = vadd.f32 %v20928_v41, %v2284_v62  ;;  %v3621_v40 = vshll.u32 %v21366_v42, 16 }
 0x25f   : > { %v2904_v2 = vrot.slane %v2658_v13, 7  ;;  %v2902_v45 = vrot.slane %v2657_v26, 7  ;;  %v2390_v43 = vadd.f32 %v20925_v37, %v21319_v38  ;;  %v21380_v33 = vpack.c.bf16 %v21246_v0, %v21234_v3  ;;  %v21388_v31 = vpop.f32.mrb[172].mxu1 }
 0x260   : > { %v2906_v21 = vrot.slane %v21372_v19, 7  ;;  %v21383_v16 = vmul.f32 %v2558_v52, %v2391_v50  ;;  %v3623_v47 = vrot.slane %v3621_v40, 1  ;;  %v3609_v23 = vshrl.u32 %v21337_v30, 16  ;;  %v21386_v34 = vpop.f32.mrb[52].mxu0  ;;  %v17648_v62 = vpop.f32.mrb[173].mxu1 }
 0x261   : > { %v2905_v63 = vsel %vm2770_vm5, %v2898_v22, %v2904_v2  ;;  %v21392_v54 = vsel %vm2770_vm5, %v2896_v35, %v2902_v45  ;;  %v2660_v38 = vmul.f32 %v2558_v52, %v2390_v43  ;;  %v3613_v3 = vshll.u32 %v21380_v33, 16  ;;  %v21395_v0 = vpop.f32.mrb[53].mxu0  ;;  %v21405_v35 = vpop.f32.mrb[174].mxu1 }
 0x262   : > { %3108 = vst.msk [vmem:[#allocation2 + $0x220] sm:$0xff] %vm3044_vm6, %v2905_v63  ;;  %v21399_v28 = vsel %vm2770_vm5, %v2900_v14, %v2906_v21  ;;  %v2910_v13 = vrot.slane %v21383_v16, 7  ;;  %v3624_v26 = vsel %vm3428_vm8, %v3619_v49, %v3623_v47  ;;  %v3611_v19 = vor.u32 %v3609_v23, %v3591_v10  ;;  %v21403_v22 = vpop.f32.mrb[54].mxu0  ;;  %v17649_v16 = vpop.f32.mrb[175].mxu1 }
 0x263   : > { %4326 = vmatprep.mubr.bf16.mxu0 %v3624_v26  ;;  %4692 = vmatprep.mubr.bf16.mxu1 %v3624_v26  ;;  %v2908_v52 = vrot.slane %v2660_v38, 7  ;;  %v3615_v50 = vrot.slane %v3613_v3, 1  ;;  %v2392_v40 = vadd.f32 %v20922_v4, %v21342_v60  ;;  %v2287_v14 = vadd.f32 %v21344_v36, %v20890_v51  ;;  %v21411_v43 = vpop.f32.mrb[55].mxu0  ;;  %v2563_v63 = vpop.permute.xlu0 %2562 }
 0x264   : > { %v2911_v10 = vsel %vm2770_vm5, %v2904_v2, %v2910_v13  ;;  %v2393_v49 = vadd.f32 %v20925_v37, %v21350_v12  ;;  %v2395_v23 = vadd.f32 %v20922_v4, %v2035_v18  ;;  %v2290_v38 = vadd.f32 %v2193_v24, %v20893_v56  ;;  %v2568_v3 = vpop.permute.xlu1 %2567 }
 0x265   : > { %3111 = vst.msk [vmem:[#allocation2 + $0x238] sm:$0xff] %vm3044_vm6, %v2911_v10  ;;  %v21420_v60 = vsel %vm2770_vm5, %v2902_v45, %v2908_v52  ;;  %v3616_v51 = vsel %vm3428_vm8, %v3611_v19, %v3615_v50  ;;  %v2662_v36 = vmul.f32 %v2563_v63, %v2392_v40  ;;  %v2394_v62 = vadd.f32 %v20928_v41, %v2287_v14 }
 0x266   : > { %4327 = vmatmul.mubr.bf16.gmra.mrb[88].mxu0 %v3616_v51  ;;  %4693 = vmatmul.mubr.bf16.gmra.mrb[208].mxu1 %v3616_v51  ;;  %v2663_v2 = vmul.f32 %v2563_v63, %v2393_v49  ;;  %v21424_v26 = vmul.f32 %v2568_v3, %v2395_v23  ;;  %v2397_v12 = vadd.f32 %v20928_v41, %v2290_v38  ;;  %v3641_v56 = vshrl.u32 %v21366_v42, 16 }
 0x267   : > { %v2912_v18 = vrot.slane %v2662_v36, 7  ;;  %v2664_v24 = vmul.f32 %v2563_v63, %v2394_v62  ;;  %v21430_v45 = vpack.c.bf16 %v21308_v32, %v21282_v61  ;;  %v2396_v19 = vadd.f32 %v20925_v37, %v21360_v27  ;;  %v21439_v23 = vpop.f32.mrb[176].mxu1 }
 0x268   : > { %v2914_v40 = vrot.slane %v2663_v2, 7  ;;  %v2918_v14 = vrot.slane %v21424_v26, 7  ;;  %v21435_v16 = vmul.f32 %v2568_v3, %v2397_v12  ;;  %v3643_v10 = vor.u32 %v3641_v56, %v3623_v47  ;;  %v21437_v49 = vpop.f32.mrb[56].mxu0  ;;  %v17652_v27 = vpop.f32.mrb[177].mxu1 }
 0x269   : > { %v21442_v38 = vsel %vm2770_vm5, %v2906_v21, %v2912_v18  ;;  %v2916_v63 = vrot.slane %v2664_v24, 7  ;;  %v3645_v61 = vshll.u32 %v21430_v45, 16  ;;  %v2666_v32 = vmul.f32 %v2568_v3, %v2396_v19  ;;  %v21445_v51 = vpop.f32.mrb[57].mxu0  ;;  %v21460_v26 = vpop.f32.mrb[178].mxu1 }
 0x26a   : > { %v21448_v36 = vsel %vm2770_vm5, %v2908_v52, %v2914_v40  ;;  %v21451_v62 = vsel %vm2770_vm5, %v2912_v18, %v2918_v14  ;;  %v2922_v47 = vrot.slane %v21435_v16, 7  ;;  %v21456_v2 = vpack.c.bf16 %v21294_v29, %v21276_v59  ;;  %v21458_v21 = vpop.f32.mrb[58].mxu0  ;;  %v17653_v18 = vpop.f32.mrb[179].mxu1 }
 0x26b   : > { %v2917_v3 = vsel %vm2770_vm5, %v2910_v13, %v2916_v63  ;;  %v3647_v12 = vrot.slane %v3645_v61, 1  ;;  %v2920_v56 = vrot.slane %v2666_v32, 7  ;;  %v3633_v52 = vshrl.u32 %v21380_v33, 16  ;;  %v21464_v24 = vpop.f32.mrb[59].mxu0  ;;  %v2573_v13 = vpop.permute.xlu0 %2572 }
 0x26c   : > { %3114 = vst.msk [vmem:[#allocation2 + $0x250] sm:$0xff] %vm3044_vm6, %v2917_v3  ;;  %v2923_v19 = vsel %vm2770_vm5, %v2916_v63, %v2922_v47  ;;  %v3637_v59 = vshll.u32 %v21456_v2, 16  ;;  %v2398_v29 = vadd.f32 %v20922_v4, %v21386_v34  ;;  %v2293_v16 = vadd.f32 %v21388_v31, %v20896_v5  ;;  %v2578_v31 = vpop.permute.xlu1 %2577 }
 0x26d   : > { %3117 = vst.msk [vmem:[#allocation2 + $0x268] sm:$0xff] %vm3044_vm6, %v2923_v19  ;;  %v3648_v61 = vsel %vm3428_vm8, %v3643_v10, %v3647_v12  ;;  %v21476_v32 = vsel %vm2770_vm5, %v2914_v40, %v2920_v56  ;;  %v3635_v27 = vor.u32 %v3633_v52, %v3615_v50  ;;  %v2399_v63 = vadd.f32 %v20925_v37, %v21395_v0 }
 0x26e   : > { %4336 = vmatprep.mubr.bf16.mxu0 %v3648_v61  ;;  %4702 = vmatprep.mubr.bf16.mxu1 %v3648_v61  ;;  %v3639_v3 = vrot.slane %v3637_v59, 1  ;;  %v2668_v18 = vmul.f32 %v2573_v13, %v2398_v29  ;;  %v2400_v34 = vadd.f32 %v20928_v41, %v2293_v16  ;;  %v2401_v5 = vadd.f32 %v20922_v4, %v21403_v22 }
 0x26f   : > { %v2669_v19 = vmul.f32 %v2573_v13, %v2399_v63  ;;  %v2296_v10 = vadd.f32 %v21405_v35, %v20899_v11  ;;  %v21487_v50 = vpack.c.bf16 %v21356_v6, %v21330_v39  ;;  %v3665_v0 = vshrl.u32 %v21430_v45, 16 }
 0x270   : > { %v3640_v40 = vsel %vm3428_vm8, %v3635_v27, %v3639_v3  ;;  %v2924_v52 = vrot.slane %v2668_v18, 7  ;;  %v2670_v59 = vmul.f32 %v2573_v13, %v2400_v34  ;;  %v2671_v29 = vmul.f32 %v2578_v31, %v2401_v5 }
 0x271   : > { %4337 = vmatmul.mubr.bf16.gmra.mrb[92].mxu0 %v3640_v40  ;;  %4703 = vmatmul.mubr.bf16.gmra.mrb[212].mxu1 %v3640_v40  ;;  %v2926_v16 = vrot.slane %v2669_v19, 7  ;;  %v2403_v22 = vadd.f32 %v20928_v41, %v2296_v10  ;;  %v3667_v61 = vor.u32 %v3665_v0, %v3647_v12  ;;  %v3669_v63 = vshll.u32 %v21487_v50, 16 }
 0x272   : > { %v21494_v11 = vsel %vm2770_vm5, %v2918_v14, %v2924_v52  ;;  %v2928_v39 = vrot.slane %v2670_v59, 7  ;;  %v2930_v6 = vrot.slane %v2671_v29, 7  ;;  %v2402_v35 = vadd.f32 %v20925_v37, %v21411_v43 }
 0x273   : > { %v21499_v27 = vsel %vm2770_vm5, %v2920_v56, %v2926_v16  ;;  %v2673_v13 = vmul.f32 %v2578_v31, %v2403_v22  ;;  %v3671_v18 = vrot.slane %v3669_v63, 1  ;;  %v21503_v34 = vpack.c.bf16 %v21333_v9, %v21324_v55  ;;  %v2583_v55 = vpop.permute.xlu0 %2582 }
 0x274   : > { %v2929_v12 = vsel %vm2770_vm5, %v2922_v47, %v2928_v39  ;;  %v21507_v5 = vsel %vm2770_vm5, %v2924_v52, %v2930_v6  ;;  %v2672_v14 = vmul.f32 %v2578_v31, %v2402_v35  ;;  %v3657_v19 = vshrl.u32 %v21456_v2, 16 }
 0x275   : > { %3120 = vst.msk [vmem:[#allocation2 + $0x280] sm:$0xff] %vm3044_vm6, %v2929_v12  ;;  %v2934_v43 = vrot.slane %v2673_v13, 7  ;;  %v3672_v56 = vsel %vm3428_vm8, %v3667_v61, %v3671_v18  ;;  %v3661_v10 = vshll.u32 %v21503_v34, 16  ;;  %v2404_v0 = vadd.f32 %v20922_v4, %v21437_v49  ;;  %v2588_v61 = vpop.permute.xlu1 %2587 }
 0x276   : > { %4346 = vmatprep.mubr.bf16.mxu0 %v3672_v56  ;;  %4712 = vmatprep.mubr.bf16.mxu1 %v3672_v56  ;;  %v2932_v9 = vrot.slane %v2672_v14, 7  ;;  %v3659_v47 = vor.u32 %v3657_v19, %v3639_v3  ;;  %v2299_v31 = vadd.f32 %v21439_v23, %v20904_v17  ;;  %v2405_v40 = vadd.f32 %v20925_v37, %v21445_v51 }
 0x277   : > { %v2935_v52 = vsel %vm2770_vm5, %v2928_v39, %v2934_v43  ;;  %v3663_v59 = vrot.slane %v3661_v10, 1  ;;  %v2674_v29 = vmul.f32 %v2583_v55, %v2404_v0  ;;  %v2407_v22 = vadd.f32 %v20922_v4, %v21458_v21 }
 0x278   : > { %3123 = vst.msk [vmem:[#allocation2 + $0x298] sm:$0xff] %vm3044_vm6, %v2935_v52  ;;  %v2933_v49 = vsel %vm2770_vm5, %v2926_v16, %v2932_v9  ;;  %v2406_v3 = vadd.f32 %v20928_v41, %v2299_v31  ;;  %v2675_v63 = vmul.f32 %v2583_v55, %v2405_v40  ;;  %v2302_v17 = vadd.f32 %v21460_v26, %v20916_v53 }
 0x279   : > { %v3664_v23 = vsel %vm3428_vm8, %v3659_v47, %v3663_v59  ;;  %v2936_v51 = vrot.slane %v2674_v29, 7  ;;  %v2677_v39 = vmul.f32 %v2588_v61, %v2407_v22  ;;  %v21530_v35 = vpack.c.bf16 %v21420_v60, %v21392_v54 }
 0x27a   : > { %4347 = vmatmul.mubr.bf16.gmra.mrb[96].mxu0 %v3664_v23  ;;  %4713 = vmatmul.mubr.bf16.gmra.mrb[216].mxu1 %v3664_v23  ;;  %v2676_v4 = vmul.f32 %v2583_v55, %v2406_v3  ;;  %v2938_v21 = vrot.slane %v2675_v63, 7  ;;  %v2409_v16 = vadd.f32 %v20928_v41, %v2302_v17  ;;  %v3689_v13 = vshrl.u32 %v21487_v50, 16  ;;  %v15910_v3 = vld [vmem:[%s25766_s5 + $0x458] sm:$0xff] }
 0x27b   : > { %v21535_v12 = vsel %vm2770_vm5, %v2930_v6, %v2936_v51  ;;  %v2942_v53 = vrot.slane %v2677_v39, 7  ;;  %v3693_v26 = vshll.u32 %v21530_v35, 16  ;;  %v2408_v14 = vadd.f32 %v20925_v37, %v21464_v24 }
 0x27c   : > { %3124 = vst [vmem:[#allocation2 + $0x2a0] sm:$0xff] %v21535_v12  ;;  %v2940_v54 = vrot.slane %v2676_v4, 7  ;;  %v21542_v60 = vsel %vm2770_vm5, %v2932_v9, %v2938_v21  ;;  %v2679_v19 = vmul.f32 %v2588_v61, %v2409_v16  ;;  %v3691_v56 = vor.u32 %v3689_v13, %v3671_v18 }
 0x27d   : > { %3125 = vst [vmem:[#allocation2 + $0x2a8] sm:$0xff] %v21542_v60  ;;  %v2943_v41 = vsel %vm2770_vm5, %v2936_v51, %v2942_v53  ;;  %v3695_v6 = vrot.slane %v3693_v26, 1  ;;  %v2678_v10 = vmul.f32 %v2588_v61, %v2408_v14  ;;  %v21548_v0 = vpack.c.bf16 %v21399_v28, %v21370_v1 }
 0x27e   : > { %v2941_v37 = vsel %vm2770_vm5, %v2934_v43, %v2940_v54  ;;  %3127 = vst [vmem:[#allocation2 + $0x2b8] sm:$0x7f] %v2943_v41  ;;  %v2946_v24 = vrot.slane %v2679_v19, 7  ;;  %v21553_v55 = vpack.c.bf16 %v21476_v32, %v21448_v36  ;;  %v3681_v47 = vshrl.u32 %v21503_v34, 16 }
 0x27f   : > { %3126 = vst.msk [vmem:[#allocation2 + $0x2b0] sm:$0xff] %vm3044_vm6, %v2941_v37  ;;  %v3696_v18 = vsel %vm3428_vm8, %v3691_v56, %v3695_v6  ;;  %v2944_v9 = vrot.slane %v2678_v10, 7  ;;  %v3685_v31 = vshll.u32 %v21548_v0, 16  ;;  %v3713_v28 = vshrl.u32 %v21530_v35, 16 }
 0x280   : > { %v2947_v1 = vsel %vm2770_vm5, %v2940_v54, %v2946_v24  ;;  %4356 = vmatprep.mubr.bf16.mxu0 %v3696_v18  ;;  %4722 = vmatprep.mubr.bf16.mxu1 %v3696_v18  ;;  %v3717_v43 = vshll.u32 %v21553_v55, 16  ;;  %v21564_v36 = vpack.c.bf16 %v21451_v62, %v21442_v38  ;;  %v3683_v40 = vor.u32 %v3681_v47, %v3663_v59 }
 0x281   : > { %3130 = vst.msk [vmem:[#allocation2 + $0x2c8] sm:$0x7f] %vm3129_vm9, %v2947_v1  ;;  %v2945_v32 = vsel %vm2770_vm5, %v2938_v21, %v2944_v9  ;;  %v3687_v52 = vrot.slane %v3685_v31, 1  ;;  %v3715_v29 = vor.u32 %v3713_v28, %v3695_v6  ;;  %v21568_v61 = vpack.c.bf16 %v2933_v49, %v21499_v27 }
 0x282   : > { %3128 = vst [vmem:[#allocation2 + $0x2c0] sm:$0x7f] %v2945_v32  ;;  %v3719_v22 = vrot.slane %v3717_v43, 1  ;;  %v3709_v38 = vshll.u32 %v21564_v36, 16  ;;  %v21577_v62 = vpack.c.bf16 %v21507_v5, %v21494_v11  ;;  %v15982_v27 = vcombine.high %v15910_v3, %v15910_v3  ;;  %v19076_v11 = vld [vmem:[%s25766_s5 + $0xc] ss:$16 sps:$4 sm:$0xff]  }
 0x283   : > { %v3688_v63 = vsel %vm3428_vm8, %v3683_v40, %v3687_v52  ;;  %v3741_v17 = vshll.u32 %v21568_v61, 16  ;;  %v3737_v49 = vshrl.u32 %v21553_v55, 16  ;;  %v3705_v51 = vshrl.u32 %v21548_v0, 16 }
 0x284   : > { %4357 = vmatmul.mubr.bf16.gmra.mrb[100].mxu0 %v3688_v63  ;;  %4723 = vmatmul.mubr.bf16.gmra.mrb[220].mxu1 %v3688_v63  ;;  %v3720_v59 = vsel %vm3428_vm8, %v3715_v29, %v3719_v22  ;;  %v3711_v39 = vrot.slane %v3709_v38, 1  ;;  %v15981_v4 = vcombine.low %v15910_v3, %v15910_v3  ;;  %v3733_v54 = vshll.u32 %v21577_v62, 16  ;;  %v21598_v29 = vld [vmem:[#allocation2 + $0x28] sm:$0xff]  ;;  %v3151_v3 = vld [vmem:[#allocation2 + $0x58] sm:$0xff]  ;;  %v3347_v63 = vld [vmem:[#allocation2 + $0x10] sm:$0xfe] }
 0x285   : > { %4366 = vmatprep.mubr.bf16.mxu0 %v3720_v59  ;;  %4732 = vmatprep.mubr.bf16.mxu1 %v3720_v59  ;;  %v3743_v23 = vrot.slane %v3741_v17, 1  ;;  %v3739_v5 = vor.u32 %v3737_v49, %v3719_v22  ;;  %v3707_v21 = vor.u32 %v3705_v51, %v3687_v52  ;;  %v3348_v56 = vld [vmem:[#allocation2 + $0x2b8] sm:$0x7f]  ;;  %v3761_v41 = vshrl.u32 %v21568_v61, 16  ;;  %v3148_v59 = vld [vmem:[#allocation2 + $0x40] sm:$0xff] }
 0x286   : > { %15999 = vmatprep.subr.msk.bf16.mxu1 %vm4211_vm7, %v15982_v27  ;;  %v4219_v13 = vsel %vm4211_vm7, %v15981_v4, 0  ;;  %v3729_v10 = vshrl.u32 %v21564_v36, 16  ;;  %v3735_v37 = vrot.slane %v3733_v54, 1  ;;  %v3425_v24 = vpack.c.bf16 %v3348_v56, %v21535_v12  ;;  %v19074_v56 = vld [vmem:[%s25766_s5 + $0x8] ss:$16 sps:$4 sm:$0xff]  }
 0x287   : > { %v3744_v53 = vsel %vm3428_vm8, %v3739_v5, %v3743_v23  ;;  %4776 = vmatpush1.bf16.msra.mxu1 %v4219_v13  ;;  %v3712_v14 = vsel %vm3428_vm8, %v3707_v21, %v3711_v39  ;;  %v3763_v18 = vor.u32 %v3761_v41, %v3743_v23  ;;  %v3753_v28 = vshrl.u32 %v21577_v62, 16  ;;  %v3154_v5 = vld [vmem:[#allocation2 + $0x70] sm:$0xff]  ;;  %v3163_v41 = vld [vmem:[#allocation2 + $0xb8] sm:$0xff] }
 0x288   : > { %5716 = vmatprep.subr.bf16.mxu1 %v19076_v11  ;;  %v3731_v9 = vor.u32 %v3729_v10, %v3711_v39  ;;  %v3757_v1 = vshll.u32 %v3425_v24, 16  ;;  %v3424_v38 = vpack.c.bf16 %v21598_v29, %v3347_v63  ;;  %v21602_v17 = vpack.c.bf16 %v3151_v3, %v3148_v59  ;;  %v3157_v39 = vld [vmem:[#allocation2 + $0x88] sm:$0xff]  ;;  %v19056_v10 = vld [vmem:[%s25766_s5 + $0x20] ss:$16 sps:$4 sm:$0xff]  }
 0x289   : > { %v3349_v16 = vld [vmem:[#allocation2 + $0x2c0] sm:$0x7f]  ;;  %v3755_v40 = vor.u32 %v3753_v28, %v3735_v37  ;;  %v3777_v27 = vshrl.u32 %v3425_v24, 16  ;;  %v25776_v4 = vmov 0   ;;  %v21607_v13 = vpack.c.bf16 %v3157_v39, %v3154_v5  ;;  %v3169_v3 = vld [vmem:[#allocation2 + $0xe8] sm:$0xff] }
 0x28a   : > { %v3426_v26 = vpack.c.bf16 %v3349_v16, %v21542_v60  ;;  %v3736_v31 = vsel %vm3428_vm8, %v3731_v9, %v3735_v37  ;;  %v3759_v43 = vrot.slane %v3757_v1, 1  ;;  %v3456_v49 = vshll.u32 %v3424_v38, 16  ;;  %v3160_v37 = vld [vmem:[#allocation2 + $0xa0] sm:$0xff]  ;;  %v19091_v63 = vld [vmem:[%s25766_s5 + $0x6c] ss:$16 sps:$4 sm:$0xff]  }
 0x28b   : > { %v3461_v51 = vshll.u32 %v21602_v17, 16  ;;  %v3454_v21 = vshrl.u32 %v3424_v38, 16  ;;  %v19061_v24 = vld [vmem:[%s25766_s5 + $0x44] ss:$16 sps:$4 sm:$0xff]   ;;  %v19059_v28 = vld [vmem:[%s25766_s5 + $0x40] ss:$16 sps:$4 sm:$0xff]  }
 0x28c   : > { %4367 = vmatmul.mubr.bf16.gmra.mrb[104].mxu0 %v3712_v14  ;;  %4733 = vmatmul.mubr.bf16.gmra.mrb[224].mxu1 %v3712_v14  ;;  %v3765_v19 = vshll.u32 %v3426_v26, 16  ;;  %v3780_v32 = vshrl.u32 %v3426_v26, 16  ;;  %v3760_v22 = vsel %vm3428_vm8, %v3755_v40, %v3759_v43  ;;  %v3779_v23 = vor.u32 %v3777_v27, %v3759_v43  ;;  %v19053_v26 = vld [vmem:[%s25766_s5] ss:$16 sps:$4 sm:$0xff]   ;;  %v19058_v14 = vld [vmem:[%s25766_s5 + $0x24] ss:$16 sps:$4 sm:$0xff]  }
 0x28d   : > { %4376 = vmatprep.mubr.bf16.mxu0 %v3744_v53  ;;  %4742 = vmatprep.mubr.bf16.mxu1 %v3744_v53  ;;  %v3458_v11 = vrot.slane %v3456_v49, 1  ;;  %v3463_v16 = vrot.slane %v3461_v51, 1  ;;  %v19088_v43 = vld [vmem:[%s25766_s5 + $0x4c] ss:$16 sps:$4 sm:$0xff]   ;;  %v3166_v38 = vld [vmem:[#allocation2 + $0xd0] sm:$0xff]  ;;  %v3505_v27 = vshrl.u32 %v21607_v13, 16 }
 0x28e   : > { %v3767_v6 = vrot.slane %v3765_v19, 1  ;;  %v3485_v19 = vshll.u32 %v21607_v13, 16  ;;  %v19062_v59 = vld [vmem:[%s25766_s5 + $0x60] ss:$16 sps:$4 sm:$0xff]   ;;  %v19067_v51 = vld [vmem:[%s25766_s5 + $0x84] ss:$16 sps:$4 sm:$0xff]  }
 0x28f   : > { %v3459_v53 = vor.u32 %v3458_v11, %v3454_v21  ;;  %v19089_v39 = vld [vmem:[%s25766_s5 + $0x68] ss:$16 sps:$4 sm:$0xff]   ;;  %v19065_v5 = vld [vmem:[%s25766_s5 + $0x80] ss:$16 sps:$4 sm:$0xff]   ;;  %v19097_v21 = vld [vmem:[%s25766_s5 + $0x8c] ss:$16 sps:$4 sm:$0xff]  }
 0x290   : > { %v3768_v47 = vsel %vm3428_vm8, %v3763_v18, %v3767_v6  ;;  %v3782_v52 = vor.u32 %v3780_v32, %v3767_v6  ;;  %v19082_v6 = vld [vmem:[%s25766_s5 + $0x2c] ss:$16 sps:$4 sm:$0xff]   ;;  %v3481_v18 = vshrl.u32 %v21602_v17, 16  ;;  %v3487_v9 = vrot.slane %v3485_v19, 1 }
 0x291   : > { %v3464_v54 = vsel %vm3428_vm8, %v3459_v53, %v3463_v16  ;;  %v19100_v19 = vld [vmem:[%s25766_s5 + $0xac] ss:$16 sps:$4 sm:$0xff]   ;;  %vm14808_vm5 = vcmask 982016  }
 0x292   : > { %v3483_v1 = vor.u32 %v3481_v18, %v3463_v16  ;;  %v3507_v11 = vor.u32 %v3505_v27, %v3487_v9  ;;  %v19098_v18 = vld [vmem:[%s25766_s5 + $0xa8] ss:$16 sps:$4 sm:$0xff]  }
 0x294   : > { %4377 = vmatmul.mubr.bf16.gmra.mrb[108].mxu0 %v3736_v31  ;;  %4743 = vmatmul.mubr.bf16.gmra.mrb[228].mxu1 %v3736_v31  ;;  %v19080_v31 = vld [vmem:[%s25766_s5 + $0x28] ss:$16 sps:$4 sm:$0xff]   ;;  %v3488_v32 = vsel %vm3428_vm8, %v3483_v1, %v3487_v9  ;;  %v19106_v1 = vld [vmem:[%s25766_s5 + $0xcc] ss:$16 sps:$4 sm:$0xff]  }
 0x295   : > { %4386 = vmatprep.mubr.bf16.mxu0 %v3768_v47  ;;  %4752 = vmatprep.mubr.bf16.mxu1 %v3768_v47  ;;  %v21634_v47 = vpack.c.bf16 %v3163_v41, %v3160_v37  ;;  %v19068_v41 = vld [vmem:[%s25766_s5 + $0xa0] ss:$16 sps:$4 sm:$0xff]  }
 0x297   : > { %v3509_v40 = vshll.u32 %v21634_v47, 16 }
 0x299   : > { %v3511_v49 = vrot.slane %v3509_v40, 1  ;;  %v19104_v40 = vld [vmem:[%s25766_s5 + $0xc8] ss:$16 sps:$4 sm:$0xff]  }
 0x29b   : > { %v3512_v16 = vsel %vm3428_vm8, %v3507_v11, %v3511_v49  ;;  %v19083_v11 = vld [vmem:[%s25766_s5 + $0x100] ss:$16 sps:$4 sm:$0xff]  }
 0x29c   : > { %4387 = vmatmul.mubr.bf16.gmra.mrb[112].mxu0 %v3760_v22  ;;  %4753 = vmatmul.mubr.bf16.gmra.mrb[232].mxu1 %v3760_v22  ;;  %v19086_v22 = vld [vmem:[%s25766_s5 + $0x48] ss:$16 sps:$4 sm:$0xff]  }
 0x29d   : > { %4396 = vmatprep.mubr.bf16.mxu0 %v3782_v52  ;;  %4762 = vmatprep.mubr.bf16.mxu1 %v3782_v52  ;;  %v19064_v52 = vld [vmem:[%s25766_s5 + $0x64] ss:$16 sps:$4 sm:$0xff]  }
 0x2a4   : > { %4397 = vmatmul.mubr.bf16.gmra.mrb[116].mxu0 %v3779_v23  ;;  %4763 = vmatmul.mubr.bf16.gmra.mrb[236].mxu1 %v3779_v23  ;;  %v21664_v23 = vpack.c.bf16 %v3169_v3, %v3166_v38  ;;  %v3178_v3 = vld [vmem:[#allocation2 + $0x130] sm:$0xff] }
 0x2a5   : > { %4439 = vmatprep.mubr.bf16.mxu0 %v25776_v4  ;;  %4805 = vmatprep.mubr.bf16.mxu1 %v25776_v4 }
 0x2a6   : > { %v3533_v53 = vshll.u32 %v21664_v23, 16  ;;  %v3553_v38 = vshrl.u32 %v21664_v23, 16 }
 0x2ac   : > { %15984 = vmatmul.mubr.msk.bf16.vlgmr.msra.gmra.mrb[60].mxu0 %vm3044_vm6, %v3464_v54  ;;  %16000 = vmatmul.mubr.msk.bf16.vlgmr.msra.gmra.mrb[180].mxu1 %vm3044_vm6, %v3464_v54  ;;  %v3175_v54 = vld [vmem:[#allocation2 + $0x118] sm:$0xff] }
 0x2ad   : > { %5351 = vmatpush1.bf16.msra.mxu0 %v19053_v26  ;;  %4449 = vmatprep.mubr.bf16.mxu0 %v25776_v4  ;;  %v19070_v26 = vld [vmem:[%s25766_s5 + $0xa4] ss:$16 sps:$4 sm:$0xff]  }
 0x2ae   : > { %4815 = vmatprep.mubr.bf16.mxu1 %v25776_v4  ;;  %5352 = vmatprep.subr.bf16.mxu0 %v19058_v14  ;;  %v19095_v14 = vld [vmem:[%s25766_s5 + $0x88] ss:$16 sps:$4 sm:$0xff]  }
 0x2af   : > { %5717 = vmatpush1.bf16.msra.mxu1 %v19074_v56  ;;  %v3172_v56 = vld [vmem:[#allocation2 + $0x100] sm:$0xff] }
 0x2b0   : > { %5718 = vmatprep.subr.bf16.mxu1 %v19082_v6  ;;  %v3529_v6 = vshrl.u32 %v21634_v47, 16  ;;  %v21697_v37 = vpack.c.bf16 %v3175_v54, %v3172_v56  ;;  %v19118_v54 = vld [vmem:[%s25766_s5 + $0x12c] ss:$16 sps:$4 sm:$0xff]   ;;  %v19092_v56 = vld [vmem:[%s25766_s5 + $0x120] ss:$16 sps:$4 sm:$0xff]  }
 0x2b1   : > { %5353 = vmatpush1.bf16.msra.mxu0 %v19056_v10  ;;  %v3535_v10 = vrot.slane %v3533_v53, 1  ;;  %v19094_v53 = vld [vmem:[%s25766_s5 + $0x124] ss:$16 sps:$4 sm:$0xff]  }
 0x2b2   : > { %5354 = vmatprep.subr.bf16.mxu0 %v19061_v24  ;;  %v19073_v24 = vld [vmem:[%s25766_s5 + $0xc4] ss:$16 sps:$4 sm:$0xff]   ;;  %v3531_v9 = vor.u32 %v3529_v6, %v3511_v49 }
 0x2b3   : > { %5719 = vmatpush1.bf16.msra.mxu1 %v19080_v31  ;;  %v19071_v31 = vld [vmem:[%s25766_s5 + $0xc0] ss:$16 sps:$4 sm:$0xff]   ;;  %v19085_v49 = vld [vmem:[%s25766_s5 + $0x104] ss:$16 sps:$4 sm:$0xff]  }
 0x2b4   : > { %15985 = vmatmul.mubr.msk.bf16.gmra.mrb[64].mxu0 %vm3044_vm6, %v3488_v32  ;;  %16001 = vmatmul.mubr.msk.bf16.gmra.mrb[184].mxu1 %vm3044_vm6, %v3488_v32  ;;  %v19079_v32 = vld [vmem:[%s25766_s5 + $0xe4] ss:$16 sps:$4 sm:$0xff]  }
 0x2b5   : > { %4459 = vmatprep.mubr.bf16.mxu0 %v25776_v4  ;;  %4825 = vmatprep.mubr.bf16.mxu1 %v25776_v4 }
 0x2b6   : > { %5355 = vmatpush1.bf16.msra.mxu0 %v19059_v28  ;;  %5720 = vmatprep.subr.bf16.mxu1 %v19088_v43  ;;  %v3536_v28 = vsel %vm3428_vm8, %v3531_v9, %v3535_v10  ;;  %v3557_v43 = vshll.u32 %v21697_v37, 16 }
 0x2b7   : > { %5356 = vmatprep.subr.bf16.mxu0 %v19064_v52  ;;  %5721 = vmatpush1.bf16.msra.mxu1 %v19086_v22  ;;  %v3181_v52 = vld [vmem:[#allocation2 + $0x148] sm:$0xff] }
 0x2b8   : > { %5722 = vmatprep.subr.bf16.mxu1 %v19091_v63  ;;  %v19109_v22 = vld [vmem:[%s25766_s5 + $0xec] ss:$16 sps:$4 sm:$0xff]   ;;  %v19077_v63 = vld [vmem:[%s25766_s5 + $0xe0] ss:$16 sps:$4 sm:$0xff]   ;;  %v21730_v27 = vpack.c.bf16 %v3181_v52, %v3178_v3 }
 0x2b9   : > { %v3193_v52 = vld [vmem:[#allocation2 + $0x1a8] sm:$0xff]  ;;  %v3190_v3 = vld [vmem:[#allocation2 + $0x190] sm:$0xff] }
 0x2ba   : > { %5357 = vmatpush1.bf16.msra.mxu0 %v19062_v59  ;;  %v3559_v59 = vrot.slane %v3557_v43, 1 }
 0x2bb   : > { %5358 = vmatprep.subr.bf16.mxu0 %v19067_v51  ;;  %5723 = vmatpush1.bf16.msra.mxu1 %v19089_v39  ;;  %v19107_v51 = vld [vmem:[%s25766_s5 + $0xe8] ss:$16 sps:$4 sm:$0xff]   ;;  %v3555_v39 = vor.u32 %v3553_v38, %v3535_v10  ;;  %v3601_v38 = vshrl.u32 %v21730_v27, 16 }
 0x2bc   : > { %15986 = vmatmul.mubr.msk.bf16.gmra.mrb[68].mxu0 %vm3044_vm6, %v3512_v16  ;;  %16002 = vmatmul.mubr.msk.bf16.gmra.mrb[188].mxu1 %vm3044_vm6, %v3512_v16  ;;  %v3581_v16 = vshll.u32 %v21730_v27, 16 }
 0x2bd   : > { %4469 = vmatprep.mubr.bf16.mxu0 %v25776_v4  ;;  %4835 = vmatprep.mubr.bf16.mxu1 %v25776_v4 }
 0x2be   : > { %5359 = vmatpush1.bf16.msra.mxu0 %v19065_v5  ;;  %5724 = vmatprep.subr.bf16.mxu1 %v19097_v21  ;;  %v19115_v5 = vld [vmem:[%s25766_s5 + $0x10c] ss:$16 sps:$4 sm:$0xff]   ;;  %v3560_v21 = vsel %vm3428_vm8, %v3555_v39, %v3559_v59  ;;  %v3583_v6 = vrot.slane %v3581_v16, 1  ;;  %v19125_v39 = vld [vmem:[%s25766_s5 + $0x168] ss:$16 sps:$4 sm:$0xff]  }
 0x2bf   : > { %5360 = vmatprep.subr.bf16.mxu0 %v19070_v26  ;;  %5725 = vmatpush1.bf16.msra.mxu1 %v19095_v14  ;;  %v19113_v26 = vld [vmem:[%s25766_s5 + $0x108] ss:$16 sps:$4 sm:$0xff]  }
 0x2c0   : > { %5726 = vmatprep.subr.bf16.mxu1 %v19100_v19  ;;  %v3187_v14 = vld [vmem:[#allocation2 + $0x178] sm:$0xff]  ;;  %v3184_v19 = vld [vmem:[#allocation2 + $0x160] sm:$0xff] }
 0x2c1   : > { %v21763_v10 = vpack.c.bf16 %v3187_v14, %v3184_v19  ;;  %v19131_v14 = vld [vmem:[%s25766_s5 + $0x188] ss:$16 sps:$4 sm:$0xff]   ;;  %v19136_v19 = vld [vmem:[%s25766_s5 + $0x1ac] ss:$16 sps:$4 sm:$0xff]  }
 0x2c2   : > { %5361 = vmatpush1.bf16.msra.mxu0 %v19068_v41  ;;  %v3577_v41 = vshrl.u32 %v21697_v37, 16 }
 0x2c3   : > { %5362 = vmatprep.subr.bf16.mxu0 %v19073_v24  ;;  %5727 = vmatpush1.bf16.msra.mxu1 %v19098_v18  ;;  %v19103_v24 = vld [vmem:[%s25766_s5 + $0x144] ss:$16 sps:$4 sm:$0xff]   ;;  %v19116_v18 = vld [vmem:[%s25766_s5 + $0x128] ss:$16 sps:$4 sm:$0xff]   ;;  %v3605_v43 = vshll.u32 %v21763_v10, 16 }
 0x2c4   : > { %15987 = vmatmul.mubr.msk.bf16.gmra.mrb[72].mxu0 %vm3044_vm6, %v3536_v28  ;;  %16003 = vmatmul.mubr.msk.bf16.gmra.mrb[192].mxu1 %vm3044_vm6, %v3536_v28  ;;  %v3579_v9 = vor.u32 %v3577_v41, %v3559_v59  ;;  %v19128_v41 = vld [vmem:[%s25766_s5 + $0x1a0] ss:$16 sps:$4 sm:$0xff]  }
 0x2c5   : > { %4479 = vmatprep.mubr.bf16.mxu0 %v25776_v4  ;;  %4845 = vmatprep.mubr.bf16.mxu1 %v25776_v4  ;;  %v3607_v59 = vrot.slane %v3605_v43, 1  ;;  %v19142_v43 = vld [vmem:[%s25766_s5 + $0x1cc] ss:$16 sps:$4 sm:$0xff]  }
 0x2c6   : > { %5363 = vmatpush1.bf16.msra.mxu0 %v19071_v31  ;;  %5728 = vmatprep.subr.bf16.mxu1 %v19106_v1  ;;  %v19101_v31 = vld [vmem:[%s25766_s5 + $0x140] ss:$16 sps:$4 sm:$0xff]   ;;  %v19124_v1 = vld [vmem:[%s25766_s5 + $0x14c] ss:$16 sps:$4 sm:$0xff]   ;;  %v3584_v28 = vsel %vm3428_vm8, %v3579_v9, %v3583_v6  ;;  %v19134_v9 = vld [vmem:[%s25766_s5 + $0x1a8] ss:$16 sps:$4 sm:$0xff]  }
 0x2c7   : > { %5364 = vmatprep.subr.bf16.mxu0 %v19079_v32  ;;  %5729 = vmatpush1.bf16.msra.mxu1 %v19104_v40  ;;  %v19112_v32 = vld [vmem:[%s25766_s5 + $0x164] ss:$16 sps:$4 sm:$0xff]   ;;  %v19122_v40 = vld [vmem:[%s25766_s5 + $0x148] ss:$16 sps:$4 sm:$0xff]  }
 0x2c8   : > { %5730 = vmatprep.subr.bf16.mxu1 %v19109_v22  ;;  %v19127_v22 = vld [vmem:[%s25766_s5 + $0x16c] ss:$16 sps:$4 sm:$0xff]  }
 0x2ca   : > { %5365 = vmatpush1.bf16.msra.mxu0 %v19077_v63  ;;  %v19110_v63 = vld [vmem:[%s25766_s5 + $0x160] ss:$16 sps:$4 sm:$0xff]  }
 0x2cb   : > { %5366 = vmatprep.subr.bf16.mxu0 %v19085_v49  ;;  %5731 = vmatpush1.bf16.msra.mxu1 %v19107_v51  ;;  %v21796_v49 = vpack.c.bf16 %v3193_v52, %v3190_v3  ;;  %v19121_v51 = vld [vmem:[%s25766_s5 + $0x184] ss:$16 sps:$4 sm:$0xff]   ;;  %v19140_v52 = vld [vmem:[%s25766_s5 + $0x1c8] ss:$16 sps:$4 sm:$0xff]  }
 0x2cc   : > { %15988 = vmatmul.mubr.msk.bf16.gmra.mrb[76].mxu0 %vm3044_vm6, %v3560_v21  ;;  %16004 = vmatmul.mubr.msk.bf16.gmra.mrb[196].mxu1 %vm3044_vm6, %v3560_v21  ;;  %v19133_v21 = vld [vmem:[%s25766_s5 + $0x18c] ss:$16 sps:$4 sm:$0xff]  }
 0x2cd   : > { %4489 = vmatprep.mubr.bf16.mxu0 %v25776_v4  ;;  %4855 = vmatprep.mubr.bf16.mxu1 %v25776_v4  ;;  %v3205_v3 = vld [vmem:[#allocation2 + $0x208] sm:$0xff] }
 0x2ce   : > { %5367 = vmatpush1.bf16.msra.mxu0 %v19083_v11  ;;  %5732 = vmatprep.subr.bf16.mxu1 %v19115_v5  ;;  %v3603_v11 = vor.u32 %v3601_v38, %v3583_v6  ;;  %v19119_v5 = vld [vmem:[%s25766_s5 + $0x180] ss:$16 sps:$4 sm:$0xff]   ;;  %v3625_v6 = vshrl.u32 %v21763_v10, 16 }
 0x2cf   : > { %5368 = vmatprep.subr.bf16.mxu0 %v19094_v53  ;;  %5733 = vmatpush1.bf16.msra.mxu1 %v19113_v26  ;;  %v3629_v53 = vshll.u32 %v21796_v49, 16  ;;  %v19130_v26 = vld [vmem:[%s25766_s5 + $0x1a4] ss:$16 sps:$4 sm:$0xff]  }
 0x2d0   : > { %5734 = vmatprep.subr.bf16.mxu1 %v19118_v54  ;;  %v3608_v16 = vsel %vm3428_vm8, %v3603_v11, %v3607_v59  ;;  %v3199_v54 = vld [vmem:[#allocation2 + $0x1d8] sm:$0xff]  ;;  %v3202_v38 = vld [vmem:[#allocation2 + $0x1f0] sm:$0xff] }
 0x2d1   : > { %v21862_v11 = vpack.c.bf16 %v3205_v3, %v3202_v38  ;;  %v3223_v3 = vld [vmem:[#allocation2 + $0x298] sm:$0xff] }
 0x2d2   : > { %5369 = vmatpush1.bf16.msra.mxu0 %v19092_v56  ;;  %v3196_v56 = vld [vmem:[#allocation2 + $0x1c0] sm:$0xff] }
 0x2d3   : > { %5370 = vmatprep.subr.bf16.mxu0 %v19103_v24  ;;  %5735 = vmatpush1.bf16.msra.mxu1 %v19116_v18  ;;  %v3631_v24 = vrot.slane %v3629_v53, 1  ;;  %v21829_v18 = vpack.c.bf16 %v3199_v54, %v3196_v56  ;;  %v3208_v54 = vld [vmem:[#allocation2 + $0x220] sm:$0xff] }
 0x2d4   : > { %15989 = vmatmul.mubr.msk.bf16.gmra.mrb[80].mxu0 %vm3044_vm6, %v3584_v28  ;;  %16005 = vmatmul.mubr.msk.bf16.gmra.mrb[200].mxu1 %vm3044_vm6, %v3584_v28  ;;  %v19137_v28 = vld [vmem:[%s25766_s5 + $0x1c0] ss:$16 sps:$4 sm:$0xff]  }
 0x2d5   : > { %4499 = vmatprep.mubr.bf16.mxu0 %v25776_v4  ;;  %4865 = vmatprep.mubr.bf16.mxu1 %v25776_v4 }
 0x2d6   : > { %5371 = vmatpush1.bf16.msra.mxu0 %v19101_v31  ;;  %5736 = vmatprep.subr.bf16.mxu1 %v19124_v1  ;;  %v19139_v31 = vld [vmem:[%s25766_s5 + $0x1c4] ss:$16 sps:$4 sm:$0xff]   ;;  %v3627_v1 = vor.u32 %v3625_v6, %v3607_v59  ;;  %v19143_v59 = vld [vmem:[%s25766_s5 + $0x1e0] ss:$16 sps:$4 sm:$0xff]  }
 0x2d7   : > { %5372 = vmatprep.subr.bf16.mxu0 %v19112_v32  ;;  %5737 = vmatpush1.bf16.msra.mxu1 %v19122_v40  ;;  %v3653_v40 = vshll.u32 %v21829_v18, 16 }
 0x2d8   : > { %5738 = vmatprep.subr.bf16.mxu1 %v19127_v22  ;;  %v3632_v32 = vsel %vm3428_vm8, %v3627_v1, %v3631_v24  ;;  %v19145_v22 = vld [vmem:[%s25766_s5 + $0x1e4] ss:$16 sps:$4 sm:$0xff]  }
 0x2d9   : > { %v3214_v1 = vld [vmem:[#allocation2 + $0x250] sm:$0xff] }
 0x2da   : > { %5373 = vmatpush1.bf16.msra.mxu0 %v19110_v63  ;;  %v19148_v63 = vld [vmem:[%s25766_s5 + $0x1ec] ss:$16 sps:$4 sm:$0xff]  }
 0x2db   : > { %5374 = vmatprep.subr.bf16.mxu0 %v19121_v51  ;;  %5739 = vmatpush1.bf16.msra.mxu1 %v19125_v39  ;;  %v3649_v51 = vshrl.u32 %v21796_v49, 16  ;;  %v3655_v39 = vrot.slane %v3653_v40, 1 }
 0x2dc   : > { %15990 = vmatmul.mubr.msk.bf16.gmra.mrb[84].mxu0 %vm3044_vm6, %v3608_v16  ;;  %16006 = vmatmul.mubr.msk.bf16.gmra.mrb[204].mxu1 %vm3044_vm6, %v3608_v16 }
 0x2dd   : > { %4509 = vmatprep.mubr.bf16.mxu0 %v25776_v4  ;;  %4875 = vmatprep.mubr.bf16.mxu1 %v25776_v4  ;;  %v3651_v16 = vor.u32 %v3649_v51, %v3631_v24 }
 0x2de   : > { %5375 = vmatpush1.bf16.msra.mxu0 %v19119_v5  ;;  %5740 = vmatprep.subr.bf16.mxu1 %v19133_v21  ;;  %v19146_v5 = vld [vmem:[%s25766_s5 + $0x1e8] ss:$16 sps:$4 sm:$0xff]   ;;  %v19151_v21 = vld [vmem:[%s25766_s5 + $0x204] ss:$16 sps:$4 sm:$0xff]  }
 0x2df   : > { %5376 = vmatprep.subr.bf16.mxu0 %v19130_v26  ;;  %5741 = vmatpush1.bf16.msra.mxu1 %v19131_v14  ;;  %v3656_v53 = vsel %vm3428_vm8, %v3651_v16, %v3655_v39  ;;  %v3677_v26 = vshll.u32 %v21862_v11, 16  ;;  %v3211_v14 = vld [vmem:[#allocation2 + $0x238] sm:$0xff]  ;;  %v3350_v16 = vld [vmem:[#allocation2 + $0x2c8] sm:$0x7f] }
 0x2e0   : > { %5742 = vmatprep.subr.bf16.mxu1 %v19136_v19  ;;  %v3673_v19 = vshrl.u32 %v21829_v18, 16 }
 0x2e1   : > { %v3679_v56 = vrot.slane %v3677_v26, 1 }
 0x2e2   : > { %5377 = vmatpush1.bf16.msra.mxu0 %v19128_v41  ;;  %v21877_v41 = vpack.c.bf16 %v3211_v14, %v3208_v54  ;;  %v3675_v6 = vor.u32 %v3673_v19, %v3655_v39 }
 0x2e3   : > { %5378 = vmatprep.subr.bf16.mxu0 %v19139_v31  ;;  %5743 = vmatpush1.bf16.msra.mxu1 %v19134_v9  ;;  %v3217_v31 = vld [vmem:[#allocation2 + $0x268] sm:$0xff] }
 0x2e4   : > { %15991 = vmatmul.mubr.msk.bf16.gmra.mrb[88].mxu0 %vm3044_vm6, %v3632_v32  ;;  %16007 = vmatmul.mubr.msk.bf16.gmra.mrb[208].mxu1 %vm3044_vm6, %v3632_v32  ;;  %v3680_v24 = vsel %vm3428_vm8, %v3675_v6, %v3679_v56  ;;  %v3701_v9 = vshll.u32 %v21877_v41, 16  ;;  %v21886_v32 = vpack.c.bf16 %v3217_v31, %v3214_v1  ;;  %v3721_v38 = vshrl.u32 %v21877_v41, 16 }
 0x2e5   : > { %4519 = vmatprep.mubr.bf16.mxu0 %v25776_v4  ;;  %4885 = vmatprep.mubr.bf16.mxu1 %v25776_v4 }
 0x2e6   : > { %5379 = vmatpush1.bf16.msra.mxu0 %v19137_v28  ;;  %5744 = vmatprep.subr.bf16.mxu1 %v19142_v43  ;;  %v3697_v28 = vshrl.u32 %v21862_v11, 16  ;;  %v3703_v43 = vrot.slane %v3701_v9, 1  ;;  %v3745_v26 = vshrl.u32 %v21886_v32, 16 }
 0x2e7   : > { %5745 = vmatpush1.bf16.msra.mxu1 %v19140_v52  ;;  %5380 = vmatprep.subr.bf16.mxu0 %v19145_v22  ;;  %v3725_v22 = vshll.u32 %v21886_v32, 16 }
 0x2e8   : > { %5746 = vmatprep.subr.bf16.mxu1 %v19148_v63  ;;  %v3699_v40 = vor.u32 %v3697_v28, %v3679_v56  ;;  %v3220_v63 = vld [vmem:[#allocation2 + $0x280] sm:$0xff]  ;;  %v3723_v39 = vor.u32 %v3721_v38, %v3703_v43  ;;  %v19156_v28 = vld [vmem:[%s25766_s5 + $0x20c] ss:$16 sps:$4 sm:$0xff]  }
 0x2e9   : > { %v21895_v51 = vpack.c.bf16 %v3223_v3, %v3220_v63  ;;  %v3140_v63 = vld [vmem:[#allocation2] sm:$0xff] }
 0x2ea   : > { %5381 = vmatpush1.bf16.msra.mxu0 %v19143_v59  ;;  %v3704_v52 = vsel %vm3428_vm8, %v3699_v40, %v3703_v43  ;;  %v3727_v59 = vrot.slane %v3725_v22, 1  ;;  %v3141_v40 = vld [vmem:[#allocation2 + $0x8] sm:$0xff]  ;;  %v21921_v22 = vld [vmem:[#allocation2 + $0x20] sm:$0xff] }
 0x2eb   : > { %5747 = vmatpush1.bf16.msra.mxu1 %v19146_v5  ;;  %5533 = vmatprep.subr.bf16.mxu0 %v19151_v21  ;;  %v3749_v21 = vshll.u32 %v21895_v51, 16  ;;  %v3301_v3 = vpack.c.bf16 %v21921_v22, %v3141_v40  ;;  %v3298_v38 = vld [vmem:[%s25766_s5 + $0x220] sm:$0xff] }
 0x2ec   : > { %15992 = vmatmul.mubr.msk.bf16.gmra.mrb[92].mxu0 %vm3044_vm6, %v3656_v53  ;;  %16008 = vmatmul.mubr.msk.bf16.gmra.mrb[212].mxu1 %vm3044_vm6, %v3656_v53  ;;  %v3728_v5 = vsel %vm3428_vm8, %v3723_v39, %v3727_v59  ;;  %v21903_v53 = vld [vmem:[#allocation2 + $0x2b0] sm:$0xff]  ;;  %v3747_v19 = vor.u32 %v3745_v26, %v3727_v59  ;;  %v3299_v59 = vld [vmem:[%s25766_s5 + $0x228] sm:$0xff]  ;;  %v21932_v39 = vld [vmem:[#allocation2 + $0x18] sm:$0xff]  ;;  %v16084_v26 = vcombine.high %v3298_v38, %v3298_v38 }
 0x2ed   : > { %4529 = vmatprep.mubr.bf16.mxu0 %v25776_v4  ;;  %4895 = vmatprep.mubr.bf16.mxu1 %v25776_v4  ;;  %v3751_v14 = vrot.slane %v3749_v21, 1  ;;  %v3427_v54 = vpack.c.bf16 %v3350_v16, %v21903_v53  ;;  %v19149_v21 = vld [vmem:[%s25766_s5 + $0x200] ss:$16 sps:$4 sm:$0xff]   ;;  %v19154_v16 = vld [vmem:[%s25766_s5 + $0x208] ss:$16 sps:$4 sm:$0xff]  }
 0x2ee   : > { %5899 = vmatprep.subr.bf16.mxu1 %v19156_v28  ;;  %v19182_v28 = vld [vmem:[%s25766_s5 + $0x46c] ss:$16 sps:$4 sm:$0xff]  }
 0x2ef   : > { %v3752_v56 = vsel %vm3428_vm8, %v3747_v19, %v3751_v14  ;;  %v3773_v6 = vshll.u32 %v3427_v54, 16  ;;  %v3783_v43 = vshrl.u32 %v3427_v54, 16  ;;  %v16086_v54 = vcombine.high %v3299_v59, %v3299_v59 }
 0x2f0   : > { %v16085_v19 = vcombine.low %v3299_v59, %v3299_v59  ;;  %v19164_v59 = vld [vmem:[%s25766_s5 + $0x484] ss:$16 sps:$4 sm:$0xff]  }
 0x2f1   : > { %v3775_v9 = vrot.slane %v3773_v6, 1 }
 0x2f2   : > { %v5345_v6 = vsel %vm4211_vm7, %v16085_v19, 0  ;;  %v19192_v19 = vld [vmem:[%s25766_s5 + $0x4a8] ss:$16 sps:$4 sm:$0xff]  }
 0x2f4   : > { %15993 = vmatmul.mubr.msk.bf16.gmra.mrb[96].mxu0 %vm3044_vm6, %v3680_v24  ;;  %16009 = vmatmul.mubr.msk.bf16.gmra.mrb[216].mxu1 %vm3044_vm6, %v3680_v24  ;;  %v3769_v24 = vshrl.u32 %v21895_v51, 16 }
 0x2f5   : > { %4539 = vmatprep.mubr.bf16.mxu0 %v25776_v4  ;;  %4905 = vmatprep.mubr.bf16.mxu1 %v25776_v4 }
 0x2f6   : > { %v3771_v31 = vor.u32 %v3769_v24, %v3751_v14  ;;  %v16083_v14 = vcombine.low %v3298_v38, %v3298_v38  ;;  %v19161_v24 = vld [vmem:[%s25766_s5 + $0x464] ss:$16 sps:$4 sm:$0xff]  }
 0x2f8   : > { %v3776_v1 = vsel %vm3428_vm8, %v3771_v31, %v3775_v9  ;;  %v25778_v31 = vld [vmem:[#allocation20_spill] sm:$0xff] }
 0x2fc   : > { %15994 = vmatmul.mubr.msk.bf16.gmra.mrb[100].mxu0 %vm3044_vm6, %v3704_v52  ;;  %16010 = vmatmul.mubr.msk.bf16.gmra.mrb[220].mxu1 %vm3044_vm6, %v3704_v52  ;;  %v3785_v52 = vor.u32 %v3783_v43, %v3775_v9  ;;  %v25777_v9 = vld [vmem:[#allocation19_spill] sm:$0xff] }
 0x2fd   : > { %4549 = vmatprep.mubr.bf16.mxu0 %v25776_v4  ;;  %4915 = vmatprep.mubr.bf16.mxu1 %v25776_v4  ;;  %v3228_v43 = vld [vmem:[#allocation2 + $0x2c0] sm:$0x3f] }
 0x2fe   : > { %v3343_v40 = vpack.c.bf16 %v3228_v43, %v21542_v60  ;;  %v19159_v60 = vld [vmem:[%s25766_s5 + $0x460] ss:$16 sps:$4 sm:$0xff]  }
 0x2ff   : > { %v19171_v43 = vld [vmem:[%s25766_s5 + $0x4e0] ss:$16 sps:$4 sm:$0xff]  }
 0x304   : > { %15995 = vmatmul.mubr.msk.bf16.gmra.mrb[104].mxu0 %vm3044_vm6, %v3728_v5  ;;  %16011 = vmatmul.mubr.msk.bf16.gmra.mrb[224].mxu1 %vm3044_vm6, %v3728_v5  ;;  %v3300_v5 = vpack.c.bf16 %v21932_v39, %v3140_v63  ;;  %v3142_v63 = vld [vmem:[#allocation2 + $0x10] sm:$0xff] }
 0x305   : > { %4559 = vmatprep.mubr.bf16.mxu0 %v25776_v4  ;;  %4925 = vmatprep.mubr.bf16.mxu1 %v25776_v4  ;;  %v3302_v38 = vpack.c.bf16 %v21598_v29, %v3142_v63  ;;  %v19162_v29 = vld [vmem:[%s25766_s5 + $0x480] ss:$16 sps:$4 sm:$0xff]   ;;  %v19206_v63 = vld [vmem:[%s25766_s5 + $0x50c] ss:$16 sps:$4 sm:$0xff]  }
 0x30c   : > { %15996 = vmatmul.mubr.msk.bf16.gmra.mrb[108].mxu0 %vm3044_vm6, %v3752_v56  ;;  %16012 = vmatmul.mubr.msk.bf16.gmra.mrb[228].mxu1 %vm3044_vm6, %v3752_v56  ;;  %v5339_v56 = vsel %vm4211_vm7, %v16083_v14, 0  ;;  %v19194_v14 = vld [vmem:[%s25766_s5 + $0x4ac] ss:$16 sps:$4 sm:$0xff]  }
 0x30d   : > { %4569 = vmatprep.mubr.bf16.mxu0 %v25776_v4  ;;  %4935 = vmatprep.mubr.bf16.mxu1 %v25776_v4 }
 0x314   : > { %15997 = vmatmul.mubr.msk.bf16.gmra.mrb[112].mxu0 %vm3044_vm6, %v3776_v1  ;;  %16013 = vmatmul.mubr.msk.bf16.gmra.mrb[232].mxu1 %vm3044_vm6, %v3776_v1  ;;  %v25779_v1 = vld [vmem:[#allocation21_spill] sm:$0xff] }
 0x315   : > { %4579 = vmatprep.mubr.bf16.mxu0 %v25776_v4  ;;  %4945 = vmatprep.mubr.bf16.mxu1 %v25776_v4 }
 0x31c   : > { %15998 = vmatmul.mubr.msk.bf16.gmra.mrb[116].mxu0 %vm3044_vm6, %v3785_v52  ;;  %16014 = vmatmul.mubr.msk.bf16.gmra.mrb[236].mxu1 %vm3044_vm6, %v3785_v52  ;;  %v3227_v52 = vld [vmem:[#allocation2 + $0x2b8] sm:$0x3f] }
 0x31d   : > { %5382 = vmatprep.mubr.bf16.mxu0 %v3301_v3  ;;  %5748 = vmatprep.mubr.bf16.mxu1 %v3301_v3  ;;  %v3342_v3 = vpack.c.bf16 %v3227_v52, %v21535_v12  ;;  %v19180_v12 = vld [vmem:[%s25766_s5 + $0x468] ss:$16 sps:$4 sm:$0xff]   ;;  %v19176_v52 = vld [vmem:[%s25766_s5 + $0x504] ss:$16 sps:$4 sm:$0xff]  }
 0x324   : > { %5383 = vmatmul.mubr.bf16.vlgmr.msra.gmra.mrb[60].mxu0 %v3300_v5  ;;  %5749 = vmatmul.mubr.bf16.vlgmr.msra.gmra.mrb[180].mxu1 %v3300_v5  ;;  %v19188_v5 = vld [vmem:[%s25766_s5 + $0x48c] ss:$16 sps:$4 sm:$0xff]  }
 0x325   : > { %5392 = vmatprep.mubr.bf16.mxu0 %v20984_v15  ;;  %5758 = vmatprep.mubr.bf16.mxu1 %v20984_v15 }
 0x326   : > { %5534 = vmatpush1.bf16.msra.mxu0 %v19149_v21  ;;  %5900 = vmatpush1.bf16.msra.mxu1 %v19154_v16  ;;  %v19167_v21 = vld [vmem:[%s25766_s5 + $0x4a4] ss:$16 sps:$4 sm:$0xff]   ;;  %v19186_v16 = vld [vmem:[%s25766_s5 + $0x488] ss:$16 sps:$4 sm:$0xff]  }
 0x327   : > { %16087 = vmatprep.subr.msk.bf16.mxu0 %vm4211_vm7, %v16084_v26  ;;  %16103 = vmatprep.subr.msk.bf16.mxu1 %vm4211_vm7, %v16086_v54  ;;  %v19165_v26 = vld [vmem:[%s25766_s5 + $0x4a0] ss:$16 sps:$4 sm:$0xff]   ;;  %v19170_v54 = vld [vmem:[%s25766_s5 + $0x4c4] ss:$16 sps:$4 sm:$0xff]  }
 0x32a   : > { %5536 = vmatpush1.bf16.msra.mxu0 %v5339_v56  ;;  %5902 = vmatpush1.bf16.msra.mxu1 %v5345_v6  ;;  %v19197_v56 = vld [vmem:[%s25766_s5 + $0x4cc] ss:$16 sps:$4 sm:$0xff]   ;;  %v19168_v6 = vld [vmem:[%s25766_s5 + $0x4c0] ss:$16 sps:$4 sm:$0xff]  }
 0x32b   : > { %6735 = vmatprep.subr.bf16.mxu0 %v19161_v24  ;;  %7101 = vmatprep.subr.bf16.mxu1 %v19182_v28  ;;  %v19173_v24 = vld [vmem:[%s25766_s5 + $0x4e4] ss:$16 sps:$4 sm:$0xff]   ;;  %v19195_v28 = vld [vmem:[%s25766_s5 + $0x4c8] ss:$16 sps:$4 sm:$0xff]  }
 0x32c   : > { %5393 = vmatmul.mubr.bf16.gmra.mrb[64].mxu0 %v21019_v46  ;;  %5759 = vmatmul.mubr.bf16.gmra.mrb[184].mxu1 %v21019_v46 }
 0x32d   : > { %5402 = vmatprep.mubr.bf16.mxu0 %v21055_v20  ;;  %5768 = vmatprep.mubr.bf16.mxu1 %v21055_v20 }
 0x334   : > { %5403 = vmatmul.mubr.bf16.gmra.mrb[68].mxu0 %v21103_v58  ;;  %5769 = vmatmul.mubr.bf16.gmra.mrb[188].mxu1 %v21103_v58 }
 0x335   : > { %5412 = vmatprep.mubr.bf16.mxu0 %v21138_v48  ;;  %5778 = vmatprep.mubr.bf16.mxu1 %v21138_v48 }
 0x33c   : > { %5413 = vmatmul.mubr.bf16.gmra.mrb[72].mxu0 %v21164_v7  ;;  %5779 = vmatmul.mubr.bf16.gmra.mrb[192].mxu1 %v21164_v7 }
 0x33d   : > { %5422 = vmatprep.mubr.bf16.mxu0 %v21187_v25  ;;  %5788 = vmatprep.mubr.bf16.mxu1 %v21187_v25 }
 0x344   : > { %5423 = vmatmul.mubr.bf16.gmra.mrb[76].mxu0 %v25777_v9  ;;  %5789 = vmatmul.mubr.bf16.gmra.mrb[196].mxu1 %v25777_v9 }
 0x345   : > { %5432 = vmatprep.mubr.bf16.mxu0 %v25778_v31  ;;  %5798 = vmatprep.mubr.bf16.mxu1 %v25778_v31 }
 0x34c   : > { %5433 = vmatmul.mubr.bf16.gmra.mrb[80].mxu0 %v25779_v1  ;;  %5799 = vmatmul.mubr.bf16.gmra.mrb[200].mxu1 %v25779_v1 }
 0x34d   : > { %5442 = vmatprep.mubr.bf16.mxu0 %v21270_v57  ;;  %5808 = vmatprep.mubr.bf16.mxu1 %v21270_v57 }
 0x354   : > { %5443 = vmatmul.mubr.bf16.gmra.mrb[84].mxu0 %v21290_v8  ;;  %5809 = vmatmul.mubr.bf16.gmra.mrb[204].mxu1 %v21290_v8 }
 0x355   : > { %5452 = vmatprep.mubr.bf16.mxu0 %v21317_v44  ;;  %5818 = vmatprep.mubr.bf16.mxu1 %v21317_v44 }
 0x35c   : > { %5453 = vmatmul.mubr.bf16.gmra.mrb[88].mxu0 %v21337_v30  ;;  %5819 = vmatmul.mubr.bf16.gmra.mrb[208].mxu1 %v21337_v30 }
 0x35d   : > { %5462 = vmatprep.mubr.bf16.mxu0 %v21366_v42  ;;  %5828 = vmatprep.mubr.bf16.mxu1 %v21366_v42 }
 0x364   : > { %5463 = vmatmul.mubr.bf16.gmra.mrb[92].mxu0 %v21380_v33  ;;  %5829 = vmatmul.mubr.bf16.gmra.mrb[212].mxu1 %v21380_v33 }
 0x365   : > { %5472 = vmatprep.mubr.bf16.mxu0 %v21430_v45  ;;  %5838 = vmatprep.mubr.bf16.mxu1 %v21430_v45 }
 0x36c   : > { %5473 = vmatmul.mubr.bf16.gmra.mrb[96].mxu0 %v21456_v2  ;;  %5839 = vmatmul.mubr.bf16.gmra.mrb[216].mxu1 %v21456_v2 }
 0x36d   : > { %5482 = vmatprep.mubr.bf16.mxu0 %v21487_v50  ;;  %5848 = vmatprep.mubr.bf16.mxu1 %v21487_v50 }
 0x374   : > { %5483 = vmatmul.mubr.bf16.gmra.mrb[100].mxu0 %v21503_v34  ;;  %5849 = vmatmul.mubr.bf16.gmra.mrb[220].mxu1 %v21503_v34 }
 0x375   : > { %5492 = vmatprep.mubr.bf16.mxu0 %v21530_v35  ;;  %5858 = vmatprep.mubr.bf16.mxu1 %v21530_v35 }
 0x37c   : > { %5493 = vmatmul.mubr.bf16.gmra.mrb[104].mxu0 %v21548_v0  ;;  %5859 = vmatmul.mubr.bf16.gmra.mrb[224].mxu1 %v21548_v0 }
 0x37d   : > { %5502 = vmatprep.mubr.bf16.mxu0 %v21553_v55  ;;  %5868 = vmatprep.mubr.bf16.mxu1 %v21553_v55 }
 0x384   : > { %5503 = vmatmul.mubr.bf16.gmra.mrb[108].mxu0 %v21564_v36  ;;  %5869 = vmatmul.mubr.bf16.gmra.mrb[228].mxu1 %v21564_v36 }
 0x385   : > { %5512 = vmatprep.mubr.bf16.mxu0 %v21568_v61  ;;  %5878 = vmatprep.mubr.bf16.mxu1 %v21568_v61 }
 0x38c   : > { %5513 = vmatmul.mubr.bf16.gmra.mrb[112].mxu0 %v21577_v62  ;;  %5879 = vmatmul.mubr.bf16.gmra.mrb[232].mxu1 %v21577_v62 }
 0x38d   : > { %5522 = vmatprep.mubr.bf16.mxu0 %v3343_v40  ;;  %5888 = vmatprep.mubr.bf16.mxu1 %v3343_v40  ;;  %v19203_v40 = vld [vmem:[%s25766_s5 + $0x4ec] ss:$16 sps:$4 sm:$0xff]  }
 0x394   : > { %5523 = vmatmul.mubr.bf16.gmra.mrb[116].mxu0 %v3342_v3  ;;  %5889 = vmatmul.mubr.bf16.gmra.mrb[236].mxu1 %v3342_v3  ;;  %v19201_v3 = vld [vmem:[%s25766_s5 + $0x4e8] ss:$16 sps:$4 sm:$0xff]  }
 0x395   : > { %5565 = vmatprep.mubr.bf16.mxu0 %v25776_v4  ;;  %5931 = vmatprep.mubr.bf16.mxu1 %v25776_v4 }
 0x39c   : > { %16088 = vmatmul.mubr.msk.bf16.vlgmr.msra.gmra.mrb[60].mxu0 %vm3044_vm6, %v3302_v38  ;;  %16104 = vmatmul.mubr.msk.bf16.vlgmr.msra.gmra.mrb[180].mxu1 %vm3044_vm6, %v3302_v38  ;;  %v19179_v38 = vld [vmem:[%s25766_s5 + $0x524] ss:$16 sps:$4 sm:$0xff]  }
 0x39d   : > { %6736 = vmatpush1.bf16.msra.mxu0 %v19159_v60  ;;  %5575 = vmatprep.mubr.bf16.mxu0 %v25776_v4  ;;  %v19174_v60 = vld [vmem:[%s25766_s5 + $0x500] ss:$16 sps:$4 sm:$0xff]  }
 0x39e   : > { %5941 = vmatprep.mubr.bf16.mxu1 %v25776_v4  ;;  %6737 = vmatprep.subr.bf16.mxu0 %v19164_v59  ;;  %v19204_v59 = vld [vmem:[%s25766_s5 + $0x508] ss:$16 sps:$4 sm:$0xff]  }
 0x39f   : > { %7102 = vmatpush1.bf16.msra.mxu1 %v19180_v12  ;;  %v19177_v12 = vld [vmem:[%s25766_s5 + $0x520] ss:$16 sps:$4 sm:$0xff]  }
 0x3a0   : > { %7103 = vmatprep.subr.bf16.mxu1 %v19188_v5  ;;  %v19212_v5 = vld [vmem:[%s25766_s5 + $0x52c] ss:$16 sps:$4 sm:$0xff]  }
 0x3a1   : > { %6738 = vmatpush1.bf16.msra.mxu0 %v19162_v29  ;;  %v19185_v29 = vld [vmem:[%s25766_s5 + $0x544] ss:$16 sps:$4 sm:$0xff]  }
 0x3a2   : > { %6739 = vmatprep.subr.bf16.mxu0 %v19167_v21  ;;  %v19210_v21 = vld [vmem:[%s25766_s5 + $0x528] ss:$16 sps:$4 sm:$0xff]  }
 0x3a3   : > { %7104 = vmatpush1.bf16.msra.mxu1 %v19186_v16  ;;  %v19215_v16 = vld [vmem:[%s25766_s5 + $0x54c] ss:$16 sps:$4 sm:$0xff]  }
 0x3a4   : > { %16089 = vmatmul.mubr.msk.bf16.gmra.mrb[64].mxu0 %vm3044_vm6, %v21602_v17  ;;  %16105 = vmatmul.mubr.msk.bf16.gmra.mrb[184].mxu1 %vm3044_vm6, %v21602_v17 }
 0x3a5   : > { %5585 = vmatprep.mubr.bf16.mxu0 %v25776_v4  ;;  %5951 = vmatprep.mubr.bf16.mxu1 %v25776_v4 }
 0x3a6   : > { %6740 = vmatpush1.bf16.msra.mxu0 %v19165_v26  ;;  %7105 = vmatprep.subr.bf16.mxu1 %v19194_v14  ;;  %v19183_v26 = vld [vmem:[%s25766_s5 + $0x540] ss:$16 sps:$4 sm:$0xff]   ;;  %v19191_v14 = vld [vmem:[%s25766_s5 + $0x564] ss:$16 sps:$4 sm:$0xff]  }
 0x3a7   : > { %6741 = vmatprep.subr.bf16.mxu0 %v19170_v54  ;;  %7106 = vmatpush1.bf16.msra.mxu1 %v19192_v19  ;;  %v19213_v54 = vld [vmem:[%s25766_s5 + $0x548] ss:$16 sps:$4 sm:$0xff]   ;;  %v19189_v19 = vld [vmem:[%s25766_s5 + $0x560] ss:$16 sps:$4 sm:$0xff]  }
 0x3a8   : > { %7107 = vmatprep.subr.bf16.mxu1 %v19197_v56  ;;  %v19221_v56 = vld [vmem:[%s25766_s5 + $0x56c] ss:$16 sps:$4 sm:$0xff]  }
 0x3aa   : > { %6742 = vmatpush1.bf16.msra.mxu0 %v19168_v6  ;;  %v19200_v6 = vld [vmem:[%s25766_s5 + $0x584] ss:$16 sps:$4 sm:$0xff]  }
 0x3ab   : > { %6743 = vmatprep.subr.bf16.mxu0 %v19173_v24  ;;  %7108 = vmatpush1.bf16.msra.mxu1 %v19195_v28  ;;  %v19219_v24 = vld [vmem:[%s25766_s5 + $0x568] ss:$16 sps:$4 sm:$0xff]   ;;  %v19224_v28 = vld [vmem:[%s25766_s5 + $0x58c] ss:$16 sps:$4 sm:$0xff]  }
 0x3ac   : > { %16090 = vmatmul.mubr.msk.bf16.gmra.mrb[68].mxu0 %vm3044_vm6, %v21607_v13  ;;  %16106 = vmatmul.mubr.msk.bf16.gmra.mrb[188].mxu1 %vm3044_vm6, %v21607_v13 }
 0x3ad   : > { %5595 = vmatprep.mubr.bf16.mxu0 %v25776_v4  ;;  %5961 = vmatprep.mubr.bf16.mxu1 %v25776_v4 }
 0x3ae   : > { %6744 = vmatpush1.bf16.msra.mxu0 %v19171_v43  ;;  %7109 = vmatprep.subr.bf16.mxu1 %v19203_v40  ;;  %v19198_v43 = vld [vmem:[%s25766_s5 + $0x580] ss:$16 sps:$4 sm:$0xff]   ;;  %v19209_v40 = vld [vmem:[%s25766_s5 + $0x5a4] ss:$16 sps:$4 sm:$0xff]  }
 0x3af   : > { %6745 = vmatprep.subr.bf16.mxu0 %v19176_v52  ;;  %7110 = vmatpush1.bf16.msra.mxu1 %v19201_v3  ;;  %v19222_v52 = vld [vmem:[%s25766_s5 + $0x588] ss:$16 sps:$4 sm:$0xff]   ;;  %v19207_v3 = vld [vmem:[%s25766_s5 + $0x5a0] ss:$16 sps:$4 sm:$0xff]  }
 0x3b0   : > { %7111 = vmatprep.subr.bf16.mxu1 %v19206_v63  ;;  %v19230_v63 = vld [vmem:[%s25766_s5 + $0x5ac] ss:$16 sps:$4 sm:$0xff]  }
 0x3b2   : > { %6746 = vmatpush1.bf16.msra.mxu0 %v19174_v60  ;;  %v19218_v60 = vld [vmem:[%s25766_s5 + $0x5c4] ss:$16 sps:$4 sm:$0xff]  }
 0x3b3   : > { %6747 = vmatprep.subr.bf16.mxu0 %v19179_v38  ;;  %7112 = vmatpush1.bf16.msra.mxu1 %v19204_v59  ;;  %v19228_v38 = vld [vmem:[%s25766_s5 + $0x5a8] ss:$16 sps:$4 sm:$0xff]   ;;  %v19233_v59 = vld [vmem:[%s25766_s5 + $0x5cc] ss:$16 sps:$4 sm:$0xff]  }
 0x3b4   : > { %16091 = vmatmul.mubr.msk.bf16.gmra.mrb[72].mxu0 %vm3044_vm6, %v21634_v47  ;;  %16107 = vmatmul.mubr.msk.bf16.gmra.mrb[192].mxu1 %vm3044_vm6, %v21634_v47 }
 0x3b5   : > { %5605 = vmatprep.mubr.bf16.mxu0 %v25776_v4  ;;  %5971 = vmatprep.mubr.bf16.mxu1 %v25776_v4 }
 0x3b6   : > { %6748 = vmatpush1.bf16.msra.mxu0 %v19177_v12  ;;  %7113 = vmatprep.subr.bf16.mxu1 %v19212_v5  ;;  %v19216_v12 = vld [vmem:[%s25766_s5 + $0x5c0] ss:$16 sps:$4 sm:$0xff]   ;;  %v19227_v5 = vld [vmem:[%s25766_s5 + $0x5e4] ss:$16 sps:$4 sm:$0xff]  }
 0x3b7   : > { %6749 = vmatprep.subr.bf16.mxu0 %v19185_v29  ;;  %7114 = vmatpush1.bf16.msra.mxu1 %v19210_v21  ;;  %v19231_v29 = vld [vmem:[%s25766_s5 + $0x5c8] ss:$16 sps:$4 sm:$0xff]   ;;  %v19225_v21 = vld [vmem:[%s25766_s5 + $0x5e0] ss:$16 sps:$4 sm:$0xff]  }
 0x3b8   : > { %7115 = vmatprep.subr.bf16.mxu1 %v19215_v16  ;;  %v19239_v16 = vld [vmem:[%s25766_s5 + $0x5ec] ss:$16 sps:$4 sm:$0xff]  }
 0x3ba   : > { %6750 = vmatpush1.bf16.msra.mxu0 %v19183_v26  ;;  %v19236_v26 = vld [vmem:[%s25766_s5 + $0x604] ss:$16 sps:$4 sm:$0xff]  }
 0x3bb   : > { %6751 = vmatprep.subr.bf16.mxu0 %v19191_v14  ;;  %7116 = vmatpush1.bf16.msra.mxu1 %v19213_v54  ;;  %v19237_v14 = vld [vmem:[%s25766_s5 + $0x5e8] ss:$16 sps:$4 sm:$0xff]   ;;  %v19242_v54 = vld [vmem:[%s25766_s5 + $0x60c] ss:$16 sps:$4 sm:$0xff]  }
 0x3bc   : > { %16092 = vmatmul.mubr.msk.bf16.gmra.mrb[76].mxu0 %vm3044_vm6, %v21664_v23  ;;  %16108 = vmatmul.mubr.msk.bf16.gmra.mrb[196].mxu1 %vm3044_vm6, %v21664_v23 }
 0x3bd   : > { %5615 = vmatprep.mubr.bf16.mxu0 %v25776_v4  ;;  %5981 = vmatprep.mubr.bf16.mxu1 %v25776_v4 }
 0x3be   : > { %6752 = vmatpush1.bf16.msra.mxu0 %v19189_v19  ;;  %7117 = vmatprep.subr.bf16.mxu1 %v19221_v56  ;;  %v19234_v19 = vld [vmem:[%s25766_s5 + $0x600] ss:$16 sps:$4 sm:$0xff]   ;;  %v19240_v56 = vld [vmem:[%s25766_s5 + $0x608] ss:$16 sps:$4 sm:$0xff]  }
 0x3bf   : > { %6753 = vmatprep.subr.bf16.mxu0 %v19200_v6  ;;  %7118 = vmatpush1.bf16.msra.mxu1 %v19219_v24  ;;  %v19245_v6 = vld [vmem:[%s25766_s5 + $0x624] ss:$16 sps:$4 sm:$0xff]   ;;  %v19243_v24 = vld [vmem:[%s25766_s5 + $0x620] ss:$16 sps:$4 sm:$0xff]  }
 0x3c0   : > { %7119 = vmatprep.subr.bf16.mxu1 %v19224_v28  ;;  %v19248_v28 = vld [vmem:[%s25766_s5 + $0x62c] ss:$16 sps:$4 sm:$0xff]  }
 0x3c2   : > { %6754 = vmatpush1.bf16.msra.mxu0 %v19198_v43  ;;  %v19246_v43 = vld [vmem:[%s25766_s5 + $0x628] ss:$16 sps:$4 sm:$0xff]  }
 0x3c3   : > { %6755 = vmatprep.subr.bf16.mxu0 %v19209_v40  ;;  %7120 = vmatpush1.bf16.msra.mxu1 %v19222_v52  ;;  %v19251_v40 = vld [vmem:[%s25766_s5 + $0x644] ss:$16 sps:$4 sm:$0xff]   ;;  %v19254_v52 = vld [vmem:[%s25766_s5 + $0x64c] ss:$16 sps:$4 sm:$0xff]  }
 0x3c4   : > { %16093 = vmatmul.mubr.msk.bf16.gmra.mrb[80].mxu0 %vm3044_vm6, %v21697_v37  ;;  %16109 = vmatmul.mubr.msk.bf16.gmra.mrb[200].mxu1 %vm3044_vm6, %v21697_v37 }
 0x3c5   : > { %5625 = vmatprep.mubr.bf16.mxu0 %v25776_v4  ;;  %5991 = vmatprep.mubr.bf16.mxu1 %v25776_v4 }
 0x3c6   : > { %6756 = vmatpush1.bf16.msra.mxu0 %v19207_v3  ;;  %7121 = vmatprep.subr.bf16.mxu1 %v19230_v63  ;;  %v19249_v3 = vld [vmem:[%s25766_s5 + $0x640] ss:$16 sps:$4 sm:$0xff]   ;;  %v19252_v63 = vld [vmem:[%s25766_s5 + $0x648] ss:$16 sps:$4 sm:$0xff]  }
 0x3c7   : > { %6757 = vmatprep.subr.bf16.mxu0 %v19218_v60  ;;  %7122 = vmatpush1.bf16.msra.mxu1 %v19228_v38  ;;  %v19257_v60 = vld [vmem:[%s25766_s5 + $0x664] ss:$16 sps:$4 sm:$0xff]   ;;  %v6083_v38 = vld [vmem:[#allocation2 + $0x8] sm:$0xfc] }
 0x3c8   : > { %7123 = vmatprep.subr.bf16.mxu1 %v19233_v59  ;;  %v19262_v59 = vld [vmem:[%s25766_s5 + $0x66c] ss:$16 sps:$4 sm:$0xff]  }
 0x3ca   : > { %6758 = vmatpush1.bf16.msra.mxu0 %v19216_v12  ;;  %v6160_v12 = vpack.c.bf16 %v21921_v22, %v6083_v38  ;;  %v6212_v22 = vrot.slane %v21019_v46, 1  ;;  %v19260_v46 = vld [vmem:[%s25766_s5 + $0x668] ss:$16 sps:$4 sm:$0xff]  }
 0x3cb   : > { %6759 = vmatprep.subr.bf16.mxu0 %v19227_v5  ;;  %7124 = vmatpush1.bf16.msra.mxu1 %v19231_v29  ;;  %v3229_v5 = vld [vmem:[#allocation2 + $0x2c8] sm:$0x3f]  ;;  %v6215_v29 = vrot.slane %v20984_v15, 1  ;;  %v6222_v15 = vrot.slane %v21055_v20, 1 }
 0x3cc   : > { %16094 = vmatmul.mubr.msk.bf16.gmra.mrb[84].mxu0 %vm3044_vm6, %v21730_v27  ;;  %16110 = vmatmul.mubr.msk.bf16.gmra.mrb[204].mxu1 %vm3044_vm6, %v21730_v27 }
 0x3cd   : > { %5635 = vmatprep.mubr.bf16.mxu0 %v25776_v4  ;;  %6001 = vmatprep.mubr.bf16.mxu1 %v25776_v4 }
 0x3ce   : > { %6760 = vmatpush1.bf16.msra.mxu0 %v19225_v21  ;;  %7125 = vmatprep.subr.bf16.mxu1 %v19239_v16  ;;  %v6082_v21 = vld [vmem:[#allocation2] sm:$0xfc]  ;;  %v3344_v16 = vpack.c.bf16 %v3229_v5, %v21903_v53 }
 0x3cf   : > { %6761 = vmatprep.subr.bf16.mxu0 %v19236_v26  ;;  %7126 = vmatpush1.bf16.msra.mxu1 %v19237_v14  ;;  %v6214_v26 = vrot.slane %v6160_v12, 1  ;;  %v16187_v53 = vld [vmem:[%s25766_s5 + $0x680] sm:$0xff]  ;;  %v6234_v12 = vrot.slane %v21187_v25, 1  ;;  %v6238_v25 = vrot.slane %v25779_v1, 1 }
 0x3d0   : > { %7127 = vmatprep.subr.bf16.mxu1 %v19242_v54  ;;  %v6159_v54 = vpack.c.bf16 %v21932_v39, %v6082_v21  ;;  %v19255_v39 = vld [vmem:[%s25766_s5 + $0x660] ss:$16 sps:$4 sm:$0xff]   ;;  %v16257_v20 = vcombine.low %v16187_v53, %v16187_v53  ;;  %v6240_v21 = vrot.slane %v25778_v31, 1  ;;  %v6244_v31 = vrot.slane %v21290_v8, 1 }
 0x3d1   : > { %v6216_v14 = vsel %vm6210_vm10, %v6214_v26, %v6215_v29  ;;  %v6246_v26 = vrot.slane %v21270_v57, 1  ;;  %v6250_v57 = vrot.slane %v21337_v30, 1 }
 0x3d2   : > { %6762 = vmatpush1.bf16.msra.mxu0 %v19234_v19  ;;  %v6211_v19 = vrot.slane %v6159_v54, 1  ;;  %v6252_v54 = vrot.slane %v21317_v44, 1  ;;  %v6256_v44 = vrot.slane %v21380_v33, 1 }
 0x3d3   : > { %6763 = vmatprep.subr.bf16.mxu0 %v19245_v6  ;;  %7128 = vmatpush1.bf16.msra.mxu1 %v19240_v56  ;;  %v16188_v56 = vld [vmem:[%s25766_s5 + $0x688] sm:$0xff]  ;;  %s17138_s5 = sshll.u32 %s20053_s8, 7  ;;  %s19896_s8 = smov [#allocation6]  }
 0x3d4   : > { %16095 = vmatmul.mubr.msk.bf16.gmra.mrb[88].mxu0 %vm3044_vm6, %v21763_v10  ;;  %16111 = vmatmul.mubr.msk.bf16.gmra.mrb[208].mxu1 %vm3044_vm6, %v21763_v10  ;;  %v6213_v6 = vsel %vm6210_vm10, %v6211_v19, %v6212_v22  ;;  %v6253_v1 = vsel %vm6210_vm10, %v6246_v26, %v6252_v54  ;;  %v6258_v19 = vrot.slane %v21366_v42, 1  ;;  %v6262_v42 = vrot.slane %v21456_v2, 1 }
 0x3d5   : > { %5645 = vmatprep.mubr.bf16.mxu0 %v25776_v4  ;;  %6011 = vmatprep.mubr.bf16.mxu1 %v25776_v4 }
 0x3d6   : > { %6764 = vmatpush1.bf16.msra.mxu0 %v19243_v24  ;;  %7129 = vmatprep.subr.bf16.mxu1 %v19248_v28  ;;  %v16258_v24 = vcombine.high %v16187_v53, %v16187_v53  ;;  %v16260_v28 = vcombine.high %v16188_v56, %v16188_v56  ;;  %v6259_v8 = vsel %vm6210_vm10, %v6252_v54, %v6258_v19  ;;  %v6264_v53 = vrot.slane %v21430_v45, 1  ;;  %v19300_v54 = vld [vmem:[%s25780_s10 + $0xe0] ss:$12 sps:$4 sm:$0xff]  }
 0x3d7   : > { %7130 = vmatpush1.bf16.msra.mxu1 %v19246_v43  ;;  %6765 = vmatprep.subr.bf16.mxu0 %v19251_v40  ;;  %v16259_v43 = vcombine.low %v16188_v56, %v16188_v56  ;;  %v6223_v40 = vsel %vm6210_vm10, %v6215_v29, %v6222_v15  ;;  %v6232_v29 = vrot.slane %v25777_v9, 1  ;;  %v6247_v9 = vsel %vm6210_vm10, %v6240_v21, %v6246_v26  ;;  %v19265_v26 = vld [vmem:[%s25780_s10] ss:$12 sps:$4 sm:$0xff]  }
 0x3d8   : > { %7131 = vmatprep.subr.bf16.mxu1 %v19254_v52  ;;  %v6220_v52 = vrot.slane %v21103_v58, 1  ;;  %v6226_v58 = vrot.slane %v21164_v7, 1  ;;  %v6241_v7 = vsel %vm6210_vm10, %v6234_v12, %v6240_v21  ;;  %v6257_v56 = vsel %vm6210_vm10, %v6250_v57, %v6256_v44  ;;  %v19825_v21 = vld [vmem:[#allocation2 + $0x28] sm:$0xff] }
 0x3d9   : > { %v6265_v30 = vsel %vm6210_vm10, %v6258_v19, %v6264_v53  ;;  %v6268_v45 = vrot.slane %v21503_v34, 1  ;;  %v19308_v19 = vld [vmem:[%s25780_s10 + $0xf8] ss:$12 sps:$4 sm:$0xff]  }
 0x3da   : > { %6766 = vmatpush1.bf16.msra.mxu0 %v19249_v3  ;;  %v6724_v3 = vsel %vm4211_vm7, %v16257_v20, 0  ;;  %v6221_v38 = vsel %vm6210_vm10, %v6212_v22, %v6220_v52  ;;  %v6227_v5 = vsel %vm6210_vm10, %v6220_v52, %v6226_v58  ;;  %v6245_v22 = vsel %vm6210_vm10, %v6238_v25, %v6244_v31 }
 0x3db   : > { %7132 = vmatpush1.bf16.msra.mxu1 %v19252_v63  ;;  %6918 = vmatprep.subr.bf16.mxu0 %v19257_v60  ;;  %v6730_v63 = vsel %vm4211_vm7, %v16259_v43, 0  ;;  %v6228_v60 = vrot.slane %v21138_v48, 1  ;;  %v6282_v20 = vrot.slane %v21553_v55, 1  ;;  %v6288_v43 = vrot.slane %v21568_v61, 1  ;;  %v19823_v55 = vld [vmem:[#allocation2 + $0x2a8] sm:$0xff] }
 0x3dc   : > { %16096 = vmatmul.mubr.msk.bf16.gmra.mrb[92].mxu0 %vm3044_vm6, %v21796_v49  ;;  %16112 = vmatmul.mubr.msk.bf16.gmra.mrb[212].mxu1 %vm3044_vm6, %v21796_v49 }
 0x3dd   : > { %5655 = vmatprep.mubr.bf16.mxu0 %v25776_v4  ;;  %6021 = vmatprep.mubr.bf16.mxu1 %v25776_v4  ;;  %v6235_v48 = vsel %vm6210_vm10, %v6228_v60, %v6234_v12  ;;  %v19267_v12 = vld [vmem:[%s25780_s10 + $0x4] ss:$12 sps:$4 sm:$0xff]  }
 0x3de   : > { %7284 = vmatprep.subr.bf16.mxu1 %v19262_v59  ;;  %v6229_v59 = vsel %vm6210_vm10, %v6222_v15, %v6228_v60  ;;  %v6251_v15 = vsel %vm6210_vm10, %v6244_v31, %v6250_v57  ;;  %v19270_v31 = vld [vmem:[%s25780_s10 + $0x1c] ss:$12 sps:$4 sm:$0xff]   ;;  %v19273_v57 = vld [vmem:[%s25780_s10 + $0x34] ss:$12 sps:$4 sm:$0xff]  }
 0x3e4   : > { %16097 = vmatmul.mubr.msk.bf16.gmra.mrb[96].mxu0 %vm3044_vm6, %v21829_v18  ;;  %16113 = vmatmul.mubr.msk.bf16.gmra.mrb[216].mxu1 %vm3044_vm6, %v21829_v18 }
 0x3e5   : > { %5665 = vmatprep.mubr.bf16.mxu0 %v25776_v4  ;;  %6031 = vmatprep.mubr.bf16.mxu1 %v25776_v4 }
 0x3ec   : > { %16098 = vmatmul.mubr.msk.bf16.gmra.mrb[100].mxu0 %vm3044_vm6, %v21862_v11  ;;  %16114 = vmatmul.mubr.msk.bf16.gmra.mrb[220].mxu1 %vm3044_vm6, %v21862_v11 }
 0x3ed   : > { %5675 = vmatprep.mubr.bf16.mxu0 %v25776_v4  ;;  %6041 = vmatprep.mubr.bf16.mxu1 %v25776_v4 }
 0x3f4   : > { %16099 = vmatmul.mubr.msk.bf16.gmra.mrb[104].mxu0 %vm3044_vm6, %v21877_v41  ;;  %16115 = vmatmul.mubr.msk.bf16.gmra.mrb[224].mxu1 %vm3044_vm6, %v21877_v41 }
 0x3f5   : > { %5685 = vmatprep.mubr.bf16.mxu0 %v25776_v4  ;;  %6051 = vmatprep.mubr.bf16.mxu1 %v25776_v4 }
 0x3fc   : > { %16100 = vmatmul.mubr.msk.bf16.gmra.mrb[108].mxu0 %vm3044_vm6, %v21886_v32  ;;  %16116 = vmatmul.mubr.msk.bf16.gmra.mrb[228].mxu1 %vm3044_vm6, %v21886_v32 }
 0x3fd   : > { %5695 = vmatprep.mubr.bf16.mxu0 %v25776_v4  ;;  %6061 = vmatprep.mubr.bf16.mxu1 %v25776_v4 }
 0x404   : > { %16101 = vmatmul.mubr.msk.bf16.gmra.mrb[112].mxu0 %vm3044_vm6, %v21895_v51  ;;  %16117 = vmatmul.mubr.msk.bf16.gmra.mrb[232].mxu1 %vm3044_vm6, %v21895_v51 }
 0x405   : > { %5705 = vmatprep.mubr.bf16.mxu0 %v25776_v4  ;;  %6071 = vmatprep.mubr.bf16.mxu1 %v25776_v4 }
 0x40c   : > { %16102 = vmatmul.mubr.msk.bf16.gmra.mrb[116].mxu0 %vm3044_vm6, %v3344_v16  ;;  %16118 = vmatmul.mubr.msk.bf16.gmra.mrb[236].mxu1 %vm3044_vm6, %v3344_v16  ;;  %v6233_v16 = vsel %vm6210_vm10, %v6226_v58, %v6232_v29 }
 0x40d   : > { %6767 = vmatprep.mubr.bf16.mxu0 %v6216_v14  ;;  %7133 = vmatprep.mubr.bf16.mxu1 %v6216_v14  ;;  %v6239_v14 = vsel %vm6210_vm10, %v6232_v29, %v6238_v25  ;;  %v6084_v29 = vld [vmem:[#allocation2 + $0x10] sm:$0xfc] }
 0x414   : > { %6768 = vmatmul.mubr.bf16.vlgmr.msra.gmra.mrb[60].mxu0 %v6213_v6  ;;  %7134 = vmatmul.mubr.bf16.vlgmr.msra.gmra.mrb[180].mxu1 %v6213_v6  ;;  %v6270_v6 = vrot.slane %v21487_v50, 1  ;;  %v6274_v50 = vrot.slane %v21548_v0, 1  ;;  %v6289_v0 = vsel %vm6210_vm10, %v6282_v20, %v6288_v43 }
 0x415   : > { %6777 = vmatprep.mubr.bf16.mxu0 %v6223_v40  ;;  %7143 = vmatprep.mubr.bf16.mxu1 %v6223_v40  ;;  %v6086_v40 = vld [vmem:[#allocation2 + $0x2c0] sm:$0xff] }
 0x416   : > { %6919 = vmatpush1.bf16.msra.mxu0 %v19255_v39  ;;  %7285 = vmatpush1.bf16.msra.mxu1 %v19260_v46  ;;  %v6263_v39 = vsel %vm6210_vm10, %v6256_v44, %v6262_v42  ;;  %v6271_v33 = vsel %vm6210_vm10, %v6264_v53, %v6270_v6  ;;  %v6276_v46 = vrot.slane %v21530_v35, 1  ;;  %v6280_v35 = vrot.slane %v21564_v36, 1  ;;  %v19824_v36 = vld [vmem:[#allocation2 + $0x2a0] sm:$0xff]  ;;  %v19276_v44 = vld [vmem:[%s25780_s10 + $0x4c] ss:$12 sps:$4 sm:$0xff]  }
 0x417   : > { %16261 = vmatprep.subr.msk.bf16.mxu0 %vm4211_vm7, %v16258_v24  ;;  %16277 = vmatprep.subr.msk.bf16.mxu1 %vm4211_vm7, %v16260_v28  ;;  %v6269_v24 = vsel %vm6210_vm10, %v6262_v42, %v6268_v45  ;;  %v6275_v28 = vsel %vm6210_vm10, %v6268_v45, %v6274_v50  ;;  %v19310_v53 = vld [vmem:[%s25780_s10 + $0x110] ss:$12 sps:$4 sm:$0xff]   ;;  %v6230_v42 = vrot.slane %v21634_v47, 1  ;;  %v19316_v47 = vld [vmem:[%s25780_s10 + $0x68] ss:$12 sps:$4 sm:$0xff]  }
 0x418   : > { %v6277_v2 = vsel %vm6210_vm10, %v6270_v6, %v6276_v46  ;;  %v6283_v34 = vsel %vm6210_vm10, %v6276_v46, %v6282_v20  ;;  %v6281_v52 = vsel %vm6210_vm10, %v6274_v50, %v6280_v35  ;;  %v19279_v6 = vld [vmem:[%s25780_s10 + $0x64] ss:$12 sps:$4 sm:$0xff]   ;;  %v19282_v46 = vld [vmem:[%s25780_s10 + $0x7c] ss:$12 sps:$4 sm:$0xff]   ;;  %v19321_v50 = vld [vmem:[%s25780_s10 + $0x80] ss:$12 sps:$4 sm:$0xff]  }
 0x419   : > { %v6236_v20 = vrot.slane %v21664_v23, 1  ;;  %v19286_v23 = vld [vmem:[%s25780_s10 + $0xa8] ss:$12 sps:$4 sm:$0xff]  }
 0x41a   : > { %6921 = vmatpush1.bf16.msra.mxu0 %v6724_v3  ;;  %7287 = vmatpush1.bf16.msra.mxu1 %v6730_v63  ;;  %v6163_v3 = vpack.c.bf16 %v6086_v40, %v19823_v55  ;;  %v6286_v63 = vrot.slane %v21577_v62, 1  ;;  %v6242_v40 = vrot.slane %v21697_v37, 1  ;;  %v19294_v37 = vld [vmem:[%s25780_s10 + $0xd8] ss:$12 sps:$4 sm:$0xff]  }
 0x41b   : > { %8395 = vmatprep.subr.bf16.mxu0 %v19267_v12  ;;  %v19305_v12 = vld [vmem:[%s25780_s10 + $0x120] ss:$12 sps:$4 sm:$0xff]  }
 0x41c   : > { %6778 = vmatmul.mubr.bf16.gmra.mrb[64].mxu0 %v6221_v38  ;;  %7144 = vmatmul.mubr.bf16.gmra.mrb[184].mxu1 %v6221_v38  ;;  %v6294_v60 = vrot.slane %v6163_v3, 1  ;;  %v6085_v38 = vld [vmem:[#allocation2 + $0x2b8] sm:$0xff]  ;;  %v6243_v55 = vsel %vm6210_vm10, %v6236_v20, %v6242_v40 }
 0x41d   : > { %6787 = vmatprep.mubr.bf16.mxu0 %v6229_v59  ;;  %7153 = vmatprep.mubr.bf16.mxu1 %v6229_v59  ;;  %v6287_v59 = vsel %vm6210_vm10, %v6280_v35, %v6286_v63  ;;  %v6162_v58 = vpack.c.bf16 %v6085_v38, %v19824_v36  ;;  %v6237_v35 = vsel %vm6210_vm10, %v6230_v42, %v6236_v20  ;;  %v19296_v3 = vld [vmem:[%s25780_s10 + $0xdc] ss:$12 sps:$4 sm:$0xff]   ;;  %v19304_v36 = vld [vmem:[%s25780_s10 + $0x10c] ss:$12 sps:$4 sm:$0xff]  }
 0x41e   : > { %v6295_v61 = vsel %vm6210_vm10, %v6288_v43, %v6294_v60  ;;  %v19288_v43 = vld [vmem:[%s25780_s10 + $0xac] ss:$12 sps:$4 sm:$0xff]   ;;  %v19297_v38 = vld [vmem:[%s25780_s10 + $0xf0] ss:$12 sps:$4 sm:$0xff]  }
 0x424   : > { %6788 = vmatmul.mubr.bf16.gmra.mrb[68].mxu0 %v6227_v5  ;;  %7154 = vmatmul.mubr.bf16.gmra.mrb[188].mxu1 %v6227_v5  ;;  %v6292_v5 = vrot.slane %v6162_v58, 1  ;;  %v6254_v58 = vrot.slane %v21763_v10, 1  ;;  %v19312_v10 = vld [vmem:[%s25780_s10 + $0x138] ss:$12 sps:$4 sm:$0xff]  }
 0x425   : > { %6797 = vmatprep.mubr.bf16.mxu0 %v6235_v48  ;;  %7163 = vmatprep.mubr.bf16.mxu1 %v6235_v48  ;;  %v19292_v48 = vld [vmem:[%s25780_s10 + $0xc8] ss:$12 sps:$4 sm:$0xff]  }
 0x426   : > { %v6293_v62 = vsel %vm6210_vm10, %v6286_v63, %v6292_v5  ;;  %17192 = vmatprep.subr.bf16.mxu1 %v19292_v48  ;;  %v6248_v63 = vrot.slane %v21730_v27, 1  ;;  %v19302_v27 = vld [vmem:[%s25780_s10 + $0x108] ss:$12 sps:$4 sm:$0xff]   ;;  %v6260_v48 = vrot.slane %v21796_v49, 1  ;;  %v6266_v49 = vrot.slane %v21829_v18, 1 }
 0x427   : > { %v6278_v18 = vrot.slane %v21877_v41, 1  ;;  %v19323_v41 = vld [vmem:[%s25780_s10 + $0x98] ss:$12 sps:$4 sm:$0xff]  }
 0x42c   : > { %6798 = vmatmul.mubr.bf16.gmra.mrb[72].mxu0 %v6233_v16  ;;  %7164 = vmatmul.mubr.bf16.gmra.mrb[192].mxu1 %v6233_v16  ;;  %v6161_v16 = vpack.c.bf16 %v19825_v21, %v6084_v29  ;;  %v19320_v29 = vld [vmem:[%s25780_s10 + $0x154] ss:$12 sps:$4 sm:$0xff]   ;;  %v19318_v21 = vld [vmem:[%s25780_s10 + $0x150] ss:$12 sps:$4 sm:$0xff]  }
 0x42d   : > { %6807 = vmatprep.mubr.bf16.mxu0 %v6241_v7  ;;  %7173 = vmatprep.mubr.bf16.mxu1 %v6241_v7  ;;  %v6218_v7 = vrot.slane %v21602_v17, 1  ;;  %v19268_v17 = vld [vmem:[%s25780_s10 + $0x18] ss:$12 sps:$4 sm:$0xff]  }
 0x42e   : > { %v6217_v25 = vrot.slane %v6161_v16, 1  ;;  %v6261_v16 = vsel %vm6210_vm10, %v6254_v58, %v6260_v48 }
 0x434   : > { %6808 = vmatmul.mubr.bf16.gmra.mrb[76].mxu0 %v6239_v14  ;;  %7174 = vmatmul.mubr.bf16.gmra.mrb[196].mxu1 %v6239_v14  ;;  %v19293_v14 = vld [vmem:[%s25780_s10 + $0x8] ss:$12 sps:$4 sm:$0xff]  }
 0x435   : > { %6817 = vmatprep.mubr.bf16.mxu0 %v6247_v9  ;;  %7183 = vmatprep.mubr.bf16.mxu1 %v6247_v9  ;;  %v6219_v9 = vsel %vm6210_vm10, %v6217_v25, %v6218_v7  ;;  %v6272_v25 = vrot.slane %v21862_v11, 1  ;;  %v6284_v11 = vrot.slane %v21886_v32, 1  ;;  %v19326_v32 = vld [vmem:[%s25780_s10 + $0x16c] ss:$12 sps:$4 sm:$0xff]  }
 0x43c   : > { %6818 = vmatmul.mubr.bf16.gmra.mrb[80].mxu0 %v6245_v22  ;;  %7184 = vmatmul.mubr.bf16.gmra.mrb[200].mxu1 %v6245_v22  ;;  %v19301_v22 = vld [vmem:[%s25780_s10 + $0x20] ss:$12 sps:$4 sm:$0xff]  }
 0x43d   : > { %6827 = vmatprep.mubr.bf16.mxu0 %v6253_v1  ;;  %7193 = vmatprep.mubr.bf16.mxu1 %v6253_v1  ;;  %v6224_v1 = vrot.slane %v21607_v13, 1  ;;  %v19309_v13 = vld [vmem:[%s25780_s10 + $0x38] ss:$12 sps:$4 sm:$0xff]  }
 0x43f   : > { %v6231_v45 = vsel %vm6210_vm10, %v6224_v1, %v6230_v42  ;;  %v25783_v42 = vld [vmem:[#allocation16_spill] sm:$0xff] }
 0x444   : > { %6828 = vmatmul.mubr.bf16.gmra.mrb[84].mxu0 %v6251_v15  ;;  %7194 = vmatmul.mubr.bf16.gmra.mrb[204].mxu1 %v6251_v15  ;;  %v19271_v15 = vld [vmem:[%s25780_s10 + $0x30] ss:$12 sps:$4 sm:$0xff]  }
 0x445   : > { %6837 = vmatprep.mubr.bf16.mxu0 %v6259_v8  ;;  %7203 = vmatprep.mubr.bf16.mxu1 %v6259_v8  ;;  %v6225_v8 = vsel %vm6210_vm10, %v6218_v7, %v6224_v1  ;;  %v6267_v7 = vsel %vm6210_vm10, %v6260_v48, %v6266_v49  ;;  %v6290_v1 = vrot.slane %v21895_v51, 1 }
 0x44c   : > { %6838 = vmatmul.mubr.bf16.gmra.mrb[88].mxu0 %v6257_v56  ;;  %7204 = vmatmul.mubr.bf16.gmra.mrb[208].mxu1 %v6257_v56  ;;  %v19274_v56 = vld [vmem:[%s25780_s10 + $0x48] ss:$12 sps:$4 sm:$0xff]  }
 0x44d   : > { %6847 = vmatprep.mubr.bf16.mxu0 %v6265_v30  ;;  %7213 = vmatprep.mubr.bf16.mxu1 %v6265_v30  ;;  %v19311_v30 = vld [vmem:[%s25780_s10 + $0x50] ss:$12 sps:$4 sm:$0xff]  }
 0x454   : > { %6848 = vmatmul.mubr.bf16.gmra.mrb[92].mxu0 %v6263_v39  ;;  %7214 = vmatmul.mubr.bf16.gmra.mrb[212].mxu1 %v6263_v39  ;;  %v19315_v39 = vld [vmem:[%s25780_s10 + $0x128] ss:$12 sps:$4 sm:$0xff]  }
 0x455   : > { %6857 = vmatprep.mubr.bf16.mxu0 %v6271_v33  ;;  %7223 = vmatprep.mubr.bf16.mxu1 %v6271_v33  ;;  %v19277_v33 = vld [vmem:[%s25780_s10 + $0x60] ss:$12 sps:$4 sm:$0xff]  }
 0x45c   : > { %6858 = vmatmul.mubr.bf16.gmra.mrb[96].mxu0 %v6269_v24  ;;  %7224 = vmatmul.mubr.bf16.gmra.mrb[216].mxu1 %v6269_v24  ;;  %v19317_v24 = vld [vmem:[%s25780_s10 + $0x140] ss:$12 sps:$4 sm:$0xff]  }
 0x45d   : > { %6867 = vmatprep.mubr.bf16.mxu0 %v6277_v2  ;;  %7233 = vmatprep.mubr.bf16.mxu1 %v6277_v2  ;;  %v19280_v2 = vld [vmem:[%s25780_s10 + $0x78] ss:$12 sps:$4 sm:$0xff]  }
 0x464   : > { %6868 = vmatmul.mubr.bf16.gmra.mrb[100].mxu0 %v6275_v28  ;;  %7234 = vmatmul.mubr.bf16.gmra.mrb[220].mxu1 %v6275_v28  ;;  %v19285_v28 = vld [vmem:[%s25780_s10 + $0x94] ss:$12 sps:$4 sm:$0xff]  }
 0x465   : > { %6877 = vmatprep.mubr.bf16.mxu0 %v6283_v34  ;;  %7243 = vmatprep.mubr.bf16.mxu1 %v6283_v34  ;;  %v19283_v34 = vld [vmem:[%s25780_s10 + $0x90] ss:$12 sps:$4 sm:$0xff]  }
 0x46c   : > { %6878 = vmatmul.mubr.bf16.gmra.mrb[104].mxu0 %v6281_v52  ;;  %7244 = vmatmul.mubr.bf16.gmra.mrb[224].mxu1 %v6281_v52  ;;  %v19291_v52 = vld [vmem:[%s25780_s10 + $0xc4] ss:$12 sps:$4 sm:$0xff]  }
 0x46d   : > { %6887 = vmatprep.mubr.bf16.mxu0 %v6289_v0  ;;  %7253 = vmatprep.mubr.bf16.mxu1 %v6289_v0  ;;  %v19289_v0 = vld [vmem:[%s25780_s10 + $0xc0] ss:$12 sps:$4 sm:$0xff]  }
 0x474   : > { %6888 = vmatmul.mubr.bf16.gmra.mrb[108].mxu0 %v6287_v59  ;;  %7254 = vmatmul.mubr.bf16.gmra.mrb[228].mxu1 %v6287_v59  ;;  %v6249_v59 = vsel %vm6210_vm10, %v6242_v40, %v6248_v63 }
 0x475   : > { %6897 = vmatprep.mubr.bf16.mxu0 %v6295_v61  ;;  %7263 = vmatprep.mubr.bf16.mxu1 %v6295_v61  ;;  %v19307_v61 = vld [vmem:[%s25780_s10 + $0x124] ss:$12 sps:$4 sm:$0xff]  }
 0x47c   : > { %6898 = vmatmul.mubr.bf16.gmra.mrb[112].mxu0 %v6293_v62  ;;  %7264 = vmatmul.mubr.bf16.gmra.mrb[232].mxu1 %v6293_v62  ;;  %v19314_v62 = vld [vmem:[%s25780_s10 + $0x13c] ss:$12 sps:$4 sm:$0xff]  }
 0x47d   : > { %6907 = vmatprep.mubr.bf16.mxu0 %v6294_v60  ;;  %7273 = vmatprep.mubr.bf16.mxu1 %v6294_v60  ;;  %v19299_v60 = vld [vmem:[%s25780_s10 + $0xf4] ss:$12 sps:$4 sm:$0xff]  }
 0x484   : > { %6908 = vmatmul.mubr.bf16.gmra.mrb[116].mxu0 %v6292_v5  ;;  %7274 = vmatmul.mubr.bf16.gmra.mrb[236].mxu1 %v6292_v5  ;;  %v6255_v5 = vsel %vm6210_vm10, %v6248_v63, %v6254_v58 }
 0x485   : > { %6950 = vmatprep.mubr.bf16.mxu0 %v25776_v4  ;;  %7316 = vmatprep.mubr.bf16.mxu1 %v25776_v4 }
 0x48c   : > { %16262 = vmatmul.mubr.msk.bf16.vlgmr.msra.gmra.mrb[60].mxu0 %vm3044_vm6, %v6219_v9  ;;  %16278 = vmatmul.mubr.msk.bf16.vlgmr.msra.gmra.mrb[180].mxu1 %vm3044_vm6, %v6219_v9  ;;  %v19322_v9 = vld [vmem:[%s25780_s10 + $0x158] ss:$12 sps:$4 sm:$0xff]  }
 0x48d   : > { %6960 = vmatprep.mubr.bf16.mxu0 %v25776_v4  ;;  %7326 = vmatprep.mubr.bf16.mxu1 %v25776_v4 }
 0x48e   : > { %8396 = vmatpush1.bf16.msra.mxu0 %v19265_v26  ;;  %17193 = vmatpush3.bf16.msra.mxu1 %v19293_v14  ;;  %v6273_v26 = vsel %vm6210_vm10, %v6266_v49, %v6272_v25  ;;  %v6279_v14 = vsel %vm6210_vm10, %v6272_v25, %v6278_v18  ;;  %v19354_v49 = vld [vmem:[%s25780_s10 + $0x1a0] ss:$12 sps:$4 sm:$0xff]  }
 0x48f   : > { %8397 = vmatprep.subr.bf16.mxu0 %v19270_v31  ;;  %17194 = vmatprep.subr.bf16.mxu1 %v19300_v54  ;;  %v6285_v31 = vsel %vm6210_vm10, %v6278_v18, %v6284_v11  ;;  %v19324_v54 = vld [vmem:[%s25780_s10 + $0x168] ss:$12 sps:$4 sm:$0xff]  }
 0x492   : > { %8398 = vmatpush1.bf16.msra.mxu0 %v19268_v17  ;;  %17195 = vmatpush3.bf16.msra.mxu1 %v19301_v22  ;;  %v19327_v17 = vld [vmem:[%s25780_s10 + $0x170] ss:$12 sps:$4 sm:$0xff]  }
 0x493   : > { %8399 = vmatprep.subr.bf16.mxu0 %v19273_v57  ;;  %17196 = vmatprep.subr.bf16.mxu1 %v19308_v19  ;;  %v19328_v22 = vld [vmem:[%s25780_s10 + $0xb0] ss:$12 sps:$4 sm:$0xff]   ;;  %v6087_v57 = vld [vmem:[#allocation2 + $0x2c8] sm:$0xff]  ;;  %v6291_v19 = vsel %vm6210_vm10, %v6284_v11, %v6290_v1  ;;  %v19337_v11 = vld [vmem:[%s25780_s10 + $0x1b4] ss:$12 sps:$4 sm:$0xff]  }
 0x494   : > { %16263 = vmatmul.mubr.msk.bf16.gmra.mrb[64].mxu0 %vm3044_vm6, %v6225_v8  ;;  %16279 = vmatmul.mubr.msk.bf16.gmra.mrb[184].mxu1 %vm3044_vm6, %v6225_v8  ;;  %v19331_v8 = vld [vmem:[%s25780_s10 + $0x184] ss:$12 sps:$4 sm:$0xff]  }
 0x495   : > { %6970 = vmatprep.mubr.bf16.mxu0 %v25776_v4  ;;  %7336 = vmatprep.mubr.bf16.mxu1 %v25776_v4 }
 0x496   : > { %8400 = vmatpush1.bf16.msra.mxu0 %v19271_v15  ;;  %17197 = vmatpush3.bf16.msra.mxu1 %v19309_v13  ;;  %v19826_v15 = vld [vmem:[#allocation2 + $0x2b0] sm:$0xff] }
 0x497   : > { %8401 = vmatprep.subr.bf16.mxu0 %v19276_v44  ;;  %17198 = vmatprep.subr.bf16.mxu1 %v19310_v53  ;;  %v6164_v13 = vpack.c.bf16 %v6087_v57, %v19826_v15  ;;  %v7587_v53 = vld [vmem:[%s25781_s0] sm:$0xf]  ;;  %v19355_v57 = vld [vmem:[%s25780_s10 + $0x1b8] ss:$12 sps:$4 sm:$0xff]   ;;  %s15712_s0 = sshll.u32 %s783_s28, 3 }
 0x498   : > { %v19340_v15 = vld [vmem:[%s25780_s10 + $0x1cc] ss:$12 sps:$4 sm:$0xff]  }
 0x499   : > { %v6296_v51 = vrot.slane %v6164_v13, 1 }
 0x49a   : > { %8402 = vmatpush1.bf16.msra.mxu0 %v19274_v56  ;;  %17199 = vmatpush3.bf16.msra.mxu1 %v19311_v30  ;;  %v25782_v56 = vld [vmem:[#allocation15_spill] sm:$0xff] }
 0x49b   : > { %8403 = vmatprep.subr.bf16.mxu0 %v19279_v6  ;;  %17200 = vmatprep.subr.bf16.mxu1 %v19315_v39  ;;  %v6297_v44 = vsel %vm6210_vm10, %v6290_v1, %v6296_v51  ;;  %v7603_v30 = vsub.s32 3, %v25782_v56  ;;  %v22597_v6 = vrot.slane %v7587_v53, %v25783_v42  ;;  %v25784_v39 = vld [vmem:[#allocation18_spill] sm:$0xff] }
 0x49c   : > { %16264 = vmatmul.mubr.msk.bf16.gmra.mrb[68].mxu0 %vm3044_vm6, %v6231_v45  ;;  %16280 = vmatmul.mubr.msk.bf16.gmra.mrb[188].mxu1 %vm3044_vm6, %v6231_v45  ;;  %v19335_v1 = vld [vmem:[%s25780_s10 + $0x1b0] ss:$12 sps:$4 sm:$0xff]  }
 0x49d   : > { %6980 = vmatprep.mubr.bf16.mxu0 %v25776_v4  ;;  %7346 = vmatprep.mubr.bf16.mxu1 %v25776_v4 }
 0x49e   : > { %8404 = vmatpush1.bf16.msra.mxu0 %v19277_v33  ;;  %17201 = vmatpush3.bf16.msra.mxu1 %v19316_v47  ;;  %v22600_v33 = vrot.slane %v7587_v53, %v25784_v39 }
 0x49f   : > { %8405 = vmatprep.subr.bf16.mxu0 %v19282_v46  ;;  %17202 = vmatprep.subr.bf16.mxu1 %v19317_v24  ;;  %v25785_v46 = vld [vmem:[#allocation17_spill] sm:$0xff] }
 0x4a0   : > { %v22603_v24 = vrot.slane %v7587_v53, %v25785_v46 }
 0x4a2   : > { %8406 = vmatpush1.bf16.msra.mxu0 %v19280_v2  ;;  %17203 = vmatpush3.bf16.msra.mxu1 %v19321_v50  ;;  %v22605_v2 = vrot.slane %v7587_v53, %v7603_v30 }
 0x4a3   : > { %8407 = vmatprep.subr.bf16.mxu0 %v19285_v28  ;;  %17204 = vmatprep.subr.bf16.mxu1 %v19322_v9 }
 0x4a4   : > { %16265 = vmatmul.mubr.msk.bf16.gmra.mrb[72].mxu0 %vm3044_vm6, %v6237_v35  ;;  %16281 = vmatmul.mubr.msk.bf16.gmra.mrb[192].mxu1 %vm3044_vm6, %v6237_v35 }
 0x4a5   : > { %6990 = vmatprep.mubr.bf16.mxu0 %v25776_v4  ;;  %7356 = vmatprep.mubr.bf16.mxu1 %v25776_v4 }
 0x4a6   : > { %8408 = vmatpush1.bf16.msra.mxu0 %v19283_v34  ;;  %17205 = vmatpush3.bf16.msra.mxu1 %v19323_v41 }
 0x4a7   : > { %8409 = vmatprep.subr.bf16.mxu0 %v19288_v43  ;;  %17206 = vmatprep.subr.bf16.mxu1 %v19327_v17 }
 0x4aa   : > { %8410 = vmatpush1.bf16.msra.mxu0 %v19286_v23  ;;  %17207 = vmatpush3.bf16.msra.mxu1 %v19328_v22 }
 0x4ab   : > { %8411 = vmatprep.subr.bf16.mxu0 %v19291_v52  ;;  %8914 = vmatprep.subr.bf16.mxu1 %v25776_v4 }
 0x4ac   : > { %16266 = vmatmul.mubr.msk.bf16.gmra.mrb[76].mxu0 %vm3044_vm6, %v6243_v55  ;;  %16282 = vmatmul.mubr.msk.bf16.gmra.mrb[196].mxu1 %vm3044_vm6, %v6243_v55 }
 0x4ad   : > { %7000 = vmatprep.mubr.bf16.mxu0 %v25776_v4  ;;  %7366 = vmatprep.mubr.bf16.mxu1 %v25776_v4 }
 0x4ae   : > { %8412 = vmatpush1.bf16.msra.mxu0 %v19289_v0 }
 0x4af   : > { %8413 = vmatprep.subr.bf16.mxu0 %v19296_v3 }
 0x4b2   : > { %8414 = vmatpush1.bf16.msra.mxu0 %v19294_v37 }
 0x4b3   : > { %8415 = vmatprep.subr.bf16.mxu0 %v19299_v60 }
 0x4b4   : > { %16267 = vmatmul.mubr.msk.bf16.gmra.mrb[80].mxu0 %vm3044_vm6, %v6249_v59  ;;  %16283 = vmatmul.mubr.msk.bf16.gmra.mrb[200].mxu1 %vm3044_vm6, %v6249_v59 }
 0x4b5   : > { %7010 = vmatprep.mubr.bf16.mxu0 %v25776_v4  ;;  %7376 = vmatprep.mubr.bf16.mxu1 %v25776_v4 }
 0x4b6   : > { %8416 = vmatpush1.bf16.msra.mxu0 %v19297_v38 }
 0x4b7   : > { %8417 = vmatprep.subr.bf16.mxu0 %v19304_v36  ;;  %v19329_v36 = vld [vmem:[%s25780_s10 + $0x180] ss:$12 sps:$4 sm:$0xff]  }
 0x4ba   : > { %8418 = vmatpush1.bf16.msra.mxu0 %v19302_v27  ;;  %v19350_v27 = vld [vmem:[%s25780_s10 + $0x188] ss:$12 sps:$4 sm:$0xff]  }
 0x4bb   : > { %8419 = vmatprep.subr.bf16.mxu0 %v19307_v61  ;;  %v19334_v61 = vld [vmem:[%s25780_s10 + $0x19c] ss:$12 sps:$4 sm:$0xff]  }
 0x4bc   : > { %16268 = vmatmul.mubr.msk.bf16.gmra.mrb[84].mxu0 %vm3044_vm6, %v6255_v5  ;;  %16284 = vmatmul.mubr.msk.bf16.gmra.mrb[204].mxu1 %vm3044_vm6, %v6255_v5 }
 0x4bd   : > { %7020 = vmatprep.mubr.bf16.mxu0 %v25776_v4  ;;  %7386 = vmatprep.mubr.bf16.mxu1 %v25776_v4 }
 0x4be   : > { %8420 = vmatpush1.bf16.msra.mxu0 %v19305_v12 }
 0x4bf   : > { %8421 = vmatprep.subr.bf16.mxu0 %v19314_v62 }
 0x4c2   : > { %8422 = vmatpush1.bf16.msra.mxu0 %v19312_v10 }
 0x4c3   : > { %8423 = vmatprep.subr.bf16.mxu0 %v19320_v29 }
 0x4c4   : > { %16269 = vmatmul.mubr.msk.bf16.gmra.mrb[88].mxu0 %vm3044_vm6, %v6261_v16  ;;  %16285 = vmatmul.mubr.msk.bf16.gmra.mrb[208].mxu1 %vm3044_vm6, %v6261_v16  ;;  %v19332_v16 = vld [vmem:[%s25780_s10 + $0x198] ss:$12 sps:$4 sm:$0xff]  }
 0x4c5   : > { %7030 = vmatprep.mubr.bf16.mxu0 %v25776_v4  ;;  %7396 = vmatprep.mubr.bf16.mxu1 %v25776_v4 }
 0x4c6   : > { %8424 = vmatpush1.bf16.msra.mxu0 %v19318_v21 }
 0x4c7   : > { %8425 = vmatprep.subr.bf16.mxu0 %v19326_v32 }
 0x4ca   : > { %8426 = vmatpush1.bf16.msra.mxu0 %v19324_v54 }
 0x4cb   : > { %8578 = vmatprep.subr.bf16.mxu0 %v19331_v8 }
 0x4cc   : > { %16270 = vmatmul.mubr.msk.bf16.gmra.mrb[92].mxu0 %vm3044_vm6, %v6267_v7  ;;  %16286 = vmatmul.mubr.msk.bf16.gmra.mrb[212].mxu1 %vm3044_vm6, %v6267_v7 }
 0x4cd   : > { %7040 = vmatprep.mubr.bf16.mxu0 %v25776_v4  ;;  %7406 = vmatprep.mubr.bf16.mxu1 %v25776_v4 }
 0x4d4   : > { %16271 = vmatmul.mubr.msk.bf16.gmra.mrb[96].mxu0 %vm3044_vm6, %v6273_v26  ;;  %16287 = vmatmul.mubr.msk.bf16.gmra.mrb[216].mxu1 %vm3044_vm6, %v6273_v26 }
 0x4d5   : > { %7050 = vmatprep.mubr.bf16.mxu0 %v25776_v4  ;;  %7416 = vmatprep.mubr.bf16.mxu1 %v25776_v4 }
 0x4dc   : > { %16272 = vmatmul.mubr.msk.bf16.gmra.mrb[100].mxu0 %vm3044_vm6, %v6279_v14  ;;  %16288 = vmatmul.mubr.msk.bf16.gmra.mrb[220].mxu1 %vm3044_vm6, %v6279_v14 }
 0x4dd   : > { %7060 = vmatprep.mubr.bf16.mxu0 %v25776_v4  ;;  %7426 = vmatprep.mubr.bf16.mxu1 %v25776_v4 }
 0x4e4   : > { %16273 = vmatmul.mubr.msk.bf16.gmra.mrb[104].mxu0 %vm3044_vm6, %v6285_v31  ;;  %16289 = vmatmul.mubr.msk.bf16.gmra.mrb[224].mxu1 %vm3044_vm6, %v6285_v31 }
 0x4e5   : > { %7070 = vmatprep.mubr.bf16.mxu0 %v25776_v4  ;;  %7436 = vmatprep.mubr.bf16.mxu1 %v25776_v4 }
 0x4ec   : > { %16274 = vmatmul.mubr.msk.bf16.gmra.mrb[108].mxu0 %vm3044_vm6, %v6291_v19  ;;  %16290 = vmatmul.mubr.msk.bf16.gmra.mrb[228].mxu1 %vm3044_vm6, %v6291_v19 }
 0x4ed   : > { %7080 = vmatprep.mubr.bf16.mxu0 %v25776_v4  ;;  %7446 = vmatprep.mubr.bf16.mxu1 %v25776_v4 }
 0x4f4   : > { %16275 = vmatmul.mubr.msk.bf16.gmra.mrb[112].mxu0 %vm3044_vm6, %v6297_v44  ;;  %16291 = vmatmul.mubr.msk.bf16.gmra.mrb[232].mxu1 %vm3044_vm6, %v6297_v44 }
 0x4f5   : > { %7090 = vmatprep.mubr.bf16.mxu0 %v25776_v4  ;;  %7456 = vmatprep.mubr.bf16.mxu1 %v25776_v4 }
 0x4fc   : > { %16276 = vmatmul.mubr.msk.bf16.gmra.mrb[116].mxu0 %vm3044_vm6, %v6296_v51  ;;  %16292 = vmatmul.mubr.msk.bf16.gmra.mrb[236].mxu1 %vm3044_vm6, %v6296_v51 }
 0x55f   : > { %v6952_v47 = vpop.f32.mrb[60].mxu0  ;;  %v7318_v45 = vpop.f32.mrb[180].mxu1 }
 0x560   : > { %v6954_v50 = vpop.f32.mrb[61].mxu0  ;;  %v7320_v20 = vpop.f32.mrb[181].mxu1  ;;  %v7609_v35 = vadd.f32 %v22597_v6, %v6952_v47  ;;  %v7611_v43 = vadd.f32 %v22600_v33, %v7318_v45  ;;  %v19338_v47 = vld [vmem:[%s25780_s10 + $0x1c8] ss:$12 sps:$4 sm:$0xff]   ;;  %v19359_v45 = vld [vmem:[%s25780_s10 + $0x1d0] ss:$12 sps:$4 sm:$0xff]  }
 0x561   : > { %v6956_v28 = vpop.f32.mrb[62].mxu0  ;;  %v7322_v34 = vpop.f32.mrb[182].mxu1  ;;  %v7610_v55 = vadd.f32 %v22603_v24, %v6954_v50  ;;  %v7612_v3 = vadd.f32 %v22605_v2, %v7320_v20 }
 0x562   : > { %v7613_v23 = vadd.f32 %v22597_v6, %v6956_v28  ;;  %v7615_v40 = vadd.f32 %v22600_v33, %v7322_v34  ;;  %v6958_v52 = vpop.f32.mrb[63].mxu0  ;;  %v7324_v0 = vpop.f32.mrb[183].mxu1 }
 0x563   : > { %v7614_v37 = vadd.f32 %v22603_v24, %v6958_v52  ;;  %v7616_v63 = vadd.f32 %v22605_v2, %v7324_v0 }
 0x564   : > { %v7841_v60 = vpack.c.bf16 %v7613_v23, %v7609_v35  ;;  %v22615_v38 = vpack.c.bf16 %v7615_v40, %v7611_v43  ;;  %v19343_v43 = vld [vmem:[%s25780_s10 + $0x1e4] ss:$12 sps:$4 sm:$0xff]  }
 0x565   : > { %v7842_v59 = vpack.c.bf16 %v7614_v37, %v7610_v55  ;;  %v22623_v58 = vpack.c.bf16 %v7616_v63, %v7612_v3  ;;  %v19341_v63 = vld [vmem:[%s25780_s10 + $0x1e0] ss:$12 sps:$4 sm:$0xff]  }
 0x567   : > { %v6962_v12 = vpop.f32.mrb[64].mxu0  ;;  %v7328_v5 = vpop.f32.mrb[184].mxu1  ;;  %8427 = vmatprep.mubr.bf16.mxu0 %v7842_v59  ;;  %8793 = vmatprep.mubr.bf16.mxu1 %v7842_v59 }
 0x568   : > { %v6964_v62 = vpop.f32.mrb[65].mxu0  ;;  %v7330_v10 = vpop.f32.mrb[185].mxu1  ;;  %8428 = vmatmul.mubr.bf16.vlgmr.msra.gmra.mrb[120].mxu0 %v7841_v60  ;;  %8794 = vmatmul.mubr.bf16.vlgmr.msra.gmra.mrb[240].mxu1 %v7841_v60  ;;  %v7617_v48 = vadd.f32 %v22597_v6, %v6962_v12  ;;  %v7619_v7 = vadd.f32 %v22600_v33, %v7328_v5  ;;  %v19360_v60 = vld [vmem:[%s25780_s10 + $0x1e8] ss:$12 sps:$4 sm:$0xff]  }
 0x569   : > { %v6966_v29 = vpop.f32.mrb[66].mxu0  ;;  %v7332_v21 = vpop.f32.mrb[186].mxu1  ;;  %8579 = vmatpush1.bf16.msra.mxu0 %v19329_v36  ;;  %8915 = vmatpush1.bf16.msra.mxu1 %v19350_v27  ;;  %v7618_v9 = vadd.f32 %v22603_v24, %v6964_v62  ;;  %v7620_v31 = vadd.f32 %v22605_v2, %v7330_v10  ;;  %v19346_v36 = vld [vmem:[%s25780_s10 + $0x1fc] ss:$12 sps:$4 sm:$0xff]  }
 0x56a   : > { %v7621_v25 = vadd.f32 %v22597_v6, %v6966_v29  ;;  %v7623_v26 = vadd.f32 %v22600_v33, %v7332_v21  ;;  %v6968_v18 = vpop.f32.mrb[67].mxu0  ;;  %v7334_v14 = vpop.f32.mrb[187].mxu1  ;;  %8580 = vmatprep.subr.bf16.mxu0 %v19334_v61  ;;  %8916 = vmatprep.subr.bf16.mxu1 %v25776_v4  ;;  %v19344_v29 = vld [vmem:[%s25780_s10 + $0x1f8] ss:$12 sps:$4 sm:$0xff]   ;;  %v19361_v21 = vld [vmem:[%s25780_s10 + $0x200] ss:$12 sps:$4 sm:$0xff]  }
 0x56b   : > { %v7622_v41 = vadd.f32 %v22603_v24, %v6968_v18  ;;  %v7624_v54 = vadd.f32 %v22605_v2, %v7334_v14  ;;  %v19349_v18 = vld [vmem:[%s25780_s10 + $0x214] ss:$12 sps:$4 sm:$0xff]  }
 0x56c   : > { %v7845_v32 = vpack.c.bf16 %v7621_v25, %v7617_v48  ;;  %v22646_v17 = vpack.c.bf16 %v7623_v26, %v7619_v7 }
 0x56d   : > { %v7846_v22 = vpack.c.bf16 %v7622_v41, %v7618_v9  ;;  %8581 = vmatpush1.bf16.msra.mxu0 %v19332_v16  ;;  %8917 = vmatpush1.bf16.msra.mxu1 %v19354_v49  ;;  %v22654_v19 = vpack.c.bf16 %v7624_v54, %v7620_v31 }
 0x56e   : > { %8582 = vmatprep.subr.bf16.mxu0 %v19337_v11  ;;  %8918 = vmatprep.subr.bf16.mxu1 %v25776_v4 }
 0x56f   : > { %v6972_v13 = vpop.f32.mrb[68].mxu0  ;;  %v7338_v8 = vpop.f32.mrb[188].mxu1  ;;  %8437 = vmatprep.mubr.bf16.mxu0 %v7846_v22  ;;  %8801 = vmatprep.mubr.bf16.mxu1 %v7846_v22  ;;  %v19347_v22 = vld [vmem:[%s25780_s10 + $0x210] ss:$12 sps:$4 sm:$0xff]  }
 0x570   : > { %v6974_v51 = vpop.f32.mrb[69].mxu0  ;;  %v7340_v44 = vpop.f32.mrb[189].mxu1  ;;  %8438 = vmatmul.mubr.bf16.gmra.mrb[124].mxu0 %v7845_v32  ;;  %8802 = vmatmul.mubr.bf16.gmra.mrb[244].mxu1 %v7845_v32  ;;  %v7625_v53 = vadd.f32 %v22597_v6, %v6972_v13  ;;  %v7627_v50 = vadd.f32 %v22600_v33, %v7338_v8 }
 0x571   : > { %v6976_v56 = vpop.f32.mrb[70].mxu0  ;;  %v7342_v30 = vpop.f32.mrb[190].mxu1  ;;  %8583 = vmatpush1.bf16.msra.mxu0 %v19335_v1  ;;  %8919 = vmatpush1.bf16.msra.mxu1 %v19355_v57  ;;  %v7626_v23 = vadd.f32 %v22603_v24, %v6974_v51  ;;  %v7628_v40 = vadd.f32 %v22605_v2, %v7340_v44  ;;  %v19365_v1 = vld [vmem:[%s25780_s10 + $0x218] ss:$12 sps:$4 sm:$0xff]  }
 0x572   : > { %v7629_v20 = vadd.f32 %v22597_v6, %v6976_v56  ;;  %v7631_v28 = vadd.f32 %v22600_v33, %v7342_v30  ;;  %v6978_v34 = vpop.f32.mrb[71].mxu0  ;;  %v7344_v35 = vpop.f32.mrb[191].mxu1  ;;  %8584 = vmatprep.subr.bf16.mxu0 %v19340_v15  ;;  %8920 = vmatprep.subr.bf16.mxu1 %v25776_v4  ;;  %v19353_v15 = vld [vmem:[%s25780_s10 + $0x22c] ss:$12 sps:$4 sm:$0xff]  }
 0x573   : > { %v7630_v52 = vadd.f32 %v22603_v24, %v6978_v34  ;;  %v7632_v0 = vadd.f32 %v22605_v2, %v7344_v35 }
 0x574   : > { %v7849_v55 = vpack.c.bf16 %v7629_v20, %v7625_v53  ;;  %v22678_v3 = vpack.c.bf16 %v7631_v28, %v7627_v50 }
 0x575   : > { %v7850_v37 = vpack.c.bf16 %v7630_v52, %v7626_v23  ;;  %8585 = vmatpush1.bf16.msra.mxu0 %v19338_v47  ;;  %8921 = vmatpush1.bf16.msra.mxu1 %v19359_v45  ;;  %v22686_v59 = vpack.c.bf16 %v7632_v0, %v7628_v40  ;;  %v19351_v47 = vld [vmem:[%s25780_s10 + $0x228] ss:$12 sps:$4 sm:$0xff]   ;;  %v19366_v45 = vld [vmem:[%s25780_s10 + $0x230] ss:$12 sps:$4 sm:$0xff]  }
 0x576   : > { %8586 = vmatprep.subr.bf16.mxu0 %v19343_v43  ;;  %8922 = vmatprep.subr.bf16.mxu1 %v25776_v4  ;;  %v19358_v43 = vld [vmem:[%s25780_s10 + $0x244] ss:$12 sps:$4 sm:$0xff]  }
 0x577   : > { %v6982_v27 = vpop.f32.mrb[72].mxu0  ;;  %v7348_v61 = vpop.f32.mrb[192].mxu1  ;;  %8447 = vmatprep.mubr.bf16.mxu0 %v7850_v37  ;;  %8809 = vmatprep.mubr.bf16.mxu1 %v7850_v37 }
 0x578   : > { %v6984_v12 = vpop.f32.mrb[73].mxu0  ;;  %v7350_v5 = vpop.f32.mrb[193].mxu1  ;;  %8448 = vmatmul.mubr.bf16.gmra.mrb[128].mxu0 %v7849_v55  ;;  %8810 = vmatmul.mubr.bf16.gmra.mrb[248].mxu1 %v7849_v55  ;;  %v7633_v62 = vadd.f32 %v22597_v6, %v6982_v27  ;;  %v7635_v16 = vadd.f32 %v22600_v33, %v7348_v61  ;;  %v19364_v61 = vld [vmem:[%s25780_s10 + $0x25c] ss:$12 sps:$4 sm:$0xff]  }
 0x579   : > { %v6986_v10 = vpop.f32.mrb[74].mxu0  ;;  %v7352_v48 = vpop.f32.mrb[194].mxu1  ;;  %8587 = vmatpush1.bf16.msra.mxu0 %v19341_v63  ;;  %8923 = vmatpush1.bf16.msra.mxu1 %v19360_v60  ;;  %v7634_v14 = vadd.f32 %v22603_v24, %v6984_v12  ;;  %v7636_v11 = vadd.f32 %v22605_v2, %v7350_v5  ;;  %v19356_v60 = vld [vmem:[%s25780_s10 + $0x240] ss:$12 sps:$4 sm:$0xff]  }
 0x57a   : > { %v7637_v49 = vadd.f32 %v22597_v6, %v6986_v10  ;;  %v7639_v7 = vadd.f32 %v22600_v33, %v7352_v48  ;;  %v6988_v25 = vpop.f32.mrb[75].mxu0  ;;  %v7354_v26 = vpop.f32.mrb[195].mxu1  ;;  %8588 = vmatprep.subr.bf16.mxu0 %v19346_v36  ;;  %8924 = vmatprep.subr.bf16.mxu1 %v25776_v4  ;;  %v19370_v36 = vld [vmem:[%s25780_s10 + $0x248] ss:$12 sps:$4 sm:$0xff]  }
 0x57b   : > { %v7638_v9 = vadd.f32 %v22603_v24, %v6988_v25  ;;  %v7640_v31 = vadd.f32 %v22605_v2, %v7354_v26 }
 0x57c   : > { %v7853_v41 = vpack.c.bf16 %v7637_v49, %v7633_v62  ;;  %v22710_v54 = vpack.c.bf16 %v7639_v7, %v7635_v16  ;;  %v19362_v16 = vld [vmem:[%s25780_s10 + $0x258] ss:$12 sps:$4 sm:$0xff]   ;;  %v19371_v49 = vld [vmem:[%s25780_s10 + $0x260] ss:$12 sps:$4 sm:$0xff]  }
 0x57d   : > { %v7854_v32 = vpack.c.bf16 %v7638_v9, %v7634_v14  ;;  %8589 = vmatpush1.bf16.msra.mxu0 %v19344_v29  ;;  %8925 = vmatpush1.bf16.msra.mxu1 %v19361_v21  ;;  %v22718_v57 = vpack.c.bf16 %v7640_v31, %v7636_v11 }
 0x57e   : > { %8590 = vmatprep.subr.bf16.mxu0 %v19349_v18  ;;  %8926 = vmatprep.subr.bf16.mxu1 %v25776_v4  ;;  %v19369_v18 = vld [vmem:[%s25780_s10 + $0x274] ss:$12 sps:$4 sm:$0xff]  }
 0x57f   : > { %v6992_v13 = vpop.f32.mrb[76].mxu0  ;;  %v7358_v8 = vpop.f32.mrb[196].mxu1  ;;  %8457 = vmatprep.mubr.bf16.mxu0 %v7854_v32  ;;  %8817 = vmatprep.mubr.bf16.mxu1 %v7854_v32 }
 0x580   : > { %v6994_v51 = vpop.f32.mrb[77].mxu0  ;;  %v7360_v44 = vpop.f32.mrb[197].mxu1  ;;  %8458 = vmatmul.mubr.bf16.gmra.mrb[132].mxu0 %v7853_v41  ;;  %8818 = vmatmul.mubr.bf16.gmra.mrb[252].mxu1 %v7853_v41  ;;  %v7641_v53 = vadd.f32 %v22597_v6, %v6992_v13  ;;  %v7643_v50 = vadd.f32 %v22600_v33, %v7358_v8  ;;  %v19367_v13 = vld [vmem:[%s25780_s10 + $0x270] ss:$12 sps:$4 sm:$0xff]   ;;  %v19372_v8 = vld [vmem:[%s25780_s10 + $0x278] ss:$12 sps:$4 sm:$0xff]  }
 0x581   : > { %v6996_v56 = vpop.f32.mrb[78].mxu0  ;;  %v7362_v30 = vpop.f32.mrb[198].mxu1  ;;  %8591 = vmatpush1.bf16.msra.mxu0 %v19347_v22  ;;  %8927 = vmatpush1.bf16.msra.mxu1 %v19365_v1  ;;  %v7642_v23 = vadd.f32 %v22603_v24, %v6994_v51  ;;  %v7644_v40 = vadd.f32 %v22605_v2, %v7360_v44  ;;  %v19375_v44 = vld [vmem:[%s25780_s10 + $0x28c] ss:$12 sps:$4 sm:$0xff]  }
 0x582   : > { %v7645_v20 = vadd.f32 %v22597_v6, %v6996_v56  ;;  %v7647_v28 = vadd.f32 %v22600_v33, %v7362_v30  ;;  %v6998_v34 = vpop.f32.mrb[79].mxu0  ;;  %v7364_v35 = vpop.f32.mrb[199].mxu1  ;;  %8592 = vmatprep.subr.bf16.mxu0 %v19353_v15  ;;  %8928 = vmatprep.subr.bf16.mxu1 %v25776_v4 }
 0x583   : > { %v7646_v52 = vadd.f32 %v22603_v24, %v6998_v34  ;;  %v7648_v0 = vadd.f32 %v22605_v2, %v7364_v35  ;;  %v19376_v34 = vld [vmem:[%s25780_s10 + $0x290] ss:$12 sps:$4 sm:$0xff]  }
 0x584   : > { %v7857_v55 = vpack.c.bf16 %v7645_v20, %v7641_v53  ;;  %v22742_v37 = vpack.c.bf16 %v7647_v28, %v7643_v50  ;;  %v19373_v28 = vld [vmem:[%s25780_s10 + $0x288] ss:$12 sps:$4 sm:$0xff]   ;;  %s785_s10 = scalar_lea.vmem [#allocation6], %s15712_s0  ;;  %s19831_s0 = sshll.u32 %s19896_s8, 4  ;;  %s19832_s0 = int_to_ptr.vmem [resolvable:$false] %s19831_s0 }
 0x585   : > { %v7858_v63 = vpack.c.bf16 %v7646_v52, %v7642_v23  ;;  %8593 = vmatpush1.bf16.msra.mxu0 %v19351_v47  ;;  %8929 = vmatpush1.bf16.msra.mxu1 %v19366_v45  ;;  %v22750_v27 = vpack.c.bf16 %v7648_v0, %v7644_v40  ;;  %s15649_s26 = sshll.u32 %s785_s10, 4  ;;  %s25631_s26 = int_to_ptr.vmem [resolvable:$true] %s15649_s26 }
 0x586   : > { %8594 = vmatprep.subr.bf16.mxu0 %v19358_v43  ;;  %8930 = vmatprep.subr.bf16.mxu1 %v25776_v4  ;;  %p19834_p0 = scmp.lt.s32.totalorder %s25631_s26, %s19832_s0 }
 0x587   : > { %v7002_v12 = vpop.f32.mrb[80].mxu0  ;;  %v7368_v5 = vpop.f32.mrb[200].mxu1  ;;  %8467 = vmatprep.mubr.bf16.mxu0 %v7858_v63  ;;  %8825 = vmatprep.mubr.bf16.mxu1 %v7858_v63 }
 0x588   : > { %v7004_v62 = vpop.f32.mrb[81].mxu0  ;;  %v7370_v10 = vpop.f32.mrb[201].mxu1  ;;  %8468 = vmatmul.mubr.bf16.gmra.mrb[136].mxu0 %v7857_v55  ;;  %8826 = vmatmul.mubr.bf16.gmra.mrb[0].mxu1 %v7857_v55  ;;  %v7649_v48 = vadd.f32 %v22597_v6, %v7002_v12  ;;  %v7651_v14 = vadd.f32 %v22600_v33, %v7368_v5 }
 0x589   : > { %v7006_v29 = vpop.f32.mrb[82].mxu0  ;;  %v7372_v21 = vpop.f32.mrb[202].mxu1  ;;  %8595 = vmatpush1.bf16.msra.mxu0 %v19356_v60  ;;  %8931 = vmatpush1.bf16.msra.mxu1 %v19370_v36  ;;  %v7650_v9 = vadd.f32 %v22603_v24, %v7004_v62  ;;  %v7652_v31 = vadd.f32 %v22605_v2, %v7370_v10 }
 0x58a   : > { %v7653_v7 = vadd.f32 %v22597_v6, %v7006_v29  ;;  %v7008_v25 = vpop.f32.mrb[83].mxu0  ;;  %v7374_v26 = vpop.f32.mrb[203].mxu1  ;;  %8596 = vmatprep.subr.bf16.mxu0 %v19364_v61  ;;  %8932 = vmatprep.subr.bf16.mxu1 %v25776_v4  ;;  %v7655_v11 = vadd.f32 %v22600_v33, %v7372_v21 }
 0x58b   : > { %v7654_v41 = vadd.f32 %v22603_v24, %v7008_v25  ;;  %v7656_v32 = vadd.f32 %v22605_v2, %v7374_v26 }
 0x58c   : > { %v7861_v22 = vpack.c.bf16 %v7653_v7, %v7649_v48  ;;  %v22774_v1 = vpack.c.bf16 %v7655_v11, %v7651_v14 }
 0x58d   : > { %v7862_v15 = vpack.c.bf16 %v7654_v41, %v7650_v9  ;;  %8597 = vmatpush1.bf16.msra.mxu0 %v19362_v16  ;;  %8933 = vmatpush1.bf16.msra.mxu1 %v19371_v49  ;;  %v22782_v51 = vpack.c.bf16 %v7656_v32, %v7652_v31 }
 0x58e   : > { %8598 = vmatprep.subr.bf16.mxu0 %v19369_v18  ;;  %8934 = vmatprep.subr.bf16.mxu1 %v25776_v4 }
 0x58f   : > { %v7012_v53 = vpop.f32.mrb[84].mxu0  ;;  %v7378_v56 = vpop.f32.mrb[204].mxu1  ;;  %8477 = vmatprep.mubr.bf16.mxu0 %v7862_v15  ;;  %8833 = vmatprep.mubr.bf16.mxu1 %v7862_v15 }
 0x590   : > { %v7014_v30 = vpop.f32.mrb[85].mxu0  ;;  %v7380_v47 = vpop.f32.mrb[205].mxu1  ;;  %8478 = vmatmul.mubr.bf16.gmra.mrb[140].mxu0 %v7861_v22  ;;  %8834 = vmatmul.mubr.bf16.gmra.mrb[4].mxu1 %v7861_v22  ;;  %v7657_v45 = vadd.f32 %v22597_v6, %v7012_v53  ;;  %v7659_v40 = vadd.f32 %v22600_v33, %v7378_v56 }
 0x591   : > { %v7016_v50 = vpop.f32.mrb[86].mxu0  ;;  %v7382_v20 = vpop.f32.mrb[206].mxu1  ;;  %8599 = vmatpush1.bf16.msra.mxu0 %v19367_v13  ;;  %8935 = vmatpush1.bf16.msra.mxu1 %v19372_v8  ;;  %v7658_v0 = vadd.f32 %v22603_v24, %v7014_v30  ;;  %v7660_v55 = vadd.f32 %v22605_v2, %v7380_v47 }
 0x592   : > { %v7661_v35 = vadd.f32 %v22597_v6, %v7016_v50  ;;  %v7018_v43 = vpop.f32.mrb[87].mxu0  ;;  %v7384_v23 = vpop.f32.mrb[207].mxu1  ;;  %8600 = vmatprep.subr.bf16.mxu0 %v19375_v44  ;;  %8936 = vmatprep.subr.bf16.mxu1 %v25776_v4  ;;  %v7663_v52 = vadd.f32 %v22600_v33, %v7382_v20 }
 0x593   : > { %v7662_v63 = vadd.f32 %v22603_v24, %v7018_v43  ;;  %v7664_v60 = vadd.f32 %v22605_v2, %v7384_v23 }
 0x594   : > { %v7865_v36 = vpack.c.bf16 %v7661_v35, %v7657_v45  ;;  %v22803_v61 = vpack.c.bf16 %v7663_v52, %v7659_v40 }
 0x595   : > { %v7866_v12 = vpack.c.bf16 %v7662_v63, %v7658_v0  ;;  %8601 = vmatpush1.bf16.msra.mxu0 %v19373_v28  ;;  %8937 = vmatpush1.bf16.msra.mxu1 %v19376_v34  ;;  %v22805_v5 = vpack.c.bf16 %v7664_v60, %v7660_v55 }
 0x596   : > { %9652 = vmatprep.subr.bf16.mxu1 %v25776_v4 }
 0x597   : > { %v7022_v62 = vpop.f32.mrb[88].mxu0  ;;  %v7388_v10 = vpop.f32.mrb[208].mxu1  ;;  %8487 = vmatprep.mubr.bf16.mxu0 %v7866_v12  ;;  %8841 = vmatprep.mubr.bf16.mxu1 %v7866_v12 }
 0x598   : > { %v7024_v48 = vpop.f32.mrb[89].mxu0  ;;  %v7390_v29 = vpop.f32.mrb[209].mxu1  ;;  %8488 = vmatmul.mubr.bf16.gmra.mrb[144].mxu0 %v7865_v36  ;;  %8842 = vmatmul.mubr.bf16.gmra.mrb[8].mxu1 %v7865_v36  ;;  %v7665_v49 = vadd.f32 %v22597_v6, %v7022_v62  ;;  %v7667_v18 = vadd.f32 %v22600_v33, %v7388_v10 }
 0x599   : > { %v7026_v21 = vpop.f32.mrb[90].mxu0  ;;  %v7392_v16 = vpop.f32.mrb[210].mxu1  ;;  %v7666_v11 = vadd.f32 %v22603_v24, %v7024_v48  ;;  %v7668_v9 = vadd.f32 %v22605_v2, %v7390_v29 }
 0x59a   : > { %v7669_v7 = vadd.f32 %v22597_v6, %v7026_v21  ;;  %v7028_v25 = vpop.f32.mrb[91].mxu0  ;;  %v7394_v26 = vpop.f32.mrb[211].mxu1  ;;  %v7671_v14 = vadd.f32 %v22600_v33, %v7392_v16 }
 0x59b   : > { %v7670_v31 = vadd.f32 %v22603_v24, %v7028_v25  ;;  %v7672_v41 = vadd.f32 %v22605_v2, %v7394_v26 }
 0x59c   : > { %v7869_v32 = vpack.c.bf16 %v7669_v7, %v7665_v49  ;;  %v22816_v22 = vpack.c.bf16 %v7671_v14, %v7667_v18 }
 0x59d   : > { %v7870_v15 = vpack.c.bf16 %v7670_v31, %v7666_v11  ;;  %v22818_v13 = vpack.c.bf16 %v7672_v41, %v7668_v9 }
 0x59f   : > { %v7032_v8 = vpop.f32.mrb[92].mxu0  ;;  %v7398_v44 = vpop.f32.mrb[212].mxu1  ;;  %8497 = vmatprep.mubr.bf16.mxu0 %v7870_v15  ;;  %8849 = vmatprep.mubr.bf16.mxu1 %v7870_v15 }
 0x5a0   : > { %v7034_v53 = vpop.f32.mrb[93].mxu0  ;;  %v7400_v56 = vpop.f32.mrb[213].mxu1  ;;  %8498 = vmatmul.mubr.bf16.gmra.mrb[148].mxu0 %v7869_v32  ;;  %8850 = vmatmul.mubr.bf16.gmra.mrb[12].mxu1 %v7869_v32  ;;  %v7673_v45 = vadd.f32 %v22597_v6, %v7032_v8  ;;  %v7675_v34 = vadd.f32 %v22600_v33, %v7398_v44 }
 0x5a1   : > { %v7036_v30 = vpop.f32.mrb[94].mxu0  ;;  %v7402_v47 = vpop.f32.mrb[214].mxu1  ;;  %v7674_v43 = vadd.f32 %v22603_v24, %v7034_v53  ;;  %v7676_v23 = vadd.f32 %v22605_v2, %v7400_v56 }
 0x5a2   : > { %v7677_v50 = vadd.f32 %v22597_v6, %v7036_v30  ;;  %v7038_v20 = vpop.f32.mrb[95].mxu0  ;;  %v7404_v28 = vpop.f32.mrb[215].mxu1  ;;  %v7679_v35 = vadd.f32 %v22600_v33, %v7402_v47 }
 0x5a3   : > { %v7678_v40 = vadd.f32 %v22603_v24, %v7038_v20  ;;  %v7680_v52 = vadd.f32 %v22605_v2, %v7404_v28 }
 0x5a4   : > { %v7873_v0 = vpack.c.bf16 %v7677_v50, %v7673_v45  ;;  %v22828_v55 = vpack.c.bf16 %v7679_v35, %v7675_v34 }
 0x5a5   : > { %v7874_v63 = vpack.c.bf16 %v7678_v40, %v7674_v43  ;;  %v22830_v60 = vpack.c.bf16 %v7680_v52, %v7676_v23 }
 0x5a7   : > { %v7042_v36 = vpop.f32.mrb[96].mxu0  ;;  %v7408_v12 = vpop.f32.mrb[216].mxu1  ;;  %8507 = vmatprep.mubr.bf16.mxu0 %v7874_v63  ;;  %8857 = vmatprep.mubr.bf16.mxu1 %v7874_v63 }
 0x5a8   : > { %v7044_v62 = vpop.f32.mrb[97].mxu0  ;;  %v7410_v10 = vpop.f32.mrb[217].mxu1  ;;  %8508 = vmatmul.mubr.bf16.gmra.mrb[152].mxu0 %v7873_v0  ;;  %8858 = vmatmul.mubr.bf16.gmra.mrb[16].mxu1 %v7873_v0  ;;  %v7681_v21 = vadd.f32 %v22597_v6, %v7042_v36  ;;  %v7683_v25 = vadd.f32 %v22600_v33, %v7408_v12 }
 0x5a9   : > { %v7046_v48 = vpop.f32.mrb[98].mxu0  ;;  %v7412_v29 = vpop.f32.mrb[218].mxu1  ;;  %v7682_v18 = vadd.f32 %v22603_v24, %v7044_v62  ;;  %v7684_v14 = vadd.f32 %v22605_v2, %v7410_v10 }
 0x5aa   : > { %v7685_v16 = vadd.f32 %v22597_v6, %v7046_v48  ;;  %v7048_v49 = vpop.f32.mrb[99].mxu0  ;;  %v7414_v7 = vpop.f32.mrb[219].mxu1  ;;  %v7687_v26 = vadd.f32 %v22600_v33, %v7412_v29 }
 0x5ab   : > { %v7686_v11 = vadd.f32 %v22603_v24, %v7048_v49  ;;  %v7688_v9 = vadd.f32 %v22605_v2, %v7414_v7 }
 0x5ac   : > { %v7877_v31 = vpack.c.bf16 %v7685_v16, %v7681_v21  ;;  %v22840_v41 = vpack.c.bf16 %v7687_v26, %v7683_v25 }
 0x5ad   : > { %v7878_v32 = vpack.c.bf16 %v7686_v11, %v7682_v18  ;;  %v22842_v15 = vpack.c.bf16 %v7688_v9, %v7684_v14 }
 0x5af   : > { %v7052_v8 = vpop.f32.mrb[100].mxu0  ;;  %v7418_v44 = vpop.f32.mrb[220].mxu1  ;;  %8517 = vmatprep.mubr.bf16.mxu0 %v7878_v32  ;;  %8865 = vmatprep.mubr.bf16.mxu1 %v7878_v32 }
 0x5b0   : > { %v7054_v53 = vpop.f32.mrb[101].mxu0  ;;  %v7420_v56 = vpop.f32.mrb[221].mxu1  ;;  %8518 = vmatmul.mubr.bf16.gmra.mrb[156].mxu0 %v7877_v31  ;;  %8866 = vmatmul.mubr.bf16.gmra.mrb[20].mxu1 %v7877_v31  ;;  %v7689_v45 = vadd.f32 %v22597_v6, %v7052_v8  ;;  %v7691_v34 = vadd.f32 %v22600_v33, %v7418_v44 }
 0x5b1   : > { %v7056_v30 = vpop.f32.mrb[102].mxu0  ;;  %v7422_v47 = vpop.f32.mrb[222].mxu1  ;;  %v7690_v43 = vadd.f32 %v22603_v24, %v7054_v53  ;;  %v7692_v23 = vadd.f32 %v22605_v2, %v7420_v56 }
 0x5b2   : > { %v7693_v50 = vadd.f32 %v22597_v6, %v7056_v30  ;;  %v7058_v20 = vpop.f32.mrb[103].mxu0  ;;  %v7424_v28 = vpop.f32.mrb[223].mxu1  ;;  %v7695_v35 = vadd.f32 %v22600_v33, %v7422_v47 }
 0x5b3   : > { %v7694_v40 = vadd.f32 %v22603_v24, %v7058_v20  ;;  %v7696_v52 = vadd.f32 %v22605_v2, %v7424_v28 }
 0x5b4   : > { %v7881_v0 = vpack.c.bf16 %v7693_v50, %v7689_v45  ;;  %v22852_v63 = vpack.c.bf16 %v7695_v35, %v7691_v34 }
 0x5b5   : > { %v7882_v36 = vpack.c.bf16 %v7694_v40, %v7690_v43  ;;  %v22854_v12 = vpack.c.bf16 %v7696_v52, %v7692_v23 }
 0x5b7   : > { %v7062_v62 = vpop.f32.mrb[104].mxu0  ;;  %v7428_v10 = vpop.f32.mrb[224].mxu1  ;;  %8527 = vmatprep.mubr.bf16.mxu0 %v7882_v36  ;;  %8873 = vmatprep.mubr.bf16.mxu1 %v7882_v36 }
 0x5b8   : > { %v7064_v48 = vpop.f32.mrb[105].mxu0  ;;  %v7430_v29 = vpop.f32.mrb[225].mxu1  ;;  %8528 = vmatmul.mubr.bf16.gmra.mrb[160].mxu0 %v7881_v0  ;;  %8874 = vmatmul.mubr.bf16.gmra.mrb[24].mxu1 %v7881_v0  ;;  %v7697_v49 = vadd.f32 %v22597_v6, %v7062_v62  ;;  %v7699_v18 = vadd.f32 %v22600_v33, %v7428_v10 }
 0x5b9   : > { %v7066_v21 = vpop.f32.mrb[106].mxu0  ;;  %v7432_v16 = vpop.f32.mrb[226].mxu1  ;;  %v7698_v11 = vadd.f32 %v22603_v24, %v7064_v48  ;;  %v7700_v9 = vadd.f32 %v22605_v2, %v7430_v29 }
 0x5ba   : > { %v7701_v7 = vadd.f32 %v22597_v6, %v7066_v21  ;;  %v7068_v25 = vpop.f32.mrb[107].mxu0  ;;  %v7434_v26 = vpop.f32.mrb[227].mxu1  ;;  %v7703_v14 = vadd.f32 %v22600_v33, %v7432_v16 }
 0x5bb   : > { %v7702_v31 = vadd.f32 %v22603_v24, %v7068_v25  ;;  %v7704_v32 = vadd.f32 %v22605_v2, %v7434_v26 }
 0x5bc   : > { %v7885_v8 = vpack.c.bf16 %v7701_v7, %v7697_v49  ;;  %v22864_v44 = vpack.c.bf16 %v7703_v14, %v7699_v18 }
 0x5bd   : > { %v7886_v53 = vpack.c.bf16 %v7702_v31, %v7698_v11  ;;  %v22866_v56 = vpack.c.bf16 %v7704_v32, %v7700_v9 }
 0x5bf   : > { %v7072_v30 = vpop.f32.mrb[108].mxu0  ;;  %v7438_v47 = vpop.f32.mrb[228].mxu1  ;;  %8537 = vmatprep.mubr.bf16.mxu0 %v7886_v53  ;;  %8881 = vmatprep.mubr.bf16.mxu1 %v7886_v53 }
 0x5c0   : > { %v7074_v45 = vpop.f32.mrb[109].mxu0  ;;  %v7440_v50 = vpop.f32.mrb[229].mxu1  ;;  %8538 = vmatmul.mubr.bf16.gmra.mrb[164].mxu0 %v7885_v8  ;;  %8882 = vmatmul.mubr.bf16.gmra.mrb[28].mxu1 %v7885_v8  ;;  %v7705_v34 = vadd.f32 %v22597_v6, %v7072_v30  ;;  %v7707_v40 = vadd.f32 %v22600_v33, %v7438_v47 }
 0x5c1   : > { %v7076_v20 = vpop.f32.mrb[110].mxu0  ;;  %v7442_v28 = vpop.f32.mrb[230].mxu1  ;;  %v7706_v0 = vadd.f32 %v22603_v24, %v7074_v45  ;;  %v7708_v36 = vadd.f32 %v22605_v2, %v7440_v50 }
 0x5c2   : > { %v7709_v35 = vadd.f32 %v22597_v6, %v7076_v20  ;;  %v7078_v43 = vpop.f32.mrb[111].mxu0  ;;  %v7444_v23 = vpop.f32.mrb[231].mxu1  ;;  %v7711_v52 = vadd.f32 %v22600_v33, %v7442_v28 }
 0x5c3   : > { %v7710_v62 = vadd.f32 %v22603_v24, %v7078_v43  ;;  %v7712_v10 = vadd.f32 %v22605_v2, %v7444_v23 }
 0x5c4   : > { %v7889_v48 = vpack.c.bf16 %v7709_v35, %v7705_v34  ;;  %v22876_v29 = vpack.c.bf16 %v7711_v52, %v7707_v40 }
 0x5c5   : > { %v7890_v21 = vpack.c.bf16 %v7710_v62, %v7706_v0  ;;  %v22878_v16 = vpack.c.bf16 %v7712_v10, %v7708_v36 }
 0x5c7   : > { %v7082_v49 = vpop.f32.mrb[112].mxu0  ;;  %v7448_v7 = vpop.f32.mrb[232].mxu1  ;;  %8547 = vmatprep.mubr.bf16.mxu0 %v7890_v21  ;;  %8889 = vmatprep.mubr.bf16.mxu1 %v7890_v21 }
 0x5c8   : > { %v7084_v25 = vpop.f32.mrb[113].mxu0  ;;  %v7450_v26 = vpop.f32.mrb[233].mxu1  ;;  %8548 = vmatmul.mubr.bf16.gmra.mrb[168].mxu0 %v7889_v48  ;;  %8890 = vmatmul.mubr.bf16.gmra.mrb[32].mxu1 %v7889_v48  ;;  %v7713_v11 = vadd.f32 %v22597_v6, %v7082_v49  ;;  %v7715_v9 = vadd.f32 %v22600_v33, %v7448_v7 }
 0x5c9   : > { %v7086_v18 = vpop.f32.mrb[114].mxu0  ;;  %v7452_v14 = vpop.f32.mrb[234].mxu1  ;;  %v7714_v30 = vadd.f32 %v22603_v24, %v7084_v25  ;;  %v7716_v47 = vadd.f32 %v22605_v2, %v7450_v26 }
 0x5ca   : > { %v7717_v31 = vadd.f32 %v22597_v6, %v7086_v18  ;;  %v7719_v32 = vadd.f32 %v22600_v33, %v7452_v14  ;;  %v7088_v8 = vpop.f32.mrb[115].mxu0  ;;  %v7454_v53 = vpop.f32.mrb[235].mxu1 }
 0x5cb   : > { %v7718_v45 = vadd.f32 %v22603_v24, %v7088_v8  ;;  %v7720_v50 = vadd.f32 %v22605_v2, %v7454_v53 }
 0x5cc   : > { %v7893_v20 = vpack.c.bf16 %v7717_v31, %v7713_v11  ;;  %v22888_v28 = vpack.c.bf16 %v7719_v32, %v7715_v9 }
 0x5cd   : > { %v22890_v34 = vpack.c.bf16 %v7720_v50, %v7716_v47  ;;  %v7894_v35 = vpack.c.bf16 %v7718_v45, %v7714_v30 }
 0x5cf   : > { %v7092_v43 = vpop.f32.mrb[116].mxu0  ;;  %v7458_v23 = vpop.f32.mrb[236].mxu1  ;;  %8557 = vmatprep.mubr.bf16.mxu0 %v7894_v35  ;;  %8897 = vmatprep.mubr.bf16.mxu1 %v7894_v35 }
 0x5d0   : > { %v7094_v40 = vpop.f32.mrb[117].mxu0  ;;  %v7460_v52 = vpop.f32.mrb[237].mxu1  ;;  %8558 = vmatmul.mubr.bf16.gmra.mrb[172].mxu0 %v7893_v20  ;;  %8898 = vmatmul.mubr.bf16.gmra.mrb[36].mxu1 %v7893_v20  ;;  %v7721_v62 = vadd.f32 %v22597_v6, %v7092_v43  ;;  %v7723_v10 = vadd.f32 %v22600_v33, %v7458_v23 }
 0x5d1   : > { %v7096_v0 = vpop.f32.mrb[118].mxu0  ;;  %v7462_v36 = vpop.f32.mrb[238].mxu1  ;;  %v7722_v25 = vadd.f32 %v22603_v24, %v7094_v40  ;;  %v7724_v26 = vadd.f32 %v22605_v2, %v7460_v52 }
 0x5d2   : > { %v7725_v48 = vadd.f32 %v22597_v6, %v7096_v0  ;;  %v7727_v21 = vadd.f32 %v22600_v33, %v7462_v36  ;;  %v7098_v49 = vpop.f32.mrb[119].mxu0  ;;  %v7464_v7 = vpop.f32.mrb[239].mxu1 }
 0x5d3   : > { %v7726_v18 = vadd.f32 %v22603_v24, %v7098_v49  ;;  %v7728_v14 = vadd.f32 %v22605_v2, %v7464_v7 }
 0x5d4   : > { %v7897_v11 = vpack.c.bf16 %v7725_v48, %v7721_v62  ;;  %v22900_v9 = vpack.c.bf16 %v7727_v21, %v7723_v10 }
 0x5d5   : > { %v22902_v31 = vpack.c.bf16 %v7728_v14, %v7724_v26  ;;  %v7898_v32 = vpack.c.bf16 %v7726_v18, %v7722_v25 }
 0x5d7   : > { %8567 = vmatprep.mubr.bf16.mxu0 %v7898_v32  ;;  %8905 = vmatprep.mubr.bf16.mxu1 %v7898_v32 }
 0x5d8   : > { %8568 = vmatmul.mubr.bf16.gmra.mrb[176].mxu0 %v7897_v11  ;;  %8906 = vmatmul.mubr.bf16.gmra.mrb[40].mxu1 %v7897_v11 }
 0x5d9   : > { %16377 = vmatprep.mubr.msk.bf16.mxu0 %vm8349_vm11, %v22623_v58  ;;  %16392 = vmatprep.mubr.msk.bf16.mxu1 %vm8349_vm11, %v22623_v58 }
 0x5e0   : > { %8611 = vmatmul.mubr.bf16.vlgmr.msra.gmra.mrb[120].mxu0 %v22615_v38  ;;  %8947 = vmatmul.mubr.bf16.vlgmr.msra.gmra.mrb[44].mxu1 %v22615_v38 }
 0x5e1   : > { %16378 = vmatprep.mubr.msk.bf16.mxu0 %vm8349_vm11, %v22654_v19  ;;  %16393 = vmatprep.mubr.msk.bf16.mxu1 %vm8349_vm11, %v22654_v19 }
 0x5e8   : > { %8621 = vmatmul.mubr.bf16.gmra.mrb[124].mxu0 %v22646_v17  ;;  %8955 = vmatmul.mubr.bf16.gmra.mrb[48].mxu1 %v22646_v17 }
 0x5e9   : > { %16379 = vmatprep.mubr.msk.bf16.mxu0 %vm8349_vm11, %v22686_v59  ;;  %16394 = vmatprep.mubr.msk.bf16.mxu1 %vm8349_vm11, %v22686_v59 }
 0x5f0   : > { %8631 = vmatmul.mubr.bf16.gmra.mrb[128].mxu0 %v22678_v3  ;;  %8963 = vmatmul.mubr.bf16.gmra.mrb[52].mxu1 %v22678_v3 }
 0x5f1   : > { %16380 = vmatprep.mubr.msk.bf16.mxu0 %vm8349_vm11, %v22718_v57  ;;  %16395 = vmatprep.mubr.msk.bf16.mxu1 %vm8349_vm11, %v22718_v57 }
 0x5f8   : > { %8641 = vmatmul.mubr.bf16.gmra.mrb[132].mxu0 %v22710_v54  ;;  %8971 = vmatmul.mubr.bf16.gmra.mrb[56].mxu1 %v22710_v54 }
 0x5f9   : > { %16381 = vmatprep.mubr.msk.bf16.mxu0 %vm8349_vm11, %v22750_v27  ;;  %16396 = vmatprep.mubr.msk.bf16.mxu1 %vm8349_vm11, %v22750_v27 }
 0x600   : > { %8651 = vmatmul.mubr.bf16.gmra.mrb[136].mxu0 %v22742_v37  ;;  %8979 = vmatmul.mubr.bf16.gmra.mrb[60].mxu1 %v22742_v37 }
 0x601   : > { %16382 = vmatprep.mubr.msk.bf16.mxu0 %vm8349_vm11, %v22782_v51  ;;  %16397 = vmatprep.mubr.msk.bf16.mxu1 %vm8349_vm11, %v22782_v51 }
 0x608   : > { %8661 = vmatmul.mubr.bf16.gmra.mrb[140].mxu0 %v22774_v1  ;;  %8987 = vmatmul.mubr.bf16.gmra.mrb[64].mxu1 %v22774_v1 }
 0x609   : > { %16383 = vmatprep.mubr.msk.bf16.mxu0 %vm8349_vm11, %v22805_v5  ;;  %16398 = vmatprep.mubr.msk.bf16.mxu1 %vm8349_vm11, %v22805_v5 }
 0x610   : > { %8671 = vmatmul.mubr.bf16.gmra.mrb[144].mxu0 %v22803_v61  ;;  %8995 = vmatmul.mubr.bf16.gmra.mrb[68].mxu1 %v22803_v61 }
 0x611   : > { %16384 = vmatprep.mubr.msk.bf16.mxu0 %vm8349_vm11, %v22818_v13  ;;  %16399 = vmatprep.mubr.msk.bf16.mxu1 %vm8349_vm11, %v22818_v13 }
 0x618   : > { %8681 = vmatmul.mubr.bf16.gmra.mrb[148].mxu0 %v22816_v22  ;;  %9003 = vmatmul.mubr.bf16.gmra.mrb[72].mxu1 %v22816_v22 }
 0x619   : > { %16385 = vmatprep.mubr.msk.bf16.mxu0 %vm8349_vm11, %v22830_v60  ;;  %16400 = vmatprep.mubr.msk.bf16.mxu1 %vm8349_vm11, %v22830_v60 }
 0x620   : > { %8691 = vmatmul.mubr.bf16.gmra.mrb[152].mxu0 %v22828_v55  ;;  %9011 = vmatmul.mubr.bf16.gmra.mrb[76].mxu1 %v22828_v55 }
 0x621   : > { %16386 = vmatprep.mubr.msk.bf16.mxu0 %vm8349_vm11, %v22842_v15  ;;  %16401 = vmatprep.mubr.msk.bf16.mxu1 %vm8349_vm11, %v22842_v15 }
 0x628   : > { %8701 = vmatmul.mubr.bf16.gmra.mrb[156].mxu0 %v22840_v41  ;;  %9019 = vmatmul.mubr.bf16.gmra.mrb[80].mxu1 %v22840_v41 }
 0x629   : > { %16387 = vmatprep.mubr.msk.bf16.mxu0 %vm8349_vm11, %v22854_v12  ;;  %16402 = vmatprep.mubr.msk.bf16.mxu1 %vm8349_vm11, %v22854_v12 }
 0x630   : > { %8711 = vmatmul.mubr.bf16.gmra.mrb[160].mxu0 %v22852_v63  ;;  %9027 = vmatmul.mubr.bf16.gmra.mrb[84].mxu1 %v22852_v63 }
 0x631   : > { %16388 = vmatprep.mubr.msk.bf16.mxu0 %vm8349_vm11, %v22866_v56  ;;  %16403 = vmatprep.mubr.msk.bf16.mxu1 %vm8349_vm11, %v22866_v56 }
 0x638   : > { %8721 = vmatmul.mubr.bf16.gmra.mrb[164].mxu0 %v22864_v44  ;;  %9035 = vmatmul.mubr.bf16.gmra.mrb[88].mxu1 %v22864_v44 }
 0x639   : > { %16389 = vmatprep.mubr.msk.bf16.mxu0 %vm8349_vm11, %v22878_v16  ;;  %16404 = vmatprep.mubr.msk.bf16.mxu1 %vm8349_vm11, %v22878_v16 }
 0x63b   : > { %v17208_v6 = vpop.f32.mrb[240].mxu1 }
 0x63c   : > { %v17209_v33 = vpop.f32.mrb[241].mxu1 }
 0x63d   : > { %v22980_v24 = vadd.f32 %v17209_v33, %v17208_v6  ;;  %v17211_v2 = vpop.f32.mrb[242].mxu1 }
 0x63e   : > { %v17212_v38 = vpop.f32.mrb[243].mxu1 }
 0x63f   : > { %v22982_v58 = vadd.f32 %v17212_v38, %v17211_v2 }
 0x640   : > { %8731 = vmatmul.mubr.bf16.gmra.mrb[168].mxu0 %v22876_v29  ;;  %9043 = vmatmul.mubr.bf16.gmra.mrb[92].mxu1 %v22876_v29 }
 0x641   : > { %16390 = vmatprep.mubr.msk.bf16.mxu0 %vm8349_vm11, %v22890_v34  ;;  %16405 = vmatprep.mubr.msk.bf16.mxu1 %vm8349_vm11, %v22890_v34 }
 0x643   : > { %v17214_v17 = vpop.f32.mrb[244].mxu1 }
 0x644   : > { %v17215_v19 = vpop.f32.mrb[245].mxu1 }
 0x645   : > { %v22990_v3 = vadd.f32 %v17215_v19, %v17214_v17  ;;  %v17217_v59 = vpop.f32.mrb[246].mxu1 }
 0x646   : > { %v17218_v54 = vpop.f32.mrb[247].mxu1 }
 0x647   : > { %v22992_v57 = vadd.f32 %v17218_v54, %v17217_v59 }
 0x648   : > { %8741 = vmatmul.mubr.bf16.gmra.mrb[172].mxu0 %v22888_v28  ;;  %9051 = vmatmul.mubr.bf16.gmra.mrb[96].mxu1 %v22888_v28 }
 0x649   : > { %16391 = vmatprep.mubr.msk.bf16.mxu0 %vm8349_vm11, %v22902_v31  ;;  %16406 = vmatprep.mubr.msk.bf16.mxu1 %vm8349_vm11, %v22902_v31 }
 0x64b   : > { %v17220_v37 = vpop.f32.mrb[248].mxu1 }
 0x64c   : > { %v17221_v27 = vpop.f32.mrb[249].mxu1 }
 0x64d   : > { %v23000_v1 = vadd.f32 %v17221_v27, %v17220_v37  ;;  %v17223_v51 = vpop.f32.mrb[250].mxu1 }
 0x64e   : > { %v17224_v61 = vpop.f32.mrb[251].mxu1 }
 0x64f   : > { %v23002_v5 = vadd.f32 %v17224_v61, %v17223_v51 }
 0x650   : > { %8751 = vmatmul.mubr.bf16.gmra.mrb[176].mxu0 %v22900_v9  ;;  %9059 = vmatmul.mubr.bf16.gmra.mrb[100].mxu1 %v22900_v9 }
 0x653   : > { %v17226_v22 = vpop.f32.mrb[252].mxu1 }
 0x654   : > { %v17227_v13 = vpop.f32.mrb[253].mxu1 }
 0x655   : > { %v23006_v55 = vadd.f32 %v17227_v13, %v17226_v22  ;;  %v17229_v60 = vpop.f32.mrb[254].mxu1 }
 0x656   : > { %v17230_v41 = vpop.f32.mrb[255].mxu1 }
 0x657   : > { %v23008_v15 = vadd.f32 %v17230_v41, %v17229_v60 }
 0x65b   : > { %v17232_v63 = vpop.f32.mrb[0].mxu1 }
 0x65c   : > { %v17233_v12 = vpop.f32.mrb[1].mxu1 }
 0x65d   : > { %v23010_v44 = vadd.f32 %v17233_v12, %v17232_v63  ;;  %v17235_v56 = vpop.f32.mrb[2].mxu1 }
 0x65e   : > { %v17236_v29 = vpop.f32.mrb[3].mxu1 }
 0x65f   : > { %v23012_v16 = vadd.f32 %v17236_v29, %v17235_v56 }
 0x663   : > { %v17238_v8 = vpop.f32.mrb[4].mxu1 }
 0x664   : > { %v17239_v53 = vpop.f32.mrb[5].mxu1 }
 0x665   : > { %v17241_v30 = vpop.f32.mrb[6].mxu1  ;;  %v23014_v47 = vadd.f32 %v17239_v53, %v17238_v8 }
 0x666   : > { %v17242_v45 = vpop.f32.mrb[7].mxu1 }
 0x667   : > { %v23016_v50 = vadd.f32 %v17242_v45, %v17241_v30 }
 0x66b   : > { %v17244_v20 = vpop.f32.mrb[8].mxu1 }
 0x66c   : > { %v17245_v28 = vpop.f32.mrb[9].mxu1 }
 0x66d   : > { %v17247_v34 = vpop.f32.mrb[10].mxu1  ;;  %v23018_v35 = vadd.f32 %v17245_v28, %v17244_v20 }
 0x66e   : > { %v17248_v43 = vpop.f32.mrb[11].mxu1 }
 0x66f   : > { %v23020_v23 = vadd.f32 %v17248_v43, %v17247_v34 }
 0x673   : > { %v17250_v40 = vpop.f32.mrb[12].mxu1 }
 0x674   : > { %v17251_v52 = vpop.f32.mrb[13].mxu1 }
 0x675   : > { %v17253_v0 = vpop.f32.mrb[14].mxu1  ;;  %v23022_v36 = vadd.f32 %v17251_v52, %v17250_v40  ;;  %v9157_v52 = vld [vmem:[%s25786_s9] sm:$0x7] }
 0x676   : > { %v17254_v62 = vpop.f32.mrb[15].mxu1 }
 0x677   : > { %v23024_v10 = vadd.f32 %v17254_v62, %v17253_v0  ;;  %v23058_v62 = vrot.slane %v9157_v52, %v25783_v42 }
 0x67b   : > { %v17256_v48 = vpop.f32.mrb[16].mxu1 }
 0x67c   : > { %v17257_v21 = vpop.f32.mrb[17].mxu1 }
 0x67d   : > { %v17259_v49 = vpop.f32.mrb[18].mxu1  ;;  %v23026_v7 = vadd.f32 %v17257_v21, %v17256_v48  ;;  %v9264_v48 = vld [vmem:[%s25787_s7] sm:$0x7]  ;;  %v19379_v21 = vld [vmem:[%s25788_s27 + $0x4] ss:$8 sps:$4 sm:$0xff]   ;;  %s25629_s7 = scalar_lea.hbm %s25807_s30, %s17138_s5  ;;  %s19827_s27 = scalar_lea.vmem %s25631_s26, 128 }
 0x67e   : > { %v17260_v25 = vpop.f32.mrb[19].mxu1  ;;  %16424 = vmatprep.mubr.msk.bf16.mxu0 %vm9504_vm12, %v19379_v21  ;;  %16432 = vmatprep.mubr.msk.bf16.mxu1 %vm9504_vm12, %v19379_v21  ;;  %p19828_p11 = scmp.ne.s32.totalorder %s25631_s26, %s19827_s27 }
 0x67f   : > { %v23028_v26 = vadd.f32 %v17260_v25, %v17259_v49 }
 0x680   : > { %p19829_p12 = pnand %p19828_p11, %p20070_p5 }
 0x682   : > { %p19830_p13 = pneg %p19829_p12 }
 0x683   : > { %v17262_v18 = vpop.f32.mrb[20].mxu1 }
 0x684   : > { %v17263_v14 = vpop.f32.mrb[21].mxu1 }
 0x685   : > { %v17265_v11 = vpop.f32.mrb[22].mxu1  ;;  %v23030_v9 = vadd.f32 %v17263_v14, %v17262_v18  ;;  %v23067_v18 = vrot.slane %v9157_v52, %v25785_v46 }
 0x686   : > { %v17266_v31 = vpop.f32.mrb[23].mxu1 }
 0x687   : > { %v23032_v32 = vadd.f32 %v17266_v31, %v17265_v11 }
 0x68b   : > { %v17268_v6 = vpop.f32.mrb[24].mxu1 }
 0x68c   : > { %v17269_v33 = vpop.f32.mrb[25].mxu1 }
 0x68d   : > { %v17271_v2 = vpop.f32.mrb[26].mxu1  ;;  %v23034_v38 = vadd.f32 %v17269_v33, %v17268_v6  ;;  %v23073_v33 = vrot.slane %v9264_v48, %v25783_v42 }
 0x68e   : > { %v17272_v17 = vpop.f32.mrb[27].mxu1 }
 0x68f   : > { %v23036_v19 = vadd.f32 %v17272_v17, %v17271_v2  ;;  %v23076_v2 = vrot.slane %v9157_v52, %v25784_v39 }
 0x693   : > { %v17274_v59 = vpop.f32.mrb[28].mxu1 }
 0x694   : > { %v17275_v54 = vpop.f32.mrb[29].mxu1 }
 0x695   : > { %v17277_v37 = vpop.f32.mrb[30].mxu1  ;;  %v23038_v27 = vadd.f32 %v17275_v54, %v17274_v59 }
 0x696   : > { %v17278_v51 = vpop.f32.mrb[31].mxu1 }
 0x697   : > { %v23040_v61 = vadd.f32 %v17278_v51, %v17277_v37 }
 0x69b   : > { %v17280_v22 = vpop.f32.mrb[32].mxu1 }
 0x69c   : > { %v17281_v13 = vpop.f32.mrb[33].mxu1 }
 0x69d   : > { %v17283_v60 = vpop.f32.mrb[34].mxu1  ;;  %v23042_v41 = vadd.f32 %v17281_v13, %v17280_v22 }
 0x69e   : > { %v17284_v63 = vpop.f32.mrb[35].mxu1 }
 0x69f   : > { %v23044_v12 = vadd.f32 %v17284_v63, %v17283_v60 }
 0x6a3   : > { %v17286_v56 = vpop.f32.mrb[36].mxu1 }
 0x6a4   : > { %v17287_v29 = vpop.f32.mrb[37].mxu1 }
 0x6a5   : > { %v17289_v8 = vpop.f32.mrb[38].mxu1  ;;  %v23046_v53 = vadd.f32 %v17287_v29, %v17286_v56  ;;  %v23082_v29 = vrot.slane %v9264_v48, %v25785_v46 }
 0x6a6   : > { %v17290_v30 = vpop.f32.mrb[39].mxu1 }
 0x6a7   : > { %v23048_v45 = vadd.f32 %v17290_v30, %v17289_v8 }
 0x6ab   : > { %v17292_v20 = vpop.f32.mrb[40].mxu1 }
 0x6ac   : > { %v17293_v28 = vpop.f32.mrb[41].mxu1 }
 0x6ad   : > { %v17295_v34 = vpop.f32.mrb[42].mxu1  ;;  %v23050_v43 = vadd.f32 %v17293_v28, %v17292_v20  ;;  %v23087_v28 = vrot.slane %v9264_v48, %v25784_v39 }
 0x6ae   : > { %v17296_v40 = vpop.f32.mrb[43].mxu1 }
 0x6af   : > { %v23055_v0 = vadd.f32 %v17296_v40, %v17295_v34 }
 0x6b3   : > { %v8612_v49 = vpop.f32.mrb[120].mxu0  ;;  %v8948_v25 = vpop.f32.mrb[44].mxu1 }
 0x6b4   : > { %v9067_v14 = vmax.f32 %v8612_v49, 0.0  ;;  %v8949_v11 = vadd.f32 %v22980_v24, %v8948_v25  ;;  %v8614_v31 = vpop.f32.mrb[121].mxu0  ;;  %v8950_v6 = vpop.f32.mrb[45].mxu1 }
 0x6b5   : > { %v9068_v17 = vmax.f32 %v8614_v31, 0.0  ;;  %v8616_v59 = vpop.f32.mrb[122].mxu0  ;;  %v8951_v54 = vpop.f32.mrb[46].mxu1 }
 0x6b6   : > { %v9174_v37 = vmul.f32 %v23058_v62, %v9067_v14  ;;  %v9069_v51 = vmax.f32 %v8949_v11, 0.0  ;;  %v9070_v22 = vmax.f32 %v8616_v59, 0.0  ;;  %v8952_v24 = vadd.f32 %v22982_v58, %v8951_v54  ;;  %v8618_v13 = vpop.f32.mrb[123].mxu0  ;;  %v8953_v60 = vpop.f32.mrb[47].mxu1 }
 0x6b7   : > { %v9175_v63 = vmul.f32 %v23067_v18, %v9068_v17  ;;  %v9071_v56 = vmax.f32 %v8618_v13, 0.0 }
 0x6b8   : > { %v9177_v8 = vmul.f32 %v23058_v62, %v9070_v22  ;;  %v9072_v30 = vmax.f32 %v8952_v24, 0.0  ;;  %v9176_v20 = vmul.f32 %v23076_v2, %v9069_v51  ;;  %v9281_v58 = vadd.f32 %v23073_v33, %v9174_v37 }
 0x6b9   : > { %v9178_v34 = vmul.f32 %v23067_v18, %v9071_v56  ;;  %v9282_v25 = vadd.f32 %v23082_v29, %v9175_v63 }
 0x6ba   : > { %v9284_v40 = vadd.f32 %v23073_v33, %v9177_v8  ;;  %v9179_v52 = vmul.f32 %v23076_v2, %v9072_v30  ;;  %v9283_v54 = vadd.f32 %v23087_v28, %v9176_v20 }
 0x6bb   : > { %v8622_v21 = vpop.f32.mrb[124].mxu0  ;;  %v8956_v49 = vpop.f32.mrb[48].mxu1  ;;  %v9285_v14 = vadd.f32 %v23082_v29, %v9178_v34 }
 0x6bc   : > { %v9286_v11 = vadd.f32 %v23087_v28, %v9179_v52  ;;  %v9073_v31 = vmax.f32 %v8622_v21, 0.0  ;;  %v8957_v48 = vadd.f32 %v22990_v3, %v8956_v49  ;;  %v8624_v6 = vpop.f32.mrb[125].mxu0  ;;  %v8958_v17 = vpop.f32.mrb[49].mxu1  ;;  %v23097_v59 = vpack.c.bf16 %v9284_v40, %v9281_v58 }
 0x6bd   : > { %v9074_v37 = vmax.f32 %v8624_v6, 0.0  ;;  %v8626_v51 = vpop.f32.mrb[126].mxu0  ;;  %v8959_v22 = vpop.f32.mrb[50].mxu1  ;;  %v23100_v24 = vpack.c.bf16 %v9285_v14, %v9282_v25 }
 0x6be   : > { %v9180_v13 = vmul.f32 %v23058_v62, %v9073_v31  ;;  %v9075_v60 = vmax.f32 %v8957_v48, 0.0  ;;  %v9076_v63 = vmax.f32 %v8626_v51, 0.0  ;;  %v8960_v56 = vadd.f32 %v22992_v57, %v8959_v22  ;;  %v8628_v8 = vpop.f32.mrb[127].mxu0  ;;  %v8961_v30 = vpop.f32.mrb[51].mxu1 }
 0x6bf   : > { %v9181_v3 = vmul.f32 %v23067_v18, %v9074_v37  ;;  %v9077_v34 = vmax.f32 %v8628_v8, 0.0  ;;  %9539 = vmatprep.subr.bf16.mxu0 %v23100_v24  ;;  %v23106_v58 = vpack.c.bf16 %v9286_v11, %v9283_v54 }
 0x6c0   : > { %v9183_v20 = vmul.f32 %v23058_v62, %v9076_v63  ;;  %v9078_v40 = vmax.f32 %v8960_v56, 0.0  ;;  %9540 = vmatpush1.bf16.msra.mxu0 %v23097_v59  ;;  %v9182_v52 = vmul.f32 %v23076_v2, %v9075_v60  ;;  %v9287_v57 = vadd.f32 %v23073_v33, %v9180_v13 }
 0x6c1   : > { %v9184_v21 = vmul.f32 %v23067_v18, %v9077_v34  ;;  %9653 = vmatpush1.bf16.msra.mxu1 %v23106_v58  ;;  %v9288_v31 = vadd.f32 %v23082_v29, %v9181_v3 }
 0x6c2   : > { %v9290_v49 = vadd.f32 %v23073_v33, %v9183_v20  ;;  %v9185_v25 = vmul.f32 %v23076_v2, %v9078_v40  ;;  %9654 = vmatprep.subr.bf16.mxu1 %v25776_v4  ;;  %v9289_v13 = vadd.f32 %v23087_v28, %v9182_v52 }
 0x6c3   : > { %v8632_v14 = vpop.f32.mrb[128].mxu0  ;;  %v8964_v11 = vpop.f32.mrb[52].mxu1  ;;  %v9291_v48 = vadd.f32 %v23082_v29, %v9184_v21 }
 0x6c4   : > { %v9292_v6 = vadd.f32 %v23087_v28, %v9185_v25  ;;  %v9079_v17 = vmax.f32 %v8632_v14, 0.0  ;;  %v8965_v54 = vadd.f32 %v23000_v1, %v8964_v11  ;;  %v8634_v37 = vpop.f32.mrb[129].mxu0  ;;  %v8966_v51 = vpop.f32.mrb[53].mxu1  ;;  %v23121_v22 = vpack.c.bf16 %v9290_v49, %v9287_v57 }
 0x6c5   : > { %v9080_v60 = vmax.f32 %v8634_v37, 0.0  ;;  %v8636_v63 = vpop.f32.mrb[130].mxu0  ;;  %v8967_v56 = vpop.f32.mrb[54].mxu1  ;;  %v23124_v8 = vpack.c.bf16 %v9291_v48, %v9288_v31 }
 0x6c6   : > { %v9186_v30 = vmul.f32 %v23058_v62, %v9079_v17  ;;  %v9081_v3 = vmax.f32 %v8965_v54, 0.0  ;;  %v9082_v34 = vmax.f32 %v8636_v63, 0.0  ;;  %v8968_v20 = vadd.f32 %v23002_v5, %v8967_v56  ;;  %v8638_v40 = vpop.f32.mrb[131].mxu0  ;;  %v8969_v21 = vpop.f32.mrb[55].mxu1 }
 0x6c7   : > { %v9187_v1 = vmul.f32 %v23067_v18, %v9080_v60  ;;  %v9083_v25 = vmax.f32 %v8638_v40, 0.0  ;;  %9541 = vmatprep.subr.bf16.mxu0 %v23124_v8  ;;  %v23130_v57 = vpack.c.bf16 %v9292_v6, %v9289_v13 }
 0x6c8   : > { %v9189_v52 = vmul.f32 %v23058_v62, %v9082_v34  ;;  %v9084_v49 = vmax.f32 %v8968_v20, 0.0  ;;  %9542 = vmatpush1.bf16.msra.mxu0 %v23121_v22  ;;  %v9188_v14 = vmul.f32 %v23076_v2, %v9081_v3  ;;  %v9293_v5 = vadd.f32 %v23073_v33, %v9186_v30 }
 0x6c9   : > { %v9190_v11 = vmul.f32 %v23067_v18, %v9083_v25  ;;  %9655 = vmatpush1.bf16.msra.mxu1 %v23130_v57  ;;  %v9294_v54 = vadd.f32 %v23082_v29, %v9187_v1 }
 0x6ca   : > { %v9296_v31 = vadd.f32 %v23073_v33, %v9189_v52  ;;  %v9191_v48 = vmul.f32 %v23076_v2, %v9084_v49  ;;  %9656 = vmatprep.subr.bf16.mxu1 %v25776_v4  ;;  %v9295_v3 = vadd.f32 %v23087_v28, %v9188_v14 }
 0x6cb   : > { %v8642_v6 = vpop.f32.mrb[132].mxu0  ;;  %v8972_v17 = vpop.f32.mrb[56].mxu1  ;;  %v9297_v37 = vadd.f32 %v23082_v29, %v9190_v11 }
 0x6cc   : > { %v9298_v51 = vadd.f32 %v23087_v28, %v9191_v48  ;;  %v9085_v13 = vmax.f32 %v8642_v6, 0.0  ;;  %v8973_v60 = vadd.f32 %v23006_v55, %v8972_v17  ;;  %v8644_v63 = vpop.f32.mrb[133].mxu0  ;;  %v8974_v56 = vpop.f32.mrb[57].mxu1  ;;  %v23145_v30 = vpack.c.bf16 %v9296_v31, %v9293_v5 }
 0x6cd   : > { %v9086_v34 = vmax.f32 %v8644_v63, 0.0  ;;  %v8646_v20 = vpop.f32.mrb[134].mxu0  ;;  %v8975_v40 = vpop.f32.mrb[58].mxu1  ;;  %v23148_v21 = vpack.c.bf16 %v9297_v37, %v9294_v54 }
 0x6ce   : > { %v9192_v1 = vmul.f32 %v23058_v62, %v9085_v13  ;;  %v9087_v25 = vmax.f32 %v8973_v60, 0.0  ;;  %v9088_v52 = vmax.f32 %v8646_v20, 0.0  ;;  %v8976_v49 = vadd.f32 %v23008_v15, %v8975_v40  ;;  %v8648_v11 = vpop.f32.mrb[135].mxu0  ;;  %v8977_v48 = vpop.f32.mrb[59].mxu1 }
 0x6cf   : > { %v9193_v55 = vmul.f32 %v23067_v18, %v9086_v34  ;;  %v9089_v6 = vmax.f32 %v8648_v11, 0.0  ;;  %9543 = vmatprep.subr.bf16.mxu0 %v23148_v21  ;;  %v23154_v5 = vpack.c.bf16 %v9298_v51, %v9295_v3 }
 0x6d0   : > { %v9195_v14 = vmul.f32 %v23058_v62, %v9088_v52  ;;  %v9090_v31 = vmax.f32 %v8976_v49, 0.0  ;;  %9544 = vmatpush1.bf16.msra.mxu0 %v23145_v30  ;;  %v9194_v17 = vmul.f32 %v23076_v2, %v9087_v25  ;;  %v9299_v15 = vadd.f32 %v23073_v33, %v9192_v1 }
 0x6d1   : > { %v9196_v54 = vmul.f32 %v23067_v18, %v9089_v6  ;;  %9657 = vmatpush1.bf16.msra.mxu1 %v23154_v5  ;;  %v9300_v63 = vadd.f32 %v23082_v29, %v9193_v55 }
 0x6d2   : > { %v9302_v37 = vadd.f32 %v23073_v33, %v9195_v14  ;;  %v9197_v13 = vmul.f32 %v23076_v2, %v9090_v31  ;;  %9658 = vmatprep.subr.bf16.mxu1 %v25776_v4  ;;  %v9301_v6 = vadd.f32 %v23087_v28, %v9194_v17 }
 0x6d3   : > { %v8652_v51 = vpop.f32.mrb[136].mxu0  ;;  %v8980_v60 = vpop.f32.mrb[60].mxu1  ;;  %v9303_v56 = vadd.f32 %v23082_v29, %v9196_v54 }
 0x6d4   : > { %v9091_v3 = vmax.f32 %v8652_v51, 0.0  ;;  %v8981_v34 = vadd.f32 %v23010_v44, %v8980_v60  ;;  %v8654_v20 = vpop.f32.mrb[137].mxu0  ;;  %v8982_v40 = vpop.f32.mrb[61].mxu1  ;;  %v23168_v25 = vpack.c.bf16 %v9302_v37, %v9299_v15  ;;  %v9304_v1 = vadd.f32 %v23087_v28, %v9197_v13 }
 0x6d5   : > { %v9092_v52 = vmax.f32 %v8654_v20, 0.0  ;;  %v8656_v49 = vpop.f32.mrb[138].mxu0  ;;  %v8983_v11 = vpop.f32.mrb[62].mxu1  ;;  %v23171_v48 = vpack.c.bf16 %v9303_v56, %v9300_v63 }
 0x6d6   : > { %v9198_v55 = vmul.f32 %v23058_v62, %v9091_v3  ;;  %v9093_v14 = vmax.f32 %v8981_v34, 0.0  ;;  %v9094_v31 = vmax.f32 %v8656_v49, 0.0  ;;  %v8984_v54 = vadd.f32 %v23012_v16, %v8983_v11  ;;  %v8658_v44 = vpop.f32.mrb[139].mxu0  ;;  %v8985_v51 = vpop.f32.mrb[63].mxu1 }
 0x6d7   : > { %v9199_v15 = vmul.f32 %v23067_v18, %v9092_v52  ;;  %v9095_v37 = vmax.f32 %v8658_v44, 0.0  ;;  %9545 = vmatprep.subr.bf16.mxu0 %v23171_v48  ;;  %v23178_v13 = vpack.c.bf16 %v9304_v1, %v9301_v6 }
 0x6d8   : > { %v9201_v60 = vmul.f32 %v23058_v62, %v9094_v31  ;;  %v9096_v63 = vmax.f32 %v8984_v54, 0.0  ;;  %9546 = vmatpush1.bf16.msra.mxu0 %v23168_v25  ;;  %v9200_v17 = vmul.f32 %v23076_v2, %v9093_v14  ;;  %v9305_v16 = vadd.f32 %v23073_v33, %v9198_v55 }
 0x6d9   : > { %v9202_v56 = vmul.f32 %v23067_v18, %v9095_v37  ;;  %9659 = vmatpush1.bf16.msra.mxu1 %v23178_v13  ;;  %v9306_v1 = vadd.f32 %v23082_v29, %v9199_v15 }
 0x6da   : > { %v9308_v3 = vadd.f32 %v23073_v33, %v9201_v60  ;;  %v9203_v34 = vmul.f32 %v23076_v2, %v9096_v63  ;;  %9660 = vmatprep.subr.bf16.mxu1 %v25776_v4  ;;  %v9307_v60 = vadd.f32 %v23087_v28, %v9200_v17 }
 0x6db   : > { %v8662_v20 = vpop.f32.mrb[140].mxu0  ;;  %v8988_v40 = vpop.f32.mrb[64].mxu1  ;;  %v9309_v52 = vadd.f32 %v23082_v29, %v9202_v56 }
 0x6dc   : > { %v9097_v49 = vmax.f32 %v8662_v20, 0.0  ;;  %v8989_v11 = vadd.f32 %v23014_v47, %v8988_v40  ;;  %v8664_v6 = vpop.f32.mrb[141].mxu0  ;;  %v8990_v14 = vpop.f32.mrb[65].mxu1  ;;  %v23192_v31 = vpack.c.bf16 %v9308_v3, %v9305_v16  ;;  %v9310_v55 = vadd.f32 %v23087_v28, %v9203_v34 }
 0x6dd   : > { %v9098_v54 = vmax.f32 %v8664_v6, 0.0  ;;  %v8666_v44 = vpop.f32.mrb[142].mxu0  ;;  %v8991_v51 = vpop.f32.mrb[66].mxu1  ;;  %v23195_v37 = vpack.c.bf16 %v9309_v52, %v9306_v1 }
 0x6de   : > { %v9204_v15 = vmul.f32 %v23058_v62, %v9097_v49  ;;  %v9099_v63 = vmax.f32 %v8989_v11, 0.0  ;;  %v9100_v56 = vmax.f32 %v8666_v44, 0.0  ;;  %v8992_v20 = vadd.f32 %v23016_v50, %v8991_v51  ;;  %v8668_v47 = vpop.f32.mrb[143].mxu0  ;;  %v8993_v40 = vpop.f32.mrb[67].mxu1 }
 0x6df   : > { %v9205_v16 = vmul.f32 %v23067_v18, %v9098_v54  ;;  %v9101_v3 = vmax.f32 %v8668_v47, 0.0  ;;  %9547 = vmatprep.subr.bf16.mxu0 %v23195_v37  ;;  %v23202_v34 = vpack.c.bf16 %v9310_v55, %v9307_v60 }
 0x6e0   : > { %v9206_v1 = vmul.f32 %v23076_v2, %v9099_v63  ;;  %v9207_v52 = vmul.f32 %v23058_v62, %v9100_v56  ;;  %v9102_v17 = vmax.f32 %v8992_v20, 0.0  ;;  %9548 = vmatpush1.bf16.msra.mxu0 %v23192_v31  ;;  %v9311_v50 = vadd.f32 %v23073_v33, %v9204_v15 }
 0x6e1   : > { %v9208_v49 = vmul.f32 %v23067_v18, %v9101_v3  ;;  %9661 = vmatpush1.bf16.msra.mxu1 %v23202_v34  ;;  %v9312_v44 = vadd.f32 %v23082_v29, %v9205_v16 }
 0x6e2   : > { %v9314_v11 = vadd.f32 %v23073_v33, %v9207_v52  ;;  %v9209_v6 = vmul.f32 %v23076_v2, %v9102_v17  ;;  %9662 = vmatprep.subr.bf16.mxu1 %v25776_v4  ;;  %v9313_v14 = vadd.f32 %v23087_v28, %v9206_v1 }
 0x6e3   : > { %v8672_v55 = vpop.f32.mrb[144].mxu0  ;;  %v8996_v54 = vpop.f32.mrb[68].mxu1  ;;  %v9315_v51 = vadd.f32 %v23082_v29, %v9208_v49 }
 0x6e4   : > { %v9316_v60 = vadd.f32 %v23087_v28, %v9209_v6  ;;  %v9103_v63 = vmax.f32 %v8672_v55, 0.0  ;;  %v8997_v56 = vadd.f32 %v23018_v35, %v8996_v54  ;;  %v8674_v15 = vpop.f32.mrb[145].mxu0  ;;  %v8998_v20 = vpop.f32.mrb[69].mxu1  ;;  %v23218_v47 = vpack.c.bf16 %v9314_v11, %v9311_v50 }
 0x6e5   : > { %v9104_v40 = vmax.f32 %v8674_v15, 0.0  ;;  %v8676_v3 = vpop.f32.mrb[146].mxu0  ;;  %v8999_v52 = vpop.f32.mrb[70].mxu1  ;;  %v23220_v17 = vpack.c.bf16 %v9315_v51, %v9312_v44 }
 0x6e6   : > { %v23222_v1 = vpack.c.bf16 %v9316_v60, %v9313_v14  ;;  %v9210_v16 = vmul.f32 %v23058_v62, %v9103_v63  ;;  %v9105_v39 = vmax.f32 %v8997_v56, 0.0  ;;  %v9106_v49 = vmax.f32 %v8676_v3, 0.0  ;;  %v8678_v46 = vpop.f32.mrb[147].mxu0  ;;  %v9001_v6 = vpop.f32.mrb[71].mxu1 }
 0x6e7   : > { %v9211_v55 = vmul.f32 %v23067_v18, %v9104_v40  ;;  %v9000_v35 = vadd.f32 %v23020_v23, %v8999_v52  ;;  %v9107_v54 = vmax.f32 %v8678_v46, 0.0  ;;  %9549 = vmatprep.subr.bf16.mxu0 %v23220_v17 }
 0x6e8   : > { %v9213_v50 = vmul.f32 %v23058_v62, %v9106_v49  ;;  %9550 = vmatpush1.bf16.msra.mxu0 %v23218_v47  ;;  %9663 = vmatpush1.bf16.msra.mxu1 %v23222_v1  ;;  %v9212_v11 = vmul.f32 %v23076_v2, %v9105_v39  ;;  %v9317_v51 = vadd.f32 %v23073_v33, %v9210_v16 }
 0x6e9   : > { %v9108_v14 = vmax.f32 %v9000_v35, 0.0  ;;  %v9214_v44 = vmul.f32 %v23067_v18, %v9107_v54  ;;  %9664 = vmatprep.subr.bf16.mxu1 %v25776_v4  ;;  %v9318_v56 = vadd.f32 %v23082_v29, %v9211_v55 }
 0x6ea   : > { %v9320_v23 = vadd.f32 %v23073_v33, %v9213_v50  ;;  %v9319_v49 = vadd.f32 %v23087_v28, %v9212_v11 }
 0x6eb   : > { %v9215_v46 = vmul.f32 %v23076_v2, %v9108_v14  ;;  %v8682_v60 = vpop.f32.mrb[148].mxu0  ;;  %v9004_v63 = vpop.f32.mrb[72].mxu1  ;;  %v9321_v15 = vadd.f32 %v23082_v29, %v9214_v44 }
 0x6ec   : > { %v9109_v20 = vmax.f32 %v8682_v60, 0.0  ;;  %v9005_v39 = vadd.f32 %v23022_v36, %v9004_v63  ;;  %v8684_v40 = vpop.f32.mrb[149].mxu0  ;;  %v9006_v3 = vpop.f32.mrb[73].mxu1  ;;  %v23240_v52 = vpack.c.bf16 %v9320_v23, %v9317_v51 }
 0x6ed   : > { %v9322_v16 = vadd.f32 %v23087_v28, %v9215_v46  ;;  %v9110_v6 = vmax.f32 %v8684_v40, 0.0  ;;  %v8686_v35 = vpop.f32.mrb[150].mxu0  ;;  %v9007_v54 = vpop.f32.mrb[74].mxu1  ;;  %v23244_v50 = vpack.c.bf16 %v9321_v15, %v9318_v56 }
 0x6ee   : > { %v9216_v55 = vmul.f32 %v23058_v62, %v9109_v20  ;;  %v9111_v14 = vmax.f32 %v9005_v39, 0.0  ;;  %v9112_v44 = vmax.f32 %v8686_v35, 0.0  ;;  %v9008_v60 = vadd.f32 %v23024_v10, %v9007_v54  ;;  %v8688_v36 = vpop.f32.mrb[151].mxu0  ;;  %v9009_v63 = vpop.f32.mrb[75].mxu1 }
 0x6ef   : > { %v23248_v3 = vpack.c.bf16 %v9322_v16, %v9319_v49  ;;  %v9217_v51 = vmul.f32 %v23067_v18, %v9110_v6  ;;  %v9113_v11 = vmax.f32 %v8688_v36, 0.0  ;;  %9551 = vmatprep.subr.bf16.mxu0 %v23244_v50 }
 0x6f0   : > { %v9218_v23 = vmul.f32 %v23076_v2, %v9111_v14  ;;  %v9219_v46 = vmul.f32 %v23058_v62, %v9112_v44  ;;  %v9114_v56 = vmax.f32 %v9008_v60, 0.0  ;;  %9552 = vmatpush1.bf16.msra.mxu0 %v23240_v52  ;;  %v9323_v10 = vadd.f32 %v23073_v33, %v9216_v55 }
 0x6f1   : > { %25790 = vst [vmem:[#allocation19_spill] sm:$0xff] %v23248_v3  ;;  %v9220_v15 = vmul.f32 %v23067_v18, %v9113_v11  ;;  %9665 = vmatpush1.bf16.msra.mxu1 %v23248_v3  ;;  %v9324_v6 = vadd.f32 %v23082_v29, %v9217_v51 }
 0x6f2   : > { %v9326_v20 = vadd.f32 %v23073_v33, %v9219_v46  ;;  %v9221_v39 = vmul.f32 %v23076_v2, %v9114_v56  ;;  %9666 = vmatprep.subr.bf16.mxu1 %v25776_v4  ;;  %v9325_v40 = vadd.f32 %v23087_v28, %v9218_v23 }
 0x6f3   : > { %v8692_v49 = vpop.f32.mrb[152].mxu0  ;;  %v9012_v16 = vpop.f32.mrb[76].mxu1  ;;  %v9327_v35 = vadd.f32 %v23082_v29, %v9220_v15 }
 0x6f4   : > { %v9328_v54 = vadd.f32 %v23087_v28, %v9221_v39  ;;  %v9115_v14 = vmax.f32 %v8692_v49, 0.0  ;;  %v9013_v44 = vadd.f32 %v23026_v7, %v9012_v16  ;;  %v8694_v55 = vpop.f32.mrb[153].mxu0  ;;  %v9014_v60 = vpop.f32.mrb[77].mxu1  ;;  %v23266_v36 = vpack.c.bf16 %v9326_v20, %v9323_v10 }
 0x6f5   : > { %v9116_v63 = vmax.f32 %v8694_v55, 0.0  ;;  %v8696_v11 = vpop.f32.mrb[154].mxu0  ;;  %v9015_v46 = vpop.f32.mrb[78].mxu1  ;;  %v23268_v56 = vpack.c.bf16 %v9327_v35, %v9324_v6 }
 0x6f6   : > { %v23270_v23 = vpack.c.bf16 %v9328_v54, %v9325_v40  ;;  %v9222_v51 = vmul.f32 %v23058_v62, %v9115_v14  ;;  %v9117_v42 = vmax.f32 %v9013_v44, 0.0  ;;  %v9118_v15 = vmax.f32 %v8696_v11, 0.0  ;;  %v8698_v3 = vpop.f32.mrb[155].mxu0  ;;  %v9017_v39 = vpop.f32.mrb[79].mxu1 }
 0x6f7   : > { %v9223_v49 = vmul.f32 %v23067_v18, %v9116_v63  ;;  %v9016_v7 = vadd.f32 %v23028_v26, %v9015_v46  ;;  %v9119_v16 = vmax.f32 %v8698_v3, 0.0  ;;  %9553 = vmatprep.subr.bf16.mxu0 %v23268_v56 }
 0x6f8   : > { %v9225_v10 = vmul.f32 %v23058_v62, %v9118_v15  ;;  %9554 = vmatpush1.bf16.msra.mxu0 %v23266_v36  ;;  %9667 = vmatpush1.bf16.msra.mxu1 %v23270_v23  ;;  %v9224_v20 = vmul.f32 %v23076_v2, %v9117_v42  ;;  %v9329_v35 = vadd.f32 %v23073_v33, %v9222_v51 }
 0x6f9   : > { %v9120_v40 = vmax.f32 %v9016_v7, 0.0  ;;  %v9226_v6 = vmul.f32 %v23067_v18, %v9119_v16  ;;  %9668 = vmatprep.subr.bf16.mxu1 %v25776_v4  ;;  %v9330_v3 = vadd.f32 %v23082_v29, %v9223_v49 }
 0x6fa   : > { %v9332_v26 = vadd.f32 %v23073_v33, %v9225_v10  ;;  %v9331_v15 = vadd.f32 %v23087_v28, %v9224_v20 }
 0x6fb   : > { %v9227_v54 = vmul.f32 %v23076_v2, %v9120_v40  ;;  %v9333_v14 = vadd.f32 %v23082_v29, %v9226_v6  ;;  %v8702_v44 = vpop.f32.mrb[156].mxu0  ;;  %v9020_v55 = vpop.f32.mrb[80].mxu1 }
 0x6fc   : > { %v23287_v60 = vpack.c.bf16 %v9332_v26, %v9329_v35  ;;  %v9121_v42 = vmax.f32 %v8702_v44, 0.0  ;;  %v9021_v63 = vadd.f32 %v23030_v9, %v9020_v55  ;;  %v8704_v11 = vpop.f32.mrb[157].mxu0  ;;  %v9022_v46 = vpop.f32.mrb[81].mxu1 }
 0x6fd   : > { %v9334_v51 = vadd.f32 %v23087_v28, %v9227_v54  ;;  %v9122_v39 = vmax.f32 %v8704_v11, 0.0  ;;  %v8706_v7 = vpop.f32.mrb[158].mxu0  ;;  %v9023_v49 = vpop.f32.mrb[82].mxu1  ;;  %v23292_v16 = vpack.c.bf16 %v9333_v14, %v9330_v3 }
 0x6fe   : > { %v9228_v10 = vmul.f32 %v23058_v62, %v9121_v42  ;;  %v9123_v40 = vmax.f32 %v9021_v63, 0.0  ;;  %v9124_v6 = vmax.f32 %v8706_v7, 0.0  ;;  %v9024_v35 = vadd.f32 %v23032_v32, %v9023_v49  ;;  %v8708_v26 = vpop.f32.mrb[159].mxu0  ;;  %v9025_v44 = vpop.f32.mrb[83].mxu1 }
 0x6ff   : > { %v23296_v9 = vpack.c.bf16 %v9334_v51, %v9331_v15  ;;  %v9229_v55 = vmul.f32 %v23067_v18, %v9122_v39  ;;  %v9125_v20 = vmax.f32 %v8708_v26, 0.0  ;;  %9555 = vmatprep.subr.bf16.mxu0 %v23292_v16 }
 0x700   : > { %v9230_v54 = vmul.f32 %v23076_v2, %v9123_v40  ;;  %v9231_v3 = vmul.f32 %v23058_v62, %v9124_v6  ;;  %v9126_v14 = vmax.f32 %v9024_v35, 0.0  ;;  %9556 = vmatpush1.bf16.msra.mxu0 %v23287_v60  ;;  %v9335_v32 = vadd.f32 %v23073_v33, %v9228_v10 }
 0x701   : > { %25791 = vst [vmem:[#allocation20_spill] sm:$0xff] %v23296_v9  ;;  %v9232_v42 = vmul.f32 %v23067_v18, %v9125_v20  ;;  %9669 = vmatpush1.bf16.msra.mxu1 %v23296_v9  ;;  %v9336_v15 = vadd.f32 %v23082_v29, %v9229_v55 }
 0x702   : > { %v9338_v63 = vadd.f32 %v23073_v33, %v9231_v3  ;;  %v9233_v11 = vmul.f32 %v23076_v2, %v9126_v14  ;;  %9670 = vmatprep.subr.bf16.mxu1 %v25776_v4  ;;  %v9337_v46 = vadd.f32 %v23087_v28, %v9230_v54 }
 0x703   : > { %v9339_v51 = vadd.f32 %v23082_v29, %v9232_v42  ;;  %v8712_v39 = vpop.f32.mrb[160].mxu0  ;;  %v9028_v7 = vpop.f32.mrb[84].mxu1 }
 0x704   : > { %v23312_v49 = vpack.c.bf16 %v9338_v63, %v9335_v32  ;;  %v9340_v40 = vadd.f32 %v23087_v28, %v9233_v11  ;;  %v9127_v6 = vmax.f32 %v8712_v39, 0.0  ;;  %v9029_v10 = vadd.f32 %v23034_v38, %v9028_v7  ;;  %v8714_v35 = vpop.f32.mrb[161].mxu0  ;;  %v9030_v26 = vpop.f32.mrb[85].mxu1 }
 0x705   : > { %v9128_v44 = vmax.f32 %v8714_v35, 0.0  ;;  %v8716_v20 = vpop.f32.mrb[162].mxu0  ;;  %v9031_v3 = vpop.f32.mrb[86].mxu1  ;;  %v23316_v14 = vpack.c.bf16 %v9339_v51, %v9336_v15 }
 0x706   : > { %v23318_v54 = vpack.c.bf16 %v9340_v40, %v9337_v46  ;;  %v9234_v55 = vmul.f32 %v23058_v62, %v9127_v6  ;;  %v9129_v42 = vmax.f32 %v9029_v10, 0.0  ;;  %v9130_v9 = vmax.f32 %v8716_v20, 0.0  ;;  %v8718_v32 = vpop.f32.mrb[163].mxu0  ;;  %v9033_v63 = vpop.f32.mrb[87].mxu1 }
 0x707   : > { %v9235_v11 = vmul.f32 %v23067_v18, %v9128_v44  ;;  %v9032_v39 = vadd.f32 %v23036_v19, %v9031_v3  ;;  %v9131_v38 = vmax.f32 %v8718_v32, 0.0  ;;  %9557 = vmatprep.subr.bf16.mxu0 %v23316_v14 }
 0x708   : > { %25792 = vst [vmem:[#allocation21_spill] sm:$0xff] %v23318_v54  ;;  %v9237_v7 = vmul.f32 %v23058_v62, %v9130_v9  ;;  %9558 = vmatpush1.bf16.msra.mxu0 %v23312_v49  ;;  %9671 = vmatpush1.bf16.msra.mxu1 %v23318_v54  ;;  %v9236_v46 = vmul.f32 %v23076_v2, %v9129_v42 }
 0x709   : > { %v9132_v15 = vmax.f32 %v9032_v39, 0.0  ;;  %v9238_v51 = vmul.f32 %v23067_v18, %v9131_v38  ;;  %9672 = vmatprep.subr.bf16.mxu1 %v25776_v4  ;;  %v9341_v40 = vadd.f32 %v23073_v33, %v9234_v55  ;;  %v9342_v6 = vadd.f32 %v23082_v29, %v9235_v11 }
 0x70a   : > { %v9344_v19 = vadd.f32 %v23073_v33, %v9237_v7  ;;  %v9343_v63 = vadd.f32 %v23087_v28, %v9236_v46 }
 0x70b   : > { %v9239_v10 = vmul.f32 %v23076_v2, %v9132_v15  ;;  %v9345_v9 = vadd.f32 %v23082_v29, %v9238_v51  ;;  %v8722_v35 = vpop.f32.mrb[164].mxu0  ;;  %v9036_v26 = vpop.f32.mrb[88].mxu1 }
 0x70c   : > { %v23335_v44 = vpack.c.bf16 %v9344_v19, %v9341_v40  ;;  %v9133_v20 = vmax.f32 %v8722_v35, 0.0  ;;  %v9037_v3 = vadd.f32 %v23038_v27, %v9036_v26  ;;  %v8724_v42 = vpop.f32.mrb[165].mxu0  ;;  %v9038_v32 = vpop.f32.mrb[89].mxu1 }
 0x70d   : > { %v9346_v55 = vadd.f32 %v23087_v28, %v9239_v10  ;;  %v9134_v39 = vmax.f32 %v8724_v42, 0.0  ;;  %v8726_v38 = vpop.f32.mrb[166].mxu0  ;;  %v9039_v11 = vpop.f32.mrb[90].mxu1  ;;  %v23340_v7 = vpack.c.bf16 %v9345_v9, %v9342_v6 }
 0x70e   : > { %v9240_v15 = vmul.f32 %v23058_v62, %v9133_v20  ;;  %v9135_v51 = vmax.f32 %v9037_v3, 0.0  ;;  %v9136_v54 = vmax.f32 %v8726_v38, 0.0  ;;  %v9040_v40 = vadd.f32 %v23040_v61, %v9039_v11  ;;  %v8728_v19 = vpop.f32.mrb[167].mxu0  ;;  %v9041_v35 = vpop.f32.mrb[91].mxu1 }
 0x70f   : > { %v23344_v27 = vpack.c.bf16 %v9346_v55, %v9343_v63  ;;  %v9241_v26 = vmul.f32 %v23067_v18, %v9134_v39  ;;  %v9137_v46 = vmax.f32 %v8728_v19, 0.0  ;;  %9559 = vmatprep.subr.bf16.mxu0 %v23340_v7 }
 0x710   : > { %v9242_v10 = vmul.f32 %v23076_v2, %v9135_v51  ;;  %v9243_v6 = vmul.f32 %v23058_v62, %v9136_v54  ;;  %v9138_v9 = vmax.f32 %v9040_v40, 0.0  ;;  %9560 = vmatpush1.bf16.msra.mxu0 %v23335_v44  ;;  %v9347_v61 = vadd.f32 %v23073_v33, %v9240_v15 }
 0x711   : > { %25793 = vst [vmem:[#allocation15_spill] sm:$0xff] %v23344_v27  ;;  %v9244_v20 = vmul.f32 %v23067_v18, %v9137_v46  ;;  %9673 = vmatpush1.bf16.msra.mxu1 %v23344_v27  ;;  %v9348_v63 = vadd.f32 %v23082_v29, %v9241_v26 }
 0x712   : > { %v9350_v3 = vadd.f32 %v23073_v33, %v9243_v6  ;;  %v9245_v42 = vmul.f32 %v23076_v2, %v9138_v9  ;;  %9674 = vmatprep.subr.bf16.mxu1 %v25776_v4  ;;  %v9349_v32 = vadd.f32 %v23087_v28, %v9242_v10 }
 0x713   : > { %v9351_v54 = vadd.f32 %v23082_v29, %v9244_v20  ;;  %v8732_v55 = vpop.f32.mrb[168].mxu0  ;;  %v9044_v39 = vpop.f32.mrb[92].mxu1 }
 0x714   : > { %v23360_v38 = vpack.c.bf16 %v9350_v3, %v9347_v61  ;;  %v9352_v11 = vadd.f32 %v23087_v28, %v9245_v42  ;;  %v9139_v51 = vmax.f32 %v8732_v55, 0.0  ;;  %v9045_v15 = vadd.f32 %v23042_v41, %v9044_v39  ;;  %v8734_v40 = vpop.f32.mrb[169].mxu0  ;;  %v9046_v19 = vpop.f32.mrb[93].mxu1 }
 0x715   : > { %v9140_v35 = vmax.f32 %v8734_v40, 0.0  ;;  %v8736_v46 = vpop.f32.mrb[170].mxu0  ;;  %v9047_v6 = vpop.f32.mrb[94].mxu1  ;;  %v23364_v9 = vpack.c.bf16 %v9351_v54, %v9348_v63 }
 0x716   : > { %v23366_v10 = vpack.c.bf16 %v9352_v11, %v9349_v32  ;;  %v9246_v26 = vmul.f32 %v23058_v62, %v9139_v51  ;;  %v9141_v20 = vmax.f32 %v9045_v15, 0.0  ;;  %v9142_v27 = vmax.f32 %v8736_v46, 0.0  ;;  %v8738_v61 = vpop.f32.mrb[171].mxu0  ;;  %v9049_v3 = vpop.f32.mrb[95].mxu1 }
 0x717   : > { %v9247_v42 = vmul.f32 %v23067_v18, %v9140_v35  ;;  %v9048_v55 = vadd.f32 %v23044_v12, %v9047_v6  ;;  %v9143_v41 = vmax.f32 %v8738_v61, 0.0  ;;  %9561 = vmatprep.subr.bf16.mxu0 %v23364_v9 }
 0x718   : > { %25794 = vst [vmem:[#allocation22_spill] sm:$0xff] %v23366_v10  ;;  %v9249_v39 = vmul.f32 %v23058_v62, %v9142_v27  ;;  %9562 = vmatpush1.bf16.msra.mxu0 %v23360_v38  ;;  %9675 = vmatpush1.bf16.msra.mxu1 %v23366_v10  ;;  %v9248_v32 = vmul.f32 %v23076_v2, %v9141_v20 }
 0x719   : > { %v9144_v63 = vmax.f32 %v9048_v55, 0.0  ;;  %v9250_v54 = vmul.f32 %v23067_v18, %v9143_v41  ;;  %9676 = vmatprep.subr.bf16.mxu1 %v25776_v4  ;;  %v9353_v11 = vadd.f32 %v23073_v33, %v9246_v26  ;;  %v9354_v51 = vadd.f32 %v23082_v29, %v9247_v42 }
 0x71a   : > { %v9356_v12 = vadd.f32 %v23073_v33, %v9249_v39  ;;  %v9355_v3 = vadd.f32 %v23087_v28, %v9248_v32 }
 0x71b   : > { %v9251_v15 = vmul.f32 %v23076_v2, %v9144_v63  ;;  %v9357_v27 = vadd.f32 %v23082_v29, %v9250_v54  ;;  %v8742_v40 = vpop.f32.mrb[172].mxu0  ;;  %v9052_v19 = vpop.f32.mrb[96].mxu1 }
 0x71c   : > { %v23383_v35 = vpack.c.bf16 %v9356_v12, %v9353_v11  ;;  %v9145_v46 = vmax.f32 %v8742_v40, 0.0  ;;  %v9053_v6 = vadd.f32 %v23046_v53, %v9052_v19  ;;  %v8744_v20 = vpop.f32.mrb[173].mxu0  ;;  %v9054_v61 = vpop.f32.mrb[97].mxu1 }
 0x71d   : > { %v9358_v26 = vadd.f32 %v23087_v28, %v9251_v15  ;;  %v9146_v55 = vmax.f32 %v8744_v20, 0.0  ;;  %v8746_v41 = vpop.f32.mrb[174].mxu0  ;;  %v9055_v42 = vpop.f32.mrb[98].mxu1  ;;  %v23388_v39 = vpack.c.bf16 %v9357_v27, %v9354_v51 }
 0x71e   : > { %v9252_v63 = vmul.f32 %v23058_v62, %v9145_v46  ;;  %v9147_v54 = vmax.f32 %v9053_v6, 0.0  ;;  %v9148_v10 = vmax.f32 %v8746_v41, 0.0  ;;  %v9056_v11 = vadd.f32 %v23048_v45, %v9055_v42  ;;  %v8748_v12 = vpop.f32.mrb[175].mxu0  ;;  %v9057_v40 = vpop.f32.mrb[99].mxu1 }
 0x71f   : > { %v23392_v53 = vpack.c.bf16 %v9358_v26, %v9355_v3  ;;  %v9253_v19 = vmul.f32 %v23067_v18, %v9146_v55  ;;  %v9149_v32 = vmax.f32 %v8748_v12, 0.0  ;;  %9563 = vmatprep.subr.bf16.mxu0 %v23388_v39 }
 0x720   : > { %v9254_v15 = vmul.f32 %v23076_v2, %v9147_v54  ;;  %v9255_v51 = vmul.f32 %v23058_v62, %v9148_v10  ;;  %v9150_v27 = vmax.f32 %v9056_v11, 0.0  ;;  %9564 = vmatpush1.bf16.msra.mxu0 %v23383_v35  ;;  %v9359_v45 = vadd.f32 %v23073_v33, %v9252_v63 }
 0x721   : > { %25795 = vst [vmem:[#allocation23_spill] sm:$0xff] %v23392_v53  ;;  %v9256_v46 = vmul.f32 %v23067_v18, %v9149_v32  ;;  %9677 = vmatpush1.bf16.msra.mxu1 %v23392_v53  ;;  %v9360_v3 = vadd.f32 %v23082_v29, %v9253_v19 }
 0x722   : > { %v9362_v6 = vadd.f32 %v23073_v33, %v9255_v51  ;;  %v9257_v20 = vmul.f32 %v23076_v2, %v9150_v27  ;;  %9678 = vmatprep.subr.bf16.mxu1 %v25776_v4  ;;  %v9361_v61 = vadd.f32 %v23087_v28, %v9254_v15 }
 0x723   : > { %v9363_v10 = vadd.f32 %v23082_v29, %v9256_v46  ;;  %v8752_v26 = vpop.f32.mrb[176].mxu0  ;;  %v9060_v55 = vpop.f32.mrb[100].mxu1 }
 0x724   : > { %v23408_v41 = vpack.c.bf16 %v9362_v6, %v9359_v45  ;;  %v9364_v42 = vadd.f32 %v23087_v28, %v9257_v20  ;;  %v9151_v54 = vmax.f32 %v8752_v26, 0.0  ;;  %v9061_v63 = vadd.f32 %v23050_v43, %v9060_v55  ;;  %v8754_v11 = vpop.f32.mrb[177].mxu0  ;;  %v9062_v12 = vpop.f32.mrb[101].mxu1 }
 0x725   : > { %v9152_v40 = vmax.f32 %v8754_v11, 0.0  ;;  %v8756_v32 = vpop.f32.mrb[178].mxu0  ;;  %v9063_v51 = vpop.f32.mrb[102].mxu1  ;;  %v23412_v27 = vpack.c.bf16 %v9363_v10, %v9360_v3 }
 0x726   : > { %v23414_v15 = vpack.c.bf16 %v9364_v42, %v9361_v61  ;;  %v9258_v19 = vmul.f32 %v23058_v62, %v9151_v54  ;;  %v9153_v46 = vmax.f32 %v9061_v63, 0.0  ;;  %v9154_v53 = vmax.f32 %v8756_v32, 0.0  ;;  %v8758_v45 = vpop.f32.mrb[179].mxu0  ;;  %v9065_v6 = vpop.f32.mrb[103].mxu1  ;;  %v19433_v32 = vld [vmem:[%s25802_s1 + $0x14] ss:$8 sps:$4 sm:$0xff]  }
 0x727   : > { %v9259_v20 = vmul.f32 %v23067_v18, %v9152_v40  ;;  %v9064_v26 = vadd.f32 %v23055_v0, %v9063_v51  ;;  %v9155_v43 = vmax.f32 %v8758_v45, 0.0  ;;  %9565 = vmatprep.subr.bf16.mxu0 %v23412_v27  ;;  %v19431_v51 = vld [vmem:[%s25802_s1 + $0x10] ss:$8 sps:$4 sm:$0xff]   ;;  %v19439_v45 = vld [vmem:[%s25802_s1 + $0x24] ss:$8 sps:$4 sm:$0xff]  }
 0x728   : > { %v9261_v55 = vmul.f32 %v23058_v62, %v9154_v53  ;;  %9566 = vmatpush1.bf16.msra.mxu0 %v23408_v41  ;;  %9679 = vmatpush1.bf16.msra.mxu1 %v23414_v15  ;;  %v9260_v61 = vmul.f32 %v23076_v2, %v9153_v46  ;;  %v9365_v42 = vadd.f32 %v23073_v33, %v9258_v19  ;;  %v19418_v19 = vld [vmem:[%s25789_s4 + $0xd0] ss:$8 sps:$4 sm:$0xff]   ;;  %v19437_v46 = vld [vmem:[%s25802_s1 + $0x20] ss:$8 sps:$4 sm:$0xff]  }
 0x729   : > { %v9156_v3 = vmax.f32 %v9064_v26, 0.0  ;;  %v9262_v10 = vmul.f32 %v23067_v18, %v9155_v43  ;;  %9680 = vmatprep.subr.bf16.mxu1 %v25776_v4  ;;  %v9366_v54 = vadd.f32 %v23082_v29, %v9259_v20  ;;  %v19440_v6 = vld [vmem:[%s25802_s1 + $0x138] ss:$8 sps:$4 sm:$0xff]   ;;  %v19419_v20 = vld [vmem:[%s25789_s4 + $0xe4] ss:$8 sps:$4 sm:$0xff]  }
 0x72a   : > { %v9368_v0 = vadd.f32 %v23073_v33, %v9261_v55  ;;  %v9367_v11 = vadd.f32 %v23087_v28, %v9260_v61  ;;  %v19442_v26 = vld [vmem:[%s25802_s1 + $0x13c] ss:$8 sps:$4 sm:$0xff]   ;;  %v19443_v55 = vld [vmem:[%s25802_s1 + $0x30] ss:$8 sps:$4 sm:$0xff]   ;;  %v19448_v61 = vld [vmem:[%s25802_s1 + $0x14c] ss:$8 sps:$4 sm:$0xff]  }
 0x72b   : > { %v9263_v63 = vmul.f32 %v23076_v2, %v9156_v3  ;;  %v9369_v62 = vadd.f32 %v23082_v29, %v9262_v10  ;;  %v19377_v2 = vld [vmem:[%s25789_s4] ss:$8 sps:$4 sm:$0xff]   ;;  %v19380_v29 = vld [vmem:[%s25789_s4 + $0x14] ss:$8 sps:$4 sm:$0xff]  }
 0x72c   : > { %v9413_v53 = vpack.c.bf16 %v9368_v0, %v9365_v42  ;;  %v19445_v43 = vld [vmem:[%s25802_s1 + $0x34] ss:$8 sps:$4 sm:$0xff]   ;;  %v19446_v3 = vld [vmem:[%s25802_s1 + $0x148] ss:$8 sps:$4 sm:$0xff]   ;;  %v19451_v0 = vld [vmem:[%s25802_s1 + $0x44] ss:$8 sps:$4 sm:$0xff]  }
 0x72d   : > { %v9370_v12 = vadd.f32 %v23087_v28, %v9263_v63  ;;  %v23433_v40 = vpack.c.bf16 %v9369_v62, %v9366_v54  ;;  %v19421_v10 = vld [vmem:[%s25789_s4 + $0xe0] ss:$8 sps:$4 sm:$0xff]   ;;  %v19422_v63 = vld [vmem:[%s25789_s4 + $0xf4] ss:$8 sps:$4 sm:$0xff]  }
 0x72e   : > { %v23436_v18 = vsel %vm6210_vm10, %v9413_v53, 0  ;;  %v19449_v42 = vld [vmem:[%s25802_s1 + $0x40] ss:$8 sps:$4 sm:$0xff]   ;;  %v19454_v62 = vld [vmem:[%s25802_s1 + $0x15c] ss:$8 sps:$4 sm:$0xff]  }
 0x72f   : > { %16423 = vmatprep.subr.msk.bf16.mxu0 %vm6210_vm10, %v23433_v40  ;;  %v9415_v33 = vpack.c.bf16 %v9370_v12, %v9367_v11  ;;  %v19452_v54 = vld [vmem:[%s25802_s1 + $0x158] ss:$8 sps:$4 sm:$0xff]   ;;  %v19457_v53 = vld [vmem:[%s25802_s1 + $0x54] ss:$8 sps:$4 sm:$0xff]  }
 0x730   : > { %9568 = vmatpush1.bf16.msra.mxu0 %v23436_v18  ;;  %v19455_v11 = vld [vmem:[%s25802_s1 + $0x50] ss:$8 sps:$4 sm:$0xff]   ;;  %v19460_v12 = vld [vmem:[%s25802_s1 + $0x16c] ss:$8 sps:$4 sm:$0xff]  }
 0x731   : > { %v23448_v28 = vsel %vm6210_vm10, %v9415_v33, 0  ;;  %9862 = vmatprep.subr.bf16.mxu0 %v23100_v24  ;;  %v19382_v24 = vld [vmem:[%s25789_s4 + $0x10] ss:$8 sps:$4 sm:$0xff]   ;;  %v19461_v33 = vld [vmem:[%s25802_s1 + $0x60] ss:$8 sps:$4 sm:$0xff]  }
 0x732   : > { %9681 = vmatpush1.bf16.msra.mxu1 %v23448_v28 }
 0x733   : > { %9572 = vmatmul.mubr.bf16.vlgmr.msra.gmra.mrb[180].mxu0 %v19377_v2  ;;  %9975 = vmatprep.subr.bf16.mxu1 %v25776_v4 }
 0x734   : > { %9863 = vmatpush1.bf16.msra.mxu0 %v23097_v59  ;;  %16425 = vmatprep.mubr.msk.bf16.mxu0 %vm9504_vm12, %v19380_v29  ;;  %v19383_v59 = vld [vmem:[%s25789_s4 + $0x24] ss:$8 sps:$4 sm:$0xff]  }
 0x735   : > { %9685 = vmatmul.mubr.bf16.vlgmr.msra.gmra.mrb[104].mxu1 %v19377_v2  ;;  %9864 = vmatprep.subr.bf16.mxu0 %v23124_v8  ;;  %v19388_v8 = vld [vmem:[%s25789_s4 + $0x30] ss:$8 sps:$4 sm:$0xff]   ;;  %v19463_v2 = vld [vmem:[%s25802_s1 + $0x64] ss:$8 sps:$4 sm:$0xff]  }
 0x736   : > { %9976 = vmatpush1.bf16.msra.mxu1 %v23106_v58  ;;  %16433 = vmatprep.mubr.msk.bf16.mxu1 %vm9504_vm12, %v19380_v29  ;;  %v19385_v58 = vld [vmem:[%s25789_s4 + $0x20] ss:$8 sps:$4 sm:$0xff]  }
 0x737   : > { %9977 = vmatprep.subr.bf16.mxu1 %v25776_v4  ;;  %v19464_v29 = vld [vmem:[%s25802_s1 + $0x178] ss:$8 sps:$4 sm:$0xff]  }
 0x738   : > { %9865 = vmatpush1.bf16.msra.mxu0 %v23121_v22  ;;  %v19386_v22 = vld [vmem:[%s25789_s4 + $0x34] ss:$8 sps:$4 sm:$0xff]  }
 0x739   : > { %9866 = vmatprep.subr.bf16.mxu0 %v23148_v21  ;;  %v19391_v21 = vld [vmem:[%s25789_s4 + $0x40] ss:$8 sps:$4 sm:$0xff]  }
 0x73a   : > { %9978 = vmatpush1.bf16.msra.mxu1 %v23130_v57  ;;  %v19389_v57 = vld [vmem:[%s25789_s4 + $0x44] ss:$8 sps:$4 sm:$0xff]  }
 0x73b   : > { %9582 = vmatmul.mubr.bf16.gmra.mrb[184].mxu0 %v19382_v24  ;;  %9979 = vmatprep.subr.bf16.mxu1 %v25776_v4 }
 0x73c   : > { %9867 = vmatpush1.bf16.msra.mxu0 %v23145_v30  ;;  %16426 = vmatprep.mubr.msk.bf16.mxu0 %vm9504_vm12, %v19383_v59  ;;  %v25796_v30 = vld [vmem:[#allocation19_spill] sm:$0xff] }
 0x73d   : > { %9693 = vmatmul.mubr.bf16.gmra.mrb[108].mxu1 %v19382_v24  ;;  %9868 = vmatprep.subr.bf16.mxu0 %v23171_v48  ;;  %v19394_v48 = vld [vmem:[%s25789_s4 + $0x50] ss:$8 sps:$4 sm:$0xff]   ;;  %v19469_v24 = vld [vmem:[%s25802_s1 + $0x74] ss:$8 sps:$4 sm:$0xff]  }
 0x73e   : > { %9980 = vmatpush1.bf16.msra.mxu1 %v23154_v5  ;;  %16434 = vmatprep.mubr.msk.bf16.mxu1 %vm9504_vm12, %v19383_v59  ;;  %v19392_v5 = vld [vmem:[%s25789_s4 + $0x54] ss:$8 sps:$4 sm:$0xff]   ;;  %v19467_v59 = vld [vmem:[%s25802_s1 + $0x70] ss:$8 sps:$4 sm:$0xff]  }
 0x73f   : > { %9981 = vmatprep.subr.bf16.mxu1 %v25776_v4 }
 0x740   : > { %9869 = vmatpush1.bf16.msra.mxu0 %v23168_v25  ;;  %v25797_v25 = vld [vmem:[#allocation20_spill] sm:$0xff] }
 0x741   : > { %9870 = vmatprep.subr.bf16.mxu0 %v23195_v37  ;;  %v25799_v37 = vld [vmem:[#allocation15_spill] sm:$0xff] }
 0x742   : > { %9982 = vmatpush1.bf16.msra.mxu1 %v23178_v13  ;;  %v19395_v13 = vld [vmem:[%s25789_s4 + $0x64] ss:$8 sps:$4 sm:$0xff]  }
 0x743   : > { %9592 = vmatmul.mubr.bf16.gmra.mrb[188].mxu0 %v19385_v58  ;;  %9983 = vmatprep.subr.bf16.mxu1 %v25776_v4 }
 0x744   : > { %9871 = vmatpush1.bf16.msra.mxu0 %v23192_v31  ;;  %16427 = vmatprep.mubr.msk.bf16.mxu0 %vm9504_vm12, %v19386_v22  ;;  %v25798_v31 = vld [vmem:[#allocation21_spill] sm:$0xff] }
 0x745   : > { %9701 = vmatmul.mubr.bf16.gmra.mrb[112].mxu1 %v19385_v58  ;;  %9872 = vmatprep.subr.bf16.mxu0 %v23220_v17  ;;  %v25800_v17 = vld [vmem:[#allocation22_spill] sm:$0xff]  ;;  %v19472_v58 = vld [vmem:[%s25802_s1 + $0x18c] ss:$8 sps:$4 sm:$0xff]  }
 0x746   : > { %9984 = vmatpush1.bf16.msra.mxu1 %v23202_v34  ;;  %16435 = vmatprep.mubr.msk.bf16.mxu1 %vm9504_vm12, %v19386_v22  ;;  %v19397_v34 = vld [vmem:[%s25789_s4 + $0x60] ss:$8 sps:$4 sm:$0xff]  }
 0x747   : > { %9985 = vmatprep.subr.bf16.mxu1 %v25776_v4  ;;  %v19470_v22 = vld [vmem:[%s25802_s1 + $0x188] ss:$8 sps:$4 sm:$0xff]  }
 0x748   : > { %9873 = vmatpush1.bf16.msra.mxu0 %v23218_v47  ;;  %v19398_v47 = vld [vmem:[%s25789_s4 + $0x74] ss:$8 sps:$4 sm:$0xff]  }
 0x749   : > { %9874 = vmatprep.subr.bf16.mxu0 %v23244_v50  ;;  %v19403_v50 = vld [vmem:[%s25789_s4 + $0x84] ss:$8 sps:$4 sm:$0xff]  }
 0x74a   : > { %9986 = vmatpush1.bf16.msra.mxu1 %v23222_v1  ;;  %v25801_v1 = vld [vmem:[#allocation23_spill] sm:$0xff] }
 0x74b   : > { %9602 = vmatmul.mubr.bf16.gmra.mrb[192].mxu0 %v19388_v8  ;;  %9987 = vmatprep.subr.bf16.mxu1 %v25776_v4 }
 0x74c   : > { %9875 = vmatpush1.bf16.msra.mxu0 %v23240_v52  ;;  %16428 = vmatprep.mubr.msk.bf16.mxu0 %vm9504_vm12, %v19389_v57  ;;  %v19400_v52 = vld [vmem:[%s25789_s4 + $0x70] ss:$8 sps:$4 sm:$0xff]  }
 0x74d   : > { %9709 = vmatmul.mubr.bf16.gmra.mrb[116].mxu1 %v19388_v8  ;;  %9876 = vmatprep.subr.bf16.mxu0 %v23268_v56  ;;  %v19404_v56 = vld [vmem:[%s25789_s4 + $0x94] ss:$8 sps:$4 sm:$0xff]   ;;  %v19473_v8 = vld [vmem:[%s25802_s1 + $0x80] ss:$8 sps:$4 sm:$0xff]  }
 0x74e   : > { %9988 = vmatpush1.bf16.msra.mxu1 %v25796_v30  ;;  %16436 = vmatprep.mubr.msk.bf16.mxu1 %vm9504_vm12, %v19389_v57  ;;  %v19475_v57 = vld [vmem:[%s25802_s1 + $0x84] ss:$8 sps:$4 sm:$0xff]   ;;  %v19476_v30 = vld [vmem:[%s25802_s1 + $0x198] ss:$8 sps:$4 sm:$0xff]  }
 0x74f   : > { %9989 = vmatprep.subr.bf16.mxu1 %v25776_v4 }
 0x750   : > { %9877 = vmatpush1.bf16.msra.mxu0 %v23266_v36  ;;  %v19401_v36 = vld [vmem:[%s25789_s4 + $0x80] ss:$8 sps:$4 sm:$0xff]  }
 0x751   : > { %9878 = vmatprep.subr.bf16.mxu0 %v23292_v16  ;;  %v19409_v16 = vld [vmem:[%s25789_s4 + $0xa0] ss:$8 sps:$4 sm:$0xff]  }
 0x752   : > { %9990 = vmatpush1.bf16.msra.mxu1 %v23270_v23  ;;  %v19406_v23 = vld [vmem:[%s25789_s4 + $0x90] ss:$8 sps:$4 sm:$0xff]  }
 0x753   : > { %9612 = vmatmul.mubr.bf16.gmra.mrb[196].mxu0 %v19391_v21  ;;  %9991 = vmatprep.subr.bf16.mxu1 %v25776_v4 }
 0x754   : > { %9879 = vmatpush1.bf16.msra.mxu0 %v23287_v60  ;;  %16429 = vmatprep.mubr.msk.bf16.mxu0 %vm9504_vm12, %v19392_v5  ;;  %v19407_v60 = vld [vmem:[%s25789_s4 + $0xa4] ss:$8 sps:$4 sm:$0xff]  }
 0x755   : > { %9717 = vmatmul.mubr.bf16.gmra.mrb[120].mxu1 %v19391_v21  ;;  %9880 = vmatprep.subr.bf16.mxu0 %v23316_v14  ;;  %v19412_v14 = vld [vmem:[%s25789_s4 + $0xb0] ss:$8 sps:$4 sm:$0xff]   ;;  %v19478_v21 = vld [vmem:[%s25802_s1 + $0x19c] ss:$8 sps:$4 sm:$0xff]  }
 0x756   : > { %9992 = vmatpush1.bf16.msra.mxu1 %v25797_v25  ;;  %16437 = vmatprep.mubr.msk.bf16.mxu1 %vm9504_vm12, %v19392_v5  ;;  %v19481_v5 = vld [vmem:[%s25802_s1 + $0x94] ss:$8 sps:$4 sm:$0xff]   ;;  %v19479_v25 = vld [vmem:[%s25802_s1 + $0x90] ss:$8 sps:$4 sm:$0xff]  }
 0x757   : > { %9993 = vmatprep.subr.bf16.mxu1 %v25776_v4 }
 0x758   : > { %9881 = vmatpush1.bf16.msra.mxu0 %v23312_v49  ;;  %v19410_v49 = vld [vmem:[%s25789_s4 + $0xb4] ss:$8 sps:$4 sm:$0xff]  }
 0x759   : > { %9882 = vmatprep.subr.bf16.mxu0 %v23340_v7  ;;  %v19415_v7 = vld [vmem:[%s25789_s4 + $0xc0] ss:$8 sps:$4 sm:$0xff]  }
 0x75a   : > { %9994 = vmatpush1.bf16.msra.mxu1 %v25798_v31  ;;  %v19485_v31 = vld [vmem:[%s25802_s1 + $0xa0] ss:$8 sps:$4 sm:$0xff]  }
 0x75b   : > { %9622 = vmatmul.mubr.bf16.gmra.mrb[200].mxu0 %v19394_v48  ;;  %9995 = vmatprep.subr.bf16.mxu1 %v25776_v4 }
 0x75c   : > { %9883 = vmatpush1.bf16.msra.mxu0 %v23335_v44  ;;  %16430 = vmatprep.mubr.msk.bf16.mxu0 %vm9504_vm12, %v19395_v13  ;;  %v19413_v44 = vld [vmem:[%s25789_s4 + $0xc4] ss:$8 sps:$4 sm:$0xff]  }
 0x75d   : > { %9725 = vmatmul.mubr.bf16.gmra.mrb[124].mxu1 %v19394_v48  ;;  %9884 = vmatprep.subr.bf16.mxu0 %v23364_v9  ;;  %v19427_v9 = vld [vmem:[%s25802_s1 + $0x4] ss:$8 sps:$4 sm:$0xff]  }
 0x75e   : > { %9996 = vmatpush1.bf16.msra.mxu1 %v25799_v37  ;;  %16438 = vmatprep.mubr.msk.bf16.mxu1 %vm9504_vm12, %v19395_v13  ;;  %v19484_v48 = vld [vmem:[%s25802_s1 + $0x1ac] ss:$8 sps:$4 sm:$0xff]   ;;  %v19482_v13 = vld [vmem:[%s25802_s1 + $0x1a8] ss:$8 sps:$4 sm:$0xff]  }
 0x75f   : > { %9997 = vmatprep.subr.bf16.mxu1 %v25776_v4  ;;  %v19487_v37 = vld [vmem:[%s25802_s1 + $0xa4] ss:$8 sps:$4 sm:$0xff]  }
 0x760   : > { %9885 = vmatpush1.bf16.msra.mxu0 %v23360_v38  ;;  %v19425_v38 = vld [vmem:[%s25802_s1] ss:$8 sps:$4 sm:$0xff]  }
 0x761   : > { %9886 = vmatprep.subr.bf16.mxu0 %v23388_v39  ;;  %v19416_v39 = vld [vmem:[%s25789_s4 + $0xd4] ss:$8 sps:$4 sm:$0xff]  }
 0x762   : > { %9998 = vmatpush1.bf16.msra.mxu1 %v25800_v17  ;;  %v19493_v17 = vld [vmem:[%s25802_s1 + $0xb4] ss:$8 sps:$4 sm:$0xff]  }
 0x763   : > { %9632 = vmatmul.mubr.bf16.gmra.mrb[204].mxu0 %v19397_v34  ;;  %9999 = vmatprep.subr.bf16.mxu1 %v25776_v4 }
 0x764   : > { %9887 = vmatpush1.bf16.msra.mxu0 %v23383_v35  ;;  %16431 = vmatprep.mubr.msk.bf16.mxu0 %vm9504_vm12, %v19398_v47  ;;  %v19428_v35 = vld [vmem:[%s25802_s1 + $0x118] ss:$8 sps:$4 sm:$0xff]  }
 0x765   : > { %9733 = vmatmul.mubr.bf16.gmra.mrb[128].mxu1 %v19397_v34  ;;  %9888 = vmatprep.subr.bf16.mxu0 %v23412_v27  ;;  %v19436_v27 = vld [vmem:[%s25802_s1 + $0x12c] ss:$8 sps:$4 sm:$0xff]   ;;  %v19488_v34 = vld [vmem:[%s25802_s1 + $0x1b8] ss:$8 sps:$4 sm:$0xff]  }
 0x766   : > { %10000 = vmatpush1.bf16.msra.mxu1 %v25801_v1  ;;  %16439 = vmatprep.mubr.msk.bf16.mxu1 %vm9504_vm12, %v19398_v47  ;;  %v19490_v47 = vld [vmem:[%s25802_s1 + $0x1bc] ss:$8 sps:$4 sm:$0xff]   ;;  %v19491_v1 = vld [vmem:[%s25802_s1 + $0xb0] ss:$8 sps:$4 sm:$0xff]  }
 0x767   : > { %10001 = vmatprep.subr.bf16.mxu1 %v25776_v4 }
 0x768   : > { %9889 = vmatpush1.bf16.msra.mxu0 %v23408_v41  ;;  %v19430_v41 = vld [vmem:[%s25802_s1 + $0x11c] ss:$8 sps:$4 sm:$0xff]  }
 0x769   : > { %16472 = vmatprep.subr.msk.bf16.mxu0 %vm6210_vm10, %v23433_v40  ;;  %v19458_v40 = vld [vmem:[%s25802_s1 + $0x168] ss:$8 sps:$4 sm:$0xff]  }
 0x76a   : > { %10002 = vmatpush1.bf16.msra.mxu1 %v23414_v15  ;;  %v19434_v15 = vld [vmem:[%s25802_s1 + $0x128] ss:$8 sps:$4 sm:$0xff]  }
 0x76b   : > { %9642 = vmatmul.mubr.bf16.gmra.mrb[208].mxu0 %v19400_v52  ;;  %10003 = vmatprep.subr.bf16.mxu1 %v25776_v4 }
 0x76c   : > { %9891 = vmatpush1.bf16.msra.mxu0 %v23436_v18  ;;  %16473 = vmatprep.mubr.msk.bf16.mxu0 %vm9504_vm12, %v19403_v50  ;;  %v19424_v18 = vld [vmem:[%s25789_s4 + $0xf0] ss:$8 sps:$4 sm:$0xff]  }
 0x76d   : > { %9741 = vmatmul.mubr.bf16.gmra.mrb[132].mxu1 %v19400_v52  ;;  %10384 = vmatprep.subr.bf16.mxu0 %v19427_v9  ;;  %v19496_v52 = vld [vmem:[%s25802_s1 + $0x1cc] ss:$8 sps:$4 sm:$0xff]   ;;  %v19512_v9 = vld [vmem:[%s25802_s1 + $0x1f8] ss:$8 sps:$4 sm:$0xff]  }
 0x76e   : > { %10004 = vmatpush1.bf16.msra.mxu1 %v23448_v28  ;;  %16481 = vmatprep.mubr.msk.bf16.mxu1 %vm9504_vm12, %v19403_v50  ;;  %v19466_v28 = vld [vmem:[%s25802_s1 + $0x17c] ss:$8 sps:$4 sm:$0xff]   ;;  %v19494_v50 = vld [vmem:[%s25802_s1 + $0x1c8] ss:$8 sps:$4 sm:$0xff]  }
 0x76f   : > { %10827 = vmatprep.subr.bf16.mxu1 %v19430_v41  ;;  %v19517_v41 = vld [vmem:[%s25802_s1 + $0xf4] ss:$8 sps:$4 sm:$0xff]  }
 0x773   : > { %9895 = vmatmul.mubr.bf16.vlgmr.msra.gmra.mrb[212].mxu0 %v19401_v36 }
 0x774   : > { %16474 = vmatprep.mubr.msk.bf16.mxu0 %vm9504_vm12, %v19404_v56  ;;  %10385 = vmatpush1.bf16.msra.mxu0 %v19425_v38  ;;  %v19511_v38 = vld [vmem:[%s25802_s1 + $0xe4] ss:$8 sps:$4 sm:$0xff]  }
 0x775   : > { %10008 = vmatmul.mubr.bf16.vlgmr.msra.gmra.mrb[136].mxu1 %v19401_v36  ;;  %10386 = vmatprep.subr.bf16.mxu0 %v19433_v32  ;;  %v19497_v36 = vld [vmem:[%s25802_s1 + $0xc0] ss:$8 sps:$4 sm:$0xff]  }
 0x776   : > { %16482 = vmatprep.mubr.msk.bf16.mxu1 %vm9504_vm12, %v19404_v56  ;;  %10828 = vmatpush1.bf16.msra.mxu1 %v19428_v35  ;;  %v19499_v56 = vld [vmem:[%s25802_s1 + $0xc4] ss:$8 sps:$4 sm:$0xff]   ;;  %v19518_v32 = vld [vmem:[%s25802_s1 + $0x208] ss:$8 sps:$4 sm:$0xff]  }
 0x777   : > { %10829 = vmatprep.subr.bf16.mxu1 %v19436_v27  ;;  %v19514_v35 = vld [vmem:[%s25802_s1 + $0x1fc] ss:$8 sps:$4 sm:$0xff]  }
 0x778   : > { %10387 = vmatpush1.bf16.msra.mxu0 %v19431_v51  ;;  %v19520_v51 = vld [vmem:[%s25802_s1 + $0x20c] ss:$8 sps:$4 sm:$0xff]  }
 0x779   : > { %10388 = vmatprep.subr.bf16.mxu0 %v19439_v45  ;;  %v19523_v27 = vld [vmem:[%s25802_s1 + $0x104] ss:$8 sps:$4 sm:$0xff]  }
 0x77a   : > { %10830 = vmatpush1.bf16.msra.mxu1 %v19434_v15  ;;  %v19526_v15 = vld [vmem:[%s25802_s1 + $0x21c] ss:$8 sps:$4 sm:$0xff]  }
 0x77b   : > { %9905 = vmatmul.mubr.bf16.gmra.mrb[216].mxu0 %v19406_v23  ;;  %10831 = vmatprep.subr.bf16.mxu1 %v19442_v26 }
 0x77c   : > { %16475 = vmatprep.mubr.msk.bf16.mxu0 %vm9504_vm12, %v19407_v60  ;;  %10389 = vmatpush1.bf16.msra.mxu0 %v19437_v46 }
 0x77d   : > { %10016 = vmatmul.mubr.bf16.gmra.mrb[140].mxu1 %v19406_v23  ;;  %10390 = vmatprep.subr.bf16.mxu0 %v19445_v43  ;;  %v19500_v23 = vld [vmem:[%s25802_s1 + $0x1d8] ss:$8 sps:$4 sm:$0xff]  }
 0x77e   : > { %16483 = vmatprep.mubr.msk.bf16.mxu1 %vm9504_vm12, %v19407_v60  ;;  %10832 = vmatpush1.bf16.msra.mxu1 %v19440_v6  ;;  %v19502_v60 = vld [vmem:[%s25802_s1 + $0x1dc] ss:$8 sps:$4 sm:$0xff]  }
 0x77f   : > { %10833 = vmatprep.subr.bf16.mxu1 %v19448_v61 }
 0x780   : > { %10391 = vmatpush1.bf16.msra.mxu0 %v19443_v55 }
 0x781   : > { %10392 = vmatprep.subr.bf16.mxu0 %v19451_v0 }
 0x782   : > { %10834 = vmatpush1.bf16.msra.mxu1 %v19446_v3 }
 0x783   : > { %9915 = vmatmul.mubr.bf16.gmra.mrb[220].mxu0 %v19409_v16  ;;  %10835 = vmatprep.subr.bf16.mxu1 %v19454_v62 }
 0x784   : > { %16476 = vmatprep.mubr.msk.bf16.mxu0 %vm9504_vm12, %v19410_v49  ;;  %10393 = vmatpush1.bf16.msra.mxu0 %v19449_v42 }
 0x785   : > { %10024 = vmatmul.mubr.bf16.gmra.mrb[144].mxu1 %v19409_v16  ;;  %10394 = vmatprep.subr.bf16.mxu0 %v19457_v53  ;;  %v19505_v16 = vld [vmem:[%s25802_s1 + $0xd4] ss:$8 sps:$4 sm:$0xff]  }
 0x786   : > { %16484 = vmatprep.mubr.msk.bf16.mxu1 %vm9504_vm12, %v19410_v49  ;;  %10836 = vmatpush1.bf16.msra.mxu1 %v19452_v54  ;;  %v19503_v49 = vld [vmem:[%s25802_s1 + $0xd0] ss:$8 sps:$4 sm:$0xff]  }
 0x787   : > { %10837 = vmatprep.subr.bf16.mxu1 %v19460_v12 }
 0x788   : > { %10395 = vmatpush1.bf16.msra.mxu0 %v19455_v11 }
 0x789   : > { %10396 = vmatprep.subr.bf16.mxu0 %v19463_v2 }
 0x78a   : > { %10838 = vmatpush1.bf16.msra.mxu1 %v19458_v40 }
 0x78b   : > { %9925 = vmatmul.mubr.bf16.gmra.mrb[224].mxu0 %v19412_v14  ;;  %10839 = vmatprep.subr.bf16.mxu1 %v19466_v28 }
 0x78c   : > { %16477 = vmatprep.mubr.msk.bf16.mxu0 %vm9504_vm12, %v19413_v44  ;;  %10397 = vmatpush1.bf16.msra.mxu0 %v19461_v33 }
 0x78d   : > { %10032 = vmatmul.mubr.bf16.gmra.mrb[148].mxu1 %v19412_v14  ;;  %10398 = vmatprep.subr.bf16.mxu0 %v19469_v24  ;;  %v19508_v14 = vld [vmem:[%s25802_s1 + $0x1ec] ss:$8 sps:$4 sm:$0xff]  }
 0x78e   : > { %16485 = vmatprep.mubr.msk.bf16.mxu1 %vm9504_vm12, %v19413_v44  ;;  %10840 = vmatpush1.bf16.msra.mxu1 %v19464_v29  ;;  %v19506_v44 = vld [vmem:[%s25802_s1 + $0x1e8] ss:$8 sps:$4 sm:$0xff]  }
 0x78f   : > { %10841 = vmatprep.subr.bf16.mxu1 %v19472_v58 }
 0x790   : > { %10399 = vmatpush1.bf16.msra.mxu0 %v19467_v59 }
 0x791   : > { %10400 = vmatprep.subr.bf16.mxu0 %v19475_v57 }
 0x792   : > { %10842 = vmatpush1.bf16.msra.mxu1 %v19470_v22 }
 0x793   : > { %9935 = vmatmul.mubr.bf16.gmra.mrb[228].mxu0 %v19415_v7  ;;  %10843 = vmatprep.subr.bf16.mxu1 %v19478_v21 }
 0x794   : > { %16478 = vmatprep.mubr.msk.bf16.mxu0 %vm9504_vm12, %v19416_v39  ;;  %10401 = vmatpush1.bf16.msra.mxu0 %v19473_v8 }
 0x795   : > { %10040 = vmatmul.mubr.bf16.gmra.mrb[152].mxu1 %v19415_v7  ;;  %10402 = vmatprep.subr.bf16.mxu0 %v19481_v5  ;;  %v19509_v7 = vld [vmem:[%s25802_s1 + $0xe0] ss:$8 sps:$4 sm:$0xff]  }
 0x796   : > { %16486 = vmatprep.mubr.msk.bf16.mxu1 %vm9504_vm12, %v19416_v39  ;;  %10844 = vmatpush1.bf16.msra.mxu1 %v19476_v30  ;;  %v19515_v39 = vld [vmem:[%s25802_s1 + $0xf0] ss:$8 sps:$4 sm:$0xff]  }
 0x797   : > { %10845 = vmatprep.subr.bf16.mxu1 %v19484_v48 }
 0x798   : > { %10403 = vmatpush1.bf16.msra.mxu0 %v19479_v25 }
 0x799   : > { %10404 = vmatprep.subr.bf16.mxu0 %v19487_v37 }
 0x79a   : > { %10846 = vmatpush1.bf16.msra.mxu1 %v19482_v13 }
 0x79b   : > { %9945 = vmatmul.mubr.bf16.gmra.mrb[232].mxu0 %v19418_v19  ;;  %10847 = vmatprep.subr.bf16.mxu1 %v19490_v47 }
 0x79c   : > { %16479 = vmatprep.mubr.msk.bf16.mxu0 %vm9504_vm12, %v19419_v20  ;;  %10405 = vmatpush1.bf16.msra.mxu0 %v19485_v31 }
 0x79d   : > { %10048 = vmatmul.mubr.bf16.gmra.mrb[156].mxu1 %v19418_v19  ;;  %10406 = vmatprep.subr.bf16.mxu0 %v19493_v17 }
 0x79e   : > { %16487 = vmatprep.mubr.msk.bf16.mxu1 %vm9504_vm12, %v19419_v20  ;;  %10848 = vmatpush1.bf16.msra.mxu1 %v19488_v34 }
 0x79f   : > { %10849 = vmatprep.subr.bf16.mxu1 %v19496_v52 }
 0x7a0   : > { %10407 = vmatpush1.bf16.msra.mxu0 %v19491_v1 }
 0x7a1   : > { %10408 = vmatprep.subr.bf16.mxu0 %v19499_v56 }
 0x7a2   : > { %10850 = vmatpush1.bf16.msra.mxu1 %v19494_v50 }
 0x7a3   : > { %9955 = vmatmul.mubr.bf16.gmra.mrb[236].mxu0 %v19421_v10  ;;  %10851 = vmatprep.subr.bf16.mxu1 %v19502_v60 }
 0x7a4   : > { %16480 = vmatprep.mubr.msk.bf16.mxu0 %vm9504_vm12, %v19422_v63  ;;  %10409 = vmatpush1.bf16.msra.mxu0 %v19497_v36 }
 0x7a5   : > { %10056 = vmatmul.mubr.bf16.gmra.mrb[160].mxu1 %v19421_v10  ;;  %10410 = vmatprep.subr.bf16.mxu0 %v19505_v16 }
 0x7a6   : > { %16488 = vmatprep.mubr.msk.bf16.mxu1 %vm9504_vm12, %v19422_v63  ;;  %10852 = vmatpush1.bf16.msra.mxu1 %v19500_v23 }
 0x7a7   : > { %10853 = vmatprep.subr.bf16.mxu1 %v19508_v14 }
 0x7a8   : > { %10411 = vmatpush1.bf16.msra.mxu0 %v19503_v49 }
 0x7a9   : > { %10412 = vmatprep.subr.bf16.mxu0 %v19511_v38 }
 0x7aa   : > { %10854 = vmatpush1.bf16.msra.mxu1 %v19506_v44 }
 0x7ab   : > { %9965 = vmatmul.mubr.bf16.gmra.mrb[240].mxu0 %v19424_v18  ;;  %10855 = vmatprep.subr.bf16.mxu1 %v19514_v35 }
 0x7ac   : > { %10413 = vmatpush1.bf16.msra.mxu0 %v19509_v7 }
 0x7ad   : > { %10064 = vmatmul.mubr.bf16.gmra.mrb[164].mxu1 %v19424_v18  ;;  %10414 = vmatprep.subr.bf16.mxu0 %v19517_v41 }
 0x7ae   : > { %10856 = vmatpush1.bf16.msra.mxu1 %v19512_v9 }
 0x7af   : > { %10857 = vmatprep.subr.bf16.mxu1 %v19520_v51 }
 0x7b0   : > { %10415 = vmatpush1.bf16.msra.mxu0 %v19515_v39 }
 0x7b1   : > { %10497 = vmatprep.subr.bf16.mxu0 %v19523_v27 }
 0x7b2   : > { %10858 = vmatpush1.bf16.msra.mxu1 %v19518_v32 }
 0x7b3   : > { %10940 = vmatprep.subr.bf16.mxu1 %v19526_v15 }
 0x806   : > { %v23827_v19 = vpop.f32.mrb[180].mxu0 }
 0x807   : > { %v23829_v46 = vpop.f32.mrb[181].mxu0 }
 0x808   : > { %v23831_v45 = vpop.f32.mrb[182].mxu0  ;;  %v23833_v6 = vpop.f32.mrb[104].mxu1 }
 0x809   : > { %v23835_v20 = vpop.f32.mrb[183].mxu0  ;;  %v9688_v26 = vpop.f32.mrb[105].mxu1 }
 0x80a   : > { %v23837_v43 = vpop.f32.mrb[106].mxu1 }
 0x80b   : > { %v9691_v55 = vpop.f32.mrb[107].mxu1 }
 0x80e   : > { %v23839_v61 = vpop.f32.mrb[184].mxu0 }
 0x80f   : > { %v23841_v3 = vpop.f32.mrb[185].mxu0 }
 0x810   : > { %v23843_v10 = vpop.f32.mrb[186].mxu0  ;;  %v23845_v42 = vpop.f32.mrb[108].mxu1 }
 0x811   : > { %v23847_v0 = vpop.f32.mrb[187].mxu0  ;;  %v9696_v54 = vpop.f32.mrb[109].mxu1 }
 0x812   : > { %v23849_v63 = vpop.f32.mrb[110].mxu1 }
 0x813   : > { %v9699_v62 = vpop.f32.mrb[111].mxu1 }
 0x816   : > { %v23851_v53 = vpop.f32.mrb[188].mxu0 }
 0x817   : > { %v23853_v11 = vpop.f32.mrb[189].mxu0 }
 0x818   : > { %v23855_v12 = vpop.f32.mrb[190].mxu0  ;;  %v23857_v40 = vpop.f32.mrb[112].mxu1 }
 0x819   : > { %v23859_v18 = vpop.f32.mrb[191].mxu0  ;;  %v9704_v33 = vpop.f32.mrb[113].mxu1 }
 0x81a   : > { %v23861_v2 = vpop.f32.mrb[114].mxu1 }
 0x81b   : > { %v9707_v29 = vpop.f32.mrb[115].mxu1 }
 0x81e   : > { %v23863_v28 = vpop.f32.mrb[192].mxu0 }
 0x81f   : > { %v23865_v24 = vpop.f32.mrb[193].mxu0 }
 0x820   : > { %v23867_v59 = vpop.f32.mrb[194].mxu0  ;;  %v23869_v58 = vpop.f32.mrb[116].mxu1 }
 0x821   : > { %v23871_v22 = vpop.f32.mrb[195].mxu0  ;;  %v9712_v8 = vpop.f32.mrb[117].mxu1 }
 0x822   : > { %v23873_v57 = vpop.f32.mrb[118].mxu1 }
 0x823   : > { %v9715_v30 = vpop.f32.mrb[119].mxu1 }
 0x826   : > { %v23875_v21 = vpop.f32.mrb[196].mxu0 }
 0x827   : > { %v23877_v5 = vpop.f32.mrb[197].mxu0 }
 0x828   : > { %v23879_v25 = vpop.f32.mrb[198].mxu0  ;;  %v23881_v48 = vpop.f32.mrb[120].mxu1 }
 0x829   : > { %v23883_v13 = vpop.f32.mrb[199].mxu0  ;;  %v9720_v31 = vpop.f32.mrb[121].mxu1 }
 0x82a   : > { %v23885_v37 = vpop.f32.mrb[122].mxu1 }
 0x82b   : > { %v9723_v34 = vpop.f32.mrb[123].mxu1 }
 0x82e   : > { %v23887_v47 = vpop.f32.mrb[200].mxu0 }
 0x82f   : > { %v23889_v17 = vpop.f32.mrb[201].mxu0 }
 0x830   : > { %v23891_v1 = vpop.f32.mrb[202].mxu0  ;;  %v23893_v52 = vpop.f32.mrb[124].mxu1 }
 0x831   : > { %v23895_v50 = vpop.f32.mrb[203].mxu0  ;;  %v9728_v36 = vpop.f32.mrb[125].mxu1 }
 0x832   : > { %v23897_v56 = vpop.f32.mrb[126].mxu1 }
 0x833   : > { %v9731_v23 = vpop.f32.mrb[127].mxu1 }
 0x834   : > { %v10178_v23 = vld [vmem:[%s25802_s1 + $0x110] sm:$0xff] }
 0x836   : > { %v23899_v60 = vpop.f32.mrb[204].mxu0 }
 0x837   : > { %v23901_v16 = vpop.f32.mrb[205].mxu0 }
 0x838   : > { %v23903_v49 = vpop.f32.mrb[206].mxu0  ;;  %v23905_v14 = vpop.f32.mrb[128].mxu1 }
 0x839   : > { %v23907_v44 = vpop.f32.mrb[207].mxu0  ;;  %v9736_v7 = vpop.f32.mrb[129].mxu1 }
 0x83a   : > { %v23909_v38 = vpop.f32.mrb[130].mxu1 }
 0x83b   : > { %v9739_v9 = vpop.f32.mrb[131].mxu1 }
 0x83e   : > { %v23911_v35 = vpop.f32.mrb[208].mxu0 }
 0x83f   : > { %v23913_v39 = vpop.f32.mrb[209].mxu0 }
 0x840   : > { %v23915_v41 = vpop.f32.mrb[210].mxu0  ;;  %v23917_v32 = vpop.f32.mrb[132].mxu1 }
 0x841   : > { %v23919_v51 = vpop.f32.mrb[211].mxu0  ;;  %v9744_v27 = vpop.f32.mrb[133].mxu1 }
 0x842   : > { %v23921_v15 = vpop.f32.mrb[134].mxu1 }
 0x843   : > { %v9747_v26 = vpop.f32.mrb[135].mxu1 }
 0x846   : > { %v9896_v55 = vpop.f32.mrb[212].mxu0 }
 0x847   : > { %v10072_v54 = vmax.f32 %v23827_v19, %v9896_v55  ;;  %v9898_v62 = vpop.f32.mrb[213].mxu0  ;;  %v16568_v19 = vld [vmem:[%s25802_s1 + $0x228] sm:$0xff]  ;;  %v19524_v55 = vld [vmem:[%s25802_s1 + $0x218] ss:$8 sps:$4 sm:$0xff]  }
 0x848   : > { %v10073_v33 = vmax.f32 %v23829_v46, %v9898_v62  ;;  %v10009_v29 = vpop.f32.mrb[136].mxu1  ;;  %v9900_v8 = vpop.f32.mrb[214].mxu0  ;;  %v16524_v62 = vcombine.high %v10178_v23, %v10178_v23 }
 0x849   : > { %v10074_v30 = vmax.f32 %v23833_v6, %v10009_v29  ;;  %v10075_v31 = vmax.f32 %v23831_v45, %v9900_v8  ;;  %v10011_v34 = vpop.f32.mrb[137].mxu1  ;;  %v9902_v36 = vpop.f32.mrb[215].mxu0  ;;  %v19521_v45 = vld [vmem:[%s25802_s1 + $0x100] ss:$8 sps:$4 sm:$0xff]   ;;  %v16604_v29 = vcombine.high %v16568_v19, %v16568_v19  ;;  %v16523_v8 = vcombine.low %v10178_v23, %v10178_v23  ;;  %s19833_s1 = scalar_lea.vmem %s19832_s0, 256 }
 0x84a   : > { %v10076_v7 = vmax.f32 %v23835_v20, %v9902_v36  ;;  %v10012_v9 = vpop.f32.mrb[138].mxu1  ;;  %v16603_v34 = vcombine.low %v16568_v19, %v16568_v19  ;;  %p19835_p1 = scmp.lt.s32.totalorder %s19833_s1, %s19827_s27 }
 0x84b   : > { %v10120_v46 = vpack.c.bf16 %v10075_v31, %v10072_v54  ;;  %v10077_v27 = vmax.f32 %v23837_v43, %v10012_v9  ;;  %v10014_v26 = vpop.f32.mrb[139].mxu1 }
 0x84c   : > { %v10121_v6 = vpack.c.bf16 %v10076_v7, %v10073_v33  ;;  %p19836_p2 = por %p19835_p1, %p19834_p0 }
 0x84d   : > { %v23941_v20 = vpack.c.bf16 %v10077_v27, %v10074_v30 }
 0x84e   : > { %v9906_v36 = vpop.f32.mrb[216].mxu0  ;;  %10416 = vmatprep.mubr.bf16.mxu0 %v10121_v6  ;;  %10859 = vmatprep.mubr.bf16.mxu1 %v10121_v6  ;;  %p19837_p3 = pnand %p19836_p2, %p19830_p13 }
 0x84f   : > { %v10078_v43 = vmax.f32 %v23839_v61, %v9906_v36  ;;  %v9908_v54 = vpop.f32.mrb[217].mxu0  ;;  %10417 = vmatmul.mubr.bf16.vlgmr.msra.gmra.mrb[244].mxu0 %v10120_v46  ;;  %10860 = vmatmul.mubr.bf16.vlgmr.msra.gmra.mrb[168].mxu1 %v10120_v46  ;;  %v10379_v61 = vsel %vm4211_vm7, %v16523_v8, 0  ;;  %v10822_v46 = vsel %vm4211_vm7, %v16603_v34, 0 }
 0x850   : > { %v10079_v33 = vmax.f32 %v23841_v3, %v9908_v54  ;;  %v10017_v31 = vpop.f32.mrb[140].mxu1  ;;  %v9910_v7 = vpop.f32.mrb[218].mxu0  ;;  %10498 = vmatpush1.bf16.msra.mxu0 %v19521_v45  ;;  %10941 = vmatpush1.bf16.msra.mxu1 %v19524_v55  ;;  %v19533_v3 = vld [vmem:[%s25683_s11 + $0x94] ss:$8 sps:$4 sm:$0xff]  }
 0x851   : > { %v10080_v30 = vmax.f32 %v23845_v42, %v10017_v31  ;;  %v10081_v9 = vmax.f32 %v23843_v10, %v9910_v7  ;;  %v10019_v23 = vpop.f32.mrb[141].mxu1  ;;  %v9912_v19 = vpop.f32.mrb[219].mxu0  ;;  %16525 = vmatprep.subr.msk.bf16.mxu0 %vm4211_vm7, %v16524_v62  ;;  %16605 = vmatprep.subr.msk.bf16.mxu1 %vm4211_vm7, %v16604_v29 }
 0x852   : > { %v10082_v27 = vmax.f32 %v23847_v0, %v9912_v19  ;;  %v10020_v26 = vpop.f32.mrb[142].mxu1 }
 0x853   : > { %v10123_v42 = vpack.c.bf16 %v10081_v9, %v10078_v43  ;;  %v10083_v10 = vmax.f32 %v23849_v63, %v10020_v26  ;;  %v10022_v6 = vpop.f32.mrb[143].mxu1 }
 0x854   : > { %v10124_v45 = vpack.c.bf16 %v10082_v27, %v10079_v33  ;;  %10500 = vmatpush1.bf16.msra.mxu0 %v10379_v61  ;;  %10943 = vmatpush1.bf16.msra.mxu1 %v10822_v46 }
 0x855   : > { %v23956_v55 = vpack.c.bf16 %v10083_v10, %v10080_v30  ;;  %11463 = vmatprep.subr.bf16.mxu0 %v19533_v3 }
 0x856   : > { %v9916_v62 = vpop.f32.mrb[220].mxu0  ;;  %10426 = vmatprep.mubr.bf16.mxu0 %v10124_v45  ;;  %10869 = vmatprep.mubr.bf16.mxu1 %v10124_v45 }
 0x857   : > { %v10084_v29 = vmax.f32 %v23851_v53, %v9916_v62  ;;  %v9918_v8 = vpop.f32.mrb[221].mxu0  ;;  %10427 = vmatmul.mubr.bf16.gmra.mrb[248].mxu0 %v10123_v42  ;;  %10870 = vmatmul.mubr.bf16.gmra.mrb[172].mxu1 %v10123_v42 }
 0x858   : > { %v10085_v0 = vmax.f32 %v23853_v11, %v9918_v8  ;;  %v10025_v34 = vpop.f32.mrb[144].mxu1  ;;  %v9920_v36 = vpop.f32.mrb[222].mxu0 }
 0x859   : > { %v10086_v63 = vmax.f32 %v23857_v40, %v10025_v34  ;;  %v10087_v43 = vmax.f32 %v23855_v12, %v9920_v36  ;;  %v10027_v54 = vpop.f32.mrb[145].mxu1  ;;  %v9922_v33 = vpop.f32.mrb[223].mxu0 }
 0x85a   : > { %v10088_v31 = vmax.f32 %v23859_v18, %v9922_v33  ;;  %v10028_v7 = vpop.f32.mrb[146].mxu1 }
 0x85b   : > { %v10126_v30 = vpack.c.bf16 %v10087_v43, %v10084_v29  ;;  %v10089_v9 = vmax.f32 %v23861_v2, %v10028_v7  ;;  %v10030_v53 = vpop.f32.mrb[147].mxu1 }
 0x85c   : > { %v10127_v23 = vpack.c.bf16 %v10088_v31, %v10085_v0 }
 0x85d   : > { %v23964_v19 = vpack.c.bf16 %v10089_v9, %v10086_v63 }
 0x85e   : > { %v9926_v61 = vpop.f32.mrb[224].mxu0  ;;  %10436 = vmatprep.mubr.bf16.mxu0 %v10127_v23  ;;  %10879 = vmatprep.mubr.bf16.mxu1 %v10127_v23 }
 0x85f   : > { %v10090_v11 = vmax.f32 %v23863_v28, %v9926_v61  ;;  %v9928_v40 = vpop.f32.mrb[225].mxu0  ;;  %10437 = vmatmul.mubr.bf16.gmra.mrb[252].mxu0 %v10126_v30  ;;  %10880 = vmatmul.mubr.bf16.gmra.mrb[176].mxu1 %v10126_v30 }
 0x860   : > { %v10091_v12 = vmax.f32 %v23865_v24, %v9928_v40  ;;  %v10033_v46 = vpop.f32.mrb[148].mxu1  ;;  %v9930_v18 = vpop.f32.mrb[226].mxu0 }
 0x861   : > { %v10092_v3 = vmax.f32 %v23869_v58, %v10033_v46  ;;  %v10093_v2 = vmax.f32 %v23867_v59, %v9930_v18  ;;  %v10035_v27 = vpop.f32.mrb[149].mxu1  ;;  %v9932_v26 = vpop.f32.mrb[227].mxu0 }
 0x862   : > { %v10094_v42 = vmax.f32 %v23871_v22, %v9932_v26  ;;  %v10036_v10 = vpop.f32.mrb[150].mxu1 }
 0x863   : > { %v10129_v6 = vpack.c.bf16 %v10093_v2, %v10090_v11  ;;  %v10095_v45 = vmax.f32 %v23873_v57, %v10036_v10  ;;  %v10038_v28 = vpop.f32.mrb[151].mxu1 }
 0x864   : > { %v10130_v62 = vpack.c.bf16 %v10094_v42, %v10091_v12 }
 0x865   : > { %v23972_v29 = vpack.c.bf16 %v10095_v45, %v10092_v3 }
 0x866   : > { %v9936_v8 = vpop.f32.mrb[228].mxu0  ;;  %10446 = vmatprep.mubr.bf16.mxu0 %v10130_v62  ;;  %10889 = vmatprep.mubr.bf16.mxu1 %v10130_v62 }
 0x867   : > { %v10096_v24 = vmax.f32 %v23875_v21, %v9936_v8  ;;  %v9938_v58 = vpop.f32.mrb[229].mxu0  ;;  %10447 = vmatmul.mubr.bf16.gmra.mrb[0].mxu0 %v10129_v6  ;;  %10890 = vmatmul.mubr.bf16.gmra.mrb[180].mxu1 %v10129_v6 }
 0x868   : > { %v10097_v59 = vmax.f32 %v23877_v5, %v9938_v58  ;;  %v10041_v0 = vpop.f32.mrb[152].mxu1  ;;  %v9940_v22 = vpop.f32.mrb[230].mxu0 }
 0x869   : > { %v10098_v34 = vmax.f32 %v23881_v48, %v10041_v0  ;;  %v10099_v57 = vmax.f32 %v23879_v25, %v9940_v22  ;;  %v10043_v36 = vpop.f32.mrb[153].mxu1  ;;  %v9942_v63 = vpop.f32.mrb[231].mxu0 }
 0x86a   : > { %v10100_v43 = vmax.f32 %v23883_v13, %v9942_v63  ;;  %v10044_v54 = vpop.f32.mrb[154].mxu1 }
 0x86b   : > { %v10132_v33 = vpack.c.bf16 %v10099_v57, %v10096_v24  ;;  %v10101_v31 = vmax.f32 %v23885_v37, %v10044_v54  ;;  %v10046_v21 = vpop.f32.mrb[155].mxu1 }
 0x86c   : > { %v10133_v7 = vpack.c.bf16 %v10100_v43, %v10097_v59  ;;  %v19540_v21 = vld [vmem:[%s25683_s11 + $0xc0] ss:$8 sps:$4 sm:$0xff]  }
 0x86d   : > { %v23980_v30 = vpack.c.bf16 %v10101_v31, %v10098_v34 }
 0x86e   : > { %v9946_v9 = vpop.f32.mrb[232].mxu0  ;;  %10456 = vmatprep.mubr.bf16.mxu0 %v10133_v7  ;;  %10899 = vmatprep.mubr.bf16.mxu1 %v10133_v7  ;;  %v19545_v7 = vld [vmem:[%s25683_s11 + $0xd4] ss:$8 sps:$4 sm:$0xff]  }
 0x86f   : > { %v10102_v5 = vmax.f32 %v23887_v47, %v9946_v9  ;;  %v9948_v48 = vpop.f32.mrb[233].mxu0  ;;  %10457 = vmatmul.mubr.bf16.gmra.mrb[4].mxu0 %v10132_v33  ;;  %10900 = vmatmul.mubr.bf16.gmra.mrb[184].mxu1 %v10132_v33  ;;  %v19543_v9 = vld [vmem:[%s25683_s11 + $0xd0] ss:$8 sps:$4 sm:$0xff]  }
 0x870   : > { %v10103_v25 = vmax.f32 %v23889_v17, %v9948_v48  ;;  %v10049_v53 = vpop.f32.mrb[156].mxu1  ;;  %v9950_v13 = vpop.f32.mrb[234].mxu0  ;;  %v19554_v48 = vld [vmem:[%s25683_s11 + $0x104] ss:$8 sps:$4 sm:$0xff]  }
 0x871   : > { %v10104_v23 = vmax.f32 %v23893_v52, %v10049_v53  ;;  %v10105_v37 = vmax.f32 %v23891_v1, %v9950_v13  ;;  %v10051_v61 = vpop.f32.mrb[157].mxu1  ;;  %v9952_v11 = vpop.f32.mrb[235].mxu0  ;;  %v16631_v53 = vld [vmem:[%s25683_s11 + $0x118] sm:$0x33] }
 0x872   : > { %v10106_v40 = vmax.f32 %v23895_v50, %v9952_v11  ;;  %v10052_v12 = vpop.f32.mrb[158].mxu1  ;;  %v19555_v13 = vld [vmem:[%s25683_s11 + $0x114] ss:$8 sps:$4 sm:$0x3f]   ;;  %v19559_v61 = vld [vmem:[%s25683_s11 + $0x4] ss:$8 sps:$4 sm:$0xff]  }
 0x873   : > { %v10135_v46 = vpack.c.bf16 %v10105_v37, %v10102_v5  ;;  %v10107_v18 = vmax.f32 %v23897_v56, %v10052_v12  ;;  %v10054_v47 = vpop.f32.mrb[159].mxu1  ;;  %v19552_v5 = vld [vmem:[%s25683_s11 + $0x100] ss:$8 sps:$4 sm:$0xff]  }
 0x874   : > { %v10136_v3 = vpack.c.bf16 %v10106_v40, %v10103_v25  ;;  %v16630_v25 = vld [vmem:[%s25683_s11 + $0x110] sm:$0xff] }
 0x875   : > { %v23988_v2 = vpack.c.bf16 %v10107_v18, %v10104_v23  ;;  %v16648_v23 = vcombine.low %v16630_v25, %v16631_v53 }
 0x876   : > { %v9956_v27 = vpop.f32.mrb[236].mxu0  ;;  %10466 = vmatprep.mubr.bf16.mxu0 %v10136_v3  ;;  %10909 = vmatprep.mubr.bf16.mxu1 %v10136_v3 }
 0x877   : > { %v10108_v17 = vmax.f32 %v23899_v60, %v9956_v27  ;;  %v9958_v52 = vpop.f32.mrb[237].mxu0  ;;  %10467 = vmatmul.mubr.bf16.gmra.mrb[8].mxu0 %v10135_v46  ;;  %10910 = vmatmul.mubr.bf16.gmra.mrb[188].mxu1 %v10135_v46  ;;  %v11458_v37 = vsel %vm975_vm0, %v16648_v23, 0 }
 0x878   : > { %v10109_v1 = vmax.f32 %v23901_v16, %v9958_v52  ;;  %v10057_v26 = vpop.f32.mrb[160].mxu1  ;;  %v9960_v50 = vpop.f32.mrb[238].mxu0 }
 0x879   : > { %v10110_v42 = vmax.f32 %v23905_v14, %v10057_v26  ;;  %v10111_v56 = vmax.f32 %v23903_v49, %v9960_v50  ;;  %v10059_v10 = vpop.f32.mrb[161].mxu1  ;;  %v9962_v6 = vpop.f32.mrb[239].mxu0 }
 0x87a   : > { %v10112_v45 = vmax.f32 %v23907_v44, %v9962_v6  ;;  %v10060_v28 = vpop.f32.mrb[162].mxu1 }
 0x87b   : > { %v10138_v62 = vpack.c.bf16 %v10111_v56, %v10108_v17  ;;  %v10113_v8 = vmax.f32 %v23909_v38, %v10060_v28  ;;  %v10062_v60 = vpop.f32.mrb[163].mxu1 }
 0x87c   : > { %v10139_v24 = vpack.c.bf16 %v10112_v45, %v10109_v1 }
 0x87d   : > { %v23996_v58 = vpack.c.bf16 %v10113_v8, %v10110_v42 }
 0x87e   : > { %v9966_v59 = vpop.f32.mrb[240].mxu0  ;;  %10476 = vmatprep.mubr.bf16.mxu0 %v10139_v24  ;;  %10919 = vmatprep.mubr.bf16.mxu1 %v10139_v24 }
 0x87f   : > { %v10114_v16 = vmax.f32 %v23911_v35, %v9966_v59  ;;  %v9968_v14 = vpop.f32.mrb[241].mxu0  ;;  %10477 = vmatmul.mubr.bf16.gmra.mrb[12].mxu0 %v10138_v62  ;;  %10920 = vmatmul.mubr.bf16.gmra.mrb[192].mxu1 %v10138_v62 }
 0x880   : > { %v10115_v49 = vmax.f32 %v23913_v39, %v9968_v14  ;;  %v10065_v0 = vpop.f32.mrb[164].mxu1  ;;  %v9970_v44 = vpop.f32.mrb[242].mxu0  ;;  %v19531_v39 = vld [vmem:[%s25683_s11 + $0x90] ss:$8 sps:$4 sm:$0xff]  }
 0x881   : > { %v10116_v22 = vmax.f32 %v23917_v32, %v10065_v0  ;;  %v10117_v38 = vmax.f32 %v23915_v41, %v9970_v44  ;;  %v10067_v34 = vpop.f32.mrb[165].mxu1  ;;  %v9972_v57 = vpop.f32.mrb[243].mxu0  ;;  %v19536_v41 = vld [vmem:[%s25683_s11 + $0xa4] ss:$8 sps:$4 sm:$0xff]   ;;  %v19534_v32 = vld [vmem:[%s25683_s11 + $0xa0] ss:$8 sps:$4 sm:$0xff]  }
 0x882   : > { %v10118_v36 = vmax.f32 %v23919_v51, %v9972_v57  ;;  %v10068_v63 = vpop.f32.mrb[166].mxu1  ;;  %v19539_v51 = vld [vmem:[%s25683_s11 + $0xb4] ss:$8 sps:$4 sm:$0xff]  }
 0x883   : > { %v10141_v43 = vpack.c.bf16 %v10117_v38, %v10114_v16  ;;  %v10119_v54 = vmax.f32 %v23921_v15, %v10068_v63  ;;  %v10070_v35 = vpop.f32.mrb[167].mxu1  ;;  %v19537_v15 = vld [vmem:[%s25683_s11 + $0xb0] ss:$8 sps:$4 sm:$0xff]  }
 0x884   : > { %v10142_v33 = vpack.c.bf16 %v10118_v36, %v10115_v49 }
 0x885   : > { %v10143_v31 = vpack.c.bf16 %v10119_v54, %v10116_v22 }
 0x886   : > { %10486 = vmatprep.mubr.bf16.mxu0 %v10142_v33  ;;  %10929 = vmatprep.mubr.bf16.mxu1 %v10142_v33 }
 0x887   : > { %10487 = vmatmul.mubr.bf16.gmra.mrb[16].mxu0 %v10141_v43  ;;  %10930 = vmatmul.mubr.bf16.gmra.mrb[196].mxu1 %v10141_v43 }
 0x888   : > { %10529 = vmatprep.mubr.bf16.mxu0 %v25776_v4  ;;  %10972 = vmatprep.mubr.bf16.mxu1 %v25776_v4 }
 0x88f   : > { %16526 = vmatmul.mubr.msk.bf16.vlgmr.msra.gmra.mrb[244].mxu0 %vm3044_vm6, %v23941_v20  ;;  %16606 = vmatmul.mubr.msk.bf16.vlgmr.msra.gmra.mrb[168].mxu1 %vm3044_vm6, %v23941_v20  ;;  %v19542_v20 = vld [vmem:[%s25683_s11 + $0xc4] ss:$8 sps:$4 sm:$0xff]  }
 0x890   : > { %10539 = vmatprep.mubr.bf16.mxu0 %v25776_v4  ;;  %10982 = vmatprep.mubr.bf16.mxu1 %v25776_v4 }
 0x891   : > { %11464 = vmatpush1.bf16.msra.mxu0 %v19531_v39 }
 0x892   : > { %11465 = vmatprep.subr.bf16.mxu0 %v19536_v41 }
 0x895   : > { %11466 = vmatpush1.bf16.msra.mxu0 %v19534_v32 }
 0x896   : > { %11467 = vmatprep.subr.bf16.mxu0 %v19539_v51 }
 0x897   : > { %16527 = vmatmul.mubr.msk.bf16.gmra.mrb[248].mxu0 %vm3044_vm6, %v23956_v55  ;;  %16607 = vmatmul.mubr.msk.bf16.gmra.mrb[172].mxu1 %vm3044_vm6, %v23956_v55  ;;  %v19546_v55 = vld [vmem:[%s25683_s11 + $0xe0] ss:$8 sps:$4 sm:$0xff]  }
 0x898   : > { %10549 = vmatprep.mubr.bf16.mxu0 %v25776_v4  ;;  %10992 = vmatprep.mubr.bf16.mxu1 %v25776_v4 }
 0x899   : > { %11468 = vmatpush1.bf16.msra.mxu0 %v19537_v15 }
 0x89a   : > { %11469 = vmatprep.subr.bf16.mxu0 %v19542_v20 }
 0x89d   : > { %11470 = vmatpush1.bf16.msra.mxu0 %v19540_v21 }
 0x89e   : > { %11471 = vmatprep.subr.bf16.mxu0 %v19545_v7 }
 0x89f   : > { %16528 = vmatmul.mubr.msk.bf16.gmra.mrb[252].mxu0 %vm3044_vm6, %v23964_v19  ;;  %16608 = vmatmul.mubr.msk.bf16.gmra.mrb[176].mxu1 %vm3044_vm6, %v23964_v19  ;;  %v19548_v19 = vld [vmem:[%s25683_s11 + $0xe4] ss:$8 sps:$4 sm:$0xff]  }
 0x8a0   : > { %10559 = vmatprep.mubr.bf16.mxu0 %v25776_v4  ;;  %11002 = vmatprep.mubr.bf16.mxu1 %v25776_v4 }
 0x8a1   : > { %11472 = vmatpush1.bf16.msra.mxu0 %v19543_v9 }
 0x8a2   : > { %11473 = vmatprep.subr.bf16.mxu0 %v19548_v19 }
 0x8a5   : > { %11474 = vmatpush1.bf16.msra.mxu0 %v19546_v55 }
 0x8a7   : > { %16529 = vmatmul.mubr.msk.bf16.gmra.mrb[0].mxu0 %vm3044_vm6, %v23972_v29  ;;  %16609 = vmatmul.mubr.msk.bf16.gmra.mrb[180].mxu1 %vm3044_vm6, %v23972_v29  ;;  %v19549_v29 = vld [vmem:[%s25683_s11 + $0xf0] ss:$8 sps:$4 sm:$0xff]  }
 0x8a8   : > { %10569 = vmatprep.mubr.bf16.mxu0 %v25776_v4  ;;  %11012 = vmatprep.mubr.bf16.mxu1 %v25776_v4 }
 0x8af   : > { %16530 = vmatmul.mubr.msk.bf16.gmra.mrb[4].mxu0 %vm3044_vm6, %v23980_v30  ;;  %16610 = vmatmul.mubr.msk.bf16.gmra.mrb[184].mxu1 %vm3044_vm6, %v23980_v30  ;;  %v19551_v30 = vld [vmem:[%s25683_s11 + $0xf4] ss:$8 sps:$4 sm:$0xff]  }
 0x8b0   : > { %10579 = vmatprep.mubr.bf16.mxu0 %v25776_v4  ;;  %11022 = vmatprep.mubr.bf16.mxu1 %v25776_v4 }
 0x8b1   : > { %11475 = vmatprep.subr.bf16.mxu0 %v19551_v30 }
 0x8b2   : > { %11476 = vmatpush1.bf16.msra.mxu0 %v19549_v29 }
 0x8b3   : > { %11477 = vmatprep.subr.bf16.mxu0 %v19554_v48 }
 0x8b6   : > { %11478 = vmatpush1.bf16.msra.mxu0 %v19552_v5 }
 0x8b7   : > { %16531 = vmatmul.mubr.msk.bf16.gmra.mrb[8].mxu0 %vm3044_vm6, %v23988_v2  ;;  %16611 = vmatmul.mubr.msk.bf16.gmra.mrb[188].mxu1 %vm3044_vm6, %v23988_v2 }
 0x8b8   : > { %10589 = vmatprep.mubr.bf16.mxu0 %v25776_v4  ;;  %11032 = vmatprep.mubr.bf16.mxu1 %v25776_v4 }
 0x8b9   : > { %16650 = vmatprep.subr.msk.bf16.mxu0 %vm975_vm0, %v19555_v13 }
 0x8ba   : > { %11480 = vmatpush1.bf16.msra.mxu0 %v11458_v37 }
 0x8bb   : > { %11688 = vmatprep.subr.bf16.mxu0 %v19559_v61 }
 0x8bf   : > { %16532 = vmatmul.mubr.msk.bf16.gmra.mrb[12].mxu0 %vm3044_vm6, %v23996_v58  ;;  %16612 = vmatmul.mubr.msk.bf16.gmra.mrb[192].mxu1 %vm3044_vm6, %v23996_v58 }
 0x8c0   : > { %10599 = vmatprep.mubr.bf16.mxu0 %v25776_v4  ;;  %11042 = vmatprep.mubr.bf16.mxu1 %v25776_v4 }
 0x8c7   : > { %16533 = vmatmul.mubr.msk.bf16.gmra.mrb[16].mxu0 %vm3044_vm6, %v10143_v31  ;;  %16613 = vmatmul.mubr.msk.bf16.gmra.mrb[196].mxu1 %vm3044_vm6, %v10143_v31  ;;  %vm15026_vm6 = vcmask 490496  }
 0x962   : > { %v10531_v11 = vpop.f32.mrb[244].mxu0  ;;  %v10974_v40 = vpop.f32.mrb[168].mxu1 }
 0x963   : > { %v24109_v12 = vmax.f32 %v10531_v11, %v10974_v40  ;;  %v10533_v46 = vpop.f32.mrb[245].mxu0  ;;  %v10976_v18 = vpop.f32.mrb[169].mxu1 }
 0x964   : > { %v11054_v47 = vmax.f32 %v10533_v46, %v10976_v18  ;;  %v10535_v3 = vpop.f32.mrb[246].mxu0  ;;  %v10978_v2 = vpop.f32.mrb[170].mxu1 }
 0x965   : > { %11085 = vst [vmem:[#allocation3] sm:$0xff] %v24109_v12  ;;  %v24112_v27 = vmax.f32 %v10535_v3, %v10978_v2  ;;  %v10537_v17 = vpop.f32.mrb[247].mxu0  ;;  %v10980_v52 = vpop.f32.mrb[171].mxu1 }
 0x966   : > { %11087 = vst.msk [vmem:[#allocation3 + $0x8] sm:$0xff] %vm11086_vm13, %v11054_v47  ;;  %v11056_v1 = vmax.f32 %v10537_v17, %v10980_v52  ;;  %v19557_v17 = vld [vmem:[%s25683_s11] ss:$8 sps:$4 sm:$0xff]  }
 0x967   : > { %v11168_v26 = vpack.c.bf16 %v24112_v27, %v24109_v12  ;;  %v19625_v12 = vld [vmem:[%s25685_s13 + $0x174] ss:$12 sps:$4 sm:$0xff]  }
 0x968   : > { %11089 = vst.msk [vmem:[#allocation3 + $0x18] sm:$0xff] %vm11086_vm13, %v11056_v1 }
 0x96a   : > { %v10541_v50 = vpop.f32.mrb[248].mxu0  ;;  %v10984_v42 = vpop.f32.mrb[172].mxu1 }
 0x96b   : > { %v11057_v56 = vmax.f32 %v10541_v50, %v10984_v42  ;;  %v10543_v10 = vpop.f32.mrb[249].mxu0  ;;  %v10986_v6 = vpop.f32.mrb[173].mxu1  ;;  %v19562_v50 = vld [vmem:[%s25683_s11 + $0x14] ss:$8 sps:$4 sm:$0xff]  }
 0x96c   : > { %v11058_v45 = vmax.f32 %v10543_v10, %v10986_v6  ;;  %v10545_v28 = vpop.f32.mrb[250].mxu0  ;;  %v10988_v62 = vpop.f32.mrb[174].mxu1  ;;  %v11184_v8 = vld [vmem:[#allocation3] sm:$0xfe] }
 0x96d   : > { %v11059_v60 = vmax.f32 %v10545_v28, %v10988_v62  ;;  %v10547_v24 = vpop.f32.mrb[251].mxu0  ;;  %v10990_v58 = vpop.f32.mrb[175].mxu1  ;;  %v11185_v14 = vld [vmem:[#allocation3 + $0x8] sm:$0xfe]  ;;  %v11207_v0 = vpack.c.bf16 %v24112_v27, %v11184_v8 }
 0x96e   : > { %11091 = vst.msk [vmem:[#allocation3 + $0x28] sm:$0xff] %vm11086_vm13, %v11058_v45  ;;  %v11060_v59 = vmax.f32 %v10547_v24, %v10990_v58  ;;  %v19560_v62 = vld [vmem:[%s25683_s11 + $0x10] ss:$8 sps:$4 sm:$0xff]  }
 0x96f   : > { %v24119_v16 = vld [vmem:[#allocation3 + $0x18] sm:$0xff]  ;;  %v24121_v49 = vpack.c.bf16 %v11059_v60, %v11057_v56  ;;  %v11214_v63 = vshll.u32 %v11207_v0, 16  ;;  %v11212_v19 = vshrl.u32 %v11207_v0, 16 }
 0x970   : > { %11093 = vst.msk [vmem:[#allocation3 + $0x38] sm:$0xff] %vm11086_vm13, %v11060_v59  ;;  %v11208_v44 = vpack.c.bf16 %v24119_v16, %v11185_v14  ;;  %v19565_v59 = vld [vmem:[%s25683_s11 + $0x24] ss:$8 sps:$4 sm:$0xff]  }
 0x971   : > { %v11216_v20 = vrot.slane %v11214_v63, 1  ;;  %v11219_v21 = vshll.u32 %v24121_v49, 16 }
 0x972   : > { %v10551_v22 = vpop.f32.mrb[252].mxu0  ;;  %v10994_v38 = vpop.f32.mrb[176].mxu1  ;;  %v11226_v33 = vshll.u32 %v11208_v44, 16  ;;  %v11224_v5 = vshrl.u32 %v11208_v44, 16 }
 0x973   : > { %v11061_v34 = vmax.f32 %v10551_v22, %v10994_v38  ;;  %v10553_v57 = vpop.f32.mrb[253].mxu0  ;;  %v10996_v36 = vpop.f32.mrb[177].mxu1  ;;  %v11217_v23 = vor.u32 %v11216_v20, %v11212_v19  ;;  %v11221_v37 = vrot.slane %v11219_v21, 1  ;;  %v11235_v22 = vshrl.u32 %v24121_v49, 16 }
 0x974   : > { %v11062_v43 = vmax.f32 %v10553_v57, %v10996_v36  ;;  %v10555_v54 = vpop.f32.mrb[254].mxu0  ;;  %v10998_v35 = vpop.f32.mrb[178].mxu1  ;;  %v11228_v55 = vrot.slane %v11226_v33, 1 }
 0x975   : > { %v11063_v31 = vmax.f32 %v10555_v54, %v10998_v35  ;;  %v10557_v39 = vpop.f32.mrb[255].mxu0  ;;  %v11000_v41 = vpop.f32.mrb[179].mxu1  ;;  %v11123_v51 = vld [vmem:[#allocation3 + $0x28] sm:$0xff]  ;;  %v11222_v42 = vsel %vm3428_vm8, %v11217_v23, %v11221_v37 }
 0x976   : > { %11095 = vst.msk [vmem:[#allocation3 + $0x48] sm:$0xff] %vm11086_vm13, %v11062_v43  ;;  %v11064_v32 = vmax.f32 %v10557_v39, %v11000_v41  ;;  %v11229_v46 = vor.u32 %v11228_v55, %v11224_v5  ;;  %v19563_v39 = vld [vmem:[%s25683_s11 + $0x20] ss:$8 sps:$4 sm:$0xff]  }
 0x977   : > { %v11125_v15 = vld [vmem:[#allocation3 + $0x38] sm:$0xff]  ;;  %v24128_v7 = vpack.c.bf16 %v11063_v31, %v11061_v34  ;;  %v11237_v31 = vor.u32 %v11235_v22, %v11221_v37 }
 0x978   : > { %11097 = vst.msk [vmem:[#allocation3 + $0x58] sm:$0xff] %vm11086_vm13, %v11064_v32  ;;  %v24131_v9 = vpack.c.bf16 %v11125_v15, %v11123_v51  ;;  %v19568_v51 = vld [vmem:[%s25683_s11 + $0x34] ss:$8 sps:$4 sm:$0xff]  }
 0x979   : > { %v11239_v6 = vshll.u32 %v24128_v7, 16 }
 0x97a   : > { %v10561_v29 = vpop.f32.mrb[0].mxu0  ;;  %v11004_v30 = vpop.f32.mrb[180].mxu1  ;;  %v11231_v48 = vshll.u32 %v24131_v9, 16  ;;  %v11243_v24 = vshrl.u32 %v24131_v9, 16 }
 0x97b   : > { %v11065_v25 = vmax.f32 %v10561_v29, %v11004_v30  ;;  %v10563_v53 = vpop.f32.mrb[1].mxu0  ;;  %v11006_v13 = vpop.f32.mrb[181].mxu1  ;;  %v11241_v38 = vrot.slane %v11239_v6, 1  ;;  %v19566_v30 = vld [vmem:[%s25683_s11 + $0x30] ss:$8 sps:$4 sm:$0xff]  }
 0x97c   : > { %v11066_v61 = vmax.f32 %v10563_v53, %v11006_v13  ;;  %v10565_v11 = vpop.f32.mrb[2].mxu0  ;;  %v11008_v40 = vpop.f32.mrb[182].mxu1  ;;  %v11233_v18 = vrot.slane %v11231_v48, 1  ;;  %v19571_v13 = vld [vmem:[%s25683_s11 + $0x44] ss:$8 sps:$4 sm:$0xff]  }
 0x97d   : > { %v11067_v47 = vmax.f32 %v10565_v11, %v11008_v40  ;;  %v10567_v3 = vpop.f32.mrb[3].mxu0  ;;  %v11010_v2 = vpop.f32.mrb[183].mxu1  ;;  %v11127_v56 = vld [vmem:[#allocation3 + $0x48] sm:$0xff]  ;;  %v11242_v15 = vsel %vm3428_vm8, %v11237_v31, %v11241_v38  ;;  %v11251_v11 = vshrl.u32 %v24128_v7, 16 }
 0x97e   : > { %11099 = vst.msk [vmem:[#allocation3 + $0x68] sm:$0xff] %vm11086_vm13, %v11066_v61  ;;  %v11068_v52 = vmax.f32 %v10567_v3, %v11010_v2  ;;  %v11234_v1 = vsel %vm3428_vm8, %v11229_v46, %v11233_v18  ;;  %v11245_v63 = vor.u32 %v11243_v24, %v11233_v18  ;;  %v19574_v6 = vld [vmem:[%s25683_s11 + $0x54] ss:$8 sps:$4 sm:$0xff]  }
 0x97f   : > { %16651 = vmatprep.mubr.msk.bf16.mxu0 %vm11086_vm13, %v11234_v1  ;;  %v11129_v10 = vld [vmem:[#allocation3 + $0x58] sm:$0xff]  ;;  %v24145_v45 = vpack.c.bf16 %v11067_v47, %v11065_v25 }
 0x980   : > { %11101 = vst.msk [vmem:[#allocation3 + $0x78] sm:$0xff] %vm11086_vm13, %v11068_v52  ;;  %11496 = vmatmul.mubr.bf16.vlgmr.msra.gmra.mrb[20].mxu0 %v11222_v42  ;;  %v24148_v28 = vpack.c.bf16 %v11129_v10, %v11127_v56  ;;  %v19569_v42 = vld [vmem:[%s25683_s11 + $0x40] ss:$8 sps:$4 sm:$0xff]  }
 0x981   : > { %11689 = vmatpush1.bf16.msra.mxu0 %v19557_v17  ;;  %v11255_v55 = vshll.u32 %v24145_v45, 16 }
 0x982   : > { %v10571_v8 = vpop.f32.mrb[4].mxu0  ;;  %v11014_v60 = vpop.f32.mrb[184].mxu1  ;;  %v11247_v58 = vshll.u32 %v24148_v28, 16  ;;  %11690 = vmatprep.subr.bf16.mxu0 %v19562_v50  ;;  %v11259_v25 = vshrl.u32 %v24148_v28, 16  ;;  %v11253_v50 = vor.u32 %v11251_v11, %v11241_v38 }
 0x983   : > { %v11069_v14 = vmax.f32 %v10571_v8, %v11014_v60  ;;  %v10573_v0 = vpop.f32.mrb[5].mxu0  ;;  %v11016_v44 = vpop.f32.mrb[185].mxu1  ;;  %v11257_v40 = vrot.slane %v11255_v55, 1  ;;  %v19581_v11 = vld [vmem:[%s25683_s11 + $0x84] ss:$8 sps:$4 sm:$0x3f]  }
 0x984   : > { %v11070_v34 = vmax.f32 %v10573_v0, %v11016_v44  ;;  %v10575_v57 = vpop.f32.mrb[6].mxu0  ;;  %v11018_v36 = vpop.f32.mrb[186].mxu1  ;;  %v11249_v43 = vrot.slane %v11247_v58, 1 }
 0x985   : > { %v11071_v54 = vmax.f32 %v10575_v57, %v11018_v36  ;;  %v10577_v35 = vpop.f32.mrb[7].mxu0  ;;  %v11020_v33 = vpop.f32.mrb[187].mxu1  ;;  %11691 = vmatpush1.bf16.msra.mxu0 %v19560_v62  ;;  %v11131_v20 = vld [vmem:[#allocation3 + $0x68] sm:$0xff]  ;;  %v11258_v62 = vsel %vm3428_vm8, %v11253_v50, %v11257_v40 }
 0x986   : > { %11103 = vst.msk [vmem:[#allocation3 + $0x88] sm:$0xff] %vm11086_vm13, %v11070_v34  ;;  %v11072_v41 = vmax.f32 %v10577_v35, %v11020_v33  ;;  %v11250_v32 = vsel %vm3428_vm8, %v11245_v63, %v11249_v43  ;;  %11692 = vmatprep.subr.bf16.mxu0 %v19565_v59  ;;  %v11261_v3 = vor.u32 %v11259_v25, %v11249_v43  ;;  %v19577_v34 = vld [vmem:[%s25683_s11 + $0x64] ss:$8 sps:$4 sm:$0xff]   ;;  %v11267_v43 = vshrl.u32 %v24145_v45, 16 }
 0x987   : > { %16652 = vmatprep.mubr.msk.bf16.mxu0 %vm11086_vm13, %v11250_v32  ;;  %v11133_v21 = vld [vmem:[#allocation3 + $0x78] sm:$0xff]  ;;  %v24170_v19 = vpack.c.bf16 %v11071_v54, %v11069_v14  ;;  %v19572_v14 = vld [vmem:[%s25683_s11 + $0x50] ss:$8 sps:$4 sm:$0xff]  }
 0x988   : > { %11105 = vst.msk [vmem:[#allocation3 + $0x98] sm:$0xff] %vm11086_vm13, %v11072_v41  ;;  %11506 = vmatmul.mubr.bf16.gmra.mrb[24].mxu0 %v11242_v15  ;;  %v24173_v29 = vpack.c.bf16 %v11133_v21, %v11131_v20  ;;  %v11269_v20 = vor.u32 %v11267_v43, %v11257_v40  ;;  %v19575_v21 = vld [vmem:[%s25683_s11 + $0x60] ss:$8 sps:$4 sm:$0xff]  }
 0x989   : > { %11693 = vmatpush1.bf16.msra.mxu0 %v19563_v39  ;;  %v11271_v24 = vshll.u32 %v24170_v19, 16  ;;  %v19583_v40 = vld [vmem:[%s25683_s11 + $0x80] ss:$8 sps:$4 sm:$0x3f]  }
 0x98a   : > { %v10581_v5 = vpop.f32.mrb[8].mxu0  ;;  %v11024_v48 = vpop.f32.mrb[188].mxu1  ;;  %v11263_v53 = vshll.u32 %v24173_v29, 16  ;;  %11694 = vmatprep.subr.bf16.mxu0 %v19568_v51  ;;  %v11275_v22 = vshrl.u32 %v24173_v29, 16 }
 0x98b   : > { %v11073_v23 = vmax.f32 %v10581_v5, %v11024_v48  ;;  %v10583_v37 = vpop.f32.mrb[9].mxu0  ;;  %v11026_v61 = vpop.f32.mrb[189].mxu1  ;;  %v11273_v54 = vrot.slane %v11271_v24, 1  ;;  %v19580_v5 = vld [vmem:[%s25683_s11 + $0x74] ss:$8 sps:$4 sm:$0xff]  }
 0x98c   : > { %v11074_v46 = vmax.f32 %v10583_v37, %v11026_v61  ;;  %v10585_v18 = vpop.f32.mrb[10].mxu0  ;;  %v11028_v47 = vpop.f32.mrb[190].mxu1  ;;  %v11265_v2 = vrot.slane %v11263_v53, 1  ;;  %v19578_v61 = vld [vmem:[%s25683_s11 + $0x70] ss:$8 sps:$4 sm:$0xff]  }
 0x98d   : > { %v11075_v17 = vmax.f32 %v10585_v18, %v11028_v47  ;;  %v10587_v52 = vpop.f32.mrb[11].mxu0  ;;  %v11030_v1 = vpop.f32.mrb[191].mxu1  ;;  %11695 = vmatpush1.bf16.msra.mxu0 %v19566_v30  ;;  %v11135_v8 = vld [vmem:[#allocation3 + $0x88] sm:$0xff]  ;;  %v11274_v48 = vsel %vm3428_vm8, %v11269_v20, %v11273_v54 }
 0x98e   : > { %11107 = vst.msk [vmem:[#allocation3 + $0xa8] sm:$0xff] %vm11086_vm13, %v11074_v46  ;;  %v11076_v56 = vmax.f32 %v10587_v52, %v11030_v1  ;;  %v11266_v10 = vsel %vm3428_vm8, %v11261_v3, %v11265_v2  ;;  %11696 = vmatprep.subr.bf16.mxu0 %v19571_v13  ;;  %v11277_v39 = vor.u32 %v11275_v22, %v11265_v2  ;;  %v11283_v1 = vshrl.u32 %v24170_v19, 16 }
 0x98f   : > { %16653 = vmatprep.mubr.msk.bf16.mxu0 %vm11086_vm13, %v11266_v10  ;;  %v11137_v60 = vld [vmem:[#allocation3 + $0x98] sm:$0xff]  ;;  %v24195_v58 = vpack.c.bf16 %v11075_v17, %v11073_v23  ;;  %v11683_v22 = vsel %vm975_vm0, %v19583_v40, 0 }
 0x990   : > { %11109 = vst.msk [vmem:[#allocation3 + $0xb8] sm:$0xff] %vm11086_vm13, %v11076_v56  ;;  %11516 = vmatmul.mubr.bf16.gmra.mrb[28].mxu0 %v11258_v62  ;;  %v24198_v59 = vpack.c.bf16 %v11137_v60, %v11135_v8 }
 0x991   : > { %11697 = vmatpush1.bf16.msra.mxu0 %v19569_v42  ;;  %v11287_v13 = vshll.u32 %v24195_v58, 16 }
 0x992   : > { %v10591_v0 = vpop.f32.mrb[12].mxu0  ;;  %v11034_v44 = vpop.f32.mrb[192].mxu1  ;;  %v11279_v38 = vshll.u32 %v24198_v59, 16  ;;  %11698 = vmatprep.subr.bf16.mxu0 %v19574_v6  ;;  %v11291_v47 = vshrl.u32 %v24198_v59, 16 }
 0x993   : > { %v11077_v57 = vmax.f32 %v10591_v0, %v11034_v44  ;;  %v10593_v36 = vpop.f32.mrb[13].mxu0  ;;  %v11036_v63 = vpop.f32.mrb[193].mxu1  ;;  %v11289_v50 = vrot.slane %v11287_v13, 1 }
 0x994   : > { %v11078_v35 = vmax.f32 %v10593_v36, %v11036_v63  ;;  %v10595_v33 = vpop.f32.mrb[14].mxu0  ;;  %v11038_v31 = vpop.f32.mrb[194].mxu1  ;;  %v11281_v41 = vrot.slane %v11279_v38, 1  ;;  %v19586_v38 = vld [vmem:[%s25683_s11 + $0x124] ss:$8 sps:$4 sm:$0xff]  }
 0x995   : > { %v11079_v32 = vmax.f32 %v10595_v33, %v11038_v31  ;;  %v10597_v51 = vpop.f32.mrb[15].mxu0  ;;  %v11040_v15 = vpop.f32.mrb[195].mxu1  ;;  %11699 = vmatpush1.bf16.msra.mxu0 %v19572_v14  ;;  %v11139_v25 = vld [vmem:[#allocation3 + $0xa8] sm:$0xff]  ;;  %v11285_v14 = vor.u32 %v11283_v1, %v11273_v54  ;;  %v11299_v33 = vshrl.u32 %v24195_v58, 16 }
 0x996   : > { %11111 = vst.msk [vmem:[#allocation3 + $0xc8] sm:$0xff] %vm11086_vm13, %v11078_v35  ;;  %v11080_v55 = vmax.f32 %v10597_v51, %v11040_v15  ;;  %v11282_v30 = vsel %vm3428_vm8, %v11277_v39, %v11281_v41  ;;  %11700 = vmatprep.subr.bf16.mxu0 %v19577_v34  ;;  %v11293_v6 = vor.u32 %v11291_v47, %v11281_v41 }
 0x997   : > { %16654 = vmatprep.mubr.msk.bf16.mxu0 %vm11086_vm13, %v11282_v30  ;;  %v11141_v53 = vld [vmem:[#allocation3 + $0xb8] sm:$0xff]  ;;  %v24220_v23 = vpack.c.bf16 %v11079_v32, %v11077_v57  ;;  %v11290_v34 = vsel %vm3428_vm8, %v11285_v14, %v11289_v50  ;;  %v11301_v32 = vor.u32 %v11299_v33, %v11289_v50 }
 0x998   : > { %11113 = vst.msk [vmem:[#allocation3 + $0xd8] sm:$0xff] %vm11086_vm13, %v11080_v55  ;;  %11526 = vmatmul.mubr.bf16.gmra.mrb[32].mxu0 %v11274_v48  ;;  %v24223_v37 = vpack.c.bf16 %v11141_v53, %v11139_v25  ;;  %v19584_v14 = vld [vmem:[%s25683_s11 + $0x120] ss:$8 sps:$4 sm:$0xff]   ;;  %v19598_v33 = vld [vmem:[%s25683_s11 + $0x164] ss:$8 sps:$4 sm:$0xff]  }
 0x999   : > { %11701 = vmatpush1.bf16.msra.mxu0 %v19575_v21  ;;  %v11303_v63 = vshll.u32 %v24220_v23, 16 }
 0x99a   : > { %v10601_v46 = vpop.f32.mrb[16].mxu0  ;;  %v11044_v18 = vpop.f32.mrb[196].mxu1  ;;  %v11295_v3 = vshll.u32 %v24223_v37, 16  ;;  %11702 = vmatprep.subr.bf16.mxu0 %v19580_v5  ;;  %v11307_v54 = vshrl.u32 %v24223_v37, 16 }
 0x99b   : > { %v24236_v2 = vmax.f32 %v10601_v46, %v11044_v18  ;;  %v10603_v17 = vpop.f32.mrb[17].mxu0  ;;  %v11046_v52 = vpop.f32.mrb[197].mxu1  ;;  %v11305_v31 = vrot.slane %v11303_v63, 1  ;;  %v19629_v63 = vld [vmem:[%s25685_s13 + $0x18c] ss:$12 sps:$4 sm:$0xff]  }
 0x99c   : > { %v11082_v42 = vmax.f32 %v10603_v17, %v11046_v52  ;;  %v10605_v56 = vpop.f32.mrb[18].mxu0  ;;  %v11048_v10 = vpop.f32.mrb[198].mxu1  ;;  %v11297_v62 = vrot.slane %v11295_v3, 1 }
 0x99d   : > { %v24239_v8 = vmax.f32 %v10605_v56, %v11048_v10  ;;  %v10607_v60 = vpop.f32.mrb[19].mxu0  ;;  %v11050_v24 = vpop.f32.mrb[199].mxu1  ;;  %11703 = vmatpush1.bf16.msra.mxu0 %v19578_v61  ;;  %v11143_v57 = vld [vmem:[#allocation3 + $0xc8] sm:$0xff]  ;;  %v11306_v20 = vsel %vm3428_vm8, %v11301_v32, %v11305_v31  ;;  %v11315_v61 = vshrl.u32 %v24220_v23, 16 }
 0x99e   : > { %11115 = vst.msk [vmem:[#allocation3 + $0xe8] sm:$0xff] %vm11086_vm13, %v11082_v42  ;;  %v11084_v0 = vmax.f32 %v10607_v60, %v11050_v24  ;;  %v11298_v44 = vsel %vm3428_vm8, %v11293_v6, %v11297_v62  ;;  %16677 = vmatprep.subr.msk.bf16.mxu0 %vm975_vm0, %v19581_v11  ;;  %v11309_v39 = vor.u32 %v11307_v54, %v11297_v62  ;;  %v11119_v42 = vld [vmem:[#allocation3 + $0x8] sm:$0xff]  ;;  %v19619_v62 = vld [vmem:[%s25685_s13 + $0x148] ss:$12 sps:$4 sm:$0xff]   ;;  %v19617_v60 = vld [vmem:[%s25685_s13 + $0x144] ss:$12 sps:$4 sm:$0xff]  }
 0x99f   : > { %11116 = vst [vmem:[#allocation3 + $0xf0] sm:$0xff] %v24239_v8  ;;  %16655 = vmatprep.mubr.msk.bf16.mxu0 %vm11086_vm13, %v11298_v44  ;;  %v11145_v36 = vld [vmem:[#allocation3 + $0xd8] sm:$0xff]  ;;  %v11826_v25 = vpack.c.bf16 %v24239_v8, %v24236_v2  ;;  %v11317_v47 = vor.u32 %v11315_v61, %v11305_v31  ;;  %v11169_v56 = vpack.c.bf16 %v24119_v16, %v11119_v42  ;;  %v19614_v6 = vld [vmem:[%s25685_s13 + $0x130] ss:$12 sps:$4 sm:$0xff]   ;;  %v19642_v8 = vld [vmem:[%s25685_s13 + $0x1d4] ss:$12 sps:$4 sm:$0xff]  }
 0x9a0   : > { %11117 = vst.msk [vmem:[#allocation3 + $0xf8] sm:$0xff] %vm11086_vm13, %v11084_v0  ;;  %11536 = vmatmul.mubr.bf16.gmra.mrb[36].mxu0 %v11290_v34  ;;  %v24253_v43 = vpack.c.bf16 %v11145_v36, %v11143_v57  ;;  %v19612_v10 = vld [vmem:[%s25685_s13 + $0x12c] ss:$12 sps:$4 sm:$0xff]   ;;  %12748 = vmatprep.subr.bf16.mxu1 %v19614_v6  ;;  %v19589_v0 = vld [vmem:[%s25683_s11 + $0x134] ss:$8 sps:$4 sm:$0xff]  }
 0x9a1   : > { %11705 = vmatpush1.bf16.msra.mxu0 %v11683_v22  ;;  %12749 = vmatpush1.bf16.msra.mxu1 %v19612_v10  ;;  %v19623_v24 = vld [vmem:[%s25685_s13 + $0x160] ss:$12 sps:$4 sm:$0xff]   ;;  %v19621_v44 = vld [vmem:[%s25685_s13 + $0x15c] ss:$12 sps:$4 sm:$0xff]   ;;  %v19627_v22 = vld [vmem:[%s25685_s13 + $0x178] ss:$12 sps:$4 sm:$0xff]  }
 0x9a2   : > { %v11311_v35 = vshll.u32 %v24253_v43, 16  ;;  %12000 = vmatprep.subr.bf16.mxu0 %v19586_v38  ;;  %v11323_v53 = vshrl.u32 %v24253_v43, 16  ;;  %12750 = vmatprep.subr.bf16.mxu1 %v19619_v62  ;;  %v19587_v38 = vld [vmem:[%s25683_s11 + $0x130] ss:$8 sps:$4 sm:$0xff]   ;;  %v19592_v34 = vld [vmem:[%s25683_s11 + $0x144] ss:$8 sps:$4 sm:$0xff]  }
 0x9a3   : > { %v19590_v57 = vld [vmem:[%s25683_s11 + $0x140] ss:$8 sps:$4 sm:$0xff]   ;;  %v19595_v36 = vld [vmem:[%s25683_s11 + $0x154] ss:$8 sps:$4 sm:$0xff]   ;;  %v19634_v31 = vld [vmem:[%s25685_s13 + $0x1a4] ss:$12 sps:$4 sm:$0xff]  }
 0x9a4   : > { %v11313_v41 = vrot.slane %v11311_v35, 1  ;;  %v19636_v54 = vld [vmem:[%s25685_s13 + $0x1a8] ss:$12 sps:$4 sm:$0xff]   ;;  %v19593_v35 = vld [vmem:[%s25683_s11 + $0x150] ss:$8 sps:$4 sm:$0xff]  }
 0x9a5   : > { %v24261_v21 = vld [vmem:[#allocation3 + $0xe8] sm:$0xff]  ;;  %12751 = vmatpush1.bf16.msra.mxu1 %v19617_v60  ;;  %v11860_v60 = vrot.slane %v24198_v59, 1 }
 0x9a6   : > { %v11314_v51 = vsel %vm3428_vm8, %v11309_v39, %v11313_v41  ;;  %v11186_v15 = vld [vmem:[#allocation3 + $0xf0] sm:$0x7f]  ;;  %v11325_v40 = vor.u32 %v11323_v53, %v11313_v41  ;;  %12752 = vmatprep.subr.bf16.mxu1 %v19623_v24  ;;  %v19601_v41 = vld [vmem:[%s25683_s11 + $0x174] ss:$8 sps:$4 sm:$0xff]   ;;  %v19599_v32 = vld [vmem:[%s25683_s11 + $0x170] ss:$8 sps:$4 sm:$0xff]  }
 0x9a7   : > { %16656 = vmatprep.mubr.msk.bf16.mxu0 %vm11086_vm13, %v11314_v51  ;;  %v11187_v55 = vld [vmem:[#allocation3 + $0xf8] sm:$0x7f]  ;;  %v11209_v30 = vpack.c.bf16 %v11186_v15, %v24236_v2  ;;  %v11802_v61 = vld [vmem:[#allocation3 + $0x8] sm:$0xfc] }
 0x9a8   : > { %11546 = vmatmul.mubr.bf16.gmra.mrb[40].mxu0 %v11306_v20  ;;  %v11210_v5 = vpack.c.bf16 %v11187_v55, %v24261_v21  ;;  %v19596_v39 = vld [vmem:[%s25683_s11 + $0x160] ss:$8 sps:$4 sm:$0xff]   ;;  %v19604_v51 = vld [vmem:[%s25683_s11 + $0x184] ss:$8 sps:$4 sm:$0xff]   ;;  %v19607_v20 = vld [vmem:[%s25683_s11 + $0x194] ss:$8 sps:$4 sm:$0xff]  }
 0x9a9   : > { %v11319_v48 = vshll.u32 %v11209_v30, 16  ;;  %v11331_v1 = vshrl.u32 %v11209_v30, 16  ;;  %12753 = vmatpush1.bf16.msra.mxu1 %v19621_v44  ;;  %v19602_v15 = vld [vmem:[%s25683_s11 + $0x180] ss:$8 sps:$4 sm:$0xff]   ;;  %v19605_v55 = vld [vmem:[%s25683_s11 + $0x190] ss:$8 sps:$4 sm:$0xff]  }
 0x9aa   : > { %v11327_v13 = vshll.u32 %v11210_v5, 16  ;;  %v11334_v18 = vshrl.u32 %v11210_v5, 16  ;;  %12754 = vmatprep.subr.bf16.mxu1 %v19627_v22  ;;  %v19608_v30 = vld [vmem:[%s25683_s11 + $0x1a4] ss:$8 sps:$4 sm:$0x3f]   ;;  %v11864_v44 = vrot.slane %v24223_v37, 1 }
 0x9ab   : > { %v11321_v11 = vrot.slane %v11319_v48, 1  ;;  %v19610_v5 = vld [vmem:[%s25683_s11 + $0x1a0] ss:$8 sps:$4 sm:$0x3f]   ;;  %v19616_v10 = vld [vmem:[%s25685_s13 + $0x38] ss:$12 sps:$4 sm:$0xff]  }
 0x9ac   : > { %v11329_v46 = vrot.slane %v11327_v13, 1  ;;  %v11995_v48 = vsel %vm975_vm0, %v19610_v5, 0  ;;  %v11149_v53 = vld [vmem:[#allocation3 + $0xf8] sm:$0x3f]  ;;  %v19632_v22 = vld [vmem:[%s25685_s13 + $0x98] ss:$12 sps:$4 sm:$0xff]  }
 0x9ad   : > { %v11322_v52 = vsel %vm3428_vm8, %v11317_v47, %v11321_v11  ;;  %v11333_v50 = vor.u32 %v11331_v1, %v11321_v11  ;;  %12755 = vmatpush1.bf16.msra.mxu1 %v19625_v12  ;;  %v11183_v13 = vpack.c.bf16 %v11149_v53, %v24261_v21  ;;  %v11825_v11 = vpack.c.bf16 %v24119_v16, %v11802_v61  ;;  %v19611_v16 = vld [vmem:[%s25685_s13 + $0x8] ss:$12 sps:$4 sm:$0xff]   ;;  %v19656_v53 = vld [vmem:[%s25685_s13 + $0x220] ss:$12 sps:$4 sm:$0xff]  }
 0x9ae   : > { %v11330_v3 = vsel %vm3428_vm8, %v11325_v40, %v11329_v46  ;;  %v11336_v17 = vor.u32 %v11334_v18, %v11329_v46  ;;  %v11148_v40 = vld [vmem:[#allocation3 + $0xf0] sm:$0x3f]  ;;  %v11848_v46 = vrot.slane %v24131_v9, 1  ;;  %v11845_v1 = vrot.slane %v24121_v49, 1  ;;  %v19624_v24 = vld [vmem:[%s25685_s13 + $0x68] ss:$12 sps:$4 sm:$0xff]  }
 0x9af   : > { %16657 = vmatprep.mubr.msk.bf16.mxu0 %vm11086_vm13, %v11330_v3  ;;  %v11182_v18 = vpack.c.bf16 %v11148_v40, %v24236_v2  ;;  %v11847_v47 = vrot.slane %v11825_v11, 1  ;;  %v11801_v3 = vld [vmem:[#allocation3] sm:$0xfc]  ;;  %v11868_v12 = vrot.slane %v24253_v43, 1  ;;  %v19641_v2 = vld [vmem:[%s25685_s13 + $0xe0] ss:$12 sps:$4 sm:$0xff]  }
 0x9b0   : > { %11556 = vmatmul.mubr.bf16.gmra.mrb[44].mxu0 %v11322_v52  ;;  %v11824_v52 = vpack.c.bf16 %v24112_v27, %v11801_v3  ;;  %v19615_v27 = vld [vmem:[%s25685_s13 + $0x20] ss:$12 sps:$4 sm:$0xff]  }
 0x9b1   : > { %16658 = vmatprep.mubr.msk.bf16.mxu0 %vm11086_vm13, %v11336_v17  ;;  %v11849_v17 = vsel %vm6210_vm10, %v11847_v47, %v11848_v46  ;;  %v19657_v61 = vld [vmem:[%s25685_s13 + $0x234] ss:$12 sps:$4 sm:$0xff]   ;;  %v16779_v11 = vld [vmem:[%s25685_s13 + $0x24c] sm:$0x33] }
 0x9b2   : > { %v11844_v42 = vrot.slane %v11824_v52, 1  ;;  %v16818_v40 = vcombine.high %v16779_v11, %v16779_v11  ;;  %v12145_v47 = vld [vmem:[%s25684_s12] sm:$0x3]  ;;  %v25803_v3 = vld [vmem:[#allocation16_spill] sm:$0xff]  ;;  %v25804_v52 = vld [vmem:[#allocation17_spill] sm:$0xff] }
 0x9b8   : > { %11566 = vmatmul.mubr.bf16.gmra.mrb[48].mxu0 %v11333_v50  ;;  %v11852_v50 = vrot.slane %v24148_v28, 1 }
 0x9b9   : > { %16678 = vmatprep.mubr.msk.bf16.mxu0 %vm11086_vm13, %v11169_v56 }
 0x9ba   : > { %v11853_v56 = vsel %vm6210_vm10, %v11848_v46, %v11852_v50  ;;  %v16817_v46 = vcombine.low %v16779_v11, %v16779_v11 }
 0x9c0   : > { %11721 = vmatmul.mubr.bf16.vlgmr.msra.gmra.mrb[20].mxu0 %v11168_v26  ;;  %v19631_v26 = vld [vmem:[%s25685_s13 + $0x190] ss:$12 sps:$4 sm:$0xff]  }
 0x9c1   : > { %16679 = vmatprep.mubr.msk.bf16.mxu0 %vm11086_vm13, %v24131_v9  ;;  %12001 = vmatpush1.bf16.msra.mxu0 %v19584_v14  ;;  %v11846_v9 = vsel %vm6210_vm10, %v11844_v42, %v11845_v1 }
 0x9c2   : > { %12002 = vmatprep.subr.bf16.mxu0 %v19589_v0  ;;  %12756 = vmatprep.subr.bf16.mxu1 %v19631_v26  ;;  %v11804_v26 = vld [vmem:[#allocation3 + $0xf8] sm:$0xff] }
 0x9c3   : > { %12757 = vmatpush1.bf16.msra.mxu1 %v19629_v63  ;;  %v11869_v63 = vsel %vm6210_vm10, %v11864_v44, %v11868_v12 }
 0x9c4   : > { %12758 = vmatprep.subr.bf16.mxu1 %v19636_v54  ;;  %v11827_v54 = vpack.c.bf16 %v11804_v26, %v24261_v21 }
 0x9c5   : > { %12003 = vmatpush1.bf16.msra.mxu0 %v19587_v38 }
 0x9c6   : > { %12004 = vmatprep.subr.bf16.mxu0 %v19592_v34  ;;  %v11865_v34 = vsel %vm6210_vm10, %v11860_v60, %v11864_v44 }
 0x9c7   : > { %12759 = vmatpush1.bf16.msra.mxu1 %v19634_v31  ;;  %v11870_v31 = vrot.slane %v11826_v25, 1  ;;  %v19644_v25 = vld [vmem:[%s25685_s13 + $0x1d8] ss:$12 sps:$4 sm:$0xff]  }
 0x9c8   : > { %11731 = vmatmul.mubr.bf16.gmra.mrb[24].mxu0 %v24121_v49  ;;  %v11850_v49 = vrot.slane %v24128_v7, 1 }
 0x9c9   : > { %16680 = vmatprep.mubr.msk.bf16.mxu0 %vm11086_vm13, %v24148_v28  ;;  %12005 = vmatpush1.bf16.msra.mxu0 %v19590_v57  ;;  %v11856_v28 = vrot.slane %v24173_v29, 1  ;;  %v19637_v57 = vld [vmem:[%s25685_s13 + $0xc8] ss:$12 sps:$4 sm:$0xff]  }
 0x9ca   : > { %12006 = vmatprep.subr.bf16.mxu0 %v19595_v36  ;;  %v11851_v6 = vsel %vm6210_vm10, %v11845_v1, %v11850_v49  ;;  %v24531_v1 = vrot.slane %v12145_v47, %v25804_v52 }
 0x9cb   : > { %v11857_v62 = vsel %vm6210_vm10, %v11852_v50, %v11856_v28  ;;  %v11861_v0 = vsel %vm6210_vm10, %v11856_v28, %v11860_v60 }
 0x9cd   : > { %12007 = vmatpush1.bf16.msra.mxu0 %v19593_v35 }
 0x9ce   : > { %12008 = vmatprep.subr.bf16.mxu0 %v19598_v33 }
 0x9d0   : > { %11741 = vmatmul.mubr.bf16.gmra.mrb[28].mxu0 %v24128_v7  ;;  %v19620_v7 = vld [vmem:[%s25685_s13 + $0x50] ss:$12 sps:$4 sm:$0xff]  }
 0x9d1   : > { %16681 = vmatprep.mubr.msk.bf16.mxu0 %vm11086_vm13, %v24173_v29  ;;  %12009 = vmatpush1.bf16.msra.mxu0 %v19596_v39  ;;  %v11854_v29 = vrot.slane %v24145_v45, 1  ;;  %v19640_v39 = vld [vmem:[%s25685_s13 + $0x1c0] ss:$12 sps:$4 sm:$0xff]  }
 0x9d2   : > { %12010 = vmatprep.subr.bf16.mxu0 %v19601_v41  ;;  %12760 = vmatprep.subr.bf16.mxu1 %v19640_v39  ;;  %v19645_v41 = vld [vmem:[%s25685_s13 + $0xf8] ss:$12 sps:$4 sm:$0xff]  }
 0x9d3   : > { %v11855_v14 = vsel %vm6210_vm10, %v11850_v49, %v11854_v29 }
 0x9d5   : > { %12011 = vmatpush1.bf16.msra.mxu0 %v19599_v32  ;;  %v19646_v32 = vld [vmem:[%s25685_s13 + $0x1ec] ss:$12 sps:$4 sm:$0xff]  }
 0x9d6   : > { %12012 = vmatprep.subr.bf16.mxu0 %v19604_v51  ;;  %v19648_v51 = vld [vmem:[%s25685_s13 + $0x1f0] ss:$12 sps:$4 sm:$0xff]  }
 0x9d8   : > { %11751 = vmatmul.mubr.bf16.gmra.mrb[32].mxu0 %v24145_v45  ;;  %v19628_v45 = vld [vmem:[%s25685_s13 + $0x80] ss:$12 sps:$4 sm:$0xff]  }
 0x9d9   : > { %16682 = vmatprep.mubr.msk.bf16.mxu0 %vm11086_vm13, %v24198_v59  ;;  %12013 = vmatpush1.bf16.msra.mxu0 %v19602_v15  ;;  %v11858_v59 = vrot.slane %v24170_v19, 1  ;;  %v19649_v15 = vld [vmem:[%s25685_s13 + $0x110] ss:$12 sps:$4 sm:$0xff]  }
 0x9da   : > { %12014 = vmatprep.subr.bf16.mxu0 %v19607_v20  ;;  %v19652_v20 = vld [vmem:[%s25685_s13 + $0x208] ss:$12 sps:$4 sm:$0xff]  }
 0x9db   : > { %v11859_v38 = vsel %vm6210_vm10, %v11854_v29, %v11858_v59 }
 0x9dd   : > { %12015 = vmatpush1.bf16.msra.mxu0 %v19605_v55  ;;  %v19653_v55 = vld [vmem:[%s25685_s13 + $0x128] ss:$0 sps:$4 sm:$0x33]  }
 0x9de   : > { %16722 = vmatprep.subr.msk.bf16.mxu0 %vm975_vm0, %v19608_v30  ;;  %v19650_v30 = vld [vmem:[%s25685_s13 + $0x204] ss:$12 sps:$4 sm:$0xff]   ;;  %v13183_v5 = vsel %vm12738_vm14, %v19653_v55, 0 }
 0x9e0   : > { %11761 = vmatmul.mubr.bf16.gmra.mrb[36].mxu0 %v24170_v19  ;;  %v19633_v19 = vld [vmem:[%s25685_s13 + $0xb0] ss:$12 sps:$4 sm:$0xff]  }
 0x9e1   : > { %16683 = vmatprep.mubr.msk.bf16.mxu0 %vm11086_vm13, %v24223_v37  ;;  %12017 = vmatpush1.bf16.msra.mxu0 %v11995_v48  ;;  %v11862_v37 = vrot.slane %v24195_v58, 1  ;;  %v19654_v48 = vld [vmem:[%s25685_s13 + $0x21c] ss:$12 sps:$4 sm:$0xff]  }
 0x9e2   : > { %13298 = vmatprep.subr.bf16.mxu0 %v25776_v4 }
 0x9e3   : > { %v11863_v36 = vsel %vm6210_vm10, %v11858_v59, %v11862_v37 }
 0x9e8   : > { %11771 = vmatmul.mubr.bf16.gmra.mrb[40].mxu0 %v24195_v58  ;;  %v11866_v58 = vrot.slane %v24220_v23, 1 }
 0x9e9   : > { %16684 = vmatprep.mubr.msk.bf16.mxu0 %vm11086_vm13, %v24253_v43  ;;  %v11872_v43 = vrot.slane %v11827_v54, 1 }
 0x9ea   : > { %v11867_v35 = vsel %vm6210_vm10, %v11862_v37, %v11866_v58  ;;  %v11871_v21 = vsel %vm6210_vm10, %v11866_v58, %v11870_v31 }
 0x9eb   : > { %v11873_v33 = vsel %vm6210_vm10, %v11868_v12, %v11872_v43  ;;  %v19661_v12 = vld [vmem:[%s25685_s13 + $0x260] ss:$12 sps:$4 sm:$0xff]  }
 0x9f0   : > { %11781 = vmatmul.mubr.bf16.gmra.mrb[44].mxu0 %v24220_v23  ;;  %v19638_v23 = vld [vmem:[%s25685_s13 + $0x1bc] ss:$12 sps:$4 sm:$0xff]  }
 0x9f1   : > { %16685 = vmatprep.mubr.msk.bf16.mxu0 %vm11086_vm13, %v11183_v13  ;;  %12761 = vmatpush1.bf16.msra.mxu1 %v19638_v23  ;;  %v19659_v13 = vld [vmem:[%s25685_s13 + $0x238] ss:$12 sps:$4 sm:$0xff]  }
 0x9f2   : > { %12762 = vmatprep.subr.bf16.mxu1 %v19644_v25 }
 0x9f5   : > { %12763 = vmatpush1.bf16.msra.mxu1 %v19642_v8 }
 0x9f6   : > { %12764 = vmatprep.subr.bf16.mxu1 %v19648_v51  ;;  %v19664_v51 = vld [vmem:[%s25685_s13 + $0x290] ss:$12 sps:$4 sm:$0xff]  }
 0x9f8   : > { %11791 = vmatmul.mubr.bf16.gmra.mrb[48].mxu0 %v11182_v18  ;;  %v12740_v18 = vsel %vm12738_vm14, %v16817_v46, 0 }
 0x9f9   : > { %16723 = vmatprep.mubr.msk.bf16.mxu0 %vm11086_vm13, %v11849_v17  ;;  %12765 = vmatpush1.bf16.msra.mxu1 %v19646_v32  ;;  %v24528_v17 = vrot.slane %v12145_v47, %v25803_v3 }
 0x9fa   : > { %12766 = vmatprep.subr.bf16.mxu1 %v19652_v20 }
 0x9fd   : > { %12767 = vmatpush1.bf16.msra.mxu1 %v19650_v30 }
 0x9fe   : > { %12768 = vmatprep.subr.bf16.mxu1 %v19656_v53 }
 0xa00   : > { %12033 = vmatmul.mubr.bf16.vlgmr.msra.gmra.mrb[20].mxu0 %v11846_v9 }
 0xa01   : > { %16724 = vmatprep.mubr.msk.bf16.mxu0 %vm11086_vm13, %v11853_v56  ;;  %13299 = vmatpush1.bf16.msra.mxu0 %v19611_v16 }
 0xa02   : > { %13300 = vmatprep.subr.bf16.mxu0 %v25776_v4  ;;  %12769 = vmatpush1.bf16.msra.mxu1 %v19654_v48 }
 0xa03   : > { %12770 = vmatprep.subr.bf16.mxu1 %v19659_v13 }
 0xa05   : > { %13301 = vmatpush1.bf16.msra.mxu0 %v19615_v27 }
 0xa06   : > { %13302 = vmatprep.subr.bf16.mxu0 %v25776_v4  ;;  %12771 = vmatpush1.bf16.msra.mxu1 %v19657_v61 }
 0xa07   : > { %16820 = vmatprep.subr.msk.bf16.mxu1 %vm12738_vm14, %v16818_v40 }
 0xa08   : > { %12043 = vmatmul.mubr.bf16.gmra.mrb[24].mxu0 %v11851_v6 }
 0xa09   : > { %16725 = vmatprep.mubr.msk.bf16.mxu0 %vm11086_vm13, %v11857_v62  ;;  %13303 = vmatpush1.bf16.msra.mxu0 %v19616_v10 }
 0xa0a   : > { %13304 = vmatprep.subr.bf16.mxu0 %v25776_v4  ;;  %12773 = vmatpush1.bf16.msra.mxu1 %v12740_v18  ;;  %v19666_v18 = vld [vmem:[%s25685_s13 + $0x2a8] ss:$12 sps:$4 sm:$0xff]  }
 0xa0b   : > { %12861 = vmatprep.subr.bf16.mxu1 %v25776_v4 }
 0xa0d   : > { %13305 = vmatpush1.bf16.msra.mxu0 %v19620_v7 }
 0xa0e   : > { %13306 = vmatprep.subr.bf16.mxu0 %v25776_v4 }
 0xa10   : > { %12053 = vmatmul.mubr.bf16.gmra.mrb[28].mxu0 %v11855_v14 }
 0xa11   : > { %16726 = vmatprep.mubr.msk.bf16.mxu0 %vm11086_vm13, %v11861_v0  ;;  %13307 = vmatpush1.bf16.msra.mxu0 %v19624_v24 }
 0xa12   : > { %13308 = vmatprep.subr.bf16.mxu0 %v25776_v4 }
 0xa15   : > { %13309 = vmatpush1.bf16.msra.mxu0 %v19628_v45 }
 0xa16   : > { %13310 = vmatprep.subr.bf16.mxu0 %v25776_v4 }
 0xa18   : > { %12063 = vmatmul.mubr.bf16.gmra.mrb[32].mxu0 %v11859_v38 }
 0xa19   : > { %16727 = vmatprep.mubr.msk.bf16.mxu0 %vm11086_vm13, %v11865_v34  ;;  %13311 = vmatpush1.bf16.msra.mxu0 %v19632_v22 }
 0xa1a   : > { %13312 = vmatprep.subr.bf16.mxu0 %v25776_v4 }
 0xa1d   : > { %13313 = vmatpush1.bf16.msra.mxu0 %v19633_v19 }
 0xa1e   : > { %13314 = vmatprep.subr.bf16.mxu0 %v25776_v4 }
 0xa20   : > { %12073 = vmatmul.mubr.bf16.gmra.mrb[36].mxu0 %v11863_v36 }
 0xa21   : > { %16728 = vmatprep.mubr.msk.bf16.mxu0 %vm11086_vm13, %v11869_v63  ;;  %13315 = vmatpush1.bf16.msra.mxu0 %v19637_v57 }
 0xa22   : > { %13316 = vmatprep.subr.bf16.mxu0 %v25776_v4 }
 0xa25   : > { %13317 = vmatpush1.bf16.msra.mxu0 %v19641_v2 }
 0xa26   : > { %13318 = vmatprep.subr.bf16.mxu0 %v25776_v4 }
 0xa28   : > { %12083 = vmatmul.mubr.bf16.gmra.mrb[40].mxu0 %v11867_v35  ;;  %v19662_v35 = vld [vmem:[%s25685_s13 + $0x278] ss:$12 sps:$4 sm:$0xff]  }
 0xa29   : > { %16729 = vmatprep.mubr.msk.bf16.mxu0 %vm11086_vm13, %v11873_v33  ;;  %13319 = vmatpush1.bf16.msra.mxu0 %v19645_v41 }
 0xa2a   : > { %13320 = vmatprep.subr.bf16.mxu0 %v25776_v4 }
 0xa2d   : > { %13321 = vmatpush1.bf16.msra.mxu0 %v19649_v15 }
 0xa2e   : > { %13322 = vmatprep.subr.bf16.mxu0 %v25776_v4 }
 0xa30   : > { %12093 = vmatmul.mubr.bf16.gmra.mrb[44].mxu0 %v11871_v21 }
 0xa31   : > { %16730 = vmatprep.mubr.msk.bf16.mxu0 %vm11086_vm13, %v11872_v43  ;;  %13323 = vmatpush1.bf16.msra.mxu0 %v13183_v5 }
 0xa32   : > { %13854 = vmatprep.subr.bf16.mxu0 %v25776_v4 }
 0xa38   : > { %12103 = vmatmul.mubr.bf16.gmra.mrb[48].mxu0 %v11870_v31 }
 0xad3   : > { %v12034_v50 = vpop.f32.mrb[20].mxu0 }
 0xad4   : > { %v12157_v42 = vadd.f32 %v24528_v17, %v12034_v50  ;;  %v12036_v16 = vpop.f32.mrb[21].mxu0 }
 0xad5   : > { %v12158_v9 = vadd.f32 %v24531_v1, %v12036_v16  ;;  %v12038_v56 = vpop.f32.mrb[22].mxu0 }
 0xad6   : > { %12189 = vst [vmem:[#allocation4] sm:$0xff] %v12157_v42  ;;  %v24536_v27 = vadd.f32 %v24528_v17, %v12038_v56  ;;  %v12040_v49 = vpop.f32.mrb[23].mxu0 }
 0xad7   : > { %12191 = vst.msk [vmem:[#allocation4 + $0x8] sm:$0xff] %vm12190_vm15, %v12158_v9  ;;  %v12160_v28 = vadd.f32 %v24531_v1, %v12040_v49 }
 0xad8   : > { %v24541_v10 = vpack.c.bf16 %v24536_v27, %v12157_v42  ;;  %v19663_v42 = vld [vmem:[%s25685_s13 + $0x134] ss:$12 sps:$4 sm:$0xff]  }
 0xad9   : > { %12193 = vst.msk [vmem:[#allocation4 + $0x18] sm:$0xff] %vm12190_vm15, %v12160_v28 }
 0xadb   : > { %v12044_v6 = vpop.f32.mrb[24].mxu0 }
 0xadc   : > { %v12161_v62 = vadd.f32 %v24528_v17, %v12044_v6  ;;  %v12046_v7 = vpop.f32.mrb[25].mxu0 }
 0xadd   : > { %v12162_v29 = vadd.f32 %v24531_v1, %v12046_v7  ;;  %v12048_v60 = vpop.f32.mrb[26].mxu0  ;;  %v12321_v24 = vld [vmem:[#allocation4] sm:$0xfe] }
 0xade   : > { %v12163_v14 = vadd.f32 %v24528_v17, %v12048_v60  ;;  %v12050_v0 = vpop.f32.mrb[27].mxu0  ;;  %v12224_v59 = vld [vmem:[#allocation4 + $0x8] sm:$0xff]  ;;  %v12376_v34 = vpack.c.bf16 %v24536_v27, %v12321_v24 }
 0xadf   : > { %12195 = vst.msk [vmem:[#allocation4 + $0x28] sm:$0xff] %vm12190_vm15, %v12162_v29  ;;  %v12164_v45 = vadd.f32 %v24531_v1, %v12050_v0  ;;  %v12322_v38 = vld [vmem:[#allocation4 + $0x8] sm:$0xfe]  ;;  %v19668_v29 = vld [vmem:[%s25685_s13 + $0x2c0] ss:$12 sps:$4 sm:$0xff]  }
 0xae0   : > { %v24549_v44 = vld [vmem:[#allocation4 + $0x18] sm:$0xff]  ;;  %v24551_v22 = vpack.c.bf16 %v12163_v14, %v12161_v62  ;;  %v12383_v63 = vshll.u32 %v12376_v34, 16  ;;  %v12381_v15 = vshrl.u32 %v12376_v34, 16 }
 0xae1   : > { %12197 = vst.msk [vmem:[#allocation4 + $0x38] sm:$0xff] %vm12190_vm15, %v12164_v45  ;;  %v24556_v19 = vpack.c.bf16 %v24549_v44, %v12224_v59  ;;  %v12377_v37 = vpack.c.bf16 %v24549_v44, %v12322_v38  ;;  %v19665_v60 = vld [vmem:[%s25685_s13 + $0x14c] ss:$12 sps:$4 sm:$0xff]  }
 0xae2   : > { %v12385_v2 = vrot.slane %v12383_v63, 1  ;;  %v12388_v8 = vshll.u32 %v24551_v22, 16  ;;  %v12404_v38 = vshrl.u32 %v24551_v22, 16 }
 0xae3   : > { %v12054_v26 = vpop.f32.mrb[28].mxu0  ;;  %16885 = vmatprep.mubr.msk.bf16.mxu0 %vm12190_vm15, %v24556_v19  ;;  %v12395_v43 = vshll.u32 %v12377_v37, 16  ;;  %v12393_v55 = vshrl.u32 %v12377_v37, 16 }
 0xae4   : > { %v12165_v57 = vadd.f32 %v24528_v17, %v12054_v26  ;;  %v12056_v36 = vpop.f32.mrb[29].mxu0  ;;  %13331 = vmatmul.mubr.bf16.vlgmr.msra.gmra.mrb[52].mxu0 %v24541_v10  ;;  %v12386_v53 = vor.u32 %v12385_v2, %v12381_v15  ;;  %v12390_v13 = vrot.slane %v12388_v8, 1 }
 0xae5   : > { %v12166_v54 = vadd.f32 %v24531_v1, %v12056_v36  ;;  %v12058_v58 = vpop.f32.mrb[30].mxu0  ;;  %13855 = vmatpush1.bf16.msra.mxu0 %v19661_v12  ;;  %v12397_v32 = vrot.slane %v12395_v43, 1  ;;  %v19670_v36 = vld [vmem:[%s25685_s13 + $0x2d8] ss:$12 sps:$4 sm:$0xff]  }
 0xae6   : > { %v12167_v33 = vadd.f32 %v24528_v17, %v12058_v58  ;;  %v12060_v31 = vpop.f32.mrb[31].mxu0  ;;  %13856 = vmatprep.subr.bf16.mxu0 %v25776_v4  ;;  %v12228_v23 = vld [vmem:[#allocation4 + $0x28] sm:$0xff]  ;;  %v24606_v56 = vsel %vm3428_vm8, %v12386_v53, %v12390_v13  ;;  %v12406_v58 = vor.u32 %v12404_v38, %v12390_v13  ;;  %v19667_v43 = vld [vmem:[%s25685_s13 + $0x164] ss:$12 sps:$4 sm:$0xff]  }
 0xae7   : > { %12199 = vst.msk [vmem:[#allocation4 + $0x48] sm:$0xff] %vm12190_vm15, %v12166_v54  ;;  %v12168_v21 = vadd.f32 %v24531_v1, %v12060_v31  ;;  %v12398_v40 = vor.u32 %v12397_v32, %v12393_v55  ;;  %v19671_v32 = vld [vmem:[%s25685_s13 + $0x2f0] ss:$12 sps:$4 sm:$0xff]  }
 0xae8   : > { %v12230_v39 = vld [vmem:[#allocation4 + $0x38] sm:$0xff]  ;;  %v24575_v25 = vpack.c.bf16 %v12167_v33, %v12165_v57 }
 0xae9   : > { %12201 = vst.msk [vmem:[#allocation4 + $0x58] sm:$0xff] %vm12190_vm15, %v12168_v21  ;;  %v24578_v41 = vpack.c.bf16 %v12230_v39, %v12228_v23  ;;  %13857 = vmatpush1.bf16.msra.mxu0 %v19662_v35 }
 0xaea   : > { %13858 = vmatprep.subr.bf16.mxu0 %v25776_v4  ;;  %v12408_v6 = vshll.u32 %v24575_v25, 16 }
 0xaeb   : > { %v12064_v20 = vpop.f32.mrb[32].mxu0  ;;  %16886 = vmatprep.mubr.msk.bf16.mxu0 %vm12190_vm15, %v24578_v41  ;;  %v12400_v30 = vshll.u32 %v24578_v41, 16  ;;  %v12412_v14 = vshrl.u32 %v24578_v41, 16 }
 0xaec   : > { %v12169_v5 = vadd.f32 %v24528_v17, %v12064_v20  ;;  %v12066_v48 = vpop.f32.mrb[33].mxu0  ;;  %13339 = vmatmul.mubr.bf16.gmra.mrb[56].mxu0 %v24551_v22  ;;  %v12410_v34 = vrot.slane %v12408_v6, 1 }
 0xaed   : > { %v12170_v61 = vadd.f32 %v24531_v1, %v12066_v48  ;;  %v12068_v11 = vpop.f32.mrb[34].mxu0  ;;  %v12402_v46 = vrot.slane %v12400_v30, 1  ;;  %13859 = vmatpush1.bf16.msra.mxu0 %v19664_v51  ;;  %v19669_v51 = vld [vmem:[%s25685_s13 + $0x17c] ss:$12 sps:$4 sm:$0xff]   ;;  %v12420_v48 = vshrl.u32 %v24575_v25, 16 }
 0xaee   : > { %v12171_v47 = vadd.f32 %v24528_v17, %v12068_v11  ;;  %v12070_v50 = vpop.f32.mrb[35].mxu0  ;;  %13860 = vmatprep.subr.bf16.mxu0 %v25776_v4  ;;  %v12232_v49 = vld [vmem:[#allocation4 + $0x48] sm:$0xff]  ;;  %v24648_v31 = vsel %vm3428_vm8, %v12406_v58, %v12410_v34 }
 0xaef   : > { %12203 = vst.msk [vmem:[#allocation4 + $0x68] sm:$0xff] %vm12190_vm15, %v12170_v61  ;;  %v12172_v16 = vadd.f32 %v24531_v1, %v12070_v50  ;;  %v24601_v9 = vsel %vm3428_vm8, %v12398_v40, %v12402_v46  ;;  %v12414_v26 = vor.u32 %v12412_v14, %v12402_v46  ;;  %v19673_v46 = vld [vmem:[%s25685_s13 + $0x308] ss:$12 sps:$4 sm:$0xff]   ;;  %v12422_v50 = vor.u32 %v12420_v48, %v12410_v34 }
 0xaf0   : > { %16821 = vmatprep.mubr.msk.bf16.mxu1 %vm12190_vm15, %v24601_v9  ;;  %v12234_v28 = vld [vmem:[#allocation4 + $0x58] sm:$0xff]  ;;  %v24609_v62 = vpack.c.bf16 %v12171_v47, %v12169_v5 }
 0xaf1   : > { %12205 = vst.msk [vmem:[#allocation4 + $0x78] sm:$0xff] %vm12190_vm15, %v12172_v16  ;;  %12781 = vmatmul.mubr.bf16.vlgmr.msra.gmra.mrb[200].mxu1 %v24606_v56  ;;  %v24613_v7 = vpack.c.bf16 %v12234_v28, %v12232_v49  ;;  %13861 = vmatpush1.bf16.msra.mxu0 %v19666_v18 }
 0xaf2   : > { %12862 = vmatpush1.bf16.msra.mxu1 %v19663_v42  ;;  %13862 = vmatprep.subr.bf16.mxu0 %v25776_v4  ;;  %v12424_v39 = vshll.u32 %v24609_v62, 16  ;;  %v19672_v42 = vld [vmem:[%s25685_s13 + $0x194] ss:$12 sps:$4 sm:$0xff]  }
 0xaf3   : > { %v12074_v24 = vpop.f32.mrb[36].mxu0  ;;  %16887 = vmatprep.mubr.msk.bf16.mxu0 %vm12190_vm15, %v24613_v7  ;;  %v12416_v0 = vshll.u32 %v24613_v7, 16  ;;  %12863 = vmatprep.subr.bf16.mxu1 %v25776_v4  ;;  %v12428_v20 = vshrl.u32 %v24613_v7, 16 }
 0xaf4   : > { %v12173_v45 = vadd.f32 %v24528_v17, %v12074_v24  ;;  %v12076_v59 = vpop.f32.mrb[37].mxu0  ;;  %13347 = vmatmul.mubr.bf16.gmra.mrb[60].mxu0 %v24575_v25  ;;  %v12426_v53 = vrot.slane %v12424_v39, 1  ;;  %v19676_v39 = vld [vmem:[%s25685_s13 + $0x1c4] ss:$12 sps:$4 sm:$0xff]  }
 0xaf5   : > { %v12174_v37 = vadd.f32 %v24531_v1, %v12076_v59  ;;  %v12078_v12 = vpop.f32.mrb[38].mxu0  ;;  %v12418_v57 = vrot.slane %v12416_v0, 1  ;;  %13863 = vmatpush1.bf16.msra.mxu0 %v19668_v29  ;;  %v19675_v0 = vld [vmem:[%s25685_s13 + $0x320] ss:$12 sps:$4 sm:$0xff]  }
 0xaf6   : > { %v12175_v63 = vadd.f32 %v24528_v17, %v12078_v12  ;;  %v12080_v54 = vpop.f32.mrb[39].mxu0  ;;  %12864 = vmatpush1.bf16.msra.mxu1 %v19665_v60  ;;  %13864 = vmatprep.subr.bf16.mxu0 %v25776_v4  ;;  %v12236_v21 = vld [vmem:[#allocation4 + $0x68] sm:$0xff]  ;;  %v24690_v28 = vsel %vm3428_vm8, %v12422_v50, %v12426_v53 }
 0xaf7   : > { %12207 = vst.msk [vmem:[#allocation4 + $0x88] sm:$0xff] %vm12190_vm15, %v12174_v37  ;;  %v12176_v35 = vadd.f32 %v24531_v1, %v12080_v54  ;;  %v24642_v33 = vsel %vm3428_vm8, %v12414_v26, %v12418_v57  ;;  %12865 = vmatprep.subr.bf16.mxu1 %v25776_v4  ;;  %v12430_v11 = vor.u32 %v12428_v20, %v12418_v57  ;;  %v12436_v26 = vshrl.u32 %v24609_v62, 16 }
 0xaf8   : > { %16822 = vmatprep.mubr.msk.bf16.mxu1 %vm12190_vm15, %v24642_v33  ;;  %v12238_v23 = vld [vmem:[#allocation4 + $0x78] sm:$0xff]  ;;  %v24651_v2 = vpack.c.bf16 %v12175_v63, %v12173_v45 }
 0xaf9   : > { %12209 = vst.msk [vmem:[#allocation4 + $0x98] sm:$0xff] %vm12190_vm15, %v12176_v35  ;;  %12791 = vmatmul.mubr.bf16.gmra.mrb[204].mxu1 %v24648_v31  ;;  %v24655_v8 = vpack.c.bf16 %v12238_v23, %v12236_v21  ;;  %13865 = vmatpush1.bf16.msra.mxu0 %v19670_v36  ;;  %v19674_v45 = vld [vmem:[%s25685_s13 + $0x1ac] ss:$12 sps:$4 sm:$0xff]   ;;  %v12438_v23 = vor.u32 %v12436_v26, %v12426_v53  ;;  %v19679_v53 = vld [vmem:[%s25685_s13 + $0x350] ss:$12 sps:$4 sm:$0xff]  }
 0xafa   : > { %12866 = vmatpush1.bf16.msra.mxu1 %v19667_v43  ;;  %13866 = vmatprep.subr.bf16.mxu0 %v25776_v4  ;;  %v12440_v60 = vshll.u32 %v24651_v2, 16  ;;  %v19677_v43 = vld [vmem:[%s25685_s13 + $0x338] ss:$12 sps:$4 sm:$0xff]  }
 0xafb   : > { %v12084_v15 = vpop.f32.mrb[40].mxu0  ;;  %16888 = vmatprep.mubr.msk.bf16.mxu0 %vm12190_vm15, %v24655_v8  ;;  %v12432_v55 = vshll.u32 %v24655_v8, 16  ;;  %12867 = vmatprep.subr.bf16.mxu1 %v25776_v4  ;;  %v12444_v38 = vshrl.u32 %v24655_v8, 16 }
 0xafc   : > { %v12177_v30 = vadd.f32 %v24528_v17, %v12084_v15  ;;  %v12086_v5 = vpop.f32.mrb[41].mxu0  ;;  %13355 = vmatmul.mubr.bf16.gmra.mrb[64].mxu0 %v24609_v62  ;;  %v12442_v57 = vrot.slane %v12440_v60, 1  ;;  %v19680_v60 = vld [vmem:[%s25685_s13 + $0x368] ss:$12 sps:$4 sm:$0xff]  }
 0xafd   : > { %v12178_v13 = vadd.f32 %v24531_v1, %v12086_v5  ;;  %v12088_v61 = vpop.f32.mrb[42].mxu0  ;;  %v12434_v40 = vrot.slane %v12432_v55, 1  ;;  %13867 = vmatpush1.bf16.msra.mxu0 %v19671_v32 }
 0xafe   : > { %v12179_v18 = vadd.f32 %v24528_v17, %v12088_v61  ;;  %v12090_v47 = vpop.f32.mrb[43].mxu0  ;;  %12868 = vmatpush1.bf16.msra.mxu1 %v19669_v51  ;;  %13868 = vmatprep.subr.bf16.mxu0 %v25776_v4  ;;  %v12240_v6 = vld [vmem:[#allocation4 + $0x88] sm:$0xff]  ;;  %v24732_v15 = vsel %vm3428_vm8, %v12438_v23, %v12442_v57 }
 0xaff   : > { %12211 = vst.msk [vmem:[#allocation4 + $0xa8] sm:$0xff] %vm12190_vm15, %v12178_v13  ;;  %v12180_v16 = vadd.f32 %v24531_v1, %v12090_v47  ;;  %v24684_v49 = vsel %vm3428_vm8, %v12430_v11, %v12434_v40  ;;  %12869 = vmatprep.subr.bf16.mxu1 %v25776_v4  ;;  %v12446_v54 = vor.u32 %v12444_v38, %v12434_v40  ;;  %v19678_v13 = vld [vmem:[%s25685_s13 + $0x1dc] ss:$12 sps:$4 sm:$0xff]   ;;  %v12452_v47 = vshrl.u32 %v24651_v2, 16  ;;  %v19681_v38 = vld [vmem:[%s25685_s13 + $0x1f4] ss:$12 sps:$4 sm:$0xff]  }
 0xb00   : > { %16823 = vmatprep.mubr.msk.bf16.mxu1 %vm12190_vm15, %v24684_v49  ;;  %v12242_v29 = vld [vmem:[#allocation4 + $0x98] sm:$0xff]  ;;  %v24693_v24 = vpack.c.bf16 %v12179_v18, %v12177_v30 }
 0xb01   : > { %12213 = vst.msk [vmem:[#allocation4 + $0xb8] sm:$0xff] %vm12190_vm15, %v12180_v16  ;;  %12801 = vmatmul.mubr.bf16.gmra.mrb[208].mxu1 %v24690_v28  ;;  %v24697_v14 = vpack.c.bf16 %v12242_v29, %v12240_v6  ;;  %13869 = vmatpush1.bf16.msra.mxu0 %v19673_v46 }
 0xb02   : > { %12870 = vmatpush1.bf16.msra.mxu1 %v19672_v42  ;;  %13870 = vmatprep.subr.bf16.mxu0 %v25776_v4  ;;  %v12456_v30 = vshll.u32 %v24693_v24, 16 }
 0xb03   : > { %v12094_v59 = vpop.f32.mrb[44].mxu0  ;;  %16889 = vmatprep.mubr.msk.bf16.mxu0 %vm12190_vm15, %v24697_v14  ;;  %v12448_v34 = vshll.u32 %v24697_v14, 16  ;;  %12871 = vmatprep.subr.bf16.mxu1 %v25776_v4  ;;  %v12460_v11 = vshrl.u32 %v24697_v14, 16 }
 0xb04   : > { %v12181_v37 = vadd.f32 %v24528_v17, %v12094_v59  ;;  %v12096_v12 = vpop.f32.mrb[45].mxu0  ;;  %13363 = vmatmul.mubr.bf16.gmra.mrb[68].mxu0 %v24651_v2  ;;  %v12458_v50 = vrot.slane %v12456_v30, 1  ;;  %v12454_v59 = vor.u32 %v12452_v47, %v12442_v57  ;;  %v19684_v30 = vld [vmem:[%s25685_s13 + $0x224] ss:$12 sps:$4 sm:$0xff]  }
 0xb05   : > { %v12182_v36 = vadd.f32 %v24531_v1, %v12096_v12  ;;  %v12098_v63 = vpop.f32.mrb[46].mxu0  ;;  %v12450_v58 = vrot.slane %v12448_v34, 1  ;;  %13871 = vmatpush1.bf16.msra.mxu0 %v19675_v0  ;;  %v19682_v34 = vld [vmem:[%s25685_s13 + $0x380] ss:$0 sps:$4 sm:$0x33]  }
 0xb06   : > { %v12183_v35 = vadd.f32 %v24528_v17, %v12098_v63  ;;  %v12100_v21 = vpop.f32.mrb[47].mxu0  ;;  %12872 = vmatpush1.bf16.msra.mxu1 %v19674_v45  ;;  %13872 = vmatprep.subr.bf16.mxu0 %v25776_v4  ;;  %v12244_v20 = vld [vmem:[#allocation4 + $0xa8] sm:$0xff]  ;;  %v13739_v63 = vsel %vm12738_vm14, %v19682_v34, 0  ;;  %v19686_v34 = vld [vmem:[%s25685_s13 + $0x254] ss:$0 sps:$4 sm:$0x33]  }
 0xb07   : > { %12215 = vst.msk [vmem:[#allocation4 + $0xc8] sm:$0xff] %vm12190_vm15, %v12182_v36  ;;  %v12184_v32 = vadd.f32 %v24531_v1, %v12100_v21  ;;  %v24726_v51 = vsel %vm3428_vm8, %v12446_v54, %v12450_v58  ;;  %12873 = vmatprep.subr.bf16.mxu1 %v25776_v4  ;;  %v12462_v6 = vor.u32 %v12460_v11, %v12450_v58  ;;  %v19683_v54 = vld [vmem:[%s25685_s13 + $0x20c] ss:$12 sps:$4 sm:$0xff]  }
 0xb08   : > { %16824 = vmatprep.mubr.msk.bf16.mxu1 %vm12190_vm15, %v24726_v51  ;;  %v12246_v55 = vld [vmem:[#allocation4 + $0xb8] sm:$0xff]  ;;  %v24735_v5 = vpack.c.bf16 %v12183_v35, %v12181_v37  ;;  %v12468_v35 = vshrl.u32 %v24693_v24, 16 }
 0xb09   : > { %12217 = vst.msk [vmem:[#allocation4 + $0xd8] sm:$0xff] %vm12190_vm15, %v12184_v32  ;;  %12811 = vmatmul.mubr.bf16.gmra.mrb[212].mxu1 %v24732_v15  ;;  %v24739_v48 = vpack.c.bf16 %v12246_v55, %v12244_v20  ;;  %13873 = vmatpush1.bf16.msra.mxu0 %v19677_v43  ;;  %v13396_v32 = vld [vmem:[#allocation4 + $0x8] sm:$0xfc] }
 0xb0a   : > { %12874 = vmatpush1.bf16.msra.mxu1 %v19676_v39  ;;  %13874 = vmatprep.subr.bf16.mxu0 %v25776_v4  ;;  %v12472_v36 = vshll.u32 %v24735_v5, 16  ;;  %v12470_v20 = vor.u32 %v12468_v35, %v12458_v50  ;;  %v13451_v55 = vpack.c.bf16 %v24549_v44, %v13396_v32  ;;  %v13471_v32 = vrot.slane %v24551_v22, 1 }
 0xb0b   : > { %v12104_v61 = vpop.f32.mrb[48].mxu0  ;;  %16890 = vmatprep.mubr.msk.bf16.mxu0 %vm12190_vm15, %v24739_v48  ;;  %v12464_v40 = vshll.u32 %v24739_v48, 16  ;;  %12875 = vmatprep.subr.bf16.mxu1 %v25776_v4  ;;  %v12476_v58 = vshrl.u32 %v24739_v48, 16 }
 0xb0c   : > { %v24754_v46 = vadd.f32 %v24528_v17, %v12104_v61  ;;  %v12106_v18 = vpop.f32.mrb[49].mxu0  ;;  %13371 = vmatmul.mubr.bf16.gmra.mrb[72].mxu0 %v24693_v24  ;;  %v12474_v21 = vrot.slane %v12472_v36, 1 }
 0xb0d   : > { %v12186_v42 = vadd.f32 %v24531_v1, %v12106_v18  ;;  %v12108_v16 = vpop.f32.mrb[50].mxu0  ;;  %v12466_v29 = vrot.slane %v12464_v40, 1  ;;  %13875 = vmatpush1.bf16.msra.mxu0 %v19679_v53  ;;  %v13474_v18 = vrot.slane %v24578_v41, 1 }
 0xb0e   : > { %v12187_v0 = vadd.f32 %v24528_v17, %v12108_v16  ;;  %v12110_v45 = vpop.f32.mrb[51].mxu0  ;;  %12876 = vmatpush1.bf16.msra.mxu1 %v19678_v13  ;;  %13876 = vmatprep.subr.bf16.mxu0 %v25776_v4  ;;  %v24779_v17 = vsel %vm3428_vm8, %v12454_v59, %v12458_v50  ;;  %v12248_v26 = vld [vmem:[#allocation4 + $0xc8] sm:$0xff]  ;;  %v24809_v11 = vsel %vm3428_vm8, %v12470_v20, %v12474_v21  ;;  %v12746_v20 = vsel %vm12738_vm14, %v19686_v34, 0 }
 0xb0f   : > { %12219 = vst.msk [vmem:[#allocation4 + $0xe8] sm:$0xff] %vm12190_vm15, %v12186_v42  ;;  %v12188_v37 = vadd.f32 %v24531_v1, %v12110_v45  ;;  %v24773_v12 = vsel %vm3428_vm8, %v12462_v6, %v12466_v29  ;;  %12877 = vmatprep.subr.bf16.mxu1 %v25776_v4  ;;  %v12478_v23 = vor.u32 %v12476_v58, %v12466_v29  ;;  %v13473_v29 = vrot.slane %v13451_v55, 1  ;;  %v19685_v45 = vld [vmem:[%s25685_s13 + $0x23c] ss:$12 sps:$4 sm:$0xff]   ;;  %v19698_v34 = vld [vmem:[%s25685_s13 + $0x4c] ss:$12 sps:$4 sm:$0xff]  }
 0xb10   : > { %12220 = vst [vmem:[#allocation4 + $0xf0] sm:$0x3f] %v12187_v0  ;;  %16825 = vmatprep.mubr.msk.bf16.mxu1 %vm12190_vm15, %v24773_v12  ;;  %v12250_v57 = vld [vmem:[#allocation4 + $0xd8] sm:$0xff]  ;;  %v13395_v0 = vld [vmem:[#allocation4] sm:$0xfc] }
 0xb11   : > { %12222 = vst.msk [vmem:[#allocation4 + $0xf8] sm:$0x3f] %vm12221_vm2, %v12188_v37  ;;  %12821 = vmatmul.mubr.bf16.gmra.mrb[216].mxu1 %v24779_v17  ;;  %v24784_v1 = vpack.c.bf16 %v12250_v57, %v12248_v26  ;;  %13877 = vmatpush1.bf16.msra.mxu0 %v19680_v60  ;;  %v24835_v37 = vsel %vm6210_vm10, %v13473_v29, %v13474_v18  ;;  %v12484_v26 = vshrl.u32 %v24735_v5, 16  ;;  %v13480_v29 = vrot.slane %v24609_v62, 1 }
 0xb12   : > { %12878 = vmatpush1.bf16.msra.mxu1 %v19681_v38  ;;  %13878 = vmatprep.subr.bf16.mxu0 %v25776_v4  ;;  %v13450_v58 = vpack.c.bf16 %v24536_v27, %v13395_v0  ;;  %v19690_v0 = vld [vmem:[%s25685_s13 + $0x18] ss:$12 sps:$4 sm:$0xff]  }
 0xb13   : > { %16891 = vmatprep.mubr.msk.bf16.mxu0 %vm12190_vm15, %v24784_v1  ;;  %v12480_v43 = vshll.u32 %v24784_v1, 16  ;;  %12879 = vmatprep.subr.bf16.mxu1 %v25776_v4  ;;  %v12492_v59 = vshrl.u32 %v24784_v1, 16 }
 0xb14   : > { %13379 = vmatmul.mubr.bf16.gmra.mrb[76].mxu0 %v24735_v5  ;;  %v13470_v55 = vrot.slane %v13450_v58, 1  ;;  %v19704_v58 = vld [vmem:[%s25685_s13 + $0x7c] ss:$12 sps:$4 sm:$0xff]  }
 0xb15   : > { %v12482_v39 = vrot.slane %v12480_v43, 1  ;;  %13879 = vmatpush1.bf16.msra.mxu0 %v13739_v63  ;;  %v12486_v43 = vor.u32 %v12484_v26, %v12474_v21  ;;  %v13478_v21 = vrot.slane %v24613_v7, 1  ;;  %v13490_v26 = vrot.slane %v24739_v48, 1 }
 0xb16   : > { %12880 = vmatpush1.bf16.msra.mxu1 %v19683_v54  ;;  %v24811_v40 = vld [vmem:[#allocation4 + $0xe8] sm:$0xff] }
 0xb17   : > { %v24803_v53 = vsel %vm3428_vm8, %v12478_v23, %v12482_v39  ;;  %v12253_v13 = vld [vmem:[#allocation4 + $0xf0] sm:$0xf]  ;;  %12881 = vmatprep.subr.bf16.mxu1 %v25776_v4  ;;  %v12494_v36 = vor.u32 %v12492_v59, %v12482_v39  ;;  %v19689_v39 = vld [vmem:[%s25685_s13 + $0x4] ss:$12 sps:$4 sm:$0xff]  }
 0xb18   : > { %v12323_v61 = vld [vmem:[#allocation4 + $0xf0] sm:$0x1f]  ;;  %16826 = vmatprep.mubr.msk.bf16.mxu1 %vm12190_vm15, %v24803_v53  ;;  %v12254_v44 = vld [vmem:[#allocation4 + $0xf8] sm:$0xf]  ;;  %v24821_v6 = vpack.c.bf16 %v12253_v13, %v24754_v46 }
 0xb19   : > { %v12324_v47 = vld [vmem:[#allocation4 + $0xf8] sm:$0x1f]  ;;  %v12378_v50 = vpack.c.bf16 %v12323_v61, %v24754_v46  ;;  %12831 = vmatmul.mubr.bf16.gmra.mrb[220].mxu1 %v24809_v11  ;;  %v24817_v42 = vpack.c.bf16 %v12254_v44, %v24811_v40  ;;  %v13476_v44 = vrot.slane %v24575_v25, 1  ;;  %v19695_v59 = vld [vmem:[%s25685_s13 + $0x34] ss:$12 sps:$4 sm:$0xff]  }
 0xb1a   : > { %v12379_v16 = vpack.c.bf16 %v12324_v47, %v24811_v40  ;;  %12882 = vmatpush1.bf16.msra.mxu1 %v19684_v30  ;;  %v24866_v30 = vsel %vm6210_vm10, %v13474_v18, %v13478_v21  ;;  %v13482_v47 = vrot.slane %v24655_v8, 1 }
 0xb1b   : > { %v12488_v60 = vshll.u32 %v12378_v50, 16  ;;  %16892 = vmatprep.mubr.msk.bf16.mxu0 %vm12190_vm15, %v24817_v42  ;;  %12883 = vmatprep.subr.bf16.mxu1 %v25776_v4  ;;  %v12500_v13 = vshrl.u32 %v12378_v50, 16  ;;  %v19687_v50 = vld [vmem:[%s25685_s13] ss:$12 sps:$4 sm:$0xff]  }
 0xb1c   : > { %v12496_v38 = vshll.u32 %v12379_v16, 16  ;;  %13387 = vmatmul.mubr.bf16.gmra.mrb[80].mxu0 %v24821_v6  ;;  %v12503_v54 = vshrl.u32 %v12379_v16, 16  ;;  %v24878_v16 = vsel %vm6210_vm10, %v13471_v32, %v13476_v44  ;;  %v24882_v18 = vsel %vm6210_vm10, %v13478_v21, %v13482_v47  ;;  %v19707_v21 = vld [vmem:[%s25685_s13 + $0x94] ss:$12 sps:$4 sm:$0xff]  }
 0xb1d   : > { %v12490_v57 = vrot.slane %v12488_v60, 1  ;;  %16991 = vmatprep.mubr.msk.bf16.mxu0 %vm12190_vm15, %v24835_v37  ;;  %v13486_v60 = vrot.slane %v24697_v14, 1 }
 0xb1e   : > { %v12498_v63 = vrot.slane %v12496_v38, 1  ;;  %12884 = vmatpush1.bf16.msra.mxu1 %v19685_v45  ;;  %v24901_v45 = vsel %vm6210_vm10, %v13476_v44, %v13480_v29  ;;  %v13484_v38 = vrot.slane %v24651_v2, 1  ;;  %v19710_v44 = vld [vmem:[%s25685_s13 + $0xac] ss:$12 sps:$4 sm:$0xff]  }
 0xb1f   : > { %12885 = vmatprep.subr.bf16.mxu1 %v25776_v4  ;;  %v24855_v27 = vsel %vm3428_vm8, %v12486_v43, %v12490_v57  ;;  %v24862_v4 = vsel %vm6210_vm10, %v13470_v55, %v13471_v32  ;;  %v24870_v61 = vor.u32 %v12500_v13, %v12490_v57  ;;  %v19696_v57 = vld [vmem:[%s25685_s13 + $0x48] ss:$12 sps:$4 sm:$0xff]   ;;  %v13494_v43 = vrot.slane %v24784_v1, 1  ;;  %v19705_v55 = vld [vmem:[%s25685_s13 + $0x90] ss:$12 sps:$4 sm:$0xff]  }
 0xb20   : > { %v24842_v35 = vsel %vm3428_vm8, %v12494_v36, %v12498_v63  ;;  %v24844_v23 = vor.u32 %v12503_v54, %v12498_v63  ;;  %v24927_v36 = vsel %vm6210_vm10, %v13480_v29, %v13484_v38  ;;  %v19701_v63 = vld [vmem:[%s25685_s13 + $0x64] ss:$12 sps:$4 sm:$0xff]   ;;  %v13488_v54 = vrot.slane %v24693_v24, 1  ;;  %v13398_v32 = vld [vmem:[#allocation4 + $0xf8] sm:$0x3f] }
 0xb21   : > { %16827 = vmatprep.mubr.msk.bf16.mxu1 %vm12190_vm15, %v24842_v35  ;;  %v13492_v13 = vrot.slane %v24735_v5, 1  ;;  %vm19895_vm8 = vmmov 1  }
 0xb22   : > { %12841 = vmatmul.mubr.bf16.gmra.mrb[224].mxu1 %v24855_v27  ;;  %vm17867_vm9 = vmpackc.low %vm975_vm0, %vm19895_vm8 }
 0xb23   : > { %16828 = vmatprep.mubr.msk.bf16.mxu1 %vm12190_vm15, %v24844_v23  ;;  %12886 = vmatpush1.bf16.msra.mxu1 %v12746_v20  ;;  %v19702_v20 = vld [vmem:[%s25685_s13 + $0x78] ss:$12 sps:$4 sm:$0xff]   ;;  %v24981_v29 = vsel %vm6210_vm10, %v13488_v54, %v13492_v13 }
 0xb24   : > { %13185 = vmatprep.subr.bf16.mxu1 %v19689_v39  ;;  %13887 = vmatmul.mubr.bf16.vlgmr.msra.gmra.mrb[84].mxu0 %v24862_v4  ;;  %v24953_v39 = vsel %vm6210_vm10, %v13484_v38, %v13488_v54  ;;  %v19719_v38 = vld [vmem:[%s25685_s13 + $0xf4] ss:$12 sps:$4 sm:$0xff]  }
 0xb25   : > { %16992 = vmatprep.mubr.msk.bf16.mxu0 %vm12190_vm15, %v24866_v30  ;;  %v19730_v54 = vld [vmem:[%s25685_s13 + $0x274] ss:$12 sps:$4 sm:$0xff]  }
 0xb2a   : > { %12851 = vmatmul.mubr.bf16.gmra.mrb[228].mxu1 %v24870_v61 }
 0xb2b   : > { %16829 = vmatprep.mubr.msk.bf16.mxu1 %vm12190_vm15, %v24601_v9  ;;  %v19692_v9 = vld [vmem:[%s25685_s13 + $0x1c] ss:$12 sps:$4 sm:$0xff]  }
 0xb2c   : > { %13895 = vmatmul.mubr.bf16.gmra.mrb[88].mxu0 %v24878_v16 }
 0xb2d   : > { %16993 = vmatprep.mubr.msk.bf16.mxu0 %vm12190_vm15, %v24882_v18 }
 0xb32   : > { %12894 = vmatmul.mubr.bf16.vlgmr.msra.gmra.mrb[232].mxu1 %v24606_v56  ;;  %v24908_v56 = vsel %vm6210_vm10, %v13482_v47, %v13486_v60 }
 0xb33   : > { %16830 = vmatprep.mubr.msk.bf16.mxu1 %vm12190_vm15, %v24642_v33  ;;  %13186 = vmatpush1.bf16.msra.mxu1 %v19687_v50  ;;  %v19693_v33 = vld [vmem:[%s25685_s13 + $0x30] ss:$12 sps:$4 sm:$0xff]   ;;  %v13397_v50 = vld [vmem:[#allocation4 + $0xf0] sm:$0x3f] }
 0xb34   : > { %13187 = vmatprep.subr.bf16.mxu1 %v19692_v9  ;;  %13903 = vmatmul.mubr.bf16.gmra.mrb[92].mxu0 %v24901_v45  ;;  %v13452_v9 = vpack.c.bf16 %v13397_v50, %v24754_v46  ;;  %v19758_v50 = vld [vmem:[%s25685_s13 + $0x360] ss:$12 sps:$4 sm:$0xff]  }
 0xb35   : > { %16994 = vmatprep.mubr.msk.bf16.mxu0 %vm12190_vm15, %v24908_v56 }
 0xb36   : > { %v24997_v46 = vrot.slane %v13452_v9, 1 }
 0xb37   : > { %13188 = vmatpush1.bf16.msra.mxu1 %v19690_v0  ;;  %v19716_v0 = vld [vmem:[%s25685_s13 + $0xdc] ss:$12 sps:$4 sm:$0xff]  }
 0xb38   : > { %13189 = vmatprep.subr.bf16.mxu1 %v19695_v59  ;;  %v19714_v59 = vld [vmem:[%s25685_s13 + $0xd8] ss:$12 sps:$4 sm:$0xff]  }
 0xb3a   : > { %12902 = vmatmul.mubr.bf16.gmra.mrb[236].mxu1 %v24648_v31  ;;  %v24934_v31 = vsel %vm6210_vm10, %v13486_v60, %v13490_v26  ;;  %v19713_v60 = vld [vmem:[%s25685_s13 + $0xc4] ss:$12 sps:$4 sm:$0xff]  }
 0xb3b   : > { %16831 = vmatprep.mubr.msk.bf16.mxu1 %vm12190_vm15, %v24684_v49  ;;  %13190 = vmatpush1.bf16.msra.mxu1 %v19693_v33  ;;  %v19699_v49 = vld [vmem:[%s25685_s13 + $0x60] ss:$12 sps:$4 sm:$0xff]   ;;  %v25010_v33 = vsel %vm6210_vm10, %v13492_v13, %v24997_v46  ;;  %v19760_v13 = vld [vmem:[%s25685_s13 + $0x364] ss:$12 sps:$4 sm:$0xff]  }
 0xb3c   : > { %13191 = vmatprep.subr.bf16.mxu1 %v19698_v34  ;;  %13911 = vmatmul.mubr.bf16.gmra.mrb[96].mxu0 %v24927_v36  ;;  %v12303_v34 = vld [vmem:[%s25685_s13 + $0x120] sm:$0x33] }
 0xb3d   : > { %16995 = vmatprep.mubr.msk.bf16.mxu0 %vm12190_vm15, %v24934_v31 }
 0xb3f   : > { %13192 = vmatpush1.bf16.msra.mxu1 %v19696_v57  ;;  %v16874_v57 = vcombine.high %v12303_v34, %v12303_v34 }
 0xb40   : > { %13193 = vmatprep.subr.bf16.mxu1 %v19701_v63  ;;  %v16873_v63 = vcombine.low %v12303_v34, %v12303_v34 }
 0xb42   : > { %12910 = vmatmul.mubr.bf16.gmra.mrb[240].mxu1 %v24690_v28  ;;  %v24960_v28 = vsel %vm6210_vm10, %v13490_v26, %v13494_v43  ;;  %v19720_v26 = vld [vmem:[%s25685_s13 + $0x108] ss:$12 sps:$4 sm:$0xff]  }
 0xb43   : > { %16832 = vmatprep.mubr.msk.bf16.mxu1 %vm12190_vm15, %v24726_v51  ;;  %13194 = vmatpush1.bf16.msra.mxu1 %v19699_v49  ;;  %v13453_v51 = vpack.c.bf16 %v13398_v32, %v24811_v40  ;;  %v19708_v40 = vld [vmem:[%s25685_s13 + $0xa8] ss:$12 sps:$4 sm:$0xff]   ;;  %v13177_v49 = vsel %vm12738_vm14, %v16873_v63, 0  ;;  %v19772_v63 = vld [vmem:[%s25687_s15 + $0x18] sm:$0xff]  }
 0xb44   : > { %13195 = vmatprep.subr.bf16.mxu1 %v19704_v58  ;;  %13919 = vmatmul.mubr.bf16.gmra.mrb[100].mxu0 %v24953_v39  ;;  %v19737_v58 = vld [vmem:[%s25685_s13 + $0x2b8] ss:$12 sps:$4 sm:$0xff]   ;;  %v19743_v32 = vld [vmem:[%s25685_s13 + $0x2e8] ss:$12 sps:$4 sm:$0xff]  }
 0xb45   : > { %16996 = vmatprep.mubr.msk.bf16.mxu0 %vm12190_vm15, %v24960_v28  ;;  %v24972_v47 = vrot.slane %v13453_v51, 1  ;;  %v19757_v51 = vld [vmem:[%s25685_s13 + $0x34c] ss:$12 sps:$4 sm:$0xff]  }
 0xb47   : > { %13196 = vmatpush1.bf16.msra.mxu1 %v19702_v20  ;;  %v19751_v20 = vld [vmem:[%s25685_s13 + $0x31c] ss:$12 sps:$4 sm:$0xff]  }
 0xb48   : > { %13197 = vmatprep.subr.bf16.mxu1 %v19707_v21  ;;  %v19749_v21 = vld [vmem:[%s25685_s13 + $0x318] ss:$12 sps:$4 sm:$0xff]  }
 0xb4a   : > { %12918 = vmatmul.mubr.bf16.gmra.mrb[244].mxu1 %v24732_v15  ;;  %v24990_v15 = vsel %vm6210_vm10, %v13494_v43, %v24972_v47  ;;  %v19745_v43 = vld [vmem:[%s25685_s13 + $0x2ec] ss:$12 sps:$4 sm:$0xff]   ;;  %vm15453_vm10 = vcmask 506880  }
 0xb4b   : > { %16833 = vmatprep.mubr.msk.bf16.mxu1 %vm12190_vm15, %v24773_v12  ;;  %13198 = vmatpush1.bf16.msra.mxu1 %v19705_v55  ;;  %v19711_v12 = vld [vmem:[%s25685_s13 + $0xc0] ss:$12 sps:$4 sm:$0xff]  }
 0xb4c   : > { %13199 = vmatprep.subr.bf16.mxu1 %v19710_v44  ;;  %13927 = vmatmul.mubr.bf16.gmra.mrb[104].mxu0 %v24981_v29  ;;  %v19763_v55 = vld [vmem:[%s25687_s15 + $0x80] sm:$0xff]   ;;  %v16941_v44 = vld [vmem:[%s25685_s13 + $0x378] sm:$0x33] }
 0xb4d   : > { %16997 = vmatprep.mubr.msk.bf16.mxu0 %vm12190_vm15, %v24990_v15  ;;  %17654 = vmatprep.subr.bf16.mxu0 %v19763_v55  ;;  %v16979_v9 = vcombine.low %v16941_v44, %v16941_v44 }
 0xb4e   : > { %17655 = vmatpush3.bf16.msra.mxu0 %v19763_v55 }
 0xb4f   : > { %13200 = vmatpush1.bf16.msra.mxu1 %v19708_v40  ;;  %v16980_v40 = vcombine.high %v16941_v44, %v16941_v44 }
 0xb50   : > { %13201 = vmatprep.subr.bf16.mxu1 %v19713_v60  ;;  %v13733_v60 = vsel %vm12738_vm14, %v16979_v9, 0  ;;  %v25805_v9 = vld [vmem:[#allocation18_spill] sm:$0xff] }
 0xb52   : > { %12926 = vmatmul.mubr.bf16.gmra.mrb[248].mxu1 %v24779_v17  ;;  %v19717_v17 = vld [vmem:[%s25685_s13 + $0xf0] ss:$12 sps:$4 sm:$0xff]  }
 0xb53   : > { %16834 = vmatprep.mubr.msk.bf16.mxu1 %vm12190_vm15, %v24803_v53  ;;  %13202 = vmatpush1.bf16.msra.mxu1 %v19711_v12  ;;  %v19722_v53 = vld [vmem:[%s25685_s13 + $0x10c] ss:$12 sps:$4 sm:$0xff]  }
 0xb54   : > { %13203 = vmatprep.subr.bf16.mxu1 %v19716_v0  ;;  %13935 = vmatmul.mubr.bf16.gmra.mrb[108].mxu0 %v25010_v33  ;;  %v19767_v0 = vld [vmem:[%s25687_s15 + $0x48] sm:$0xff]  }
 0xb55   : > { %16998 = vmatprep.mubr.msk.bf16.mxu0 %vm12190_vm15, %v24972_v47 }
 0xb57   : > { %13204 = vmatpush1.bf16.msra.mxu1 %v19714_v59 }
 0xb58   : > { %13205 = vmatprep.subr.bf16.mxu1 %v19719_v38  ;;  %v19768_v38 = vld [vmem:[%s25687_s15 + $0x8] sm:$0xff]  }
 0xb5a   : > { %12934 = vmatmul.mubr.bf16.gmra.mrb[252].mxu1 %v24809_v11  ;;  %v19727_v11 = vld [vmem:[%s25685_s13 + $0x25c] ss:$12 sps:$4 sm:$0xff]  }
 0xb5b   : > { %16835 = vmatprep.mubr.msk.bf16.mxu1 %vm12190_vm15, %v24842_v35  ;;  %13206 = vmatpush1.bf16.msra.mxu1 %v19717_v17  ;;  %v19725_v35 = vld [vmem:[%s25685_s13 + $0x258] ss:$12 sps:$4 sm:$0xff]   ;;  %v19769_v17 = vld [vmem:[%s25687_s15 + $0x50] sm:$0xff]  }
 0xb5c   : > { %13207 = vmatprep.subr.bf16.mxu1 %v19722_v53  ;;  %13943 = vmatmul.mubr.bf16.gmra.mrb[112].mxu0 %v24997_v46 }
 0xb5f   : > { %13208 = vmatpush1.bf16.msra.mxu1 %v19720_v26 }
 0xb60   : > { %16876 = vmatprep.subr.msk.bf16.mxu1 %vm12738_vm14, %v16874_v57 }
 0xb62   : > { %12942 = vmatmul.mubr.bf16.gmra.mrb[0].mxu1 %v24855_v27  ;;  %v19731_v27 = vld [vmem:[%s25685_s13 + $0x288] ss:$12 sps:$4 sm:$0xff]  }
 0xb63   : > { %16836 = vmatprep.mubr.msk.bf16.mxu1 %vm12190_vm15, %v24844_v23  ;;  %13210 = vmatpush1.bf16.msra.mxu1 %v13177_v49  ;;  %v19728_v23 = vld [vmem:[%s25685_s13 + $0x270] ss:$12 sps:$4 sm:$0xff]   ;;  %v19773_v49 = vld [vmem:[%s25687_s15 + $0x60] sm:$0xff]  }
 0xb64   : > { %13741 = vmatprep.subr.bf16.mxu1 %v19727_v11  ;;  %v19774_v11 = vld [vmem:[%s25687_s15 + $0x20] sm:$0xff]  }
 0xb6a   : > { %12950 = vmatmul.mubr.bf16.gmra.mrb[4].mxu1 %v24870_v61  ;;  %v19739_v61 = vld [vmem:[%s25685_s13 + $0x2bc] ss:$12 sps:$4 sm:$0xff]  }
 0xb6b   : > { %16877 = vmatprep.mubr.msk.bf16.mxu1 %vm12190_vm15, %v24556_v19  ;;  %v19733_v19 = vld [vmem:[%s25685_s13 + $0x28c] ss:$12 sps:$4 sm:$0xff]  }
 0xb72   : > { %13218 = vmatmul.mubr.bf16.vlgmr.msra.gmra.mrb[200].mxu1 %v24541_v10  ;;  %v19736_v10 = vld [vmem:[%s25685_s13 + $0x2a4] ss:$12 sps:$4 sm:$0xff]  }
 0xb73   : > { %16878 = vmatprep.mubr.msk.bf16.mxu1 %vm12190_vm15, %v24578_v41  ;;  %13742 = vmatpush1.bf16.msra.mxu1 %v19725_v35  ;;  %v19734_v41 = vld [vmem:[%s25685_s13 + $0x2a0] ss:$12 sps:$4 sm:$0xff]  }
 0xb74   : > { %13743 = vmatprep.subr.bf16.mxu1 %v19730_v54 }
 0xb77   : > { %13744 = vmatpush1.bf16.msra.mxu1 %v19728_v23 }
 0xb78   : > { %13745 = vmatprep.subr.bf16.mxu1 %v19733_v19  ;;  %v19776_v19 = vld [vmem:[%s25687_s15 + $0x28] sm:$0xff]  }
 0xb7a   : > { %13228 = vmatmul.mubr.bf16.gmra.mrb[204].mxu1 %v24551_v22  ;;  %v19742_v22 = vld [vmem:[%s25685_s13 + $0x2d4] ss:$12 sps:$4 sm:$0xff]  }
 0xb7b   : > { %16879 = vmatprep.mubr.msk.bf16.mxu1 %vm12190_vm15, %v24613_v7  ;;  %13746 = vmatpush1.bf16.msra.mxu1 %v19731_v27  ;;  %v19740_v7 = vld [vmem:[%s25685_s13 + $0x2d0] ss:$12 sps:$4 sm:$0xff]  }
 0xb7c   : > { %13747 = vmatprep.subr.bf16.mxu1 %v19736_v10  ;;  %v19777_v27 = vld [vmem:[%s25687_s15 + $0x70] sm:$0xff]  }
 0xb7d   : > { %v19778_v10 = vld [vmem:[%s25687_s15 + $0x30] sm:$0xff]  }
 0xb7f   : > { %13748 = vmatpush1.bf16.msra.mxu1 %v19734_v41 }
 0xb80   : > { %13749 = vmatprep.subr.bf16.mxu1 %v19739_v61 }
 0xb82   : > { %13238 = vmatmul.mubr.bf16.gmra.mrb[208].mxu1 %v24575_v25  ;;  %v19748_v25 = vld [vmem:[%s25685_s13 + $0x304] ss:$12 sps:$4 sm:$0xff]  }
 0xb83   : > { %16880 = vmatprep.mubr.msk.bf16.mxu1 %vm12190_vm15, %v24655_v8  ;;  %13750 = vmatpush1.bf16.msra.mxu1 %v19737_v58  ;;  %v19746_v8 = vld [vmem:[%s25685_s13 + $0x300] ss:$12 sps:$4 sm:$0xff]  }
 0xb84   : > { %13751 = vmatprep.subr.bf16.mxu1 %v19742_v22 }
 0xb87   : > { %13752 = vmatpush1.bf16.msra.mxu1 %v19740_v7 }
 0xb88   : > { %13753 = vmatprep.subr.bf16.mxu1 %v19745_v43 }
 0xb8a   : > { %13248 = vmatmul.mubr.bf16.gmra.mrb[212].mxu1 %v24609_v62  ;;  %v19754_v62 = vld [vmem:[%s25685_s13 + $0x334] ss:$12 sps:$4 sm:$0xff]  }
 0xb8b   : > { %16881 = vmatprep.mubr.msk.bf16.mxu1 %vm12190_vm15, %v24697_v14  ;;  %13754 = vmatpush1.bf16.msra.mxu1 %v19743_v32  ;;  %v19752_v14 = vld [vmem:[%s25685_s13 + $0x330] ss:$12 sps:$4 sm:$0xff]  }
 0xb8c   : > { %13755 = vmatprep.subr.bf16.mxu1 %v19748_v25 }
 0xb8f   : > { %13756 = vmatpush1.bf16.msra.mxu1 %v19746_v8 }
 0xb90   : > { %13757 = vmatprep.subr.bf16.mxu1 %v19751_v20 }
 0xb92   : > { %13258 = vmatmul.mubr.bf16.gmra.mrb[216].mxu1 %v24651_v2  ;;  %v19764_v2 = vld [vmem:[%s25687_s15 + $0x88] sm:$0xff]  }
 0xb93   : > { %16882 = vmatprep.mubr.msk.bf16.mxu1 %vm12190_vm15, %v24739_v48  ;;  %13758 = vmatpush1.bf16.msra.mxu1 %v19749_v21  ;;  %v19755_v48 = vld [vmem:[%s25685_s13 + $0x348] ss:$12 sps:$4 sm:$0xff]  }
 0xb94   : > { %13759 = vmatprep.subr.bf16.mxu1 %v19754_v62  ;;  %17656 = vmatprep.subr.bf16.mxu0 %v19764_v2 }
 0xb95   : > { %17657 = vmatpush3.bf16.msra.mxu0 %v19764_v2 }
 0xb97   : > { %13760 = vmatpush1.bf16.msra.mxu1 %v19752_v14 }
 0xb98   : > { %13761 = vmatprep.subr.bf16.mxu1 %v19757_v51 }
 0xb9a   : > { %13268 = vmatmul.mubr.bf16.gmra.mrb[220].mxu1 %v24693_v24 }
 0xb9b   : > { %16883 = vmatprep.mubr.msk.bf16.mxu1 %vm12190_vm15, %v24784_v1  ;;  %13762 = vmatpush1.bf16.msra.mxu1 %v19755_v48 }
 0xb9c   : > { %13763 = vmatprep.subr.bf16.mxu1 %v19760_v13 }
 0xb9f   : > { %13764 = vmatpush1.bf16.msra.mxu1 %v19758_v50 }
 0xba0   : > { %16982 = vmatprep.subr.msk.bf16.mxu1 %vm12738_vm14, %v16980_v40 }
 0xba2   : > { %13278 = vmatmul.mubr.bf16.gmra.mrb[224].mxu1 %v24735_v5 }
 0xba3   : > { %16884 = vmatprep.mubr.msk.bf16.mxu1 %vm12190_vm15, %v24817_v42  ;;  %13766 = vmatpush1.bf16.msra.mxu1 %v13733_v60 }
 0xbaa   : > { %13288 = vmatmul.mubr.bf16.gmra.mrb[228].mxu1 %v24821_v6 }
 0xbab   : > { %16983 = vmatprep.mubr.msk.bf16.mxu1 %vm12190_vm15, %v24835_v37 }
 0xbb2   : > { %13774 = vmatmul.mubr.bf16.vlgmr.msra.gmra.mrb[200].mxu1 %v24862_v4 }
 0xbb3   : > { %16984 = vmatprep.mubr.msk.bf16.mxu1 %vm12190_vm15, %v24866_v30 }
 0xbb7   : > { %v25152_v24 = vpop.f32.mrb[52].mxu0 }
 0xbb8   : > { %v13334_v1 = vpop.f32.mrb[53].mxu0 }
 0xbb9   : > { %v25154_v12 = vpop.f32.mrb[54].mxu0 }
 0xbba   : > { %13784 = vmatmul.mubr.bf16.gmra.mrb[204].mxu1 %v24878_v16  ;;  %v13337_v5 = vpop.f32.mrb[55].mxu0  ;;  %v19765_v16 = vld [vmem:[%s25687_s15 + $0x40] sm:$0xff]  }
 0xbbb   : > { %16985 = vmatprep.mubr.msk.bf16.mxu1 %vm12190_vm15, %v24882_v18  ;;  %v19766_v18 = vld [vmem:[%s25687_s15] sm:$0xff]   ;;  %17298 = vmatprep.subr.bf16.mxu1 %v19765_v16 }
 0xbbc   : > { %17299 = vmatpush3.bf16.msra.mxu1 %v19766_v18 }
 0xbbd   : > { %17300 = vmatprep.subr.bf16.mxu1 %v19767_v0 }
 0xbbf   : > { %v25159_v42 = vpop.f32.mrb[56].mxu0 }
 0xbc0   : > { %v13342_v6 = vpop.f32.mrb[57].mxu0  ;;  %17301 = vmatpush3.bf16.msra.mxu1 %v19768_v38 }
 0xbc1   : > { %v25161_v37 = vpop.f32.mrb[58].mxu0  ;;  %17302 = vmatprep.subr.bf16.mxu1 %v19769_v17 }
 0xbc2   : > { %13794 = vmatmul.mubr.bf16.gmra.mrb[208].mxu1 %v24901_v45  ;;  %v13345_v4 = vpop.f32.mrb[59].mxu0 }
 0xbc3   : > { %16986 = vmatprep.mubr.msk.bf16.mxu1 %vm12190_vm15, %v24908_v56 }
 0xbc7   : > { %v25166_v30 = vpop.f32.mrb[60].mxu0 }
 0xbc8   : > { %v13350_v59 = vpop.f32.mrb[61].mxu0 }
 0xbc9   : > { %v25177_v45 = vpop.f32.mrb[62].mxu0  ;;  %v19779_v59 = vld [vmem:[%s25687_s15 + $0x78] sm:$0xff]  }
 0xbca   : > { %13804 = vmatmul.mubr.bf16.gmra.mrb[212].mxu1 %v24927_v36  ;;  %v13353_v56 = vpop.f32.mrb[63].mxu0  ;;  %v19770_v36 = vld [vmem:[%s25687_s15 + $0x10] sm:$0xff]  }
 0xbcb   : > { %16987 = vmatprep.mubr.msk.bf16.mxu1 %vm12190_vm15, %v24934_v31  ;;  %v19771_v31 = vld [vmem:[%s25687_s15 + $0x58] sm:$0xff]   ;;  %17303 = vmatpush3.bf16.msra.mxu1 %v19770_v36 }
 0xbcc   : > { %17304 = vmatprep.subr.bf16.mxu1 %v19771_v31 }
 0xbcf   : > { %v25191_v53 = vpop.f32.mrb[64].mxu0  ;;  %17305 = vmatpush3.bf16.msra.mxu1 %v19772_v63 }
 0xbd0   : > { %v13358_v34 = vpop.f32.mrb[65].mxu0  ;;  %17306 = vmatprep.subr.bf16.mxu1 %v19773_v49 }
 0xbd1   : > { %v25196_v26 = vpop.f32.mrb[66].mxu0 }
 0xbd2   : > { %13814 = vmatmul.mubr.bf16.gmra.mrb[216].mxu1 %v24953_v39  ;;  %v13361_v57 = vpop.f32.mrb[67].mxu0 }
 0xbd3   : > { %16988 = vmatprep.mubr.msk.bf16.mxu1 %vm12190_vm15, %v24960_v28  ;;  %v19775_v28 = vld [vmem:[%s25687_s15 + $0x68] sm:$0xff]   ;;  %17307 = vmatpush3.bf16.msra.mxu1 %v19774_v11 }
 0xbd4   : > { %17308 = vmatprep.subr.bf16.mxu1 %v19775_v28 }
 0xbd7   : > { %v25210_v39 = vpop.f32.mrb[68].mxu0  ;;  %17309 = vmatpush3.bf16.msra.mxu1 %v19776_v19 }
 0xbd8   : > { %v13366_v35 = vpop.f32.mrb[69].mxu0  ;;  %17310 = vmatprep.subr.bf16.mxu1 %v19777_v27 }
 0xbd9   : > { %v25215_v54 = vpop.f32.mrb[70].mxu0 }
 0xbda   : > { %13824 = vmatmul.mubr.bf16.gmra.mrb[220].mxu1 %v24981_v29  ;;  %v13369_v23 = vpop.f32.mrb[71].mxu0 }
 0xbdb   : > { %16989 = vmatprep.mubr.msk.bf16.mxu1 %vm12190_vm15, %v24990_v15  ;;  %17311 = vmatpush3.bf16.msra.mxu1 %v19778_v10 }
 0xbdc   : > { %17312 = vmatprep.subr.bf16.mxu1 %v19779_v59 }
 0xbdf   : > { %v25229_v29 = vpop.f32.mrb[72].mxu0 }
 0xbe0   : > { %v13374_v41 = vpop.f32.mrb[73].mxu0 }
 0xbe1   : > { %v25231_v15 = vpop.f32.mrb[74].mxu0 }
 0xbe2   : > { %13834 = vmatmul.mubr.bf16.gmra.mrb[224].mxu1 %v25010_v33  ;;  %v13377_v61 = vpop.f32.mrb[75].mxu0 }
 0xbe3   : > { %16990 = vmatprep.mubr.msk.bf16.mxu1 %vm12190_vm15, %v24972_v47 }
 0xbe7   : > { %v25236_v58 = vpop.f32.mrb[76].mxu0 }
 0xbe8   : > { %v13382_v22 = vpop.f32.mrb[77].mxu0 }
 0xbe9   : > { %v25238_v7 = vpop.f32.mrb[78].mxu0 }
 0xbea   : > { %13844 = vmatmul.mubr.bf16.gmra.mrb[228].mxu1 %v24997_v46  ;;  %v13385_v43 = vpop.f32.mrb[79].mxu0  ;;  %v25248_v46 = vld [vmem:[%s25686_s14] sm:$0x7] }
 0xbeb   : > { %v25253_v60 = vrot.slane %v25248_v46, %v25805_v9 }
 0xbef   : > { %v25241_v32 = vpop.f32.mrb[80].mxu0 }
 0xbf0   : > { %v13390_v25 = vpop.f32.mrb[81].mxu0 }
 0xbf1   : > { %v25243_v8 = vpop.f32.mrb[82].mxu0 }
 0xbf2   : > { %v13393_v20 = vpop.f32.mrb[83].mxu0 }
 0xbf7   : > { %v13888_v33 = vpop.f32.mrb[84].mxu0 }
 0xbf8   : > { %v13890_v21 = vpop.f32.mrb[85].mxu0 }
 0xbf9   : > { %v13891_v62 = vpop.f32.mrb[86].mxu0 }
 0xbfa   : > { %v13893_v14 = vpop.f32.mrb[87].mxu0 }
 0xbff   : > { %v13896_v47 = vpop.f32.mrb[88].mxu0 }
 0xc00   : > { %v13898_v51 = vpop.f32.mrb[89].mxu0 }
 0xc01   : > { %v13899_v55 = vpop.f32.mrb[90].mxu0 }
 0xc02   : > { %v13901_v2 = vpop.f32.mrb[91].mxu0 }
 0xc05   : > { %v12895_v48 = vpop.f32.mrb[232].mxu1 }
 0xc06   : > { %v13333_v13 = vadd.f32 %v25152_v24, %v12895_v48  ;;  %v12897_v44 = vpop.f32.mrb[233].mxu1  ;;  %v19780_v24 = vld [vmem:[%s25687_s15 + $0x38] sm:$0xff]  }
 0xc07   : > { %v12898_v50 = vpop.f32.mrb[234].mxu1  ;;  %v13904_v6 = vpop.f32.mrb[92].mxu0  ;;  %17313 = vmatpush3.bf16.msra.mxu1 %v19780_v24 }
 0xc08   : > { %v13953_v40 = vadd.f32 %v13888_v33, %v13333_v13  ;;  %v13336_v1 = vadd.f32 %v25154_v12, %v12898_v50  ;;  %v12900_v5 = vpop.f32.mrb[235].mxu1  ;;  %v13906_v4 = vpop.f32.mrb[93].mxu0 }
 0xc09   : > { %v13907_v18 = vpop.f32.mrb[94].mxu0 }
 0xc0a   : > { %v13956_v16 = vadd.f32 %v13891_v62, %v13336_v1  ;;  %v13909_v0 = vpop.f32.mrb[95].mxu0  ;;  %v14018_v56 = vadd.f32 %v25253_v60, %v13953_v40 }
 0xc0c   : > { %v14021_v38 = vadd.f32 %v25253_v60, %v13956_v16 }
 0xc0d   : > { %v12903_v17 = vpop.f32.mrb[236].mxu1 }
 0xc0e   : > { %v14102_v12 = vpack.c.bf16 %v14021_v38, %v14018_v56  ;;  %v13341_v36 = vadd.f32 %v25159_v42, %v12903_v17  ;;  %v12905_v31 = vpop.f32.mrb[237].mxu1 }
 0xc0f   : > { %v12906_v34 = vpop.f32.mrb[238].mxu1  ;;  %v13912_v11 = vpop.f32.mrb[96].mxu0 }
 0xc10   : > { %v13959_v57 = vadd.f32 %v13896_v47, %v13341_v36  ;;  %v13344_v63 = vadd.f32 %v25161_v37, %v12906_v34  ;;  %v12908_v49 = vpop.f32.mrb[239].mxu1  ;;  %17658 = vmatprep.mubr.msk.bf16.mxu0 %vm14232_vm3, %v14102_v12  ;;  %v13914_v28 = vpop.f32.mrb[97].mxu0 }
 0xc11   : > { %v13915_v23 = vpop.f32.mrb[98].mxu0 }
 0xc12   : > { %v13962_v35 = vadd.f32 %v13899_v55, %v13344_v63  ;;  %v13917_v19 = vpop.f32.mrb[99].mxu0  ;;  %v14024_v27 = vadd.f32 %v25253_v60, %v13959_v57 }
 0xc14   : > { %v14027_v10 = vadd.f32 %v25253_v60, %v13962_v35 }
 0xc15   : > { %v12911_v41 = vpop.f32.mrb[240].mxu1 }
 0xc16   : > { %v14105_v42 = vpack.c.bf16 %v14027_v10, %v14024_v27  ;;  %v13349_v61 = vadd.f32 %v25166_v30, %v12911_v41  ;;  %v12913_v22 = vpop.f32.mrb[241].mxu1 }
 0xc17   : > { %v12914_v43 = vpop.f32.mrb[242].mxu1  ;;  %v13920_v33 = vpop.f32.mrb[100].mxu0 }
 0xc18   : > { %v13965_v25 = vadd.f32 %v13904_v6, %v13349_v61  ;;  %v13352_v37 = vadd.f32 %v25177_v45, %v12914_v43  ;;  %v12916_v20 = vpop.f32.mrb[243].mxu1  ;;  %17659 = vmatmul.mubr.msk.bf16.vlgmr.msra.gmra.mrb[116].mxu0 %vm14232_vm3, %v14105_v42  ;;  %v13922_v21 = vpop.f32.mrb[101].mxu0 }
 0xc19   : > { %v13923_v14 = vpop.f32.mrb[102].mxu0 }
 0xc1a   : > { %v13968_v62 = vadd.f32 %v13907_v18, %v13352_v37  ;;  %v13925_v47 = vpop.f32.mrb[103].mxu0  ;;  %v14030_v51 = vadd.f32 %v25253_v60, %v13965_v25 }
 0xc1c   : > { %v14033_v55 = vadd.f32 %v25253_v60, %v13968_v62 }
 0xc1d   : > { %v12919_v2 = vpop.f32.mrb[244].mxu1 }
 0xc1e   : > { %v14108_v48 = vpack.c.bf16 %v14033_v55, %v14030_v51  ;;  %v13357_v30 = vadd.f32 %v25191_v53, %v12919_v2  ;;  %v12921_v13 = vpop.f32.mrb[245].mxu1 }
 0xc1f   : > { %v12922_v44 = vpop.f32.mrb[246].mxu1  ;;  %v13928_v9 = vpop.f32.mrb[104].mxu0 }
 0xc20   : > { %v13971_v50 = vadd.f32 %v13912_v11, %v13357_v30  ;;  %v13360_v45 = vadd.f32 %v25196_v26, %v12922_v44  ;;  %v12924_v40 = vpop.f32.mrb[247].mxu1  ;;  %17662 = vmatprep.mubr.msk.bf16.mxu0 %vm14232_vm3, %v14108_v48  ;;  %v13930_v1 = vpop.f32.mrb[105].mxu0 }
 0xc21   : > { %v13931_v6 = vpop.f32.mrb[106].mxu0 }
 0xc22   : > { %v13974_v5 = vadd.f32 %v13915_v23, %v13360_v45  ;;  %v13933_v4 = vpop.f32.mrb[107].mxu0  ;;  %v14036_v16 = vadd.f32 %v25253_v60, %v13971_v50 }
 0xc24   : > { %v14039_v18 = vadd.f32 %v25253_v60, %v13974_v5  ;;  %v25302_v5 = vrot.slane %v25248_v46, %v25803_v3 }
 0xc25   : > { %v12927_v0 = vpop.f32.mrb[248].mxu1 }
 0xc26   : > { %v14111_v59 = vpack.c.bf16 %v14039_v18, %v14036_v16  ;;  %v13365_v53 = vadd.f32 %v25210_v39, %v12927_v0  ;;  %v12929_v24 = vpop.f32.mrb[249].mxu1 }
 0xc27   : > { %v12930_v56 = vpop.f32.mrb[250].mxu1  ;;  %v13936_v12 = vpop.f32.mrb[108].mxu0 }
 0xc28   : > { %v13977_v38 = vadd.f32 %v13920_v33, %v13365_v53  ;;  %v13368_v26 = vadd.f32 %v25215_v54, %v12930_v56  ;;  %v12932_v17 = vpop.f32.mrb[251].mxu1  ;;  %17663 = vmatmul.mubr.msk.bf16.gmra.mrb[120].mxu0 %vm14232_vm3, %v14111_v59  ;;  %v13938_v36 = vpop.f32.mrb[109].mxu0 }
 0xc29   : > { %v13939_v34 = vpop.f32.mrb[110].mxu0 }
 0xc2a   : > { %v13980_v31 = vadd.f32 %v13923_v14, %v13368_v26  ;;  %v13941_v57 = vpop.f32.mrb[111].mxu0  ;;  %v14042_v63 = vadd.f32 %v25253_v60, %v13977_v38 }
 0xc2c   : > { %v14045_v49 = vadd.f32 %v25253_v60, %v13980_v31 }
 0xc2d   : > { %v12935_v11 = vpop.f32.mrb[252].mxu1 }
 0xc2e   : > { %v14114_v28 = vpack.c.bf16 %v14045_v49, %v14042_v63  ;;  %v13373_v39 = vadd.f32 %v25229_v29, %v12935_v11  ;;  %v12937_v35 = vpop.f32.mrb[253].mxu1 }
 0xc2f   : > { %v12938_v23 = vpop.f32.mrb[254].mxu1  ;;  %v13944_v10 = vpop.f32.mrb[112].mxu0 }
 0xc30   : > { %v13983_v19 = vadd.f32 %v13928_v9, %v13373_v39  ;;  %v13376_v54 = vadd.f32 %v25231_v15, %v12938_v23  ;;  %v12940_v27 = vpop.f32.mrb[255].mxu1  ;;  %17666 = vmatprep.mubr.msk.bf16.mxu0 %vm14232_vm3, %v14114_v28  ;;  %v13946_v41 = vpop.f32.mrb[113].mxu0 }
 0xc31   : > { %v13947_v61 = vpop.f32.mrb[114].mxu0 }
 0xc32   : > { %v13986_v42 = vadd.f32 %v13931_v6, %v13376_v54  ;;  %v13949_v22 = vpop.f32.mrb[115].mxu0  ;;  %v14048_v43 = vadd.f32 %v25253_v60, %v13983_v19  ;;  %v25306_v6 = vrot.slane %v25248_v46, %v25804_v52 }
 0xc34   : > { %v14051_v25 = vadd.f32 %v25253_v60, %v13986_v42 }
 0xc35   : > { %v12943_v37 = vpop.f32.mrb[0].mxu1 }
 0xc36   : > { %v14117_v20 = vpack.c.bf16 %v14051_v25, %v14048_v43  ;;  %v13381_v29 = vadd.f32 %v25236_v58, %v12943_v37  ;;  %v12945_v33 = vpop.f32.mrb[1].mxu1 }
 0xc37   : > { %v12946_v21 = vpop.f32.mrb[2].mxu1 }
 0xc38   : > { %v13989_v62 = vadd.f32 %v13936_v12, %v13381_v29  ;;  %v13384_v15 = vadd.f32 %v25238_v7, %v12946_v21  ;;  %v12948_v14 = vpop.f32.mrb[3].mxu1  ;;  %17667 = vmatmul.mubr.msk.bf16.gmra.mrb[124].mxu0 %vm14232_vm3, %v14117_v20 }
 0xc3a   : > { %v13992_v47 = vadd.f32 %v13939_v34, %v13384_v15  ;;  %v14054_v51 = vadd.f32 %v25253_v60, %v13989_v62 }
 0xc3c   : > { %v14057_v55 = vadd.f32 %v25253_v60, %v13992_v47 }
 0xc3d   : > { %v12951_v2 = vpop.f32.mrb[4].mxu1 }
 0xc3e   : > { %v14120_v48 = vpack.c.bf16 %v14057_v55, %v14054_v51  ;;  %v13389_v30 = vadd.f32 %v25241_v32, %v12951_v2  ;;  %v12953_v13 = vpop.f32.mrb[5].mxu1 }
 0xc3f   : > { %v12954_v44 = vpop.f32.mrb[6].mxu1 }
 0xc40   : > { %v13995_v58 = vadd.f32 %v13944_v10, %v13389_v30  ;;  %v13392_v50 = vadd.f32 %v25243_v8, %v12954_v44  ;;  %v12956_v45 = vpop.f32.mrb[7].mxu1  ;;  %17670 = vmatprep.mubr.msk.bf16.mxu0 %vm14232_vm3, %v14120_v48 }
 0xc42   : > { %v13998_v7 = vadd.f32 %v13947_v61, %v13392_v50  ;;  %v14060_v40 = vadd.f32 %v25253_v60, %v13995_v58 }
 0xc44   : > { %v14063_v9 = vadd.f32 %v25253_v60, %v13998_v7 }
 0xc46   : > { %v14123_v1 = vpack.c.bf16 %v14063_v9, %v14060_v40 }
 0xc48   : > { %17671 = vmatmul.mubr.msk.bf16.gmra.mrb[128].mxu0 %vm14232_vm3, %v14123_v1 }
 0xc85   : > { %v13775_v32 = vpop.f32.mrb[200].mxu1 }
 0xc86   : > { %v13777_v8 = vpop.f32.mrb[201].mxu1  ;;  %v14016_v16 = vadd.f32 %v25302_v5, %v13775_v32 }
 0xc87   : > { %v13779_v4 = vpop.f32.mrb[202].mxu1  ;;  %v14017_v60 = vadd.f32 %v25306_v6, %v13777_v8 }
 0xc88   : > { %v14019_v18 = vadd.f32 %v25302_v5, %v13779_v4  ;;  %v13781_v0 = vpop.f32.mrb[203].mxu1 }
 0xc89   : > { %v14020_v59 = vadd.f32 %v25306_v6, %v13781_v0 }
 0xc8a   : > { %v14100_v53 = vpack.c.bf16 %v14019_v18, %v14016_v16 }
 0xc8b   : > { %v14101_v24 = vpack.c.bf16 %v14020_v59, %v14017_v60 }
 0xc8d   : > { %v13785_v3 = vpop.f32.mrb[204].mxu1  ;;  %14289 = vmatprep.mubr.bf16.mxu1 %v14101_v24 }
 0xc8e   : > { %v13787_v56 = vpop.f32.mrb[205].mxu1  ;;  %14290 = vmatmul.mubr.bf16.vlgmr.msra.gmra.mrb[8].mxu1 %v14100_v53  ;;  %v14022_v52 = vadd.f32 %v25302_v5, %v13785_v3 }
 0xc8f   : > { %v13789_v38 = vpop.f32.mrb[206].mxu1  ;;  %v14023_v17 = vadd.f32 %v25306_v6, %v13787_v56 }
 0xc90   : > { %v14025_v46 = vadd.f32 %v25302_v5, %v13789_v38  ;;  %v13791_v26 = vpop.f32.mrb[207].mxu1 }
 0xc91   : > { %v14026_v12 = vadd.f32 %v25306_v6, %v13791_v26 }
 0xc92   : > { %v14103_v36 = vpack.c.bf16 %v14025_v46, %v14022_v52 }
 0xc93   : > { %v14104_v31 = vpack.c.bf16 %v14026_v12, %v14023_v17 }
 0xc95   : > { %v13795_v34 = vpop.f32.mrb[208].mxu1  ;;  %14297 = vmatprep.mubr.bf16.mxu1 %v14104_v31 }
 0xc96   : > { %v13797_v57 = vpop.f32.mrb[209].mxu1  ;;  %14298 = vmatmul.mubr.bf16.gmra.mrb[12].mxu1 %v14103_v36  ;;  %v14028_v49 = vadd.f32 %v25302_v5, %v13795_v34 }
 0xc97   : > { %v13799_v63 = vpop.f32.mrb[210].mxu1  ;;  %v14029_v39 = vadd.f32 %v25306_v6, %v13797_v57 }
 0xc98   : > { %v14031_v11 = vadd.f32 %v25302_v5, %v13799_v63  ;;  %v13801_v28 = vpop.f32.mrb[211].mxu1 }
 0xc99   : > { %v14032_v35 = vadd.f32 %v25306_v6, %v13801_v28 }
 0xc9a   : > { %v14106_v23 = vpack.c.bf16 %v14031_v11, %v14028_v49 }
 0xc9b   : > { %v14107_v19 = vpack.c.bf16 %v14032_v35, %v14029_v39 }
 0xc9d   : > { %v13805_v54 = vpop.f32.mrb[212].mxu1  ;;  %14305 = vmatprep.mubr.bf16.mxu1 %v14107_v19 }
 0xc9e   : > { %v13807_v27 = vpop.f32.mrb[213].mxu1  ;;  %14306 = vmatmul.mubr.bf16.gmra.mrb[16].mxu1 %v14106_v23  ;;  %v14034_v41 = vadd.f32 %v25302_v5, %v13805_v54 }
 0xc9f   : > { %v13809_v10 = vpop.f32.mrb[214].mxu1  ;;  %v14035_v22 = vadd.f32 %v25306_v6, %v13807_v27 }
 0xca0   : > { %v14037_v42 = vadd.f32 %v25302_v5, %v13809_v10  ;;  %v13811_v61 = vpop.f32.mrb[215].mxu1  ;;  %v19781_v10 = vld [vmem:[%s25690_s18] sm:$0xff]  }
 0xca1   : > { %v14038_v43 = vadd.f32 %v25306_v6, %v13811_v61 }
 0xca2   : > { %v14109_v25 = vpack.c.bf16 %v14037_v42, %v14034_v41  ;;  %v19782_v41 = vld [vmem:[%s25690_s18 + $0x20] sm:$0xff]  }
 0xca3   : > { %v14110_v37 = vpack.c.bf16 %v14038_v43, %v14035_v22  ;;  %17714 = vmatprep.mubr.msk.bf16.mxu0 %vm14549_vm4, %v19782_v41 }
 0xca5   : > { %v13815_v20 = vpop.f32.mrb[216].mxu1  ;;  %14313 = vmatprep.mubr.bf16.mxu1 %v14110_v37 }
 0xca6   : > { %v13817_v29 = vpop.f32.mrb[217].mxu1  ;;  %14314 = vmatmul.mubr.bf16.gmra.mrb[20].mxu1 %v14109_v25  ;;  %v14040_v21 = vadd.f32 %v25302_v5, %v13815_v20 }
 0xca7   : > { %v13819_v33 = vpop.f32.mrb[218].mxu1  ;;  %v14041_v14 = vadd.f32 %v25306_v6, %v13817_v29  ;;  %v25371_v29 = vld [vmem:[%s25688_s16] ss:$0 sm:$0xff] }
 0xca8   : > { %v14043_v62 = vadd.f32 %v25302_v5, %v13819_v33  ;;  %v13821_v15 = vpop.f32.mrb[219].mxu1 }
 0xca9   : > { %v14044_v47 = vadd.f32 %v25306_v6, %v13821_v15 }
 0xcaa   : > { %v14112_v51 = vpack.c.bf16 %v14043_v62, %v14040_v21 }
 0xcab   : > { %v14113_v55 = vpack.c.bf16 %v14044_v47, %v14041_v14  ;;  %v25377_v47 = vld [vmem:[%s25689_s17] ss:$0 sm:$0xff] }
 0xcad   : > { %v13825_v2 = vpop.f32.mrb[220].mxu1  ;;  %14321 = vmatprep.mubr.bf16.mxu1 %v14113_v55 }
 0xcae   : > { %v13827_v48 = vpop.f32.mrb[221].mxu1  ;;  %14322 = vmatmul.mubr.bf16.gmra.mrb[24].mxu1 %v14112_v51  ;;  %v14046_v13 = vadd.f32 %v25302_v5, %v13825_v2 }
 0xcaf   : > { %v13829_v30 = vpop.f32.mrb[222].mxu1  ;;  %v14047_v50 = vadd.f32 %v25306_v6, %v13827_v48 }
 0xcb0   : > { %v14049_v44 = vadd.f32 %v25302_v5, %v13829_v30  ;;  %v13831_v58 = vpop.f32.mrb[223].mxu1 }
 0xcb1   : > { %v14050_v45 = vadd.f32 %v25306_v6, %v13831_v58 }
 0xcb2   : > { %v14115_v7 = vpack.c.bf16 %v14049_v44, %v14046_v13 }
 0xcb3   : > { %v14116_v40 = vpack.c.bf16 %v14050_v45, %v14047_v50 }
 0xcb5   : > { %v13835_v9 = vpop.f32.mrb[224].mxu1  ;;  %14329 = vmatprep.mubr.bf16.mxu1 %v14116_v40 }
 0xcb6   : > { %v13837_v1 = vpop.f32.mrb[225].mxu1  ;;  %14330 = vmatmul.mubr.bf16.gmra.mrb[28].mxu1 %v14115_v7  ;;  %v14052_v8 = vadd.f32 %v25302_v5, %v13835_v9 }
 0xcb7   : > { %v13839_v32 = vpop.f32.mrb[226].mxu1  ;;  %v14053_v18 = vadd.f32 %v25306_v6, %v13837_v1 }
 0xcb8   : > { %v14055_v4 = vadd.f32 %v25302_v5, %v13839_v32  ;;  %v13841_v16 = vpop.f32.mrb[227].mxu1 }
 0xcb9   : > { %v14056_v0 = vadd.f32 %v25306_v6, %v13841_v16 }
 0xcba   : > { %v14118_v60 = vpack.c.bf16 %v14055_v4, %v14052_v8 }
 0xcbb   : > { %v14119_v59 = vpack.c.bf16 %v14056_v0, %v14053_v18 }
 0xcbd   : > { %v13845_v53 = vpop.f32.mrb[228].mxu1  ;;  %14337 = vmatprep.mubr.bf16.mxu1 %v14119_v59 }
 0xcbe   : > { %v13847_v24 = vpop.f32.mrb[229].mxu1  ;;  %14338 = vmatmul.mubr.bf16.gmra.mrb[32].mxu1 %v14118_v60  ;;  %v14058_v56 = vadd.f32 %v25302_v5, %v13845_v53 }
 0xcbf   : > { %v13849_v3 = vpop.f32.mrb[230].mxu1  ;;  %v14059_v46 = vadd.f32 %v25306_v6, %v13847_v24 }
 0xcc0   : > { %v14061_v38 = vadd.f32 %v25302_v5, %v13849_v3  ;;  %v13851_v52 = vpop.f32.mrb[231].mxu1 }
 0xcc1   : > { %v14062_v26 = vadd.f32 %v25306_v6, %v13851_v52 }
 0xcc2   : > { %v14121_v17 = vpack.c.bf16 %v14061_v38, %v14058_v56 }
 0xcc3   : > { %v14122_v12 = vpack.c.bf16 %v14062_v26, %v14059_v46 }
 0xcc5   : > { %14345 = vmatprep.mubr.bf16.mxu1 %v14122_v12 }
 0xcc6   : > { %14346 = vmatmul.mubr.bf16.gmra.mrb[36].mxu1 %v14121_v17 }
 0xcc7   : > { %17690 = vmatprep.mubr.msk.bf16.mxu1 %vm14549_vm4, %v19781_v10 }
 0xceb   : > { %v17660_v36 = vpop.f32.mrb[116].mxu0 }
 0xcec   : > { %v14388_v31 = vpop.f32.mrb[117].mxu0 }
 0xced   : > { %v17661_v34 = vpop.f32.mrb[118].mxu0 }
 0xcee   : > { %v14391_v57 = vpop.f32.mrb[119].mxu0 }
 0xcfb   : > { %v25340_v63 = vpop.f32.mrb[120].mxu0 }
 0xcfc   : > { %v14404_v49 = vpop.f32.mrb[121].mxu0 }
 0xcfd   : > { %v25342_v11 = vpop.f32.mrb[122].mxu0 }
 0xcfe   : > { %v14407_v28 = vpop.f32.mrb[123].mxu0 }
 0xd0b   : > { %v25344_v5 = vpop.f32.mrb[124].mxu0 }
 0xd0c   : > { %v25346_v39 = vpop.f32.mrb[125].mxu0 }
 0xd0d   : > { %v25348_v35 = vpop.f32.mrb[126].mxu0 }
 0xd0e   : > { %v25350_v6 = vpop.f32.mrb[127].mxu0 }
 0xd1b   : > { %v25352_v23 = vpop.f32.mrb[128].mxu0 }
 0xd1c   : > { %v25354_v19 = vpop.f32.mrb[129].mxu0 }
 0xd1d   : > { %v25356_v54 = vpop.f32.mrb[130].mxu0 }
 0xd1e   : > { %v25358_v27 = vpop.f32.mrb[131].mxu0 }
 0xd61   : > { %v17314_v42 = vpop.f32.mrb[8].mxu1 }
 0xd62   : > { %v17315_v61 = vpop.f32.mrb[9].mxu1 }
 0xd63   : > { %v17316_v22 = vadd.f32 %v17315_v61, %v17314_v42  ;;  %v17317_v43 = vpop.f32.mrb[10].mxu1 }
 0xd64   : > { %v17318_v25 = vpop.f32.mrb[11].mxu1 }
 0xd65   : > { %v14389_v37 = vadd.f32 %v17316_v22, %v14388_v31  ;;  %v17319_v20 = vadd.f32 %v17318_v25, %v17317_v43 }
 0xd67   : > { %v14451_v33 = vmax.f32 %v14389_v37, 0.0  ;;  %v14392_v21 = vadd.f32 %v17319_v20, %v14391_v57 }
 0xd69   : > { %v14474_v62 = vmul.f32 %v25371_v29, %v14451_v33  ;;  %v14452_v15 = vmax.f32 %v14392_v21, 0.0  ;;  %v17320_v14 = vpop.f32.mrb[12].mxu1 }
 0xd6a   : > { %v17321_v51 = vpop.f32.mrb[13].mxu1 }
 0xd6b   : > { %v14475_v55 = vmul.f32 %v25371_v29, %v14452_v15  ;;  %v17322_v2 = vadd.f32 %v17321_v51, %v17320_v14  ;;  %v17323_v48 = vpop.f32.mrb[14].mxu1  ;;  %v14497_v13 = vadd.f32 %v25377_v47, %v14474_v62 }
 0xd6c   : > { %v17324_v30 = vpop.f32.mrb[15].mxu1 }
 0xd6d   : > { %v14498_v44 = vadd.f32 %v25377_v47, %v14475_v55  ;;  %v14397_v58 = vadd.f32 %v17660_v36, %v17322_v2  ;;  %v17325_v50 = vadd.f32 %v17324_v30, %v17323_v48 }
 0xd6f   : > { %v14453_v45 = vmax.f32 %v14397_v58, 0.0  ;;  %v14400_v7 = vadd.f32 %v17661_v34, %v17325_v50  ;;  %v14513_v40 = vpack.c.bf16 %v14498_v44, %v14497_v13 }
 0xd71   : > { %v14476_v9 = vmul.f32 %v25371_v29, %v14453_v45  ;;  %v14454_v1 = vmax.f32 %v14400_v7, 0.0  ;;  %v17326_v32 = vpop.f32.mrb[16].mxu1  ;;  %17674 = vmatprep.subr.bf16.mxu1 %v14513_v40  ;;  %17698 = vmatprep.subr.bf16.mxu0 %v14513_v40 }
 0xd72   : > { %v17327_v8 = vpop.f32.mrb[17].mxu1  ;;  %17675 = vmatpush3.bf16.msra.mxu1 %v14513_v40  ;;  %17699 = vmatpush3.bf16.msra.mxu0 %v14513_v40 }
 0xd73   : > { %v14477_v4 = vmul.f32 %v25371_v29, %v14454_v1  ;;  %v17328_v16 = vadd.f32 %v17327_v8, %v17326_v32  ;;  %v17329_v18 = vpop.f32.mrb[18].mxu1  ;;  %v14499_v60 = vadd.f32 %v25377_v47, %v14476_v9 }
 0xd74   : > { %v17330_v0 = vpop.f32.mrb[19].mxu1 }
 0xd75   : > { %v14500_v59 = vadd.f32 %v25377_v47, %v14477_v4  ;;  %v14405_v53 = vadd.f32 %v17328_v16, %v14404_v49  ;;  %v17331_v24 = vadd.f32 %v17330_v0, %v17329_v18 }
 0xd77   : > { %v14455_v3 = vmax.f32 %v14405_v53, 0.0  ;;  %v14408_v56 = vadd.f32 %v17331_v24, %v14407_v28  ;;  %v14514_v38 = vpack.c.bf16 %v14500_v59, %v14499_v60 }
 0xd79   : > { %v14478_v52 = vmul.f32 %v25371_v29, %v14455_v3  ;;  %v14456_v46 = vmax.f32 %v14408_v56, 0.0  ;;  %v17332_v26 = vpop.f32.mrb[20].mxu1  ;;  %17676 = vmatprep.subr.bf16.mxu1 %v14514_v38  ;;  %17700 = vmatprep.subr.bf16.mxu0 %v14514_v38 }
 0xd7a   : > { %v17333_v17 = vpop.f32.mrb[21].mxu1  ;;  %17677 = vmatpush3.bf16.msra.mxu1 %v14514_v38  ;;  %17701 = vmatpush3.bf16.msra.mxu0 %v14514_v38 }
 0xd7b   : > { %v14479_v12 = vmul.f32 %v25371_v29, %v14456_v46  ;;  %v17334_v36 = vadd.f32 %v17333_v17, %v17332_v26  ;;  %v17335_v31 = vpop.f32.mrb[22].mxu1  ;;  %v14501_v57 = vadd.f32 %v25377_v47, %v14478_v52 }
 0xd7c   : > { %v17336_v34 = vpop.f32.mrb[23].mxu1 }
 0xd7d   : > { %v14502_v49 = vadd.f32 %v25377_v47, %v14479_v12  ;;  %v14413_v28 = vadd.f32 %v25340_v63, %v17334_v36  ;;  %v17337_v10 = vadd.f32 %v17336_v34, %v17335_v31 }
 0xd7f   : > { %v14457_v41 = vmax.f32 %v14413_v28, 0.0  ;;  %v14416_v42 = vadd.f32 %v25342_v11, %v17337_v10  ;;  %v14515_v61 = vpack.c.bf16 %v14502_v49, %v14501_v57 }
 0xd81   : > { %v14480_v22 = vmul.f32 %v25371_v29, %v14457_v41  ;;  %v14458_v43 = vmax.f32 %v14416_v42, 0.0  ;;  %v17338_v25 = vpop.f32.mrb[24].mxu1  ;;  %17678 = vmatprep.subr.bf16.mxu1 %v14515_v61  ;;  %17702 = vmatprep.subr.bf16.mxu0 %v14515_v61 }
 0xd82   : > { %v17339_v37 = vpop.f32.mrb[25].mxu1  ;;  %17679 = vmatpush3.bf16.msra.mxu1 %v14515_v61  ;;  %17703 = vmatpush3.bf16.msra.mxu0 %v14515_v61 }
 0xd83   : > { %v14481_v20 = vmul.f32 %v25371_v29, %v14458_v43  ;;  %v17340_v33 = vadd.f32 %v17339_v37, %v17338_v25  ;;  %v17341_v21 = vpop.f32.mrb[26].mxu1  ;;  %v14503_v63 = vadd.f32 %v25377_v47, %v14480_v22 }
 0xd84   : > { %v17342_v62 = vpop.f32.mrb[27].mxu1 }
 0xd85   : > { %v14504_v15 = vadd.f32 %v25377_v47, %v14481_v20  ;;  %v14421_v11 = vadd.f32 %v17340_v33, %v25346_v39  ;;  %v17343_v14 = vadd.f32 %v17342_v62, %v17341_v21  ;;  %v19785_v62 = vld [vmem:[%s25690_s18 + $0x10] sm:$0xff]  }
 0xd87   : > { %v14459_v51 = vmax.f32 %v14421_v11, 0.0  ;;  %v14424_v55 = vadd.f32 %v17343_v14, %v25350_v6  ;;  %v14516_v2 = vpack.c.bf16 %v14504_v15, %v14503_v63  ;;  %v19786_v63 = vld [vmem:[%s25690_s18 + $0x30] sm:$0xff]   ;;  %v19791_v15 = vld [vmem:[%s25691_s19 + $0x8] sm:$0xff]  }
 0xd88   : > { %v19792_v11 = vld [vmem:[%s25691_s19 + $0x44] sm:$0xff]   ;;  %v19793_v14 = vld [vmem:[%s25691_s19 + $0x10] sm:$0xff]  }
 0xd89   : > { %v14482_v48 = vmul.f32 %v25371_v29, %v14459_v51  ;;  %v14460_v30 = vmax.f32 %v14424_v55, 0.0  ;;  %v17344_v13 = vpop.f32.mrb[28].mxu1  ;;  %17680 = vmatprep.subr.bf16.mxu1 %v14516_v2  ;;  %17704 = vmatprep.subr.bf16.mxu0 %v14516_v2  ;;  %v19794_v51 = vld [vmem:[%s25691_s19 + $0x4c] sm:$0xff]   ;;  %v19787_v55 = vld [vmem:[%s25690_s18 + $0x18] sm:$0xff]  }
 0xd8a   : > { %v17345_v44 = vpop.f32.mrb[29].mxu1  ;;  %17681 = vmatpush3.bf16.msra.mxu1 %v14516_v2  ;;  %17705 = vmatpush3.bf16.msra.mxu0 %v14516_v2  ;;  %v19788_v2 = vld [vmem:[%s25690_s18 + $0x38] sm:$0xff]  }
 0xd8b   : > { %v14483_v58 = vmul.f32 %v25371_v29, %v14460_v30  ;;  %v17346_v50 = vadd.f32 %v17345_v44, %v17344_v13  ;;  %v17347_v45 = vpop.f32.mrb[30].mxu1  ;;  %v14505_v39 = vadd.f32 %v25377_v47, %v14482_v48  ;;  %v19795_v48 = vld [vmem:[%s25691_s19 + $0x18] sm:$0xff]   ;;  %v19797_v13 = vld [vmem:[%s25691_s19 + $0x20] sm:$0xff]  }
 0xd8c   : > { %v17348_v7 = vpop.f32.mrb[31].mxu1  ;;  %v19796_v30 = vld [vmem:[%s25691_s19 + $0x54] sm:$0xff]   ;;  %v19798_v44 = vld [vmem:[%s25691_s19 + $0x5c] sm:$0xff]  }
 0xd8d   : > { %v14506_v40 = vadd.f32 %v25377_v47, %v14483_v58  ;;  %v14429_v6 = vadd.f32 %v25344_v5, %v17346_v50  ;;  %v17349_v9 = vadd.f32 %v17348_v7, %v17347_v45  ;;  %v19799_v58 = vld [vmem:[%s25691_s19 + $0x28] sm:$0xff]   ;;  %v19801_v45 = vld [vmem:[%s25691_s19 + $0x30] sm:$0xff]  }
 0xd8e   : > { %v19800_v50 = vld [vmem:[%s25691_s19 + $0x64] sm:$0xff]   ;;  %v19802_v7 = vld [vmem:[%s25691_s19 + $0x6c] sm:$0xff]  }
 0xd8f   : > { %v14461_v1 = vmax.f32 %v14429_v6, 0.0  ;;  %v14432_v32 = vadd.f32 %v25348_v35, %v17349_v9  ;;  %v14517_v8 = vpack.c.bf16 %v14506_v40, %v14505_v39  ;;  %v19803_v39 = vld [vmem:[%s25691_s19 + $0x38] ss:$0 sps:$4 sm:$0xff]   ;;  %v19804_v40 = vld [vmem:[%s25691_s19 + $0x74] ss:$0 sps:$4 sm:$0xff]  }
 0xd90   : > { %v14822_v6 = vsel %vm4211_vm7, %v19803_v39, 0  ;;  %v14951_v9 = vsel %vm4211_vm7, %v19804_v40, 0 }
 0xd91   : > { %v14484_v4 = vmul.f32 %v25371_v29, %v14461_v1  ;;  %v14462_v16 = vmax.f32 %v14432_v32, 0.0  ;;  %v17350_v18 = vpop.f32.mrb[32].mxu1  ;;  %17682 = vmatprep.subr.bf16.mxu1 %v14517_v8  ;;  %17706 = vmatprep.subr.bf16.mxu0 %v14517_v8 }
 0xd92   : > { %v17351_v0 = vpop.f32.mrb[33].mxu1  ;;  %17683 = vmatpush3.bf16.msra.mxu1 %v14517_v8  ;;  %17707 = vmatpush3.bf16.msra.mxu0 %v14517_v8 }
 0xd93   : > { %v14485_v60 = vmul.f32 %v25371_v29, %v14462_v16  ;;  %v17352_v59 = vadd.f32 %v17351_v0, %v17350_v18  ;;  %v17353_v53 = vpop.f32.mrb[34].mxu1  ;;  %v14507_v5 = vadd.f32 %v25377_v47, %v14484_v4 }
 0xd94   : > { %v17354_v24 = vpop.f32.mrb[35].mxu1 }
 0xd95   : > { %v14508_v3 = vadd.f32 %v25377_v47, %v14485_v60  ;;  %v14437_v35 = vadd.f32 %v17352_v59, %v25354_v19  ;;  %v17355_v56 = vadd.f32 %v17354_v24, %v17353_v53 }
 0xd97   : > { %v14463_v38 = vmax.f32 %v14437_v35, 0.0  ;;  %v14440_v52 = vadd.f32 %v17355_v56, %v25358_v27  ;;  %v14518_v46 = vpack.c.bf16 %v14508_v3, %v14507_v5 }
 0xd99   : > { %v14486_v26 = vmul.f32 %v25371_v29, %v14463_v38  ;;  %v14464_v17 = vmax.f32 %v14440_v52, 0.0  ;;  %v17356_v12 = vpop.f32.mrb[36].mxu1  ;;  %17684 = vmatprep.subr.bf16.mxu1 %v14518_v46  ;;  %17708 = vmatprep.subr.bf16.mxu0 %v14518_v46 }
 0xd9a   : > { %v17357_v36 = vpop.f32.mrb[37].mxu1  ;;  %17685 = vmatpush3.bf16.msra.mxu1 %v14518_v46  ;;  %17709 = vmatpush3.bf16.msra.mxu0 %v14518_v46 }
 0xd9b   : > { %v14487_v31 = vmul.f32 %v25371_v29, %v14464_v17  ;;  %v17358_v34 = vadd.f32 %v17357_v36, %v17356_v12  ;;  %v17359_v57 = vpop.f32.mrb[38].mxu1  ;;  %v14509_v19 = vadd.f32 %v25377_v47, %v14486_v26 }
 0xd9c   : > { %v17360_v49 = vpop.f32.mrb[39].mxu1 }
 0xd9d   : > { %v14510_v28 = vadd.f32 %v25377_v47, %v14487_v31  ;;  %v14445_v27 = vadd.f32 %v25352_v23, %v17358_v34  ;;  %v17361_v10 = vadd.f32 %v17360_v49, %v17359_v57  ;;  %v19789_v23 = vld [vmem:[%s25691_s19] sm:$0xff]  }
 0xd9f   : > { %v14465_v41 = vmax.f32 %v14445_v27, 0.0  ;;  %v14448_v42 = vadd.f32 %v25356_v54, %v17361_v10  ;;  %v14519_v61 = vpack.c.bf16 %v14510_v28, %v14509_v19  ;;  %v19790_v54 = vld [vmem:[%s25691_s19 + $0x3c] sm:$0xff]   ;;  %v25806_v27 = vmov 0.0  }
 0xda0   : > { %v19805_v10 = vld [vmem:[%s25692_s20 + $0x20] sm:$0xff]  }
 0xda1   : > { %v14488_v22 = vmul.f32 %v25371_v29, %v14465_v41  ;;  %v14466_v43 = vmax.f32 %v14448_v42, 0.0  ;;  %17686 = vmatprep.subr.bf16.mxu1 %v14519_v61  ;;  %17710 = vmatprep.subr.bf16.mxu0 %v14519_v61  ;;  %v19806_v41 = vld [vmem:[%s25692_s20 + $0x28] sm:$0xff]   ;;  %v19807_v42 = vld [vmem:[%s25692_s20 + $0x30] sm:$0xff]  }
 0xda2   : > { %17687 = vmatpush3.bf16.msra.mxu1 %v14519_v61  ;;  %17711 = vmatpush3.bf16.msra.mxu0 %v14519_v61  ;;  %v19808_v61 = vld [vmem:[%s25692_s20 + $0x38] sm:$0x3f]  }
 0xda3   : > { %v14489_v25 = vmul.f32 %v25371_v29, %v14466_v43  ;;  %v14511_v37 = vadd.f32 %v25377_v47, %v14488_v22  ;;  %v19783_v29 = vld [vmem:[%s25690_s18 + $0x8] sm:$0xff]   ;;  %v15112_v22 = vsel %vm975_vm0, %v19808_v61, 0  ;;  %v19809_v43 = vld [vmem:[%s25692_s20] sm:$0xff]  }
 0xda5   : > { %v14512_v20 = vadd.f32 %v25377_v47, %v14489_v25  ;;  %v19784_v47 = vld [vmem:[%s25690_s18 + $0x28] sm:$0xff]  }
 0xda7   : > { %v14520_v33 = vpack.c.bf16 %v14512_v20, %v14511_v37 }
 0xda9   : > { %18870 = vmatprep.subr.msk.bf16.mxu1 %vm975_vm0, %v14520_v33  ;;  %18871 = vmatprep.subr.msk.bf16.mxu0 %vm975_vm0, %v14520_v33  ;;  %v14563_v21 = vsel %vm975_vm0, %v14520_v33, 0 }
 0xdaa   : > { %17689 = vmatpush3.bf16.msra.mxu1 %v14563_v21  ;;  %17713 = vmatpush3.bf16.msra.mxu0 %v14563_v21 }
 0xdab   : > { %17722 = vmatprep.subr.bf16.mxu1 %v19789_v23  ;;  %17746 = vmatprep.subr.bf16.mxu0 %v19790_v54 }
 0xdad   : > { %17691 = vmatmul.mubr.msk.bf16.vlgmr.msra.gmra.mrb[40].mxu1 %vm14549_vm4, %v19783_v29  ;;  %17715 = vmatmul.mubr.msk.bf16.vlgmr.msra.gmra.mrb[132].mxu0 %vm14549_vm4, %v19784_v47 }
 0xdae   : > { %17694 = vmatprep.mubr.msk.bf16.mxu1 %vm14549_vm4, %v19785_v62  ;;  %17718 = vmatprep.mubr.msk.bf16.mxu0 %vm14549_vm4, %v19786_v63 }
 0xdaf   : > { %17723 = vmatpush3.bf16.msra.mxu1 %v19789_v23  ;;  %17747 = vmatpush3.bf16.msra.mxu0 %v19790_v54 }
 0xdb0   : > { %17724 = vmatprep.subr.bf16.mxu1 %v19791_v15  ;;  %17748 = vmatprep.subr.bf16.mxu0 %v19792_v11 }
 0xdb3   : > { %17725 = vmatpush3.bf16.msra.mxu1 %v19791_v15  ;;  %17749 = vmatpush3.bf16.msra.mxu0 %v19792_v11 }
 0xdb4   : > { %17726 = vmatprep.subr.bf16.mxu1 %v19793_v14  ;;  %17750 = vmatprep.subr.bf16.mxu0 %v19794_v51 }
 0xdb5   : > { %17695 = vmatmul.mubr.msk.bf16.gmra.mrb[44].mxu1 %vm14549_vm4, %v19787_v55  ;;  %17719 = vmatmul.mubr.msk.bf16.gmra.mrb[136].mxu0 %vm14549_vm4, %v19788_v2 }
 0xdb7   : > { %17727 = vmatpush3.bf16.msra.mxu1 %v19793_v14  ;;  %17751 = vmatpush3.bf16.msra.mxu0 %v19794_v51 }
 0xdb8   : > { %17728 = vmatprep.subr.bf16.mxu1 %v19795_v48  ;;  %17752 = vmatprep.subr.bf16.mxu0 %v19796_v30 }
 0xdbb   : > { %17729 = vmatpush3.bf16.msra.mxu1 %v19795_v48  ;;  %17753 = vmatpush3.bf16.msra.mxu0 %v19796_v30 }
 0xdbc   : > { %17730 = vmatprep.subr.bf16.mxu1 %v19797_v13  ;;  %17754 = vmatprep.subr.bf16.mxu0 %v19798_v44 }
 0xdbf   : > { %17731 = vmatpush3.bf16.msra.mxu1 %v19797_v13  ;;  %17755 = vmatpush3.bf16.msra.mxu0 %v19798_v44 }
 0xdc0   : > { %17732 = vmatprep.subr.bf16.mxu1 %v19799_v58  ;;  %17756 = vmatprep.subr.bf16.mxu0 %v19800_v50 }
 0xdc3   : > { %17733 = vmatpush3.bf16.msra.mxu1 %v19799_v58  ;;  %17757 = vmatpush3.bf16.msra.mxu0 %v19800_v50 }
 0xdc4   : > { %17734 = vmatprep.subr.bf16.mxu1 %v19801_v45  ;;  %17758 = vmatprep.subr.bf16.mxu0 %v19802_v7 }
 0xdc7   : > { %17735 = vmatpush3.bf16.msra.mxu1 %v19801_v45  ;;  %17759 = vmatpush3.bf16.msra.mxu0 %v19802_v7 }
 0xdc8   : > { %18872 = vmatprep.subr.msk.bf16.mxu1 %vm4211_vm7, %v19803_v39  ;;  %18873 = vmatprep.subr.msk.bf16.mxu0 %vm4211_vm7, %v19804_v40 }
 0xdcb   : > { %17737 = vmatpush3.bf16.msra.mxu1 %v14822_v6  ;;  %17761 = vmatpush3.bf16.msra.mxu0 %v14951_v9 }
 0xdcc   : > { %17770 = vmatprep.subr.bf16.mxu1 %v19805_v10 }
 0xe80   : > { %v17692_v1 = vpop.f32.mrb[40].mxu1  ;;  %v17716_v32 = vpop.f32.mrb[132].mxu0 }
 0xe81   : > { %v14738_v8 = vmax.f32 %v17692_v1, %v17716_v32  ;;  %v14599_v4 = vpop.f32.mrb[41].mxu1  ;;  %v14705_v16 = vpop.f32.mrb[133].mxu0  ;;  %v19810_v32 = vld [vmem:[%s25692_s20 + $0x8] sm:$0xff]  }
 0xe82   : > { %v14736_v18 = vmax.f32 %v14599_v4, %v14705_v16  ;;  %v17693_v0 = vpop.f32.mrb[42].mxu1  ;;  %v17717_v60 = vpop.f32.mrb[134].mxu0 }
 0xe83   : > { %v14739_v59 = vmax.f32 %v17693_v0, %v17717_v60  ;;  %v14602_v53 = vpop.f32.mrb[43].mxu1  ;;  %v14708_v24 = vpop.f32.mrb[135].mxu0 }
 0xe84   : > { %v14737_v5 = vmax.f32 %v14602_v53, %v14708_v24 }
 0xe85   : > { %v14745_v3 = vpack.c.bf16 %v14739_v59, %v14738_v8 }
 0xe86   : > { %v14744_v35 = vpack.c.bf16 %v14737_v5, %v14736_v18  ;;  %v19811_v18 = vld [vmem:[%s25692_s20 + $0x10] sm:$0xff]   ;;  %v19812_v5 = vld [vmem:[%s25692_s20 + $0x18] sm:$0x3f]  }
 0xe88   : > { %v17696_v56 = vpop.f32.mrb[44].mxu1  ;;  %v17720_v38 = vpop.f32.mrb[136].mxu0  ;;  %17738 = vmatprep.mubr.msk.bf16.mxu1 %vm14808_vm5, %v14744_v35  ;;  %17762 = vmatprep.mubr.msk.bf16.mxu0 %vm14808_vm5, %v14744_v35  ;;  %v15215_v35 = vsel %vm975_vm0, %v19812_v5, 0 }
 0xe89   : > { %v14742_v52 = vmax.f32 %v17696_v56, %v17720_v38  ;;  %v14615_v46 = vpop.f32.mrb[45].mxu1  ;;  %v14721_v26 = vpop.f32.mrb[137].mxu0  ;;  %17739 = vmatmul.mubr.msk.bf16.vlgmr.msra.gmra.mrb[48].mxu1 %vm14808_vm5, %v14745_v3  ;;  %17763 = vmatmul.mubr.msk.bf16.vlgmr.msra.gmra.mrb[140].mxu0 %vm14808_vm5, %v14745_v3  ;;  %v19813_v56 = vld [vmem:[%s25692_s20 + $0x40] sm:$0xff]  }
 0xe8a   : > { %v14740_v17 = vmax.f32 %v14615_v46, %v14721_v26  ;;  %v17697_v12 = vpop.f32.mrb[46].mxu1  ;;  %v17721_v36 = vpop.f32.mrb[138].mxu0  ;;  %17771 = vmatpush3.bf16.msra.mxu1 %v19805_v10  ;;  %v19816_v10 = vld [vmem:[%s25692_s20 + $0x58] sm:$0x3f]  }
 0xe8b   : > { %v14743_v31 = vmax.f32 %v17697_v12, %v17721_v36  ;;  %v14618_v34 = vpop.f32.mrb[47].mxu1  ;;  %v14724_v57 = vpop.f32.mrb[139].mxu0  ;;  %17772 = vmatprep.subr.bf16.mxu1 %v19806_v41  ;;  %v19814_v12 = vld [vmem:[%s25692_s20 + $0x48] sm:$0xff]  }
 0xe8c   : > { %v14741_v49 = vmax.f32 %v14618_v34, %v14724_v57 }
 0xe8d   : > { %v14747_v19 = vpack.c.bf16 %v14743_v31, %v14742_v52  ;;  %v19815_v31 = vld [vmem:[%s25692_s20 + $0x50] sm:$0xff]  }
 0xe8e   : > { %v14746_v28 = vpack.c.bf16 %v14741_v49, %v14740_v17  ;;  %17773 = vmatpush3.bf16.msra.mxu1 %v19806_v41 }
 0xe8f   : > { %17774 = vmatprep.subr.bf16.mxu1 %v19807_v42 }
 0xe90   : > { %17742 = vmatprep.mubr.msk.bf16.mxu1 %vm14808_vm5, %v14746_v28  ;;  %17766 = vmatprep.mubr.msk.bf16.mxu0 %vm14808_vm5, %v14746_v28 }
 0xe91   : > { %17743 = vmatmul.mubr.msk.bf16.gmra.mrb[52].mxu1 %vm14808_vm5, %v14747_v19  ;;  %17767 = vmatmul.mubr.msk.bf16.gmra.mrb[144].mxu0 %vm14808_vm5, %v14747_v19 }
 0xe92   : > { %17834 = vmatprep.mubr.msk.f32.mxu0 %vm19893_vm1, %v25806_v27  ;;  %17775 = vmatpush3.bf16.msra.mxu1 %v19807_v42  ;;  %v15339_v42 = vsel %vm975_vm0, %v19816_v10, 0 }
 0xe93   : > { %18874 = vmatprep.subr.msk.bf16.mxu1 %vm975_vm0, %v19808_v61 }
 0xe96   : > { %17777 = vmatpush3.bf16.msra.mxu1 %v15112_v22 }
 0xe97   : > { %17786 = vmatprep.subr.bf16.mxu1 %v19809_v43 }
 0xf5c   : > { %v17740_v25 = vpop.f32.mrb[48].mxu1  ;;  %v17764_v37 = vpop.f32.mrb[140].mxu0 }
 0xf5d   : > { %v15020_v20 = vmax.f32 %v17740_v25, %v17764_v37  ;;  %v14858_v33 = vpop.f32.mrb[49].mxu1  ;;  %v14987_v23 = vpop.f32.mrb[141].mxu0 }
 0xf5e   : > { %v15018_v54 = vmax.f32 %v14858_v33, %v14987_v23  ;;  %v17741_v21 = vpop.f32.mrb[50].mxu1  ;;  %v17765_v29 = vpop.f32.mrb[142].mxu0 }
 0xf5f   : > { %15029 = vst.msk [vmem:[#allocation5 + $0x10] sm:$0xff] %vm15026_vm6, %v15020_v20  ;;  %v15021_v47 = vmax.f32 %v17741_v21, %v17765_v29  ;;  %v14861_v62 = vpop.f32.mrb[51].mxu1  ;;  %v14990_v63 = vpop.f32.mrb[143].mxu0  ;;  %v19894_v21 = vmov 0.0|0.0  }
 0xf60   : > { %15027 = vst.msk [vmem:[#allocation5] sm:$0xff] %vm15026_vm6, %v15018_v54  ;;  %v15019_v15 = vmax.f32 %v14861_v62, %v14990_v63  ;;  %17856 = vmatprep.subr.bf16.mxu0 %v19894_v21 }
 0xf61   : > { %15030 = vst.msk [vmem:[#allocation5 + $0x18] sm:$0xff] %vm15026_vm6, %v15021_v47  ;;  %v17130_v47 = vld [vmem:[%s25693_s21] ss:$0 sm:$0xff] }
 0xf62   : > { %15028 = vst.msk [vmem:[#allocation5 + $0x8] sm:$0xff] %vm15026_vm6, %v15019_v15 }
 0xf64   : > { %v17744_v11 = vpop.f32.mrb[52].mxu1  ;;  %v17768_v14 = vpop.f32.mrb[144].mxu0 }
 0xf65   : > { %v15024_v51 = vmax.f32 %v17744_v11, %v17768_v14  ;;  %v14874_v55 = vpop.f32.mrb[53].mxu1  ;;  %v15003_v2 = vpop.f32.mrb[145].mxu0 }
 0xf66   : > { %v15022_v48 = vmax.f32 %v14874_v55, %v15003_v2  ;;  %v17745_v30 = vpop.f32.mrb[54].mxu1  ;;  %v17769_v13 = vpop.f32.mrb[146].mxu0  ;;  %v15037_v46 = vld [vmem:[#allocation5 + $0x10] sm:$0xff] }
 0xf67   : > { %15033 = vst.msk [vmem:[#allocation5 + $0x30] sm:$0xff] %vm15026_vm6, %v15024_v51  ;;  %v15025_v44 = vmax.f32 %v17745_v30, %v17769_v13  ;;  %v14877_v58 = vpop.f32.mrb[55].mxu1  ;;  %v15006_v50 = vpop.f32.mrb[147].mxu0  ;;  %v15035_v24 = vld [vmem:[#allocation5] sm:$0xff]  ;;  %v17131_v2 = vld [vmem:[%s25694_s22] ss:$0 sm:$0xff] }
 0xf68   : > { %15031 = vst.msk [vmem:[#allocation5 + $0x20] sm:$0xff] %vm15026_vm6, %v15022_v48  ;;  %v15023_v45 = vmax.f32 %v14877_v58, %v15006_v50  ;;  %v15057_v6 = vld [vmem:[#allocation5 + $0x11] sm:$0xff] }
 0xf69   : > { %15034 = vst.msk [vmem:[#allocation5 + $0x38] sm:$0xff] %vm15026_vm6, %v15025_v44  ;;  %v15055_v7 = vld [vmem:[#allocation5 + $0x1] sm:$0xff]  ;;  %v15056_v39 = vld [vmem:[#allocation5 + $0x9] sm:$0xff]  ;;  %v15038_v38 = vld [vmem:[#allocation5 + $0x18] sm:$0xff] }
 0xf6a   : > { %15032 = vst.msk [vmem:[#allocation5 + $0x28] sm:$0xff] %vm15026_vm6, %v15023_v45  ;;  %v15072_v40 = vpack.c.bf16 %v15056_v39, %v15055_v7  ;;  %v15036_v59 = vld [vmem:[#allocation5 + $0x8] sm:$0xff]  ;;  %v15052_v26 = vpack.c.bf16 %v15038_v38, %v15037_v46  ;;  %v15284_v25 = vld [vmem:[#allocation5 + $0x12] sm:$0xff] }
 0xf6b   : > { %v15051_v3 = vpack.c.bf16 %v15036_v59, %v15035_v24  ;;  %v15282_v57 = vld [vmem:[#allocation5 + $0x2] sm:$0xff]  ;;  %v15283_v49 = vld [vmem:[#allocation5 + $0xa] sm:$0xff]  ;;  %v15531_v46 = vld [vmem:[%s25696_s24 + $0x8] sm:$0xff] }
 0xf6c   : > { %17778 = vmatprep.mubr.msk.bf16.mxu1 %vm15026_vm6, %v15072_v40  ;;  %v15299_v41 = vpack.c.bf16 %v15283_v49, %v15282_v57  ;;  %v15535_v57 = vld [vmem:[%s25696_s24 + $0x28] sm:$0xff] }
 0xf6e   : > { %v15041_v19 = vld [vmem:[#allocation5 + $0x30] sm:$0xff] }
 0xf6f   : > { %v15058_v9 = vld [vmem:[#allocation5 + $0x19] sm:$0xff] }
 0xf70   : > { %v15073_v1 = vpack.c.bf16 %v15058_v9, %v15057_v6  ;;  %v15061_v0 = vld [vmem:[#allocation5 + $0x31] sm:$0xff]  ;;  %v15062_v60 = vld [vmem:[#allocation5 + $0x39] sm:$0x3f]  ;;  %v15039_v17 = vld [vmem:[#allocation5 + $0x20] sm:$0xff] }
 0xf71   : > { %v15059_v8 = vld [vmem:[#allocation5 + $0x21] sm:$0xff]  ;;  %v15060_v4 = vld [vmem:[#allocation5 + $0x29] sm:$0xff]  ;;  %v15075_v53 = vpack.c.bf16 %v15062_v60, %v15061_v0  ;;  %v15042_v34 = vld [vmem:[#allocation5 + $0x38] sm:$0x3f] }
 0xf72   : > { %17779 = vmatmul.mubr.msk.bf16.vlgmr.msra.gmra.mrb[56].mxu1 %vm15026_vm6, %v15073_v1  ;;  %v15074_v16 = vpack.c.bf16 %v15060_v4, %v15059_v8  ;;  %v15040_v52 = vld [vmem:[#allocation5 + $0x28] sm:$0xff]  ;;  %v15054_v28 = vpack.c.bf16 %v15042_v34, %v15041_v19  ;;  %v15285_v61 = vld [vmem:[#allocation5 + $0x1a] sm:$0xff]  ;;  %v15288_v33 = vld [vmem:[#allocation5 + $0x32] sm:$0xff] }
 0xf73   : > { %17787 = vmatpush3.bf16.msra.mxu1 %v19809_v43  ;;  %v15053_v36 = vpack.c.bf16 %v15040_v52, %v15039_v17  ;;  %v15286_v22 = vld [vmem:[#allocation5 + $0x22] sm:$0xff]  ;;  %v15287_v43 = vld [vmem:[#allocation5 + $0x2a] sm:$0xff]  ;;  %v15300_v37 = vpack.c.bf16 %v15285_v61, %v15284_v25  ;;  %v15289_v23 = vld [vmem:[#allocation5 + $0x3a] sm:$0x3f] }
 0xf74   : > { %17782 = vmatprep.mubr.msk.bf16.mxu1 %vm15026_vm6, %v15074_v16  ;;  %17788 = vmatprep.subr.bf16.mxu1 %v19810_v32  ;;  %v15301_v20 = vpack.c.bf16 %v15287_v43, %v15286_v22  ;;  %v15302_v54 = vpack.c.bf16 %v15289_v23, %v15288_v33  ;;  %v15530_v52 = vld [vmem:[%s25696_s24] sm:$0xff]  ;;  %v15536_v19 = vld [vmem:[%s25696_s24 + $0x30] sm:$0xff] }
 0xf75   : > { %v17870_v17 = vpack.c.bf16 %v15531_v46, %v15530_v52  ;;  %v15534_v34 = vld [vmem:[%s25696_s24 + $0x20] sm:$0xff] }
 0xf76   : > { %v17876_v49 = vpack.c.bf16 %v15535_v57, %v15534_v34 }
 0xf77   : > { %17789 = vmatpush3.bf16.msra.mxu1 %v19810_v32 }
 0xf78   : > { %17790 = vmatprep.subr.bf16.mxu1 %v19811_v18 }
 0xf7a   : > { %17783 = vmatmul.mubr.msk.bf16.gmra.mrb[60].mxu1 %vm15026_vm6, %v15075_v53 }
 0xf7b   : > { %17791 = vmatpush3.bf16.msra.mxu1 %v19811_v18  ;;  %17794 = vmatprep.mubr.msk.bf16.mxu1 %vm15026_vm6, %v15051_v3 }
 0xf7c   : > { %18875 = vmatprep.subr.msk.bf16.mxu1 %vm975_vm0, %v19812_v5 }
 0xf7f   : > { %17793 = vmatpush3.bf16.msra.mxu1 %v15215_v35 }
 0xf80   : > { %17802 = vmatprep.subr.bf16.mxu1 %v19813_v56 }
 0xf82   : > { %17795 = vmatmul.mubr.msk.bf16.vlgmr.msra.gmra.mrb[56].mxu1 %vm15026_vm6, %v15052_v26  ;;  %v15452_v26 = vld [vmem:[%s25695_s23] sm:$0xff] }
 0xf83   : > { %17798 = vmatprep.mubr.msk.bf16.mxu1 %vm15026_vm6, %v15053_v36  ;;  %17803 = vmatpush3.bf16.msra.mxu1 %v19813_v56  ;;  %v15533_v36 = vld [vmem:[%s25696_s24 + $0x18] sm:$0xff] }
 0xf84   : > { %17804 = vmatprep.subr.bf16.mxu1 %v19814_v12 }
 0xf87   : > { %17805 = vmatpush3.bf16.msra.mxu1 %v19814_v12  ;;  %v15532_v12 = vld [vmem:[%s25696_s24 + $0x10] sm:$0xff] }
 0xf88   : > { %17806 = vmatprep.subr.bf16.mxu1 %v19815_v31 }
 0xf8a   : > { %17799 = vmatmul.mubr.msk.bf16.gmra.mrb[60].mxu1 %vm15026_vm6, %v15054_v28 }
 0xf8b   : > { %17807 = vmatpush3.bf16.msra.mxu1 %v19815_v31  ;;  %17810 = vmatprep.mubr.msk.bf16.mxu1 %vm15026_vm6, %v15299_v41  ;;  %v17873_v31 = vpack.c.bf16 %v15533_v36, %v15532_v12 }
 0xf8c   : > { %18876 = vmatprep.subr.msk.bf16.mxu1 %vm975_vm0, %v19816_v10  ;;  %vm17880_vm0 = vmpackc.low %vm4211_vm7, %vm19895_vm8 }
 0xf8f   : > { %17809 = vmatpush3.bf16.msra.mxu1 %v15339_v42  ;;  %v17134_v42 = vld [vmem:[%s25697_s25] ss:$0 sm:$0xff] }
 0xf92   : > { %17811 = vmatmul.mubr.msk.bf16.vlgmr.msra.gmra.mrb[56].mxu1 %vm15026_vm6, %v15300_v37 }
 0xf93   : > { %17814 = vmatprep.mubr.msk.bf16.mxu1 %vm15026_vm6, %v15301_v20 }
 0xf9a   : > { %17815 = vmatmul.mubr.msk.bf16.gmra.mrb[60].mxu1 %vm15026_vm6, %v15302_v54 }
0x1065   : > { %v17812_v29 = vpop.f32.mrb[56].mxu1 }
0x1066   : > { %v15416_v62 = vmax.f32 %v17812_v29, 0.0  ;;  %v15375_v63 = vpop.f32.mrb[57].mxu1 }
0x1067   : > { %v15414_v15 = vmax.f32 %v15375_v63, 0.0  ;;  %v17813_v11 = vpop.f32.mrb[58].mxu1 }
0x1068   : > { %v15431_v14 = vmul.f32 %v17130_v47, %v15416_v62  ;;  %v15417_v51 = vmax.f32 %v17813_v11, 0.0  ;;  %v15378_v55 = vpop.f32.mrb[59].mxu1 }
0x1069   : > { %v15429_v48 = vmul.f32 %v17130_v47, %v15414_v15  ;;  %v15415_v30 = vmax.f32 %v15378_v55, 0.0 }
0x106a   : > { %v15432_v13 = vmul.f32 %v17130_v47, %v15417_v51  ;;  %v15446_v58 = vadd.f32 %v17131_v2, %v15431_v14 }
0x106b   : > { %v15430_v44 = vmul.f32 %v17130_v47, %v15415_v30  ;;  %v15444_v45 = vadd.f32 %v17131_v2, %v15429_v48 }
0x106c   : > { %v15447_v50 = vadd.f32 %v17131_v2, %v15432_v13 }
0x106d   : > { %v15445_v7 = vadd.f32 %v17131_v2, %v15430_v44  ;;  %v17816_v39 = vpop.f32.mrb[60].mxu1 }
0x106e   : > { %v17860_v40 = vpack.c.bf16 %v15447_v50, %v15446_v58  ;;  %v15420_v6 = vmax.f32 %v17816_v39, 0.0  ;;  %v15391_v9 = vpop.f32.mrb[61].mxu1 }
0x106f   : > { %v17857_v1 = vpack.c.bf16 %v15445_v7, %v15444_v45  ;;  %v15418_v32 = vmax.f32 %v15391_v9, 0.0  ;;  %v17817_v8 = vpop.f32.mrb[62].mxu1 }
0x1070   : > { %v15435_v4 = vmul.f32 %v17130_v47, %v15420_v6  ;;  %v15421_v16 = vmax.f32 %v17817_v8, 0.0  ;;  %v15394_v18 = vpop.f32.mrb[63].mxu1 }
0x1071   : > { %v15433_v0 = vmul.f32 %v17130_v47, %v15418_v32  ;;  %v15419_v60 = vmax.f32 %v15394_v18, 0.0  ;;  %17858 = vmatpush3.bf16.msra.mxu0 %v17857_v1 }
0x1072   : > { %v15436_v59 = vmul.f32 %v17130_v47, %v15421_v16  ;;  %17859 = vmatprep.subr.bf16.mxu0 %v19894_v21  ;;  %v15450_v24 = vadd.f32 %v17131_v2, %v15435_v4 }
0x1073   : > { %v15434_v53 = vmul.f32 %v17130_v47, %v15419_v60  ;;  %v15448_v3 = vadd.f32 %v17131_v2, %v15433_v0 }
0x1074   : > { %v15451_v5 = vadd.f32 %v17131_v2, %v15436_v59 }
0x1075   : > { %v15449_v35 = vadd.f32 %v17131_v2, %v15434_v53  ;;  %17861 = vmatpush3.bf16.msra.mxu0 %v17860_v40 }
0x1076   : > { %v17866_v56 = vpack.c.bf16 %v15451_v5, %v15450_v24  ;;  %17862 = vmatprep.subr.bf16.mxu0 %v19894_v21 }
0x1077   : > { %v17863_v38 = vpack.c.bf16 %v15449_v35, %v15448_v3 }
0x1079   : > { %17864 = vmatpush3.bf16.msra.mxu0 %v17863_v38 }
0x107a   : > { %17865 = vmatprep.subr.bf16.mxu0 %v19894_v21 }
0x107d   : > { %17868 = vmatpush3.bf16.msk.msra.mxu0 %vm17867_vm9, %v17866_v56 }
0x107e   : > { %17869 = vmatprep.subr.bf16.mxu0 %v19894_v21 }
0x1080   : > { %17835 = vmatmul.mubr.msk.f32.vlgmr.msra.gmra.mrb[148].mxu0 %vm15453_vm10, %v15452_v26 }
0x1081   : > { %17871 = vmatpush3.bf16.msra.mxu0 %v17870_v17  ;;  %17853 = vmatprep.mubr.msk.f32.mxu0 %vm19893_vm1, %v25806_v27  ;;  %v15537_v27 = vld [vmem:[%s25696_s24 + $0x38] sm:$0xf]  ;;  %vm15621_vm1 = vcmask 80896  }
0x1082   : > { %17872 = vmatprep.subr.bf16.mxu0 %v19894_v21  ;;  %v17879_v28 = vpack.c.bf16 %v15537_v27, %v15536_v19 }
0x1085   : > { %17874 = vmatpush3.bf16.msra.mxu0 %v17873_v31 }
0x1086   : > { %17875 = vmatprep.subr.bf16.mxu0 %v19894_v21 }
0x1089   : > { %17877 = vmatpush3.bf16.msra.mxu0 %v17876_v49 }
0x108a   : > { %17878 = vmatprep.subr.bf16.mxu0 %v19894_v21 }
0x108d   : > { %17881 = vmatpush3.bf16.msk.msra.mxu0 %vm17880_vm0, %v17879_v28 }
0x1153   : > { %v15526_v10 = vpop.f32.mrb[148].mxu0 }
0x1154   : > { %17854 = vmatmul.mubr.msk.f32.vlgmr.msra.gmra.mrb[150].mxu0 %vm15026_vm6, %v15526_v10  ;;  %v17836_v41 = vpop.f32.mrb[149].mxu0 }
0x1227   : > { %v15617_v61 = vpop.f32.mrb[150].mxu0 }
0x1228   : > { %v15618_v22 = vadd.f32 %v17134_v42, %v15617_v61  ;;  %v17855_v43 = vpop.f32.mrb[151].mxu0 }
0x122a   : > { %v15622_v25 = vsel %vm15621_vm1, %v15618_v22, -inf }
0x122b   : > { %15623 = vmax.xlane.f32.xlu0 %v15622_v25 }
0x12b8   : > { %v15624_v37 = vpop.xlane.xlu0 %15623 }
0x12b9   : > { %v15625_v20 = vsub.f32 %v15618_v22, %v15624_v37 }
0x12bb   : > { %v15626_v33 = vmul.f32 1.442695, %v15625_v20 }
0x12bd   : > { %19817 = vpow2.f32 %v15626_v33 }
0x12c7   : > { %v19818_v23 = vpop.eup %19817 }
0x12c8   : > { %v15628_v54 = vsel %vm15621_vm1, %v19818_v23, 0.0 }
0x12c9   : > { %15629 = vadd.xlane.f32.xlu1 %v15628_v54 }
0x1356   : > { %v15630_v21 = vpop.xlane.xlu1 %15629 }
0x1357   : > { %19819 = vlog2.f32 %v15630_v21 }
0x1361   : > { %v19820_v29 = vpop.eup %19819 }
0x1362   : > { %v15632_v47 = vmul.f32 0.6931472, %v19820_v29 }
0x1364   : > { %v15633_v62 = vsub.f32 %v15625_v20, %v15632_v47 }
0x1366   : > { %15634 = vst.msk [vmem:[%s785_s10] sm:$0xff] %vm15621_vm1, %v15633_v62 }
0x1367   : > { %19840 = shalt.err (!%p19837_p3)
}
0x1368   : > { %s19841_s28 = scalar_lea.hbm %s25629_s7, 128  ;;  %s19845_s9 = scalar_lea.hbm %s25807_s30, 256 }
0x1369   : > { %p19842_p4 = scmp.ne.s32.totalorder %s25629_s7, %s19841_s28  ;;  %p19846_p9 = scmp.lt.u32.totalorder %s25629_s7, %s25807_s30 }
0x136a   : > { %p19847_p10 = scmp.lt.u32.totalorder %s19845_s9, %s19841_s28  ;;  %p19849_p12 = scmp.lt.u32.totalorder %s19841_s28, %s25629_s7 }
0x136b   : > { %p19843_p7 = pnand %p19842_p4, %p20070_p5 }
0x136c   : > { %p19848_p11 = por %p19847_p10, %p19846_p9 }
0x136d   : > { %p19844_p8 = pneg %p19843_p7 }
0x136e   : > { %p19850_p13 = por %p19849_p12, %p19848_p11 }
0x1370   : > { %p19851_p0 = pnand %p19850_p13, %p19844_p8 }
0x1372   : > { %19854 = shalt.err (!%p19851_p0)
}
0x1373   : > { %18877 = dma.vmem_to_hbm [thread:$0]  (%p20070_p5), %s25631_s26, 128, %s25629_s7, %s15636_s29  }
0x1374 PF: > { %s25808_s1 = sld [smem:[#allocation11_spill]]  ;;  %s25809_s27 = sld [smem:[#allocation9_spill]] }
0x137a   : > { %p18883_p1 = scmp.ge.s32.totalorder %s25808_s1, 2  ;;  %s15661_s5 = sand.u32 1, %s25809_s27  }
0x137b   : > { %s15662_s10 = scalar_lea.sflag [#allocation7], %s15661_s5 }
0x137c   : > { %p18880_p2 = pnand %p18883_p1, %p20074_p6 }
0x137e   : > { %19872 = dma.done.wait (!%p18880_p2), %s15662_s10, 128  }
0x137f   : > { %19874 = vsyncadd (!%p18880_p2), %s15662_s10, 4294967168  ;;  %s25811_s28 = sld [smem:[#allocation12_spill]]  ;;  %s25812_s9 = sld [smem:[#allocation10_spill]] }
0x1380   : > { %s25813_s7 = sld [smem:[#allocation13_spill]]  ;;  %s25814_s27 = smov %s19881_s3 }
0x1385   : > { %p36_p3 = scmp.ge.s32.totalorder %s25811_s28, 4   ;;  %s25815_s3 = smov %s25812_s9 }
0x1387   :  { %38 = sbr.rel (!%p36_p3) target bundleno = 16 (0x10), region = 174 }
0x138e   :  { %15667 = vsyncpa [#allocation7], 1 }
0x138f   :  { %15669 = vsyncpa [#allocation7 + $0x1], 1 }

</bundles_post_ra>
